<compile_context>
chip_gen: v7x
topology: tpu7x:2x2x1
jax: 0.10.0
libtpu: 0.0.40
codegen_flags: <defaults>
</compile_context>

<pallas_src>
import functools

import jax
import jax.numpy as jnp
import numpy as np
from jax import lax
from jax.experimental import pallas as pl
from jax.experimental.pallas import tpu as pltpu


def abmil_kernel(h_ref, w_enc_ref, b_enc_ref, w_vu_ref, b_vu_ref, w_w_ref, b_w_ref,
                 o_ref, m_scratch, l_scratch, acc_scratch, *, use_vpu_small_k):
    n_idx = pl.program_id(1)

    @pl.when(n_idx == 0)
    def _():
        m_scratch[...] = jnp.full(m_scratch.shape, -jnp.inf, m_scratch.dtype)
        l_scratch[...] = jnp.zeros(l_scratch.shape, l_scratch.dtype)
        acc_scratch[...] = jnp.zeros(acc_scratch.shape, acc_scratch.dtype)

    bt, nt, f = h_ref.shape
    cdt = w_enc_ref.dtype                       # MXU-operand dtype (f32 or bf16)

    # ---- Encoder: one tall MXU matmul over all block_b*block_n rows; cast H in-kernel.
    h2 = h_ref[...].reshape(bt * nt, f).astype(cdt)
    he2 = jnp.dot(h2, w_enc_ref[...], preferred_element_type=jnp.float32) + b_enc_ref[...]
    he2 = jnp.maximum(he2, 0.0)                 # (R, L) f32; Dropout == identity (eval)

    # ---- Gated attention: fused (L, 2D) matmul, then split V / U halves (f32 elementwise).
    he_c = he2.astype(cdt)
    vu = jnp.dot(he_c, w_vu_ref[...], preferred_element_type=jnp.float32) + b_vu_ref[...]
    d = vu.shape[1] // 2
    gate = jnp.tanh(vu[:, :d]) * jax.nn.sigmoid(vu[:, d:])          # (R, D) f32

    if use_vpu_small_k:
        # w_w_ref is (K, D): K tiny lane-reduces on the VPU/XLU keep the MXU free.
        k_dim = w_w_ref.shape[0]
        b_w = b_w_ref[...]
        cols = [jnp.sum(gate * w_w_ref[k:k + 1, :], axis=-1, keepdims=True) + b_w[:, k:k + 1]
                for k in range(k_dim)]
        s2 = cols[0] if k_dim == 1 else jnp.concatenate(cols, axis=-1)       # (R, K)
    else:
        # w_w_ref is (D, K): MXU path for larger K.
        s2 = jnp.dot(gate.astype(cdt), w_w_ref[...],
                     preferred_element_type=jnp.float32) + b_w_ref[...]

    k_dim = s2.shape[-1]
    s = s2.reshape(bt, nt, k_dim)               # (Bt, Nt, K) attention logits
    he_b = he2.reshape(bt, nt, -1)              # (Bt, Nt, L) f32 for the final contraction

    # ---- Flash-style online softmax over the streamed N axis.
    m_prev = m_scratch[...]
    m_new = jnp.maximum(m_prev, jnp.max(s, axis=1, keepdims=True))
    alpha = jnp.exp(m_prev - m_new)             # (Bt, 1, K)
    p = jnp.exp(s - m_new)                      # (Bt, Nt, K)
    l_scratch[...] = alpha * l_scratch[...] + jnp.sum(p, axis=1, keepdims=True)
    m_scratch[...] = m_new

    if use_vpu_small_k:
        # P^T @ He per k on the VPU (broadcast-mul + reduce over Nt); K<=4 rows waste the MXU.
        parts = [jnp.sum(p[:, :, k:k + 1] * he_b, axis=1, keepdims=True) for k in range(k_dim)]
        pm = parts[0] if k_dim == 1 else jnp.concatenate(parts, axis=1)      # (Bt, K, L)
    else:
        pm = lax.dot_general(p, he_b,
                             dimension_numbers=(((1,), (1,)), ((0,), (0,))),
                             preferred_element_type=jnp.float32)
    acc_scratch[...] = jnp.swapaxes(alpha, 1, 2) * acc_scratch[...] + pm

    @pl.when(n_idx == pl.num_programs(1) - 1)
    def _():
        inv_l = pl.reciprocal(l_scratch[...], approx=False)   # exact; once per bag block
        o_ref[...] = (acc_scratch[...] * jnp.swapaxes(inv_l, 1, 2)).astype(o_ref.dtype)


def _pick_block(total, requested, quantum):
    """Largest divisor of `total` that is <= requested and a multiple of `quantum` (or == total)."""
    requested = max(1, min(requested, total))
    for cand in range(requested, 0, -1):
        if total % cand == 0 and (cand % quantum == 0 or cand == total):
            return cand
    return total


def _tpu_defaults():
    """Generation-aware (block_n, vmem_limit_bytes, min_batch_grid)."""
    kind = ""
    try:
        kind = jax.devices()[0].device_kind.lower()
    except Exception:
        pass
    if "v7" in kind or "7x" in kind:
        return 256, 48 * 1024 * 1024, 2      # 64 MiB VMEM, 2 TensorCores
    if any(g in kind for g in ("v6", "v5", "v4")):
        return 512, 100 * 1024 * 1024, 1     # 128 MiB VMEM, 1 TensorCore
    return 256, None, 1                      # unknown: conservative, compiler-default VMEM


def abmil_forward(H, params, *, block_b=8, block_n=None, compute_dtype=jnp.float32,
                  vmem_limit_bytes=None, small_k_vpu=None, h_buffer_count=None):
    """ABMIL forward. H: [B, N, F] float32; params: dict of pre-transposed ([in, out]) weights.

    compute_dtype:  MXU operand dtype (bf16 recommended on v6e/v7x); accumulation and all
                    elementwise math stay f32.
    block_n:        N tile streamed per grid step (None -> generation-aware default).
    small_k_vpu:    run the tiny K-wide contractions on the VPU (None -> True when K <= 4).
    h_buffer_count: pipeline depth for the streamed H tile (None -> default 2; try 3 if the
                    profile shows exposed DMA on the f32 path on v5e/v6e).
    """
    B, N, F = H.shape
    L = params["w_enc"].shape[1]
    D = params["w_v"].shape[1]
    K = params["w_w"].shape[1]

    dflt_bn, dflt_vmem, min_b_grid = _tpu_defaults()
    if block_n is None:
        block_n = dflt_bn
    if vmem_limit_bytes is None:
        vmem_limit_bytes = dflt_vmem
    if small_k_vpu is None:
        small_k_vpu = K <= 4

    cd = jnp.dtype(compute_dtype)
    n_quantum = 16 if cd.itemsize < 4 else 8         # bf16 packs 2 rows per sublane

    # block_b is a leading (untiled) dim of every block -> no sublane quantum; make sure the
    # "parallel" grid axis has >= min_b_grid steps so both v7x TensorCores get work.
    block_b = _pick_block(B, block_b, 1)
    if min_b_grid > 1 and B >= min_b_grid and B // block_b < min_b_grid:
        block_b = _pick_block(B, B // min_b_grid, 1)
    block_n = _pick_block(N, block_n, n_quantum)
    # TODO(synk): non-divisible (e.g. prime) N falls back to block_n == N; pad+mask instead.

    # Shrink block_n if the working set would exceed the scoped-VMEM budget.
    budget = int(0.8 * (vmem_limit_bytes or 32 * 1024 * 1024))

    def _vmem_need(bn):
        h_tiles = 2 * block_b * bn * F * 4                          # pipelined f32 H tiles
        inter = 2 * block_b * bn * (2 * L + 2 * D + 2 * K) * 4      # f32 intermediates (approx)
        weights = (F * L + 2 * L * D + D * K) * cd.itemsize + 4 * (L + 2 * D + K)
        scratch = block_b * (2 * K + K * L) * 4
        return h_tiles + inter + weights + scratch

    while _vmem_need(block_n) > budget:
        smaller = _pick_block(N, block_n // 2, n_quantum)
        if smaller >= block_n:
            break
        block_n = smaller

    grid = (B // block_b, N // block_n)

    # Weights are tiny: pre-cast / pre-pack host-side.  H itself is NOT pre-cast (that would
    # cost a full extra HBM pass); the kernel casts each tile after load.
    w_enc = params["w_enc"].astype(cd)
    b_enc = params["b_enc"]
    w_vu = jnp.concatenate([params["w_v"], params["w_u"]], axis=1).astype(cd)   # (L, 2D)
    b_vu = jnp.concatenate([params["b_v"], params["b_u"]], axis=1)              # (1, 2D) f32
    w_w = params["w_w"].T if small_k_vpu else params["w_w"].astype(cd)          # (K,D) | (D,K)
    b_w = params["b_w"]

    def const_spec(shape):                            # single-buffered resident weight/bias
        return pl.BlockSpec(shape, lambda b, n: (0,) * len(shape),
                            pipeline_mode=pl.Buffered(1))

    if h_buffer_count is None:
        h_spec = pl.BlockSpec((block_b, block_n, F), lambda b, n: (b, n, 0))
    else:
        h_spec = pl.BlockSpec((block_b, block_n, F), lambda b, n: (b, n, 0),
                              pipeline_mode=pl.Buffered(h_buffer_count))

    flops = 2 * B * N * (F * L + 2 * L * D + D * K + K * L)
    transcendentals = B * N * (2 * D + K)
    bytes_accessed = 4 * (B * N * F + B * K * L) + cd.itemsize * (F * L + 2 * L * D + D * K)

    kernel = functools.partial(abmil_kernel, use_vpu_small_k=small_k_vpu)

    return pl.pallas_call(
        kernel,
        out_shape=jax.ShapeDtypeStruct((B, K, L), jnp.float32),
        grid_spec=pltpu.PrefetchScalarGridSpec(
            num_scalar_prefetch=0,
            grid=grid,
            in_specs=[
                h_spec,
                const_spec((F, L)), const_spec((1, L)),            # encoder
                const_spec(w_vu.shape), const_spec((1, 2 * D)),    # fused attention_V | U
                const_spec(w_w.shape), const_spec((1, K)),         # attention_weights
            ],
            out_specs=pl.BlockSpec((block_b, K, L), lambda b, n: (b, 0, 0)),
            scratch_shapes=[
                pltpu.VMEM((block_b, 1, K), jnp.float32),          # running max
                pltpu.VMEM((block_b, 1, K), jnp.float32),          # running sum
                pltpu.VMEM((block_b, K, L), jnp.float32),          # weighted-sum accumulator
            ],
        ),
        compiler_params=pltpu.CompilerParams(
            dimension_semantics=("parallel", "arbitrary"),
            vmem_limit_bytes=vmem_limit_bytes),
        cost_estimate=pl.CostEstimate(
            flops=flops, transcendentals=transcendentals, bytes_accessed=bytes_accessed),
    )(H, w_enc, b_enc, w_vu, b_vu, w_w, b_w)


def xavier_uniform(key, fan_in, fan_out):
    # matches torch.nn.init.xavier_uniform_ on a [out, in] weight; stored as [in, out]
    limit = float(np.sqrt(6.0 / (fan_in + fan_out)))
    return jax.random.uniform(key, (fan_in, fan_out), jnp.float32, -limit, limit)


def init_params(key, in_features, L, D, K):
    ks = jax.random.split(key, 4)
    return {
        "w_enc": xavier_uniform(ks[0], in_features, L),
        "b_enc": jnp.zeros((1, L), jnp.float32),
        "w_v": xavier_uniform(ks[1], L, D),
        "b_v": jnp.zeros((1, D), jnp.float32),
        "w_u": xavier_uniform(ks[2], L, D),
        "b_u": jnp.zeros((1, D), jnp.float32),
        "w_w": xavier_uniform(ks[3], D, K),
        "b_w": jnp.zeros((1, K), jnp.float32),
    }


def abmil_reference(H, p):
    he = jax.nn.relu(jnp.einsum("bnf,fl->bnl", H, p["w_enc"]) + p["b_enc"][0])
    a_v = jnp.tanh(jnp.einsum("bnl,ld->bnd", he, p["w_v"]) + p["b_v"][0])
    a_u = jax.nn.sigmoid(jnp.einsum("bnl,ld->bnd", he, p["w_u"]) + p["b_u"][0])
    a = jnp.einsum("bnd,dk->bnk", a_v * a_u, p["w_w"]) + p["b_w"][0]
    a = jnp.transpose(a, (0, 2, 1))                 # (B, K, N)
    a = jax.nn.softmax(a, axis=2)
    return jnp.einsum("bkn,bnl->bkl", a, he)        # (B, K, L)


if __name__ == "__main__":
    # Small shapes consistent with the module, exercising both grid axes:
    # batch=16, tile_num=128, in_features=64, L=32, D=16, MTL_token_num=2 -> K=2.
    B, N, F_in, L, D, K = 16, 128, 64, 32, 16, 2

    key = jax.random.PRNGKey(0)
    k_x, k_p = jax.random.split(key)
    H = jax.random.normal(k_x, (B, N, F_in), jnp.float32)
    params = init_params(k_p, F_in, L, D, K)

    ref = abmil_reference(H, params)

    # f32 path, small-K VPU/XLU contractions (default for K<=4), exact softmax reciprocal.
    out = jax.block_until_ready(abmil_forward(H, params, block_b=8, block_n=64))
    assert out.shape == (B, K, L)
    np.testing.assert_allclose(np.asarray(out), np.asarray(ref), rtol=5e-3, atol=5e-3)

    # f32 path, forced MXU branch for the tiny-K contractions (covers the K>=8 code path).
    out_mxu = jax.block_until_ready(
        abmil_forward(H, params, block_b=8, block_n=64, small_k_vpu=False))
    np.testing.assert_allclose(np.asarray(out_mxu), np.asarray(ref), rtol=5e-3, atol=5e-3)

    # bf16 MXU operands with f32 accumulation / f32 elementwise (fast path on v6e/v7x);
    # H stays f32 in HBM and is cast per-tile inside the kernel.
    out_bf16 = jax.block_until_ready(
        abmil_forward(H, params, compute_dtype=jnp.bfloat16))
    np.testing.assert_allclose(np.asarray(out_bf16), np.asarray(ref), rtol=1e-1, atol=1e-1)

    print("KERNEL_OK")
</pallas_src>

<mosaic_0001>
module attributes {stable_mosaic.version = 11 : i64} {
  func.func @abmil_kernel(%arg0: i32, %arg1: i32, %arg2: memref<8x64x64xf32, #tpu.memory_space<vmem>>, %arg3: memref<64x32xf32, #tpu.memory_space<vmem>>, %arg4: memref<1x32xf32, #tpu.memory_space<vmem>>, %arg5: memref<32x32xf32, #tpu.memory_space<vmem>>, %arg6: memref<1x32xf32, #tpu.memory_space<vmem>>, %arg7: memref<2x16xf32, #tpu.memory_space<vmem>>, %arg8: memref<1x2xf32, #tpu.memory_space<vmem>>, %arg9: memref<8x2x32xf32, #tpu.memory_space<vmem>>, %arg10: memref<8x1x2xf32, #tpu.memory_space<vmem>>, %arg11: memref<8x1x2xf32, #tpu.memory_space<vmem>>, %arg12: memref<8x2x32xf32, #tpu.memory_space<vmem>>) attributes {dimension_semantics = [#tpu.dimension_semantics<parallel>, #tpu.dimension_semantics<arbitrary>], iteration_bounds = array<i64: 2, 2>, scalar_prefetch = 0 : i64, scratch_operands = 3 : i64, tpu.core_type = #tpu.core_type<tc>, window_params = [{transform_indices = @transform_0, window_bounds = array<i64: 8, 64, 64>}, {pipeline_mode = #tpu.pipeline_mode<synchronous>, transform_indices = @transform_1, window_bounds = array<i64: 64, 32>}, {pipeline_mode = #tpu.pipeline_mode<synchronous>, transform_indices = @transform_2, window_bounds = array<i64: 1, 32>}, {pipeline_mode = #tpu.pipeline_mode<synchronous>, transform_indices = @transform_3, window_bounds = array<i64: 32, 32>}, {pipeline_mode = #tpu.pipeline_mode<synchronous>, transform_indices = @transform_4, window_bounds = array<i64: 1, 32>}, {pipeline_mode = #tpu.pipeline_mode<synchronous>, transform_indices = @transform_5, window_bounds = array<i64: 2, 16>}, {pipeline_mode = #tpu.pipeline_mode<synchronous>, transform_indices = @transform_6, window_bounds = array<i64: 1, 2>}, {transform_indices = @transform_7, window_bounds = array<i64: 8, 2, 32>}]} {
    %c0_i32 = arith.constant 0 : i32
    %0 = arith.cmpi eq, %arg1, %c0_i32 : i32
    %1 = arith.extui %0 : i1 to i32
    %c0_i32_0 = arith.constant 0 : i32
    %2 = arith.cmpi ne, %1, %c0_i32_0 : i32
    scf.if %2 {
      %cst_44 = arith.constant 0xFF800000 : f32
      %82 = vector.broadcast %cst_44 : f32 to vector<8x1x2xf32>
      %c0_45 = arith.constant 0 : index
      %c0_46 = arith.constant 0 : index
      %c0_47 = arith.constant 0 : index
      %83 = vector.load %arg10[%c0_45, %c0_46, %c0_47] : memref<8x1x2xf32, #tpu.memory_space<vmem>>, vector<8x1x2xf32>
      tpu.vector_store %arg10[%c0_45, %c0_46, %c0_47], %82 {strides = array<i32>} : memref<8x1x2xf32, #tpu.memory_space<vmem>>, vector<8x1x2xf32>,
      %cst_48 = arith.constant 0.000000e+00 : f32
      %84 = vector.broadcast %cst_48 : f32 to vector<8x1x2xf32>
      %c0_49 = arith.constant 0 : index
      %c0_50 = arith.constant 0 : index
      %c0_51 = arith.constant 0 : index
      %85 = vector.load %arg11[%c0_49, %c0_50, %c0_51] : memref<8x1x2xf32, #tpu.memory_space<vmem>>, vector<8x1x2xf32>
      tpu.vector_store %arg11[%c0_49, %c0_50, %c0_51], %84 {strides = array<i32>} : memref<8x1x2xf32, #tpu.memory_space<vmem>>, vector<8x1x2xf32>,
      %cst_52 = arith.constant 0.000000e+00 : f32
      %86 = vector.broadcast %cst_52 : f32 to vector<8x2x32xf32>
      %c0_53 = arith.constant 0 : index
      %c0_54 = arith.constant 0 : index
      %c0_55 = arith.constant 0 : index
      %87 = vector.load %arg12[%c0_53, %c0_54, %c0_55] : memref<8x2x32xf32, #tpu.memory_space<vmem>>, vector<8x2x32xf32>
      tpu.vector_store %arg12[%c0_53, %c0_54, %c0_55], %86 {strides = array<i32>} : memref<8x2x32xf32, #tpu.memory_space<vmem>>, vector<8x2x32xf32>,
    } else {
    }
    %c0 = arith.constant 0 : index
    %c0_1 = arith.constant 0 : index
    %c0_2 = arith.constant 0 : index
    %3 = vector.load %arg2[%c0, %c0_1, %c0_2] : memref<8x64x64xf32, #tpu.memory_space<vmem>>, vector<8x64x64xf32>
    %4 = vector.shape_cast %3 : vector<8x64x64xf32> to vector<512x64xf32>
    %c0_3 = arith.constant 0 : index
    %c0_4 = arith.constant 0 : index
    %5 = vector.load %arg3[%c0_3, %c0_4] : memref<64x32xf32, #tpu.memory_space<vmem>>, vector<64x32xf32>
    %cst = arith.constant dense<0.000000e+00> : vector<512x32xf32>
    %6 = tpu.matmul %4, %5, %cst {dimension_numbers = #tpu.dot_dimension_numbers<[1], [0], [0], [1], [0, 0, 1, 1], [], []>} : vector<512x64xf32>, vector<64x32xf32>, vector<512x32xf32> -> vector<512x32xf32>
    %c0_5 = arith.constant 0 : index
    %c0_6 = arith.constant 0 : index
    %7 = vector.load %arg4[%c0_5, %c0_6] : memref<1x32xf32, #tpu.memory_space<vmem>>, vector<1x32xf32>
    %8 = vector.broadcast %7 : vector<1x32xf32> to vector<512x32xf32>
    %9 = arith.addf %6, %8 : vector<512x32xf32>
    %cst_7 = arith.constant 0.000000e+00 : f32
    %10 = vector.broadcast %cst_7 : f32 to vector<512x32xf32>
    %11 = arith.maximumf %9, %10 : vector<512x32xf32>
    %c0_8 = arith.constant 0 : index
    %c0_9 = arith.constant 0 : index
    %12 = vector.load %arg5[%c0_8, %c0_9] : memref<32x32xf32, #tpu.memory_space<vmem>>, vector<32x32xf32>
    %cst_10 = arith.constant dense<0.000000e+00> : vector<512x32xf32>
    %13 = tpu.matmul %11, %12, %cst_10 {dimension_numbers = #tpu.dot_dimension_numbers<[1], [0], [0], [1], [0, 0, 1, 1], [], []>} : vector<512x32xf32>, vector<32x32xf32>, vector<512x32xf32> -> vector<512x32xf32>
    %c0_11 = arith.constant 0 : index
    %c0_12 = arith.constant 0 : index
    %14 = vector.load %arg6[%c0_11, %c0_12] : memref<1x32xf32, #tpu.memory_space<vmem>>, vector<1x32xf32>
    %15 = vector.broadcast %14 : vector<1x32xf32> to vector<512x32xf32>
    %16 = arith.addf %13, %15 : vector<512x32xf32>
    %17 = vector.extract_strided_slice %16 {offsets = [0, 0], sizes = [512, 16], strides = [1, 1]} : vector<512x32xf32> to vector<512x16xf32>
    %18 = math.tanh %17 : vector<512x16xf32>
    %19 = vector.extract_strided_slice %16 {offsets = [0, 16], sizes = [512, 16], strides = [1, 1]} : vector<512x32xf32> to vector<512x16xf32>
    %20 = arith.negf %19 : vector<512x16xf32>
    %21 = math.exp %20 : vector<512x16xf32>
    %cst_13 = arith.constant 1.000000e+00 : f32
    %22 = vector.broadcast %cst_13 : f32 to vector<512x16xf32>
    %23 = arith.addf %22, %21 : vector<512x16xf32>
    %24 = arith.divf %22, %23 : vector<512x16xf32>
    %25 = arith.mulf %18, %24 : vector<512x16xf32>
    %c0_14 = arith.constant 0 : index
    %c0_15 = arith.constant 0 : index
    %26 = vector.load %arg8[%c0_14, %c0_15] : memref<1x2xf32, #tpu.memory_space<vmem>>, vector<1x2xf32>
    %c0_16 = arith.constant 0 : index
    %c0_17 = arith.constant 0 : index
    %27 = vector.load %arg7[%c0_16, %c0_17] : memref<2x16xf32, #tpu.memory_space<vmem>>, vector<1x16xf32>
    %28 = vector.broadcast %27 : vector<1x16xf32> to vector<512x16xf32>
    %29 = arith.mulf %25, %28 : vector<512x16xf32>
    %cst_18 = arith.constant dense<0.000000e+00> : vector<512xf32>
    %30 = vector.multi_reduction <add>, %29, %cst_18 [1] : vector<512x16xf32> to vector<512xf32>
    %31 = vector.shape_cast %30 : vector<512xf32> to vector<512x1xf32>
    %32 = vector.extract_strided_slice %26 {offsets = [0, 0], sizes = [1, 1], strides = [1, 1]} : vector<1x2xf32> to vector<1x1xf32>
    %33 = vector.broadcast %32 : vector<1x1xf32> to vector<512x1xf32>
    %34 = arith.addf %31, %33 : vector<512x1xf32>
    %c1 = arith.constant 1 : index
    %c0_19 = arith.constant 0 : index
    %35 = vector.load %arg7[%c1, %c0_19] : memref<2x16xf32, #tpu.memory_space<vmem>>, vector<1x16xf32>
    %36 = vector.broadcast %35 : vector<1x16xf32> to vector<512x16xf32>
    %37 = arith.mulf %25, %36 : vector<512x16xf32>
    %cst_20 = arith.constant dense<0.000000e+00> : vector<512xf32>
    %38 = vector.multi_reduction <add>, %37, %cst_20 [1] : vector<512x16xf32> to vector<512xf32>
    %39 = vector.shape_cast %38 : vector<512xf32> to vector<512x1xf32>
    %40 = vector.extract_strided_slice %26 {offsets = [0, 1], sizes = [1, 1], strides = [1, 1]} : vector<1x2xf32> to vector<1x1xf32>
    %41 = vector.broadcast %40 : vector<1x1xf32> to vector<512x1xf32>
    %42 = arith.addf %39, %41 : vector<512x1xf32>
    %43 = tpu.concatenate %34, %42 in 1 : vector<512x1xf32>, vector<512x1xf32> -> vector<512x2xf32>
    %44 = vector.shape_cast %43 : vector<512x2xf32> to vector<8x64x2xf32>
    %45 = vector.shape_cast %11 : vector<512x32xf32> to vector<8x64x32xf32>
    %c0_21 = arith.constant 0 : index
    %c0_22 = arith.constant 0 : index
    %c0_23 = arith.constant 0 : index
    %46 = vector.load %arg10[%c0_21, %c0_22, %c0_23] : memref<8x1x2xf32, #tpu.memory_space<vmem>>, vector<8x1x2xf32>
    %cst_24 = arith.constant dense<0xFF800000> : vector<8x2xf32>
    %47 = vector.multi_reduction <maximumf>, %44, %cst_24 [1] : vector<8x64x2xf32> to vector<8x2xf32>
    %48 = vector.shape_cast %47 : vector<8x2xf32> to vector<8x1x2xf32>
    %49 = arith.maximumf %46, %48 : vector<8x1x2xf32>
    %50 = arith.subf %46, %49 : vector<8x1x2xf32>
    %51 = math.exp %50 : vector<8x1x2xf32>
    %52 = vector.broadcast %49 : vector<8x1x2xf32> to vector<8x64x2xf32>
    %53 = arith.subf %44, %52 : vector<8x64x2xf32>
    %54 = math.exp %53 : vector<8x64x2xf32>
    %c0_25 = arith.constant 0 : index
    %c0_26 = arith.constant 0 : index
    %c0_27 = arith.constant 0 : index
    %55 = vector.load %arg11[%c0_25, %c0_26, %c0_27] : memref<8x1x2xf32, #tpu.memory_space<vmem>>, vector<8x1x2xf32>
    %56 = arith.mulf %51, %55 : vector<8x1x2xf32>
    %cst_28 = arith.constant dense<0.000000e+00> : vector<8x2xf32>
    %57 = vector.multi_reduction <add>, %54, %cst_28 [1] : vector<8x64x2xf32> to vector<8x2xf32>
    %58 = vector.shape_cast %57 : vector<8x2xf32> to vector<8x1x2xf32>
    %59 = arith.addf %56, %58 : vector<8x1x2xf32>
    %c0_29 = arith.constant 0 : index
    %c0_30 = arith.constant 0 : index
    %c0_31 = arith.constant 0 : index
    %60 = vector.load %arg11[%c0_29, %c0_30, %c0_31] : memref<8x1x2xf32, #tpu.memory_space<vmem>>, vector<8x1x2xf32>
    tpu.vector_store %arg11[%c0_29, %c0_30, %c0_31], %59 {strides = array<i32>} : memref<8x1x2xf32, #tpu.memory_space<vmem>>, vector<8x1x2xf32>,
    %c0_32 = arith.constant 0 : index
    %c0_33 = arith.constant 0 : index
    %c0_34 = arith.constant 0 : index
    %61 = vector.load %arg10[%c0_32, %c0_33, %c0_34] : memref<8x1x2xf32, #tpu.memory_space<vmem>>, vector<8x1x2xf32>
    tpu.vector_store %arg10[%c0_32, %c0_33, %c0_34], %49 {strides = array<i32>} : memref<8x1x2xf32, #tpu.memory_space<vmem>>, vector<8x1x2xf32>,
    %62 = vector.extract_strided_slice %54 {offsets = [0, 0, 0], sizes = [8, 64, 1], strides = [1, 1, 1]} : vector<8x64x2xf32> to vector<8x64x1xf32>
    %63 = vector.broadcast %62 : vector<8x64x1xf32> to vector<8x64x32xf32>
    %64 = arith.mulf %63, %45 : vector<8x64x32xf32>
    %cst_35 = arith.constant dense<0.000000e+00> : vector<8x32xf32>
    %65 = vector.multi_reduction <add>, %64, %cst_35 [1] : vector<8x64x32xf32> to vector<8x32xf32>
    %66 = vector.shape_cast %65 : vector<8x32xf32> to vector<8x1x32xf32>
    %67 = vector.extract_strided_slice %54 {offsets = [0, 0, 1], sizes = [8, 64, 1], strides = [1, 1, 1]} : vector<8x64x2xf32> to vector<8x64x1xf32>
    %68 = vector.broadcast %67 : vector<8x64x1xf32> to vector<8x64x32xf32>
    %69 = arith.mulf %68, %45 : vector<8x64x32xf32>
    %cst_36 = arith.constant dense<0.000000e+00> : vector<8x32xf32>
    %70 = vector.multi_reduction <add>, %69, %cst_36 [1] : vector<8x64x32xf32> to vector<8x32xf32>
    %71 = vector.shape_cast %70 : vector<8x32xf32> to vector<8x1x32xf32>
    %72 = tpu.concatenate %66, %71 in 1 : vector<8x1x32xf32>, vector<8x1x32xf32> -> vector<8x2x32xf32>
    %73 = tpu.transpose %51, [0, 2, 1] : vector<8x1x2xf32> -> vector<8x2x1xf32>
    %c0_37 = arith.constant 0 : index
    %c0_38 = arith.constant 0 : index
    %c0_39 = arith.constant 0 : index
    %74 = vector.load %arg12[%c0_37, %c0_38, %c0_39] : memref<8x2x32xf32, #tpu.memory_space<vmem>>, vector<8x2x32xf32>
    %75 = vector.broadcast %73 : vector<8x2x1xf32> to vector<8x2x32xf32>
    %76 = arith.mulf %75, %74 : vector<8x2x32xf32>
    %77 = arith.addf %76, %72 : vector<8x2x32xf32>
    %c0_40 = arith.constant 0 : index
    %c0_41 = arith.constant 0 : index
    %c0_42 = arith.constant 0 : index
    %78 = vector.load %arg12[%c0_40, %c0_41, %c0_42] : memref<8x2x32xf32, #tpu.memory_space<vmem>>, vector<8x2x32xf32>
    tpu.vector_store %arg12[%c0_40, %c0_41, %c0_42], %77 {strides = array<i32>} : memref<8x2x32xf32, #tpu.memory_space<vmem>>, vector<8x2x32xf32>,
    %c1_i32 = arith.constant 1 : i32
    %79 = arith.cmpi eq, %arg1, %c1_i32 : i32
    %80 = arith.extui %79 : i1 to i32
    %c0_i32_43 = arith.constant 0 : i32
    %81 = arith.cmpi ne, %80, %c0_i32_43 : i32
    scf.if %81 {
      %c0_44 = arith.constant 0 : index
      %c0_45 = arith.constant 0 : index
      %c0_46 = arith.constant 0 : index
      %82 = vector.load %arg11[%c0_44, %c0_45, %c0_46] : memref<8x1x2xf32, #tpu.memory_space<vmem>>, vector<8x1x2xf32>
      %83 = tpu.reciprocal %82 : vector<8x1x2xf32> -> vector<8x1x2xf32>
      %c0_47 = arith.constant 0 : index
      %c0_48 = arith.constant 0 : index
      %c0_49 = arith.constant 0 : index
      %84 = vector.load %arg12[%c0_47, %c0_48, %c0_49] : memref<8x2x32xf32, #tpu.memory_space<vmem>>, vector<8x2x32xf32>
      %85 = tpu.transpose %83, [0, 2, 1] : vector<8x1x2xf32> -> vector<8x2x1xf32>
      %86 = vector.broadcast %85 : vector<8x2x1xf32> to vector<8x2x32xf32>
      %87 = arith.mulf %84, %86 : vector<8x2x32xf32>
      %c0_50 = arith.constant 0 : index
      %c0_51 = arith.constant 0 : index
      %c0_52 = arith.constant 0 : index
      %88 = vector.load %arg9[%c0_50, %c0_51, %c0_52] : memref<8x2x32xf32, #tpu.memory_space<vmem>>, vector<8x2x32xf32>
      tpu.vector_store %arg9[%c0_50, %c0_51, %c0_52], %87 {strides = array<i32>} : memref<8x2x32xf32, #tpu.memory_space<vmem>>, vector<8x2x32xf32>,
    } else {
    }
    return
  }
  func.func @transform_0(%arg0: i32, %arg1: i32) -> (i32, i32, i32) {
    %c0_i32 = arith.constant 0 : i32
    %c0_i32_0 = arith.constant 0 : i32
    return %arg0, %arg1, %c0_i32 : i32, i32, i32
  }
  func.func @transform_1(%arg0: i32, %arg1: i32) -> (i32, i32) {
    %c0_i32 = arith.constant 0 : i32
    %c0_i32_0 = arith.constant 0 : i32
    %c0_i32_1 = arith.constant 0 : i32
    return %c0_i32, %c0_i32_0 : i32, i32
  }
  func.func @transform_2(%arg0: i32, %arg1: i32) -> (i32, i32) {
    %c0_i32 = arith.constant 0 : i32
    %c0_i32_0 = arith.constant 0 : i32
    %c0_i32_1 = arith.constant 0 : i32
    return %c0_i32, %c0_i32_0 : i32, i32
  }
  func.func @transform_3(%arg0: i32, %arg1: i32) -> (i32, i32) {
    %c0_i32 = arith.constant 0 : i32
    %c0_i32_0 = arith.constant 0 : i32
    %c0_i32_1 = arith.constant 0 : i32
    return %c0_i32, %c0_i32_0 : i32, i32
  }
  func.func @transform_4(%arg0: i32, %arg1: i32) -> (i32, i32) {
    %c0_i32 = arith.constant 0 : i32
    %c0_i32_0 = arith.constant 0 : i32
    %c0_i32_1 = arith.constant 0 : i32
    return %c0_i32, %c0_i32_0 : i32, i32
  }
  func.func @transform_5(%arg0: i32, %arg1: i32) -> (i32, i32) {
    %c0_i32 = arith.constant 0 : i32
    %c0_i32_0 = arith.constant 0 : i32
    %c0_i32_1 = arith.constant 0 : i32
    return %c0_i32, %c0_i32_0 : i32, i32
  }
  func.func @transform_6(%arg0: i32, %arg1: i32) -> (i32, i32) {
    %c0_i32 = arith.constant 0 : i32
    %c0_i32_0 = arith.constant 0 : i32
    %c0_i32_1 = arith.constant 0 : i32
    return %c0_i32, %c0_i32_0 : i32, i32
  }
  func.func @transform_7(%arg0: i32, %arg1: i32) -> (i32, i32, i32) {
    %c0_i32 = arith.constant 0 : i32
    %c0_i32_0 = arith.constant 0 : i32
    %c0_i32_1 = arith.constant 0 : i32
    return %arg0, %c0_i32, %c0_i32_0 : i32, i32, i32
  }
}

</mosaic_0001>

<bundles_post_ra>
// kernel: tpu_custom_call.1
= control target key start
LH: loop header
LB: loop body
LE: loop exit
PB: predicated region body
PF: predicated region fallthrough
CT: control target
= control target key end

     0   :  { %s10979_s0 = inlined_call_operand.vmem [shape: f32[16,128,64], index: 0, kind: input, shape index: {}]   ;;  %s10980_s1 = inlined_call_operand.vmem [shape: f32[64,32], index: 1, kind: input, shape index: {}]   ;;  %s10981_s2 = inlined_call_operand.vmem [shape: f32[1,32], index: 2, kind: input, shape index: {}]   ;;  %s10982_s3 = inlined_call_operand.vmem [shape: f32[32,32], index: 3, kind: input, shape index: {}]   ;;  %s10983_s4 = inlined_call_operand.vmem [shape: f32[1,32], index: 4, kind: input, shape index: {}]   ;;  %s10984_s5 = inlined_call_operand.vmem [shape: f32[2,16], index: 5, kind: input, shape index: {}]   ;;  %s10985_s6 = inlined_call_operand.vmem [shape: f32[1,2], index: 6, kind: input, shape index: {}]   ;;  %s10986_s7 = inlined_call_operand.hbm [shape: f32[16,2,32], index: 7, kind: output, shape index: {}]  }
   0x1   :  { %11202 = sst [smem:[#allocation123_spill]] %s10979_s0 }
   0x2   :  { %12 = vsyncpa [#allocation7], 0 }
   0x3   :  { %14 = vsyncpa [#allocation7 + $0x1], 0  ;;  %s7328_s24 = smov 0   ;;  %s7330_s25 = smov 0  }
   0x4   :  { %s7332_s26 = smov 0   ;;  %s7334_s27 = smov 0  }
   0x5   :  { %s7336_s28 = smov 0   ;;  %s7338_s29 = smov 0  }
   0x6   :  { %s7340_s30 = smov 0   ;;  %s7342_s8 = smov 0  }
   0x7   :  { %s7344_s9 = smov 0   ;;  %s7346_s10 = smov 0  }
   0x8 LB: > { %s5887_s11 = sadd.s32 4294967295, %s7277_s10   ;;  %s5888_s12 = sadd.s32 4294967294, %s7277_s10   ;;  %s7277_s10 = sphi %s7346_s10, %s20_s10   ;;  %s7273_s9 = sphi %s7344_s9, %s11558_s9   ;;  %s7269_s8 = sphi %s7342_s8, %s11557_s8   ;;  %s7265_s30 = sphi %s7340_s30, %s11556_s30   ;;  %s7261_s29 = sphi %s7338_s29, %s11555_s29   ;;  %s7257_s28 = sphi %s7336_s28, %s11554_s28   ;;  %s7253_s27 = sphi %s7334_s27, %s11553_s27   ;;  %s7249_s26 = sphi %s7332_s26, %s11552_s26   ;;  %s7245_s25 = sphi %s7330_s25, %s11551_s25   ;;  %s7241_s24 = sphi %s7328_s24, %s11550_s24  }
   0x9   : > { %s29_s13 = sadd.s32 1, %s7269_s8  ;;  %s32_s14 = sadd.s32 1, %s7273_s9 }
   0xa   : > { %p30_p0 = scmp.ge.s32.totalorder %s29_s13, 2  ;;  %s41_s15 = sadd.s32 1, %s7257_s28 }
   0xb   : > { %p48_p1 = scmp.ne.s32.totalorder %s7257_s28, %s7253_s27  ;;  %p49_p2 = scmp.eq.s32.totalorder %s7277_s10, 0 }
   0xc   : > { %s11560_s13 = smov (%p30_p0, %s29_s13), 0  ;;  %s11562_s14 = smov (!%p30_p0, %s32_s14), %s7273_s9 }
   0xd   : > { %11203 = sst [smem:[#allocation9_spill]] %s11560_s13  ;;  %s37_s16 = ssub.s32 %s7269_s8, %s11560_s13 }
   0xe   : > { %p7391_p3 = por %p49_p2, %p48_p1  ;;  %p34_p4 = scmp.ge.s32.totalorder %s11562_s14, 2 }
   0xf   : > { %s193_s18 = sadd.s32 1, %s7249_s26  ;;  %p203_p5 = scmp.ne.s32.totalorder %s7249_s26, %s7245_s25 }
  0x10   : > { %p204_p6 = scmp.eq.s32.totalorder %s5887_s11, 3  ;;  %s11564_s14 = smov (%p34_p4, %s11562_s14), 0 }
  0x11   : > { %11205 = sst [smem:[#allocation10_spill]] %s11564_s14  ;;  %p209_p8 = scmp.ne.s32.totalorder %s7245_s25, %s7241_s24 }
  0x12   : > { %p7400_p7 = por %p204_p6, %p203_p5  ;;  %s36_s20 = ssub.s32 %s7273_s9, %s11564_s14 }
  0x13   : > { %p210_p9 = scmp.eq.s32.totalorder %s5888_s12, 3  ;;  %s38_s21 = sor.u32 %s37_s16, %s36_s20 }
  0x14   : > { %p191_p10 = scmp.eq.s32.totalorder %s36_s20, 0  ;;  %p39_p11 = scmp.eq.s32.totalorder %s38_s21, 0 }
  0x15   : > { %p7408_p12 = por %p210_p9, %p209_p8  ;;  %p5890_p13 = scmp.ge.s32.totalorder %s7277_s10, 4 }
  0x16   : > { %s7413_s23 = scalar_select %p191_p10, %s7249_s26, %s193_s18  }
  0x17   : > { %s11207_s22 = scalar_select %p7408_p12, 1, 0 }
  0x18   : > { %s7416_s11 = scalar_select %p39_p11, %s7257_s28, %s41_s15  }
  0x19   : > { %11208 = sst [smem:[#allocation11_spill]] %s11207_s22  ;;  %244 = sbr.rel (%p5890_p13) target bundleno = 74 (0x4a), region = 40 }
  0x20   : > { %247 = sbr.rel (!%p7391_p3) target bundleno = 74 (0x4a), region = 44  ;;  %s249_s12 = sand.u32 (%p7391_p3), 1, %s7257_s28  }
  0x21   : > { %s5893_s16 = sshll.u32 (%p7391_p3), %s7269_s8, 3  ;;  %s5891_s20 = sshll.u32 (%p7391_p3), %s249_s12, 9 }
  0x22   : > { %s6103_s21 = sshll.u32 (%p7391_p3), %s7273_s9, 7  ;;  %s11209_s0 = sld [smem:[#allocation123_spill]] (%p7391_p3) }
  0x23   : > { %s255_s14 = sadd.s32 (%p7391_p3), %s6103_s21, %s5893_s16  ;;  %s7432_s17 = scalar_lea.vmem (%p7391_p3), [#allocation5], %s5891_s20 }
  0x24   : > { %s5895_s13 = sshll.u32 (%p7391_p3), %s255_s14, 3 }
  0x28   : > { %s7427_s15 = scalar_lea.vmem %s11209_s0, %s5895_s13 }
  0x29   : > { %v411_v0 = vld [vmem:[%s7427_s15] sm:$0xff]  ;;  %v413_v1 = vld [vmem:[%s7427_s15 + $0x8] sm:$0xff]  ;;  %v415_v2 = vld [vmem:[%s7427_s15 + $0x10] sm:$0xff] }
  0x2a   : > { %412 = vst [vmem:[%s7432_s17] sm:$0xff] %v411_v0  ;;  %414 = vst [vmem:[%s7432_s17 + $0x8] sm:$0xff] %v413_v1  ;;  %v417_v3 = vld [vmem:[%s7427_s15 + $0x18] sm:$0xff]  ;;  %v419_v4 = vld [vmem:[%s7427_s15 + $0x20] sm:$0xff] }
  0x2b   : > { %416 = vst [vmem:[%s7432_s17 + $0x10] sm:$0xff] %v415_v2  ;;  %v421_v5 = vld [vmem:[%s7427_s15 + $0x28] sm:$0xff]  ;;  %418 = vst [vmem:[%s7432_s17 + $0x18] sm:$0xff] %v417_v3  ;;  %v423_v6 = vld [vmem:[%s7427_s15 + $0x30] sm:$0xff] }
  0x2c   : > { %420 = vst [vmem:[%s7432_s17 + $0x20] sm:$0xff] %v419_v4  ;;  %422 = vst [vmem:[%s7432_s17 + $0x28] sm:$0xff] %v421_v5  ;;  %v425_v7 = vld [vmem:[%s7427_s15 + $0x38] sm:$0xff]  ;;  %v427_v8 = vld [vmem:[%s7427_s15 + $0x80] sm:$0xff] }
  0x2d   : > { %424 = vst [vmem:[%s7432_s17 + $0x30] sm:$0xff] %v423_v6  ;;  %426 = vst [vmem:[%s7432_s17 + $0x38] sm:$0xff] %v425_v7  ;;  %v429_v9 = vld [vmem:[%s7427_s15 + $0x88] sm:$0xff]  ;;  %v431_v10 = vld [vmem:[%s7427_s15 + $0x90] sm:$0xff] }
  0x2e   : > { %428 = vst [vmem:[%s7432_s17 + $0x40] sm:$0xff] %v427_v8  ;;  %v433_v11 = vld [vmem:[%s7427_s15 + $0x98] sm:$0xff]  ;;  %430 = vst [vmem:[%s7432_s17 + $0x48] sm:$0xff] %v429_v9  ;;  %v435_v12 = vld [vmem:[%s7427_s15 + $0xa0] sm:$0xff] }
  0x2f   : > { %432 = vst [vmem:[%s7432_s17 + $0x50] sm:$0xff] %v431_v10  ;;  %434 = vst [vmem:[%s7432_s17 + $0x58] sm:$0xff] %v433_v11  ;;  %v437_v13 = vld [vmem:[%s7427_s15 + $0xa8] sm:$0xff]  ;;  %v439_v14 = vld [vmem:[%s7427_s15 + $0xb0] sm:$0xff] }
  0x30   : > { %436 = vst [vmem:[%s7432_s17 + $0x60] sm:$0xff] %v435_v12  ;;  %438 = vst [vmem:[%s7432_s17 + $0x68] sm:$0xff] %v437_v13  ;;  %v441_v15 = vld [vmem:[%s7427_s15 + $0xb8] sm:$0xff]  ;;  %v443_v16 = vld [vmem:[%s7427_s15 + $0x100] sm:$0xff] }
  0x31   : > { %440 = vst [vmem:[%s7432_s17 + $0x70] sm:$0xff] %v439_v14  ;;  %v445_v17 = vld [vmem:[%s7427_s15 + $0x108] sm:$0xff]  ;;  %442 = vst [vmem:[%s7432_s17 + $0x78] sm:$0xff] %v441_v15  ;;  %v447_v18 = vld [vmem:[%s7427_s15 + $0x110] sm:$0xff] }
  0x32   : > { %444 = vst [vmem:[%s7432_s17 + $0x80] sm:$0xff] %v443_v16  ;;  %446 = vst [vmem:[%s7432_s17 + $0x88] sm:$0xff] %v445_v17  ;;  %v449_v19 = vld [vmem:[%s7427_s15 + $0x118] sm:$0xff]  ;;  %v451_v20 = vld [vmem:[%s7427_s15 + $0x120] sm:$0xff] }
  0x33   : > { %448 = vst [vmem:[%s7432_s17 + $0x90] sm:$0xff] %v447_v18  ;;  %450 = vst [vmem:[%s7432_s17 + $0x98] sm:$0xff] %v449_v19  ;;  %v453_v21 = vld [vmem:[%s7427_s15 + $0x128] sm:$0xff]  ;;  %v455_v22 = vld [vmem:[%s7427_s15 + $0x130] sm:$0xff] }
  0x34   : > { %452 = vst [vmem:[%s7432_s17 + $0xa0] sm:$0xff] %v451_v20  ;;  %v457_v23 = vld [vmem:[%s7427_s15 + $0x138] sm:$0xff]  ;;  %454 = vst [vmem:[%s7432_s17 + $0xa8] sm:$0xff] %v453_v21  ;;  %v459_v24 = vld [vmem:[%s7427_s15 + $0x180] sm:$0xff] }
  0x35   : > { %456 = vst [vmem:[%s7432_s17 + $0xb0] sm:$0xff] %v455_v22  ;;  %458 = vst [vmem:[%s7432_s17 + $0xb8] sm:$0xff] %v457_v23  ;;  %v461_v25 = vld [vmem:[%s7427_s15 + $0x188] sm:$0xff]  ;;  %v463_v26 = vld [vmem:[%s7427_s15 + $0x190] sm:$0xff] }
  0x36   : > { %460 = vst [vmem:[%s7432_s17 + $0xc0] sm:$0xff] %v459_v24  ;;  %462 = vst [vmem:[%s7432_s17 + $0xc8] sm:$0xff] %v461_v25  ;;  %v465_v27 = vld [vmem:[%s7427_s15 + $0x198] sm:$0xff]  ;;  %v467_v28 = vld [vmem:[%s7427_s15 + $0x1a0] sm:$0xff] }
  0x37   : > { %464 = vst [vmem:[%s7432_s17 + $0xd0] sm:$0xff] %v463_v26  ;;  %v469_v29 = vld [vmem:[%s7427_s15 + $0x1a8] sm:$0xff]  ;;  %466 = vst [vmem:[%s7432_s17 + $0xd8] sm:$0xff] %v465_v27  ;;  %v471_v30 = vld [vmem:[%s7427_s15 + $0x1b0] sm:$0xff] }
  0x38   : > { %468 = vst [vmem:[%s7432_s17 + $0xe0] sm:$0xff] %v467_v28  ;;  %470 = vst [vmem:[%s7432_s17 + $0xe8] sm:$0xff] %v469_v29  ;;  %v473_v31 = vld [vmem:[%s7427_s15 + $0x1b8] sm:$0xff]  ;;  %v475_v32 = vld [vmem:[%s7427_s15 + $0x200] sm:$0xff] }
  0x39   : > { %472 = vst [vmem:[%s7432_s17 + $0xf0] sm:$0xff] %v471_v30  ;;  %474 = vst [vmem:[%s7432_s17 + $0xf8] sm:$0xff] %v473_v31  ;;  %v477_v33 = vld [vmem:[%s7427_s15 + $0x208] sm:$0xff]  ;;  %v479_v34 = vld [vmem:[%s7427_s15 + $0x210] sm:$0xff] }
  0x3a   : > { %476 = vst [vmem:[%s7432_s17 + $0x100] sm:$0xff] %v475_v32  ;;  %v481_v35 = vld [vmem:[%s7427_s15 + $0x218] sm:$0xff]  ;;  %478 = vst [vmem:[%s7432_s17 + $0x108] sm:$0xff] %v477_v33  ;;  %v483_v36 = vld [vmem:[%s7427_s15 + $0x220] sm:$0xff] }
  0x3b   : > { %480 = vst [vmem:[%s7432_s17 + $0x110] sm:$0xff] %v479_v34  ;;  %482 = vst [vmem:[%s7432_s17 + $0x118] sm:$0xff] %v481_v35  ;;  %v485_v37 = vld [vmem:[%s7427_s15 + $0x228] sm:$0xff]  ;;  %v487_v38 = vld [vmem:[%s7427_s15 + $0x230] sm:$0xff] }
  0x3c   : > { %484 = vst [vmem:[%s7432_s17 + $0x120] sm:$0xff] %v483_v36  ;;  %486 = vst [vmem:[%s7432_s17 + $0x128] sm:$0xff] %v485_v37  ;;  %v489_v39 = vld [vmem:[%s7427_s15 + $0x238] sm:$0xff]  ;;  %v491_v40 = vld [vmem:[%s7427_s15 + $0x280] sm:$0xff] }
  0x3d   : > { %488 = vst [vmem:[%s7432_s17 + $0x130] sm:$0xff] %v487_v38  ;;  %v493_v41 = vld [vmem:[%s7427_s15 + $0x288] sm:$0xff]  ;;  %490 = vst [vmem:[%s7432_s17 + $0x138] sm:$0xff] %v489_v39  ;;  %v495_v42 = vld [vmem:[%s7427_s15 + $0x290] sm:$0xff] }
  0x3e   : > { %492 = vst [vmem:[%s7432_s17 + $0x140] sm:$0xff] %v491_v40  ;;  %494 = vst [vmem:[%s7432_s17 + $0x148] sm:$0xff] %v493_v41  ;;  %v497_v43 = vld [vmem:[%s7427_s15 + $0x298] sm:$0xff]  ;;  %v499_v44 = vld [vmem:[%s7427_s15 + $0x2a0] sm:$0xff] }
  0x3f   : > { %496 = vst [vmem:[%s7432_s17 + $0x150] sm:$0xff] %v495_v42  ;;  %498 = vst [vmem:[%s7432_s17 + $0x158] sm:$0xff] %v497_v43  ;;  %v501_v45 = vld [vmem:[%s7427_s15 + $0x2a8] sm:$0xff]  ;;  %v503_v46 = vld [vmem:[%s7427_s15 + $0x2b0] sm:$0xff] }
  0x40   : > { %500 = vst [vmem:[%s7432_s17 + $0x160] sm:$0xff] %v499_v44  ;;  %v505_v47 = vld [vmem:[%s7427_s15 + $0x2b8] sm:$0xff]  ;;  %502 = vst [vmem:[%s7432_s17 + $0x168] sm:$0xff] %v501_v45  ;;  %v507_v48 = vld [vmem:[%s7427_s15 + $0x300] sm:$0xff] }
  0x41   : > { %504 = vst [vmem:[%s7432_s17 + $0x170] sm:$0xff] %v503_v46  ;;  %506 = vst [vmem:[%s7432_s17 + $0x178] sm:$0xff] %v505_v47  ;;  %v509_v49 = vld [vmem:[%s7427_s15 + $0x308] sm:$0xff]  ;;  %v511_v50 = vld [vmem:[%s7427_s15 + $0x310] sm:$0xff] }
  0x42   : > { %508 = vst [vmem:[%s7432_s17 + $0x180] sm:$0xff] %v507_v48  ;;  %510 = vst [vmem:[%s7432_s17 + $0x188] sm:$0xff] %v509_v49  ;;  %v513_v51 = vld [vmem:[%s7427_s15 + $0x318] sm:$0xff]  ;;  %v515_v52 = vld [vmem:[%s7427_s15 + $0x320] sm:$0xff] }
  0x43   : > { %512 = vst [vmem:[%s7432_s17 + $0x190] sm:$0xff] %v511_v50  ;;  %v517_v53 = vld [vmem:[%s7427_s15 + $0x328] sm:$0xff]  ;;  %514 = vst [vmem:[%s7432_s17 + $0x198] sm:$0xff] %v513_v51  ;;  %v519_v54 = vld [vmem:[%s7427_s15 + $0x330] sm:$0xff] }
  0x44   : > { %516 = vst [vmem:[%s7432_s17 + $0x1a0] sm:$0xff] %v515_v52  ;;  %518 = vst [vmem:[%s7432_s17 + $0x1a8] sm:$0xff] %v517_v53  ;;  %v521_v55 = vld [vmem:[%s7427_s15 + $0x338] sm:$0xff]  ;;  %v523_v56 = vld [vmem:[%s7427_s15 + $0x380] sm:$0xff] }
  0x45   : > { %520 = vst [vmem:[%s7432_s17 + $0x1b0] sm:$0xff] %v519_v54  ;;  %522 = vst [vmem:[%s7432_s17 + $0x1b8] sm:$0xff] %v521_v55  ;;  %v525_v57 = vld [vmem:[%s7427_s15 + $0x388] sm:$0xff]  ;;  %v527_v58 = vld [vmem:[%s7427_s15 + $0x390] sm:$0xff] }
  0x46   : > { %524 = vst [vmem:[%s7432_s17 + $0x1c0] sm:$0xff] %v523_v56  ;;  %v529_v59 = vld [vmem:[%s7427_s15 + $0x398] sm:$0xff]  ;;  %526 = vst [vmem:[%s7432_s17 + $0x1c8] sm:$0xff] %v525_v57  ;;  %v531_v60 = vld [vmem:[%s7427_s15 + $0x3a0] sm:$0xff] }
  0x47   : > { %528 = vst [vmem:[%s7432_s17 + $0x1d0] sm:$0xff] %v527_v58  ;;  %530 = vst [vmem:[%s7432_s17 + $0x1d8] sm:$0xff] %v529_v59  ;;  %v533_v61 = vld [vmem:[%s7427_s15 + $0x3a8] sm:$0xff]  ;;  %v535_v62 = vld [vmem:[%s7427_s15 + $0x3b0] sm:$0xff] }
  0x48   : > { %532 = vst [vmem:[%s7432_s17 + $0x1e0] sm:$0xff] %v531_v60  ;;  %534 = vst [vmem:[%s7432_s17 + $0x1e8] sm:$0xff] %v533_v61  ;;  %v537_v63 = vld [vmem:[%s7427_s15 + $0x3b8] sm:$0xff] }
  0x49   : > { %536 = vst [vmem:[%s7432_s17 + $0x1f0] sm:$0xff] %v535_v62  ;;  %538 = vst [vmem:[%s7432_s17 + $0x1f8] sm:$0xff] %v537_v63 }
  0x4a PF: > { %p5896_p0 = scmp.ge.s32.totalorder %s7277_s10, 1  ;;  %p543_p1 = scmp.lt.s32.totalorder %s7277_s10, 5 }
  0x4c   : > { %p544_p2 = pnand %p5896_p0, %p543_p1 }
  0x4e   : > { %547 = sbr.rel (%p544_p2) target bundleno = 2197 (0x895), region = 82 }
  0x55   : > { %s550_s13 = sand.u32 1, %s7253_s27   ;;  %s10990_s14 = sand.u32 1, %s7245_s25  }
  0x56   : > { %s5897_s22 = sshll.u32 %s550_s13, 9  ;;  %s5898_s12 = sshll.u32 %s10990_s14, 4 }
  0x57   : > { %s7565_s16 = scalar_lea.vmem [#allocation5], %s5897_s22  ;;  %s7567_s20 = scalar_lea.vmem [#allocation6], %s5898_s12 }
  0x58   : > { %p5899_p3 = scmp.ne.s32.totalorder %s7261_s29, 0 }
  0x59   : > { %vm588_vm0 = vcmask (!%p5899_p3), 8192   ;;  %vm605_vm1 = vcmask (!%p5899_p3), 254976   ;;  %v7279_v0 = vmov (!%p5899_p3), -inf   ;;  %v7280_v1 = vmov (!%p5899_p3), 0.0  }
  0x5a   : > { %587 = sbr.rel (%p5899_p3) target bundleno = 102 (0x66), region = 90  ;;  %589 = vst.msk [vmem:[#allocation2] sm:$0x1] (!%p5899_p3), %vm588_vm0, %v7279_v0  ;;  %590 = vst.msk [vmem:[#allocation2 + $0x1] sm:$0x1] (!%p5899_p3), %vm588_vm0, %v7279_v0 }
  0x5b   : > { %591 = vst.msk [vmem:[#allocation2 + $0x2] sm:$0x1] (!%p5899_p3), %vm588_vm0, %v7279_v0  ;;  %592 = vst.msk [vmem:[#allocation2 + $0x3] sm:$0x1] (!%p5899_p3), %vm588_vm0, %v7279_v0 }
  0x5c   : > { %593 = vst.msk [vmem:[#allocation2 + $0x4] sm:$0x1] (!%p5899_p3), %vm588_vm0, %v7279_v0  ;;  %594 = vst.msk [vmem:[#allocation2 + $0x5] sm:$0x1] (!%p5899_p3), %vm588_vm0, %v7279_v0 }
  0x5d   : > { %595 = vst.msk [vmem:[#allocation2 + $0x6] sm:$0x1] (!%p5899_p3), %vm588_vm0, %v7279_v0  ;;  %596 = vst.msk [vmem:[#allocation2 + $0x7] sm:$0x1] (!%p5899_p3), %vm588_vm0, %v7279_v0 }
  0x5e   : > { %597 = vst.msk [vmem:[#allocation3] sm:$0x1] (!%p5899_p3), %vm588_vm0, %v7280_v1  ;;  %598 = vst.msk [vmem:[#allocation3 + $0x1] sm:$0x1] (!%p5899_p3), %vm588_vm0, %v7280_v1 }
  0x5f   : > { %599 = vst.msk [vmem:[#allocation3 + $0x2] sm:$0x1] (!%p5899_p3), %vm588_vm0, %v7280_v1  ;;  %600 = vst.msk [vmem:[#allocation3 + $0x3] sm:$0x1] (!%p5899_p3), %vm588_vm0, %v7280_v1 }
  0x60   : > { %601 = vst.msk [vmem:[#allocation3 + $0x4] sm:$0x1] (!%p5899_p3), %vm588_vm0, %v7280_v1  ;;  %602 = vst.msk [vmem:[#allocation3 + $0x5] sm:$0x1] (!%p5899_p3), %vm588_vm0, %v7280_v1 }
  0x61   : > { %603 = vst.msk [vmem:[#allocation3 + $0x6] sm:$0x1] %vm588_vm0, %v7280_v1  ;;  %604 = vst.msk [vmem:[#allocation3 + $0x7] sm:$0x1] %vm588_vm0, %v7280_v1 }
  0x62   : > { %606 = vst.msk [vmem:[#allocation4] sm:$0x3] %vm605_vm1, %v7280_v1  ;;  %607 = vst.msk [vmem:[#allocation4 + $0x2] sm:$0x3] %vm605_vm1, %v7280_v1 }
  0x63   : > { %608 = vst.msk [vmem:[#allocation4 + $0x4] sm:$0x3] %vm605_vm1, %v7280_v1  ;;  %609 = vst.msk [vmem:[#allocation4 + $0x6] sm:$0x3] %vm605_vm1, %v7280_v1 }
  0x64   : > { %610 = vst.msk [vmem:[#allocation4 + $0x8] sm:$0x3] %vm605_vm1, %v7280_v1  ;;  %611 = vst.msk [vmem:[#allocation4 + $0xa] sm:$0x3] %vm605_vm1, %v7280_v1 }
  0x65   : > { %612 = vst.msk [vmem:[#allocation4 + $0xc] sm:$0x3] %vm605_vm1, %v7280_v1  ;;  %613 = vst.msk [vmem:[#allocation4 + $0xe] sm:$0x3] %vm605_vm1, %v7280_v1 }
  0x66 PF: > { %v678_v2 = vld [vmem:[%s10980_s1] sm:$0xff]  ;;  %v679_v3 = vld [vmem:[%s10980_s1 + $0x8] sm:$0xff]  ;;  %v680_v4 = vld [vmem:[%s10980_s1 + $0x10] sm:$0xff]  ;;  %vm693_vm2 = vcmask 523264   ;;  %vm1346_vm3 = vcmask 261120   ;;  %s7281_s13 = smov 112  }
  0x67   : > { %v6461_v5 = vpack.c.bf16 %v679_v3, %v678_v2  ;;  %v681_v6 = vld [vmem:[%s10980_s1 + $0x18] sm:$0xff]  ;;  %v682_v8 = vld [vmem:[%s10980_s1 + $0x20] sm:$0xff]  ;;  %v683_v9 = vld [vmem:[%s10980_s1 + $0x28] sm:$0xff]  ;;  %vm2762_vm4 = vcmask 130048   ;;  %vm3350_vm5 = vcmask 7168   ;;  %vm3423_vm6 = vcmask 15360  }
  0x68   : > { %v6465_v7 = vpack.c.bf16 %v681_v6, %v680_v4  ;;  %v614_v10 = vld [vmem:[%s7565_s16] sm:$0xff]  ;;  %v6469_v11 = vpack.c.bf16 %v683_v9, %v682_v8  ;;  %v684_v12 = vld [vmem:[%s10980_s1 + $0x30] sm:$0xff]  ;;  %v685_v13 = vld [vmem:[%s10980_s1 + $0x38] sm:$0xff]  ;;  %vm4056_vm7 = vcmask 8192   ;;  %vm5113_vm8 = vcmask 1040384   ;;  %p6097_p4 = scmp.ne.s32.totalorder %s7261_s29, 1 }
  0x69   : > { %6462 = vmatprep.subr.bf16.mxu0 %v6461_v5  ;;  %6261 = vmatprep.mubr.msk.f32.mxu0 %vm693_vm2, %v614_v10  ;;  %v6473_v14 = vpack.c.bf16 %v685_v13, %v684_v12  ;;  %v615_v15 = vld [vmem:[%s7565_s16 + $0x8] sm:$0xff]  ;;  %v616_v16 = vld [vmem:[%s7565_s16 + $0x10] sm:$0xff]  ;;  %v617_v17 = vld [vmem:[%s7565_s16 + $0x18] sm:$0xff]  ;;  %vm5442_vm9 = vcmask 254976  }
  0x6a   : > { %6464 = vmatpush3.bf16.msra.mxu0 %v6461_v5  ;;  %v618_v18 = vld [vmem:[%s7565_s16 + $0x20] sm:$0xff]  ;;  %v619_v19 = vld [vmem:[%s7565_s16 + $0x28] sm:$0xff]  ;;  %v620_v22 = vld [vmem:[%s7565_s16 + $0x30] sm:$0xff] }
  0x6b   : > { %6466 = vmatprep.subr.bf16.mxu0 %v6465_v7  ;;  %v1335_v20 = vld [vmem:[%s10982_s3] sm:$0xff]  ;;  %v1336_v21 = vld [vmem:[%s10982_s3 + $0x8] sm:$0xff]  ;;  %v621_v24 = vld [vmem:[%s7565_s16 + $0x38] sm:$0xff] }
  0x6c   : > { %v6477_v23 = vpack.c.bf16 %v1336_v21, %v1335_v20  ;;  %v622_v25 = vld [vmem:[%s7565_s16 + $0x40] sm:$0xff]  ;;  %v623_v26 = vld [vmem:[%s7565_s16 + $0x48] sm:$0xff]  ;;  %v624_v27 = vld [vmem:[%s7565_s16 + $0x50] sm:$0xff] }
  0x6d   : > { %v625_v28 = vld [vmem:[%s7565_s16 + $0x58] sm:$0xff]  ;;  %v626_v29 = vld [vmem:[%s7565_s16 + $0x60] sm:$0xff]  ;;  %v627_v30 = vld [vmem:[%s7565_s16 + $0x68] sm:$0xff] }
  0x6e   : > { %6468 = vmatpush3.bf16.msra.mxu0 %v6465_v7  ;;  %6478 = vmatprep.subr.bf16.mxu1 %v6477_v23  ;;  %v628_v31 = vld [vmem:[%s7565_s16 + $0x70] sm:$0xff]  ;;  %v629_v32 = vld [vmem:[%s7565_s16 + $0x78] sm:$0xff]  ;;  %v630_v33 = vld [vmem:[%s7565_s16 + $0x80] sm:$0xff] }
  0x6f   : > { %6470 = vmatprep.subr.bf16.mxu0 %v6469_v11  ;;  %6480 = vmatpush3.bf16.msra.mxu1 %v6477_v23  ;;  %v631_v34 = vld [vmem:[%s7565_s16 + $0x88] sm:$0xff]  ;;  %v632_v35 = vld [vmem:[%s7565_s16 + $0x90] sm:$0xff]  ;;  %v633_v36 = vld [vmem:[%s7565_s16 + $0x98] sm:$0xff] }
  0x70   : > { %v634_v37 = vld [vmem:[%s7565_s16 + $0xa0] sm:$0xff]  ;;  %v635_v38 = vld [vmem:[%s7565_s16 + $0xa8] sm:$0xff]  ;;  %v636_v39 = vld [vmem:[%s7565_s16 + $0xb0] sm:$0xff] }
  0x71   : > { %v637_v40 = vld [vmem:[%s7565_s16 + $0xb8] sm:$0xff]  ;;  %v638_v41 = vld [vmem:[%s7565_s16 + $0xc0] sm:$0xff]  ;;  %v639_v42 = vld [vmem:[%s7565_s16 + $0xc8] sm:$0xff] }
  0x72   : > { %6472 = vmatpush3.bf16.msra.mxu0 %v6469_v11  ;;  %v640_v43 = vld [vmem:[%s7565_s16 + $0xd0] sm:$0xff]  ;;  %v641_v44 = vld [vmem:[%s7565_s16 + $0xd8] sm:$0xff]  ;;  %v642_v45 = vld [vmem:[%s7565_s16 + $0xe0] sm:$0xff] }
  0x73   : > { %6474 = vmatprep.subr.bf16.mxu0 %v6473_v14  ;;  %v643_v46 = vld [vmem:[%s7565_s16 + $0xe8] sm:$0xff]  ;;  %v644_v47 = vld [vmem:[%s7565_s16 + $0xf0] sm:$0xff]  ;;  %v645_v48 = vld [vmem:[%s7565_s16 + $0xf8] sm:$0xff] }
  0x74   : > { %v646_v49 = vld [vmem:[%s7565_s16 + $0x100] sm:$0xff]  ;;  %v647_v50 = vld [vmem:[%s7565_s16 + $0x108] sm:$0xff]  ;;  %v648_v51 = vld [vmem:[%s7565_s16 + $0x110] sm:$0xff] }
  0x75   : > { %v649_v52 = vld [vmem:[%s7565_s16 + $0x118] sm:$0xff]  ;;  %v650_v53 = vld [vmem:[%s7565_s16 + $0x120] sm:$0xff]  ;;  %v651_v54 = vld [vmem:[%s7565_s16 + $0x128] sm:$0xff] }
  0x76   : > { %6476 = vmatpush3.bf16.msra.mxu0 %v6473_v14  ;;  %v652_v55 = vld [vmem:[%s7565_s16 + $0x130] sm:$0xff]  ;;  %v653_v56 = vld [vmem:[%s7565_s16 + $0x138] sm:$0xff]  ;;  %v654_v57 = vld [vmem:[%s7565_s16 + $0x140] sm:$0xff] }
  0x77   : > { %v655_v58 = vld [vmem:[%s7565_s16 + $0x148] sm:$0xff]  ;;  %v656_v59 = vld [vmem:[%s7565_s16 + $0x150] sm:$0xff]  ;;  %v657_v60 = vld [vmem:[%s7565_s16 + $0x158] sm:$0xff] }
  0x78   : > { %v658_v61 = vld [vmem:[%s7565_s16 + $0x160] sm:$0xff]  ;;  %v1337_v62 = vld [vmem:[%s10982_s3 + $0x10] sm:$0xff]  ;;  %v1338_v63 = vld [vmem:[%s10982_s3 + $0x18] sm:$0xff] }
  0x79   : > { %6262 = vmatmul.mubr.msk.f32.vlgmr.msra.gmra.mrb[0].mxu0 %vm693_vm2, %v615_v15  ;;  %v6481_v0 = vpack.c.bf16 %v1338_v63, %v1337_v62  ;;  %v659_v1 = vld [vmem:[%s7565_s16 + $0x168] sm:$0xff]  ;;  %v660_v2 = vld [vmem:[%s7565_s16 + $0x170] sm:$0xff]  ;;  %v661_v3 = vld [vmem:[%s7565_s16 + $0x178] sm:$0xff] }
  0x7a   : > { %6264 = vmatprep.mubr.msk.f32.mxu0 %vm693_vm2, %v616_v16  ;;  %v662_v4 = vld [vmem:[%s7565_s16 + $0x180] sm:$0xff]  ;;  %v663_v5 = vld [vmem:[%s7565_s16 + $0x188] sm:$0xff]  ;;  %v664_v6 = vld [vmem:[%s7565_s16 + $0x190] sm:$0xff] }
  0x7b   : > { %6482 = vmatprep.subr.bf16.mxu1 %v6481_v0  ;;  %v665_v7 = vld [vmem:[%s7565_s16 + $0x198] sm:$0xff]  ;;  %v666_v8 = vld [vmem:[%s7565_s16 + $0x1a0] sm:$0xff]  ;;  %v667_v9 = vld [vmem:[%s7565_s16 + $0x1a8] sm:$0xff] }
  0x7c   : > { %6484 = vmatpush3.bf16.msra.mxu1 %v6481_v0  ;;  %v668_v10 = vld [vmem:[%s7565_s16 + $0x1b0] sm:$0xff]  ;;  %v669_v11 = vld [vmem:[%s7565_s16 + $0x1b8] sm:$0xff]  ;;  %v670_v12 = vld [vmem:[%s7565_s16 + $0x1c0] sm:$0xff] }
  0x7d   : > { %6265 = vmatmul.mubr.msk.f32.gmra.mrb[2].mxu0 %vm693_vm2, %v617_v17  ;;  %v671_v13 = vld [vmem:[%s7565_s16 + $0x1c8] sm:$0xff]  ;;  %v672_v14 = vld [vmem:[%s7565_s16 + $0x1d0] sm:$0xff]  ;;  %v673_v15 = vld [vmem:[%s7565_s16 + $0x1d8] sm:$0xff] }
  0x7e   : > { %6267 = vmatprep.mubr.msk.f32.mxu0 %vm693_vm2, %v618_v18  ;;  %v674_v16 = vld [vmem:[%s7565_s16 + $0x1e0] sm:$0xff]  ;;  %v675_v17 = vld [vmem:[%s7565_s16 + $0x1e8] sm:$0xff]  ;;  %v676_v18 = vld [vmem:[%s7565_s16 + $0x1f0] sm:$0xff] }
  0x7f   : > { %v7761_v20 = vld [vmem:[%s10981_s2] ss:$0 sm:$0xff] }
  0x81   : > { %6268 = vmatmul.mubr.msk.f32.gmra.mrb[4].mxu0 %vm693_vm2, %v619_v19  ;;  %v677_v19 = vld [vmem:[%s7565_s16 + $0x1f8] sm:$0xff] }
  0x82   : > { %6270 = vmatprep.mubr.msk.f32.mxu0 %vm693_vm2, %v620_v22 }
  0x85   : > { %6271 = vmatmul.mubr.msk.f32.gmra.mrb[6].mxu0 %vm693_vm2, %v621_v24 }
  0x86   : > { %6273 = vmatprep.mubr.msk.f32.mxu0 %vm693_vm2, %v622_v25 }
  0x89   : > { %6274 = vmatmul.mubr.msk.f32.gmra.mrb[8].mxu0 %vm693_vm2, %v623_v26 }
  0x8a   : > { %6276 = vmatprep.mubr.msk.f32.mxu0 %vm693_vm2, %v624_v27 }
  0x8d   : > { %6277 = vmatmul.mubr.msk.f32.gmra.mrb[10].mxu0 %vm693_vm2, %v625_v28 }
  0x8e   : > { %6279 = vmatprep.mubr.msk.f32.mxu0 %vm693_vm2, %v626_v29 }
  0x91   : > { %6280 = vmatmul.mubr.msk.f32.gmra.mrb[12].mxu0 %vm693_vm2, %v627_v30 }
  0x92   : > { %6282 = vmatprep.mubr.msk.f32.mxu0 %vm693_vm2, %v628_v31 }
  0x95   : > { %6283 = vmatmul.mubr.msk.f32.gmra.mrb[14].mxu0 %vm693_vm2, %v629_v32 }
  0x96   : > { %6285 = vmatprep.mubr.msk.f32.mxu0 %vm693_vm2, %v630_v33 }
  0x99   : > { %6286 = vmatmul.mubr.msk.f32.gmra.mrb[16].mxu0 %vm693_vm2, %v631_v34 }
  0x9a   : > { %6288 = vmatprep.mubr.msk.f32.mxu0 %vm693_vm2, %v632_v35 }
  0x9d   : > { %6289 = vmatmul.mubr.msk.f32.gmra.mrb[18].mxu0 %vm693_vm2, %v633_v36 }
  0x9e   : > { %6291 = vmatprep.mubr.msk.f32.mxu0 %vm693_vm2, %v634_v37 }
  0xa1   : > { %6292 = vmatmul.mubr.msk.f32.gmra.mrb[20].mxu0 %vm693_vm2, %v635_v38 }
  0xa2   : > { %6294 = vmatprep.mubr.msk.f32.mxu0 %vm693_vm2, %v636_v39 }
  0xa5   : > { %6295 = vmatmul.mubr.msk.f32.gmra.mrb[22].mxu0 %vm693_vm2, %v637_v40 }
  0xa6   : > { %6297 = vmatprep.mubr.msk.f32.mxu0 %vm693_vm2, %v638_v41 }
  0xa9   : > { %6298 = vmatmul.mubr.msk.f32.gmra.mrb[24].mxu0 %vm693_vm2, %v639_v42 }
  0xaa   : > { %6300 = vmatprep.mubr.msk.f32.mxu0 %vm693_vm2, %v640_v43 }
  0xad   : > { %6301 = vmatmul.mubr.msk.f32.gmra.mrb[26].mxu0 %vm693_vm2, %v641_v44 }
  0xae   : > { %6303 = vmatprep.mubr.msk.f32.mxu0 %vm693_vm2, %v642_v45 }
  0xb1   : > { %6304 = vmatmul.mubr.msk.f32.gmra.mrb[28].mxu0 %vm693_vm2, %v643_v46 }
  0xb2   : > { %6306 = vmatprep.mubr.msk.f32.mxu0 %vm693_vm2, %v644_v47 }
  0xb5   : > { %6307 = vmatmul.mubr.msk.f32.gmra.mrb[30].mxu0 %vm693_vm2, %v645_v48 }
  0xb6   : > { %6309 = vmatprep.mubr.msk.f32.mxu0 %vm693_vm2, %v646_v49 }
  0xb9   : > { %6310 = vmatmul.mubr.msk.f32.gmra.mrb[32].mxu0 %vm693_vm2, %v647_v50 }
  0xba   : > { %6312 = vmatprep.mubr.msk.f32.mxu0 %vm693_vm2, %v648_v51 }
  0xbd   : > { %6313 = vmatmul.mubr.msk.f32.gmra.mrb[34].mxu0 %vm693_vm2, %v649_v52 }
  0xbe   : > { %6315 = vmatprep.mubr.msk.f32.mxu0 %vm693_vm2, %v650_v53 }
  0xc1   : > { %6316 = vmatmul.mubr.msk.f32.gmra.mrb[36].mxu0 %vm693_vm2, %v651_v54 }
  0xc2   : > { %6318 = vmatprep.mubr.msk.f32.mxu0 %vm693_vm2, %v652_v55 }
  0xc5   : > { %6319 = vmatmul.mubr.msk.f32.gmra.mrb[38].mxu0 %vm693_vm2, %v653_v56 }
  0xc6   : > { %6321 = vmatprep.mubr.msk.f32.mxu0 %vm693_vm2, %v654_v57 }
  0xc9   : > { %6322 = vmatmul.mubr.msk.f32.gmra.mrb[40].mxu0 %vm693_vm2, %v655_v58 }
  0xca   : > { %6324 = vmatprep.mubr.msk.f32.mxu0 %vm693_vm2, %v656_v59 }
  0xcd   : > { %6325 = vmatmul.mubr.msk.f32.gmra.mrb[42].mxu0 %vm693_vm2, %v657_v60 }
  0xce   : > { %6327 = vmatprep.mubr.msk.f32.mxu0 %vm693_vm2, %v658_v61 }
  0xd1   : > { %6328 = vmatmul.mubr.msk.f32.gmra.mrb[44].mxu0 %vm693_vm2, %v659_v1 }
  0xd2   : > { %6330 = vmatprep.mubr.msk.f32.mxu0 %vm693_vm2, %v660_v2 }
  0xd5   : > { %6331 = vmatmul.mubr.msk.f32.gmra.mrb[46].mxu0 %vm693_vm2, %v661_v3 }
  0xd6   : > { %6333 = vmatprep.mubr.msk.f32.mxu0 %vm693_vm2, %v662_v4 }
  0xd9   : > { %6334 = vmatmul.mubr.msk.f32.gmra.mrb[48].mxu0 %vm693_vm2, %v663_v5 }
  0xda   : > { %6336 = vmatprep.mubr.msk.f32.mxu0 %vm693_vm2, %v664_v6 }
  0xdd   : > { %6337 = vmatmul.mubr.msk.f32.gmra.mrb[50].mxu0 %vm693_vm2, %v665_v7 }
  0xde   : > { %6339 = vmatprep.mubr.msk.f32.mxu0 %vm693_vm2, %v666_v8 }
  0xe1   : > { %6340 = vmatmul.mubr.msk.f32.gmra.mrb[52].mxu0 %vm693_vm2, %v667_v9 }
  0xe2   : > { %6342 = vmatprep.mubr.msk.f32.mxu0 %vm693_vm2, %v668_v10 }
  0xe5   : > { %6343 = vmatmul.mubr.msk.f32.gmra.mrb[54].mxu0 %vm693_vm2, %v669_v11 }
  0xe6   : > { %6345 = vmatprep.mubr.msk.f32.mxu0 %vm693_vm2, %v670_v12 }
  0xe9   : > { %6346 = vmatmul.mubr.msk.f32.gmra.mrb[56].mxu0 %vm693_vm2, %v671_v13 }
  0xea   : > { %6348 = vmatprep.mubr.msk.f32.mxu0 %vm693_vm2, %v672_v14 }
  0xed   : > { %6349 = vmatmul.mubr.msk.f32.gmra.mrb[58].mxu0 %vm693_vm2, %v673_v15 }
  0xee   : > { %6351 = vmatprep.mubr.msk.f32.mxu0 %vm693_vm2, %v674_v16 }
  0xf1   : > { %6352 = vmatmul.mubr.msk.f32.gmra.mrb[60].mxu0 %vm693_vm2, %v675_v17 }
  0xf2   : > { %6354 = vmatprep.mubr.msk.f32.mxu0 %vm693_vm2, %v676_v18 }
  0xf5   : > { %6355 = vmatmul.mubr.msk.f32.gmra.mrb[62].mxu0 %vm693_vm2, %v677_v19 }
 0x14c   : > { %v6263_v21 = vpop.f32.mrb[0].mxu0 }
 0x14d   : > { %v958_v22 = vadd.f32 %v6263_v21, %v7761_v20  ;;  %v952_v23 = vpop.f32.mrb[1].mxu0 }
 0x14e   : > { %v953_v24 = vadd.f32 %v7761_v20, %v952_v23 }
 0x14f   : > { %v7767_v27 = vmax.f32 %v958_v22, 0.0 }
 0x150   : > { %v7765_v25 = vmax.f32 %v953_v24, 0.0  ;;  %v6266_v26 = vpop.f32.mrb[2].mxu0 }
 0x151   : > { %11211 = vst [vmem:[#allocation13_spill] sm:$0xff] %v7767_v27  ;;  %v968_v28 = vadd.f32 %v6266_v26, %v7761_v20  ;;  %v962_v29 = vpop.f32.mrb[3].mxu0 }
 0x152   : > { %11210 = vst [vmem:[#allocation12_spill] sm:$0xff] %v7765_v25  ;;  %v963_v30 = vadd.f32 %v7761_v20, %v962_v29  ;;  %6365 = vmatprep.mubr.msk.f32.mxu1 %vm1346_vm3, %v7765_v25 }
 0x153   : > { %6366 = vmatmul.mubr.msk.f32.vlgmr.msra.gmra.mrb[0].mxu1 %vm1346_vm3, %v7767_v27  ;;  %v7777_v33 = vmax.f32 %v968_v28, 0.0 }
 0x154   : > { %v7775_v31 = vmax.f32 %v963_v30, 0.0  ;;  %v6269_v32 = vpop.f32.mrb[4].mxu0 }
 0x155   : > { %11213 = vst [vmem:[#allocation15_spill] sm:$0xff] %v7777_v33  ;;  %v978_v34 = vadd.f32 %v6269_v32, %v7761_v20  ;;  %v972_v35 = vpop.f32.mrb[5].mxu0 }
 0x156   : > { %11212 = vst [vmem:[#allocation14_spill] sm:$0xff] %v7775_v31  ;;  %v973_v36 = vadd.f32 %v7761_v20, %v972_v35  ;;  %6368 = vmatprep.mubr.msk.f32.mxu1 %vm1346_vm3, %v7775_v31 }
 0x157   : > { %6369 = vmatmul.mubr.msk.f32.gmra.mrb[2].mxu1 %vm1346_vm3, %v7777_v33  ;;  %v7787_v39 = vmax.f32 %v978_v34, 0.0 }
 0x158   : > { %v7785_v37 = vmax.f32 %v973_v36, 0.0  ;;  %v6272_v38 = vpop.f32.mrb[6].mxu0 }
 0x159   : > { %11215 = vst [vmem:[#allocation17_spill] sm:$0xff] %v7787_v39  ;;  %v988_v40 = vadd.f32 %v6272_v38, %v7761_v20  ;;  %v982_v41 = vpop.f32.mrb[7].mxu0 }
 0x15a   : > { %11214 = vst [vmem:[#allocation16_spill] sm:$0xff] %v7785_v37  ;;  %v983_v42 = vadd.f32 %v7761_v20, %v982_v41  ;;  %6371 = vmatprep.mubr.msk.f32.mxu1 %vm1346_vm3, %v7785_v37 }
 0x15b   : > { %6372 = vmatmul.mubr.msk.f32.gmra.mrb[4].mxu1 %vm1346_vm3, %v7787_v39  ;;  %v7797_v45 = vmax.f32 %v988_v40, 0.0 }
 0x15c   : > { %v7795_v43 = vmax.f32 %v983_v42, 0.0  ;;  %v6275_v44 = vpop.f32.mrb[8].mxu0 }
 0x15d   : > { %11217 = vst [vmem:[#allocation19_spill] sm:$0xff] %v7797_v45  ;;  %v998_v46 = vadd.f32 %v6275_v44, %v7761_v20  ;;  %v992_v47 = vpop.f32.mrb[9].mxu0 }
 0x15e   : > { %11216 = vst [vmem:[#allocation18_spill] sm:$0xff] %v7795_v43  ;;  %v993_v48 = vadd.f32 %v7761_v20, %v992_v47  ;;  %6374 = vmatprep.mubr.msk.f32.mxu1 %vm1346_vm3, %v7795_v43 }
 0x15f   : > { %6375 = vmatmul.mubr.msk.f32.gmra.mrb[6].mxu1 %vm1346_vm3, %v7797_v45  ;;  %v7807_v51 = vmax.f32 %v998_v46, 0.0 }
 0x160   : > { %v7805_v49 = vmax.f32 %v993_v48, 0.0  ;;  %v6278_v50 = vpop.f32.mrb[10].mxu0 }
 0x161   : > { %11219 = vst [vmem:[#allocation21_spill] sm:$0xff] %v7807_v51  ;;  %v1008_v52 = vadd.f32 %v6278_v50, %v7761_v20  ;;  %v1002_v53 = vpop.f32.mrb[11].mxu0 }
 0x162   : > { %11218 = vst [vmem:[#allocation20_spill] sm:$0xff] %v7805_v49  ;;  %v1003_v54 = vadd.f32 %v7761_v20, %v1002_v53  ;;  %6377 = vmatprep.mubr.msk.f32.mxu1 %vm1346_vm3, %v7805_v49 }
 0x163   : > { %6378 = vmatmul.mubr.msk.f32.gmra.mrb[8].mxu1 %vm1346_vm3, %v7807_v51  ;;  %v7817_v57 = vmax.f32 %v1008_v52, 0.0 }
 0x164   : > { %v7815_v55 = vmax.f32 %v1003_v54, 0.0  ;;  %v6281_v56 = vpop.f32.mrb[12].mxu0 }
 0x165   : > { %11221 = vst [vmem:[#allocation23_spill] sm:$0xff] %v7817_v57  ;;  %v1018_v58 = vadd.f32 %v6281_v56, %v7761_v20  ;;  %v1012_v59 = vpop.f32.mrb[13].mxu0 }
 0x166   : > { %11220 = vst [vmem:[#allocation22_spill] sm:$0xff] %v7815_v55  ;;  %v1013_v60 = vadd.f32 %v7761_v20, %v1012_v59  ;;  %6380 = vmatprep.mubr.msk.f32.mxu1 %vm1346_vm3, %v7815_v55 }
 0x167   : > { %6381 = vmatmul.mubr.msk.f32.gmra.mrb[10].mxu1 %vm1346_vm3, %v7817_v57  ;;  %v7827_v63 = vmax.f32 %v1018_v58, 0.0 }
 0x168   : > { %v7825_v61 = vmax.f32 %v1013_v60, 0.0  ;;  %v6284_v62 = vpop.f32.mrb[14].mxu0 }
 0x169   : > { %11223 = vst [vmem:[#allocation25_spill] sm:$0xff] %v7827_v63  ;;  %v1028_v0 = vadd.f32 %v6284_v62, %v7761_v20  ;;  %v1022_v1 = vpop.f32.mrb[15].mxu0 }
 0x16a   : > { %11222 = vst [vmem:[#allocation24_spill] sm:$0xff] %v7825_v61  ;;  %v1023_v2 = vadd.f32 %v7761_v20, %v1022_v1  ;;  %6383 = vmatprep.mubr.msk.f32.mxu1 %vm1346_vm3, %v7825_v61 }
 0x16b   : > { %6384 = vmatmul.mubr.msk.f32.gmra.mrb[12].mxu1 %vm1346_vm3, %v7827_v63  ;;  %v7837_v5 = vmax.f32 %v1028_v0, 0.0 }
 0x16c   : > { %v7835_v3 = vmax.f32 %v1023_v2, 0.0  ;;  %v6287_v4 = vpop.f32.mrb[16].mxu0 }
 0x16d   : > { %11225 = vst [vmem:[#allocation27_spill] sm:$0xff] %v7837_v5  ;;  %v1038_v6 = vadd.f32 %v6287_v4, %v7761_v20  ;;  %v1032_v7 = vpop.f32.mrb[17].mxu0 }
 0x16e   : > { %11224 = vst [vmem:[#allocation26_spill] sm:$0xff] %v7835_v3  ;;  %v1033_v8 = vadd.f32 %v7761_v20, %v1032_v7  ;;  %6386 = vmatprep.mubr.msk.f32.mxu1 %vm1346_vm3, %v7835_v3 }
 0x16f   : > { %6387 = vmatmul.mubr.msk.f32.gmra.mrb[14].mxu1 %vm1346_vm3, %v7837_v5  ;;  %v7847_v11 = vmax.f32 %v1038_v6, 0.0 }
 0x170   : > { %v7845_v9 = vmax.f32 %v1033_v8, 0.0  ;;  %v6290_v10 = vpop.f32.mrb[18].mxu0 }
 0x171   : > { %11227 = vst [vmem:[#allocation29_spill] sm:$0xff] %v7847_v11  ;;  %v1048_v12 = vadd.f32 %v6290_v10, %v7761_v20  ;;  %v1042_v13 = vpop.f32.mrb[19].mxu0 }
 0x172   : > { %11226 = vst [vmem:[#allocation28_spill] sm:$0xff] %v7845_v9  ;;  %v1043_v14 = vadd.f32 %v7761_v20, %v1042_v13  ;;  %6389 = vmatprep.mubr.msk.f32.mxu1 %vm1346_vm3, %v7845_v9 }
 0x173   : > { %6390 = vmatmul.mubr.msk.f32.gmra.mrb[16].mxu1 %vm1346_vm3, %v7847_v11  ;;  %v7857_v17 = vmax.f32 %v1048_v12, 0.0 }
 0x174   : > { %v7855_v15 = vmax.f32 %v1043_v14, 0.0  ;;  %v6293_v16 = vpop.f32.mrb[20].mxu0 }
 0x175   : > { %11229 = vst [vmem:[#allocation31_spill] sm:$0xff] %v7857_v17  ;;  %v1058_v18 = vadd.f32 %v6293_v16, %v7761_v20  ;;  %v1052_v19 = vpop.f32.mrb[21].mxu0 }
 0x176   : > { %11228 = vst [vmem:[#allocation30_spill] sm:$0xff] %v7855_v15  ;;  %v1053_v21 = vadd.f32 %v7761_v20, %v1052_v19  ;;  %6392 = vmatprep.mubr.msk.f32.mxu1 %vm1346_vm3, %v7855_v15 }
 0x177   : > { %6393 = vmatmul.mubr.msk.f32.gmra.mrb[18].mxu1 %vm1346_vm3, %v7857_v17  ;;  %v7867_v24 = vmax.f32 %v1058_v18, 0.0 }
 0x178   : > { %v7865_v22 = vmax.f32 %v1053_v21, 0.0  ;;  %v6296_v23 = vpop.f32.mrb[22].mxu0 }
 0x179   : > { %11231 = vst [vmem:[#allocation33_spill] sm:$0xff] %v7867_v24  ;;  %v1068_v26 = vadd.f32 %v6296_v23, %v7761_v20  ;;  %v1062_v28 = vpop.f32.mrb[23].mxu0 }
 0x17a   : > { %11230 = vst [vmem:[#allocation32_spill] sm:$0xff] %v7865_v22  ;;  %v1063_v29 = vadd.f32 %v7761_v20, %v1062_v28  ;;  %6395 = vmatprep.mubr.msk.f32.mxu1 %vm1346_vm3, %v7865_v22 }
 0x17b   : > { %6396 = vmatmul.mubr.msk.f32.gmra.mrb[20].mxu1 %vm1346_vm3, %v7867_v24  ;;  %v7877_v34 = vmax.f32 %v1068_v26, 0.0 }
 0x17c   : > { %v7875_v30 = vmax.f32 %v1063_v29, 0.0  ;;  %v6299_v32 = vpop.f32.mrb[24].mxu0 }
 0x17d   : > { %11233 = vst [vmem:[#allocation35_spill] sm:$0xff] %v7877_v34  ;;  %v1078_v35 = vadd.f32 %v6299_v32, %v7761_v20  ;;  %v1072_v36 = vpop.f32.mrb[25].mxu0 }
 0x17e   : > { %11232 = vst [vmem:[#allocation34_spill] sm:$0xff] %v7875_v30  ;;  %v1073_v38 = vadd.f32 %v7761_v20, %v1072_v36  ;;  %6398 = vmatprep.mubr.msk.f32.mxu1 %vm1346_vm3, %v7875_v30 }
 0x17f   : > { %6399 = vmatmul.mubr.msk.f32.gmra.mrb[22].mxu1 %vm1346_vm3, %v7877_v34  ;;  %v7887_v42 = vmax.f32 %v1078_v35, 0.0 }
 0x180   : > { %v7885_v40 = vmax.f32 %v1073_v38, 0.0  ;;  %v6302_v41 = vpop.f32.mrb[26].mxu0 }
 0x181   : > { %11235 = vst [vmem:[#allocation37_spill] sm:$0xff] %v7887_v42  ;;  %v1088_v44 = vadd.f32 %v6302_v41, %v7761_v20  ;;  %v1082_v46 = vpop.f32.mrb[27].mxu0 }
 0x182   : > { %11234 = vst [vmem:[#allocation36_spill] sm:$0xff] %v7885_v40  ;;  %v1083_v47 = vadd.f32 %v7761_v20, %v1082_v46  ;;  %6401 = vmatprep.mubr.msk.f32.mxu1 %vm1346_vm3, %v7885_v40 }
 0x183   : > { %6402 = vmatmul.mubr.msk.f32.gmra.mrb[24].mxu1 %vm1346_vm3, %v7887_v42  ;;  %v7897_v52 = vmax.f32 %v1088_v44, 0.0 }
 0x184   : > { %v7895_v48 = vmax.f32 %v1083_v47, 0.0  ;;  %v6305_v50 = vpop.f32.mrb[28].mxu0 }
 0x185   : > { %11237 = vst [vmem:[#allocation39_spill] sm:$0xff] %v7897_v52  ;;  %v1098_v53 = vadd.f32 %v6305_v50, %v7761_v20  ;;  %v1092_v54 = vpop.f32.mrb[29].mxu0 }
 0x186   : > { %11236 = vst [vmem:[#allocation38_spill] sm:$0xff] %v7895_v48  ;;  %v1093_v56 = vadd.f32 %v7761_v20, %v1092_v54  ;;  %6404 = vmatprep.mubr.msk.f32.mxu1 %vm1346_vm3, %v7895_v48 }
 0x187   : > { %6405 = vmatmul.mubr.msk.f32.gmra.mrb[26].mxu1 %vm1346_vm3, %v7897_v52  ;;  %v7907_v60 = vmax.f32 %v1098_v53, 0.0 }
 0x188   : > { %v7905_v58 = vmax.f32 %v1093_v56, 0.0  ;;  %v6308_v59 = vpop.f32.mrb[30].mxu0 }
 0x189   : > { %11239 = vst [vmem:[#allocation41_spill] sm:$0xff] %v7907_v60  ;;  %v1108_v62 = vadd.f32 %v6308_v59, %v7761_v20  ;;  %v1102_v0 = vpop.f32.mrb[31].mxu0 }
 0x18a   : > { %11238 = vst [vmem:[#allocation40_spill] sm:$0xff] %v7905_v58  ;;  %v1103_v1 = vadd.f32 %v7761_v20, %v1102_v0  ;;  %6407 = vmatprep.mubr.msk.f32.mxu1 %vm1346_vm3, %v7905_v58 }
 0x18b   : > { %6408 = vmatmul.mubr.msk.f32.gmra.mrb[28].mxu1 %vm1346_vm3, %v7907_v60  ;;  %v7917_v6 = vmax.f32 %v1108_v62, 0.0 }
 0x18c   : > { %v7915_v2 = vmax.f32 %v1103_v1, 0.0  ;;  %v6311_v4 = vpop.f32.mrb[32].mxu0 }
 0x18d   : > { %11241 = vst [vmem:[#allocation43_spill] sm:$0xff] %v7917_v6  ;;  %v1118_v7 = vadd.f32 %v6311_v4, %v7761_v20  ;;  %v1112_v8 = vpop.f32.mrb[33].mxu0 }
 0x18e   : > { %11240 = vst [vmem:[#allocation42_spill] sm:$0xff] %v7915_v2  ;;  %v1113_v10 = vadd.f32 %v7761_v20, %v1112_v8  ;;  %6410 = vmatprep.mubr.msk.f32.mxu1 %vm1346_vm3, %v7915_v2 }
 0x18f   : > { %6411 = vmatmul.mubr.msk.f32.gmra.mrb[30].mxu1 %vm1346_vm3, %v7917_v6  ;;  %v7927_v14 = vmax.f32 %v1118_v7, 0.0 }
 0x190   : > { %v7925_v12 = vmax.f32 %v1113_v10, 0.0  ;;  %v6314_v13 = vpop.f32.mrb[34].mxu0 }
 0x191   : > { %11243 = vst [vmem:[#allocation45_spill] sm:$0xff] %v7927_v14  ;;  %v1128_v16 = vadd.f32 %v6314_v13, %v7761_v20  ;;  %v1122_v18 = vpop.f32.mrb[35].mxu0 }
 0x192   : > { %11242 = vst [vmem:[#allocation44_spill] sm:$0xff] %v7925_v12  ;;  %v1123_v19 = vadd.f32 %v7761_v20, %v1122_v18  ;;  %6413 = vmatprep.mubr.msk.f32.mxu1 %vm1346_vm3, %v7925_v12 }
 0x193   : > { %6414 = vmatmul.mubr.msk.f32.gmra.mrb[32].mxu1 %vm1346_vm3, %v7927_v14  ;;  %v7937_v26 = vmax.f32 %v1128_v16, 0.0 }
 0x194   : > { %v7935_v21 = vmax.f32 %v1123_v19, 0.0  ;;  %v6317_v23 = vpop.f32.mrb[36].mxu0 }
 0x195   : > { %11245 = vst [vmem:[#allocation47_spill] sm:$0xff] %v7937_v26  ;;  %v1138_v28 = vadd.f32 %v6317_v23, %v7761_v20  ;;  %v1132_v29 = vpop.f32.mrb[37].mxu0 }
 0x196   : > { %11244 = vst [vmem:[#allocation46_spill] sm:$0xff] %v7935_v21  ;;  %v1133_v32 = vadd.f32 %v7761_v20, %v1132_v29  ;;  %6416 = vmatprep.mubr.msk.f32.mxu1 %vm1346_vm3, %v7935_v21 }
 0x197   : > { %6417 = vmatmul.mubr.msk.f32.gmra.mrb[34].mxu1 %vm1346_vm3, %v7937_v26  ;;  %v7947_v38 = vmax.f32 %v1138_v28, 0.0 }
 0x198   : > { %v7945_v35 = vmax.f32 %v1133_v32, 0.0  ;;  %v6320_v36 = vpop.f32.mrb[38].mxu0 }
 0x199   : > { %11247 = vst [vmem:[#allocation49_spill] sm:$0xff] %v7947_v38  ;;  %v1148_v41 = vadd.f32 %v6320_v36, %v7761_v20  ;;  %v1142_v44 = vpop.f32.mrb[39].mxu0 }
 0x19a   : > { %11246 = vst [vmem:[#allocation48_spill] sm:$0xff] %v7945_v35  ;;  %v1143_v46 = vadd.f32 %v7761_v20, %v1142_v44  ;;  %6419 = vmatprep.mubr.msk.f32.mxu1 %vm1346_vm3, %v7945_v35 }
 0x19b   : > { %6420 = vmatmul.mubr.msk.f32.gmra.mrb[36].mxu1 %vm1346_vm3, %v7947_v38  ;;  %v7957_v53 = vmax.f32 %v1148_v41, 0.0 }
 0x19c   : > { %v7955_v47 = vmax.f32 %v1143_v46, 0.0  ;;  %v6323_v50 = vpop.f32.mrb[40].mxu0 }
 0x19d   : > { %11249 = vst [vmem:[#allocation51_spill] sm:$0xff] %v7957_v53  ;;  %v1158_v54 = vadd.f32 %v6323_v50, %v7761_v20  ;;  %v1152_v56 = vpop.f32.mrb[41].mxu0 }
 0x19e   : > { %11248 = vst [vmem:[#allocation50_spill] sm:$0xff] %v7955_v47  ;;  %v1153_v59 = vadd.f32 %v7761_v20, %v1152_v56  ;;  %6422 = vmatprep.mubr.msk.f32.mxu1 %vm1346_vm3, %v7955_v47 }
 0x19f   : > { %6423 = vmatmul.mubr.msk.f32.gmra.mrb[38].mxu1 %vm1346_vm3, %v7957_v53  ;;  %v7967_v1 = vmax.f32 %v1158_v54, 0.0 }
 0x1a0   : > { %v7965_v62 = vmax.f32 %v1153_v59, 0.0  ;;  %v6326_v0 = vpop.f32.mrb[42].mxu0 }
 0x1a1   : > { %11251 = vst [vmem:[#allocation53_spill] sm:$0xff] %v7967_v1  ;;  %v1168_v4 = vadd.f32 %v6326_v0, %v7761_v20  ;;  %v1162_v7 = vpop.f32.mrb[43].mxu0 }
 0x1a2   : > { %11250 = vst [vmem:[#allocation52_spill] sm:$0xff] %v7965_v62  ;;  %v1163_v8 = vadd.f32 %v7761_v20, %v1162_v7  ;;  %6425 = vmatprep.mubr.msk.f32.mxu1 %vm1346_vm3, %v7965_v62 }
 0x1a3   : > { %6426 = vmatmul.mubr.msk.f32.gmra.mrb[40].mxu1 %vm1346_vm3, %v7967_v1  ;;  %v7977_v16 = vmax.f32 %v1168_v4, 0.0 }
 0x1a4   : > { %v7975_v10 = vmax.f32 %v1163_v8, 0.0  ;;  %v6329_v13 = vpop.f32.mrb[44].mxu0 }
 0x1a5   : > { %11253 = vst [vmem:[#allocation55_spill] sm:$0xff] %v7977_v16  ;;  %v1178_v18 = vadd.f32 %v6329_v13, %v7761_v20  ;;  %v1172_v19 = vpop.f32.mrb[45].mxu0 }
 0x1a6   : > { %11252 = vst [vmem:[#allocation54_spill] sm:$0xff] %v7975_v10  ;;  %v1173_v23 = vadd.f32 %v7761_v20, %v1172_v19  ;;  %6428 = vmatprep.mubr.msk.f32.mxu1 %vm1346_vm3, %v7975_v10 }
 0x1a7   : > { %6429 = vmatmul.mubr.msk.f32.gmra.mrb[42].mxu1 %vm1346_vm3, %v7977_v16  ;;  %v7987_v32 = vmax.f32 %v1178_v18, 0.0 }
 0x1a8   : > { %v7985_v28 = vmax.f32 %v1173_v23, 0.0  ;;  %v6332_v29 = vpop.f32.mrb[46].mxu0 }
 0x1a9   : > { %11255 = vst [vmem:[#allocation57_spill] sm:$0xff] %v7987_v32  ;;  %v1188_v36 = vadd.f32 %v6332_v29, %v7761_v20  ;;  %v1182_v41 = vpop.f32.mrb[47].mxu0 }
 0x1aa   : > { %11254 = vst [vmem:[#allocation56_spill] sm:$0xff] %v7985_v28  ;;  %v1183_v44 = vadd.f32 %v7761_v20, %v1182_v41  ;;  %6431 = vmatprep.mubr.msk.f32.mxu1 %vm1346_vm3, %v7985_v28 }
 0x1ab   : > { %6432 = vmatmul.mubr.msk.f32.gmra.mrb[44].mxu1 %vm1346_vm3, %v7987_v32  ;;  %v7997_v54 = vmax.f32 %v1188_v36, 0.0 }
 0x1ac   : > { %v7995_v46 = vmax.f32 %v1183_v44, 0.0  ;;  %v6335_v50 = vpop.f32.mrb[48].mxu0 }
 0x1ad   : > { %11257 = vst [vmem:[#allocation59_spill] sm:$0xff] %v7997_v54  ;;  %v1198_v56 = vadd.f32 %v6335_v50, %v7761_v20  ;;  %v1192_v59 = vpop.f32.mrb[49].mxu0 }
 0x1ae   : > { %11256 = vst [vmem:[#allocation58_spill] sm:$0xff] %v7995_v46  ;;  %v1193_v0 = vadd.f32 %v7761_v20, %v1192_v59  ;;  %6434 = vmatprep.mubr.msk.f32.mxu1 %vm1346_vm3, %v7995_v46 }
 0x1af   : > { %6435 = vmatmul.mubr.msk.f32.gmra.mrb[46].mxu1 %vm1346_vm3, %v7997_v54  ;;  %v8007_v8 = vmax.f32 %v1198_v56, 0.0 }
 0x1b0   : > { %v8005_v4 = vmax.f32 %v1193_v0, 0.0  ;;  %v6338_v7 = vpop.f32.mrb[50].mxu0 }
 0x1b1   : > { %11259 = vst [vmem:[#allocation61_spill] sm:$0xff] %v8007_v8  ;;  %v1208_v13 = vadd.f32 %v6338_v7, %v7761_v20  ;;  %v1202_v18 = vpop.f32.mrb[51].mxu0 }
 0x1b2   : > { %11258 = vst [vmem:[#allocation60_spill] sm:$0xff] %v8005_v4  ;;  %v1203_v19 = vadd.f32 %v7761_v20, %v1202_v18  ;;  %6437 = vmatprep.mubr.msk.f32.mxu1 %vm1346_vm3, %v8005_v4 }
 0x1b3   : > { %6438 = vmatmul.mubr.msk.f32.gmra.mrb[48].mxu1 %vm1346_vm3, %v8007_v8  ;;  %v8017_v36 = vmax.f32 %v1208_v13, 0.0 }
 0x1b4   : > { %v8015_v23 = vmax.f32 %v1203_v19, 0.0  ;;  %v6341_v29 = vpop.f32.mrb[52].mxu0 }
 0x1b5   : > { %11261 = vst [vmem:[#allocation63_spill] sm:$0xff] %v8017_v36  ;;  %v1218_v41 = vadd.f32 %v6341_v29, %v7761_v20  ;;  %v1212_v44 = vpop.f32.mrb[53].mxu0 }
 0x1b6   : > { %11260 = vst [vmem:[#allocation62_spill] sm:$0xff] %v8015_v23  ;;  %v1213_v50 = vadd.f32 %v7761_v20, %v1212_v44  ;;  %6440 = vmatprep.mubr.msk.f32.mxu1 %vm1346_vm3, %v8015_v23 }
 0x1b7   : > { %6441 = vmatmul.mubr.msk.f32.gmra.mrb[50].mxu1 %vm1346_vm3, %v8017_v36  ;;  %v8027_v0 = vmax.f32 %v1218_v41, 0.0 }
 0x1b8   : > { %v8025_v56 = vmax.f32 %v1213_v50, 0.0  ;;  %v6344_v59 = vpop.f32.mrb[54].mxu0 }
 0x1b9   : > { %11263 = vst [vmem:[#allocation65_spill] sm:$0xff] %v8027_v0  ;;  %v1228_v7 = vadd.f32 %v6344_v59, %v7761_v20  ;;  %v1222_v13 = vpop.f32.mrb[55].mxu0 }
 0x1ba   : > { %11262 = vst [vmem:[#allocation64_spill] sm:$0xff] %v8025_v56  ;;  %v1223_v18 = vadd.f32 %v7761_v20, %v1222_v13  ;;  %6443 = vmatprep.mubr.msk.f32.mxu1 %vm1346_vm3, %v8025_v56 }
 0x1bb   : > { %6444 = vmatmul.mubr.msk.f32.gmra.mrb[52].mxu1 %vm1346_vm3, %v8027_v0  ;;  %v8037_v44 = vmax.f32 %v1228_v7, 0.0 }
 0x1bc   : > { %v8035_v19 = vmax.f32 %v1223_v18, 0.0  ;;  %v6347_v29 = vpop.f32.mrb[56].mxu0 }
 0x1bd   : > { %11265 = vst [vmem:[#allocation67_spill] sm:$0xff] %v8037_v44  ;;  %v1238_v50 = vadd.f32 %v6347_v29, %v7761_v20  ;;  %v1232_v41 = vpop.f32.mrb[57].mxu0 }
 0x1be   : > { %11264 = vst [vmem:[#allocation66_spill] sm:$0xff] %v8035_v19  ;;  %v1233_v5 = vadd.f32 %v7761_v20, %v1232_v41  ;;  %6446 = vmatprep.mubr.msk.f32.mxu1 %vm1346_vm3, %v8035_v19 }
 0x1bf   : > { %6447 = vmatmul.mubr.msk.f32.gmra.mrb[54].mxu1 %vm1346_vm3, %v8037_v44  ;;  %v8047_v3 = vmax.f32 %v1238_v50, 0.0 }
 0x1c0   : > { %v8045_v59 = vmax.f32 %v1233_v5, 0.0  ;;  %v6350_v13 = vpop.f32.mrb[58].mxu0 }
 0x1c1   : > { %11267 = vst [vmem:[#allocation69_spill] sm:$0xff] %v8047_v3  ;;  %v1248_v18 = vadd.f32 %v6350_v13, %v7761_v20  ;;  %v1242_v7 = vpop.f32.mrb[59].mxu0 }
 0x1c2   : > { %11266 = vst [vmem:[#allocation68_spill] sm:$0xff] %v8045_v59  ;;  %v1243_v63 = vadd.f32 %v7761_v20, %v1242_v7  ;;  %6449 = vmatprep.mubr.msk.f32.mxu1 %vm1346_vm3, %v8045_v59 }
 0x1c3   : > { %6450 = vmatmul.mubr.msk.f32.gmra.mrb[56].mxu1 %vm1346_vm3, %v8047_v3  ;;  %v8057_v61 = vmax.f32 %v1248_v18, 0.0 }
 0x1c4   : > { %v8055_v29 = vmax.f32 %v1243_v63, 0.0  ;;  %v6353_v41 = vpop.f32.mrb[60].mxu0 }
 0x1c5   : > { %11269 = vst [vmem:[#allocation71_spill] sm:$0xff] %v8057_v61  ;;  %v1258_v5 = vadd.f32 %v6353_v41, %v7761_v20  ;;  %v1252_v50 = vpop.f32.mrb[61].mxu0 }
 0x1c6   : > { %11268 = vst [vmem:[#allocation70_spill] sm:$0xff] %v8055_v29  ;;  %6452 = vmatprep.mubr.msk.f32.mxu1 %vm1346_vm3, %v8055_v29  ;;  %v1253_v13 = vadd.f32 %v7761_v20, %v1252_v50 }
 0x1c7   : > { %6453 = vmatmul.mubr.msk.f32.gmra.mrb[58].mxu1 %vm1346_vm3, %v8057_v61  ;;  %v8065_v7 = vmax.f32 %v1258_v5, 0.0  ;;  %v8086_v5 = vld [vmem:[%s10983_s4] ss:$0 sm:$0xff] }
 0x1c8   : > { %v8067_v59 = vmax.f32 %v1253_v13, 0.0  ;;  %v6356_v63 = vpop.f32.mrb[62].mxu0 }
 0x1c9   : > { %11270 = vst [vmem:[#allocation72_spill] sm:$0xff] %v8065_v7  ;;  %v1268_v3 = vadd.f32 %v6356_v63, %v7761_v20  ;;  %v1262_v18 = vpop.f32.mrb[63].mxu0 }
 0x1ca   : > { %11271 = vst [vmem:[#allocation73_spill] sm:$0xff] %v8067_v59  ;;  %6455 = vmatprep.mubr.msk.f32.mxu1 %vm1346_vm3, %v8067_v59  ;;  %v1263_v41 = vadd.f32 %v7761_v20, %v1262_v18 }
 0x1cb   : > { %6456 = vmatmul.mubr.msk.f32.gmra.mrb[60].mxu1 %vm1346_vm3, %v8065_v7  ;;  %v8075_v50 = vmax.f32 %v1268_v3, 0.0 }
 0x1cc   : > { %v8077_v29 = vmax.f32 %v1263_v41, 0.0 }
 0x1cd   : > { %11272 = vst [vmem:[#allocation74_spill] sm:$0xff] %v8075_v50 }
 0x1ce   : > { %11273 = vst [vmem:[#allocation75_spill] sm:$0xff] %v8077_v29  ;;  %6458 = vmatprep.mubr.msk.f32.mxu1 %vm1346_vm3, %v8077_v29 }
 0x1cf   : > { %6459 = vmatmul.mubr.msk.f32.gmra.mrb[62].mxu1 %vm1346_vm3, %v8075_v50 }
 0x226   : > { %v6367_v13 = vpop.f32.mrb[0].mxu1 }
 0x227   : > { %v8089_v20 = vadd.f32 %v6367_v13, %v8086_v5  ;;  %v1605_v63 = vpop.f32.mrb[1].mxu1 }
 0x228   : > { %v8092_v3 = vadd.f32 %v8086_v5, %v1605_v63 }
 0x229   : > { %v6031_v18 = vmul.f32 -1.442695, %v8089_v20 }
 0x22a   : > { %v6030_v41 = vmul.f32 -1.442695, %v8092_v3  ;;  %v6370_v29 = vpop.f32.mrb[2].mxu1 }
 0x22b   : > { %6616 = vpow2.f32 %v6031_v18  ;;  %v8097_v50 = vadd.f32 %v6370_v29, %v8086_v5  ;;  %v1615_v59 = vpop.f32.mrb[3].mxu1 }
 0x22c   : > { %6618 = vpow2.f32 %v6030_v41  ;;  %v8100_v7 = vadd.f32 %v8086_v5, %v1615_v59 }
 0x22d   : > { %v6033_v13 = vmul.f32 -1.442695, %v8097_v50 }
 0x22e   : > { %v6032_v61 = vmul.f32 -1.442695, %v8100_v7  ;;  %v6373_v63 = vpop.f32.mrb[4].mxu1 }
 0x22f   : > { %6620 = vpow2.f32 %v6033_v13  ;;  %v8105_v57 = vadd.f32 %v6373_v63, %v8086_v5  ;;  %v1625_v19 = vpop.f32.mrb[5].mxu1 }
 0x230   : > { %6622 = vpow2.f32 %v6032_v61  ;;  %v8108_v18 = vadd.f32 %v8086_v5, %v1625_v19 }
 0x231   : > { %v6035_v29 = vmul.f32 -1.442695, %v8105_v57 }
 0x232   : > { %v6034_v41 = vmul.f32 -1.442695, %v8108_v18  ;;  %v6376_v59 = vpop.f32.mrb[6].mxu1 }
 0x233   : > { %6624 = vpow2.f32 %v6035_v29  ;;  %v8113_v44 = vadd.f32 %v6376_v59, %v8086_v5  ;;  %v1635_v55 = vpop.f32.mrb[7].mxu1 }
 0x234   : > { %6626 = vpow2.f32 %v6034_v41  ;;  %v8116_v13 = vadd.f32 %v8086_v5, %v1635_v55 }
 0x235   : > { %v6617_v63 = vpop.eup %6616  ;;  %v6037_v61 = vmul.f32 -1.442695, %v8113_v44 }
 0x236   : > { %v6619_v56 = vpop.eup %6618  ;;  %v2181_v19 = vadd.f32 1.0, %v6617_v63  ;;  %v6036_v0 = vmul.f32 -1.442695, %v8116_v13  ;;  %v6379_v49 = vpop.f32.mrb[8].mxu1 }
 0x237   : > { %v2180_v51 = vadd.f32 1.0, %v6619_v56  ;;  %6628 = vpow2.f32 %v6037_v61  ;;  %v8121_v29 = vadd.f32 %v6379_v49, %v8086_v5  ;;  %v1645_v59 = vpop.f32.mrb[9].mxu1 }
 0x238   : > { %6630 = vrcp.f32 %v2181_v19  ;;  %v8125_v4 = vadd.f32 %v8086_v5, %v1645_v59 }
 0x239   : > { %v6621_v23 = vpop.eup %6620  ;;  %6632 = vpow2.f32 %v6036_v0  ;;  %v6039_v55 = vmul.f32 -1.442695, %v8121_v29 }
 0x23a   : > { %v6623_v41 = vpop.eup %6622  ;;  %v2183_v36 = vadd.f32 1.0, %v6621_v23  ;;  %v6382_v63 = vpop.f32.mrb[10].mxu1  ;;  %6634 = vrcp.f32 %v2180_v51  ;;  %v6038_v19 = vmul.f32 -1.442695, %v8125_v4 }
 0x23b   : > { %v1655_v8 = vpop.f32.mrb[11].mxu1  ;;  %v2182_v56 = vadd.f32 1.0, %v6623_v41  ;;  %v8128_v49 = vadd.f32 %v6382_v63, %v8086_v5 }
 0x23c   : > { %6636 = vrcp.f32 %v2183_v36  ;;  %v8132_v59 = vadd.f32 %v8086_v5, %v1655_v8 }
 0x23d   : > { %v6625_v61 = vpop.eup %6624  ;;  %6638 = vpow2.f32 %v6039_v55  ;;  %v6041_v36 = vmul.f32 -1.442695, %v8128_v49 }
 0x23e   : > { %v6627_v46 = vpop.eup %6626  ;;  %v6385_v23 = vpop.f32.mrb[12].mxu1  ;;  %6640 = vrcp.f32 %v2182_v56  ;;  %v2185_v28 = vadd.f32 1.0, %v6625_v61  ;;  %v6040_v8 = vmul.f32 -1.442695, %v8132_v59 }
 0x23f   : > { %v2184_v0 = vadd.f32 1.0, %v6627_v46  ;;  %v1665_v54 = vpop.f32.mrb[13].mxu1  ;;  %v8136_v63 = vadd.f32 %v6385_v23, %v8086_v5 }
 0x241   : > { %v6629_v51 = vpop.eup %6628  ;;  %6642 = vrcp.f32 %v2184_v0  ;;  %v8141_v0 = vadd.f32 %v8086_v5, %v1665_v54 }
 0x242   : > { %v6631_v41 = vpop.eup %6630  ;;  %v2187_v32 = vadd.f32 1.0, %v6629_v51  ;;  %6644 = vpow2.f32 %v6038_v19  ;;  %v6388_v55 = vpop.f32.mrb[14].mxu1  ;;  %v6043_v19 = vmul.f32 -1.442695, %v8136_v63 }
 0x243   : > { %2438 = vrot.lane.b32.xlu0 %v6631_v41, %s7281_s13  ;;  %v1675_v46 = vpop.f32.mrb[15].mxu1  ;;  %v6633_v56 = vpop.eup %6632  ;;  %6646 = vrcp.f32 %v2185_v28  ;;  %v8147_v16 = vadd.f32 %v6388_v55, %v8086_v5  ;;  %v6042_v54 = vmul.f32 -1.442695, %v8141_v0 }
 0x244   : > { %v6635_v61 = vpop.eup %6634  ;;  %v2186_v10 = vadd.f32 1.0, %v6633_v56  ;;  %6648 = vpow2.f32 %v6041_v36  ;;  %v8151_v1 = vadd.f32 %v8086_v5, %v1675_v46 }
 0x245   : > { %6650 = vrcp.f32 %v2187_v32 }
 0x246   : > { %v6637_v51 = vpop.eup %6636  ;;  %v6391_v23 = vpop.f32.mrb[16].mxu1  ;;  %6652 = vrcp.f32 %v2186_v10  ;;  %v6044_v46 = vmul.f32 -1.442695, %v8151_v1 }
 0x247   : > { %2442 = vrot.lane.b32.xlu1 %v6637_v51, %s7281_s13  ;;  %v1685_v41 = vpop.f32.mrb[17].mxu1  ;;  %2436 = vrot.lane.b32.xlu0 %v6635_v61, %s7281_s13  ;;  %v6639_v28 = vpop.eup %6638  ;;  %6654 = vpow2.f32 %v6040_v8  ;;  %v6045_v8 = vmul.f32 -1.442695, %v8147_v16 }
 0x248   : > { %v2189_v36 = vadd.f32 1.0, %v6639_v28  ;;  %v6641_v56 = vpop.eup %6640  ;;  %6656 = vpow2.f32 %v6043_v19  ;;  %v8157_v28 = vadd.f32 %v6391_v23, %v8086_v5 }
 0x24a   : > { %v6394_v32 = vpop.f32.mrb[18].mxu1  ;;  %6658 = vrcp.f32 %v2189_v36  ;;  %v6047_v23 = vmul.f32 -1.442695, %v8157_v28 }
 0x24b   : > { %v6643_v62 = vpop.eup %6642  ;;  %v1695_v10 = vpop.f32.mrb[19].mxu1  ;;  %2440 = vrot.lane.b32.xlu1 %v6641_v56, %s7281_s13  ;;  %6660 = vpow2.f32 %v6042_v54 }
 0x24c   : > { %v6645_v51 = vpop.eup %6644  ;;  %2444 = vrot.lane.b32.xlu0 %v6643_v62, %s7281_s13  ;;  %v8162_v62 = vadd.f32 %v8086_v5, %v1685_v41 }
 0x24d   : > { %v2188_v55 = vadd.f32 1.0, %v6645_v51  ;;  %v6647_v61 = vpop.eup %6646 }
 0x24e   : > { %v6397_v19 = vpop.f32.mrb[20].mxu1  ;;  %v6649_v45 = vpop.eup %6648  ;;  %v6046_v41 = vmul.f32 -1.442695, %v8162_v62 }
 0x24f   : > { %6662 = vrcp.f32 %v2188_v55  ;;  %v1705_v47 = vpop.f32.mrb[21].mxu1  ;;  %2446 = vrot.lane.b32.xlu1 %v6647_v61, %s7281_s13  ;;  %v6651_v56 = vpop.eup %6650  ;;  %v2191_v36 = vadd.f32 1.0, %v6649_v45  ;;  %v8168_v45 = vadd.f32 %v6394_v32, %v8086_v5 }
 0x250   : > { %6664 = vpow2.f32 %v6045_v8  ;;  %v6653_v53 = vpop.eup %6652 }
 0x251   : > { %v6655_v54 = vpop.eup %6654  ;;  %6666 = vrcp.f32 %v2191_v36  ;;  %2448 = vrot.lane.b32.xlu0 %v6653_v53, %s7281_s13  ;;  %v8172_v53 = vadd.f32 %v8086_v5, %v1695_v10 }
 0x252   : > { %v6400_v51 = vpop.f32.mrb[22].mxu1  ;;  %v2190_v55 = vadd.f32 1.0, %v6655_v54  ;;  %6668 = vpow2.f32 %v6044_v46  ;;  %v6657_v61 = vpop.eup %6656  ;;  %v6049_v54 = vmul.f32 -1.442695, %v8168_v45 }
 0x253   : > { %v1715_v43 = vpop.f32.mrb[23].mxu1  ;;  %2450 = vrot.lane.b32.xlu1 %v6651_v56, %s7281_s13  ;;  %v2193_v8 = vadd.f32 1.0, %v6657_v61  ;;  %v8177_v61 = vadd.f32 %v6397_v19, %v8086_v5  ;;  %v6048_v10 = vmul.f32 -1.442695, %v8172_v53 }
 0x254   : > { %6670 = vrcp.f32 %v2190_v55  ;;  %v6659_v35 = vpop.eup %6658 }
 0x255   : > { %6672 = vpow2.f32 %v6047_v23  ;;  %v6661_v38 = vpop.eup %6660  ;;  %v6051_v19 = vmul.f32 -1.442695, %v8177_v61 }
 0x256   : > { %v6403_v36 = vpop.f32.mrb[24].mxu1  ;;  %6674 = vrcp.f32 %v2193_v8  ;;  %v2192_v56 = vadd.f32 1.0, %v6661_v38  ;;  %v8184_v38 = vadd.f32 %v8086_v5, %v1705_v47 }
 0x257   : > { %v1725_v46 = vpop.f32.mrb[25].mxu1  ;;  %2454 = vrot.lane.b32.xlu1 %v6659_v35, %s7281_s13  ;;  %6676 = vpow2.f32 %v6046_v41 }
 0x258   : > { %6678 = vrcp.f32 %v2192_v56 }
 0x259   : > { %v6663_v32 = vpop.eup %6662  ;;  %6680 = vpow2.f32 %v6049_v54  ;;  %v8193_v54 = vadd.f32 %v6400_v51, %v8086_v5 }
 0x25a   : > { %v6665_v55 = vpop.eup %6664  ;;  %2452 = vrot.lane.b32.xlu0 %v6663_v32, %s7281_s13  ;;  %v6406_v23 = vpop.f32.mrb[26].mxu1 }
 0x25b   : > { %v2195_v8 = vadd.f32 1.0, %v6665_v55  ;;  %v8181_v39 = vpop.f32.mrb[27].mxu1  ;;  %v6667_v21 = vpop.eup %6666 }
 0x25c   : > { %v6669_v35 = vpop.eup %6668  ;;  %2458 = vrot.lane.b32.xlu1 %v6667_v21, %s7281_s13  ;;  %v6050_v21 = vmul.f32 -1.442695, %v8184_v38 }
 0x25d   : > { %6682 = vrcp.f32 %v2195_v8  ;;  %v2194_v41 = vadd.f32 1.0, %v6669_v35 }
 0x25e   : > { %v8188_v56 = vpop.f32.mrb[28].mxu1  ;;  %v6671_v32 = vpop.eup %6670  ;;  %6684 = vpow2.f32 %v6048_v10  ;;  %v8201_v10 = vadd.f32 %v8086_v5, %v1715_v43 }
 0x25f   : > { %v8190_v55 = vpop.f32.mrb[29].mxu1  ;;  %v6673_v26 = vpop.eup %6672  ;;  %6686 = vrcp.f32 %v2194_v41  ;;  %2456 = vrot.lane.b32.xlu0 %v6671_v32, %s7281_s13  ;;  %v6053_v32 = vmul.f32 -1.442695, %v8193_v54 }
 0x260   : > { %v6675_v47 = vpop.eup %6674  ;;  %v2197_v8 = vadd.f32 1.0, %v6673_v26  ;;  %6688 = vpow2.f32 %v6051_v19  ;;  %v8208_v19 = vadd.f32 %v6403_v36, %v8086_v5  ;;  %v6052_v43 = vmul.f32 -1.442695, %v8201_v10 }
 0x261   : > { %2462 = vrot.lane.b32.xlu1 %v6675_v47, %s7281_s13  ;;  %v6677_v12 = vpop.eup %6676 }
 0x262   : > { %v8198_v35 = vpop.f32.mrb[30].mxu1  ;;  %6690 = vrcp.f32 %v2197_v8  ;;  %v6679_v51 = vpop.eup %6678  ;;  %v2196_v37 = vadd.f32 1.0, %v6677_v12  ;;  %v6055_v36 = vmul.f32 -1.442695, %v8208_v19 }
 0x263   : > { %v8203_v41 = vpop.f32.mrb[31].mxu1  ;;  %6692 = vpow2.f32 %v6050_v21  ;;  %2460 = vrot.lane.b32.xlu0 %v6679_v51, %s7281_s13  ;;  %v6681_v26 = vpop.eup %6680  ;;  %v8217_v21 = vadd.f32 %v8086_v5, %v1725_v46 }
 0x264   : > { %6694 = vrcp.f32 %v2196_v37  ;;  %v2199_v14 = vadd.f32 1.0, %v6681_v26 }
 0x265   : > { %6696 = vpow2.f32 %v6053_v32  ;;  %v8226_v32 = vadd.f32 %v6406_v23, %v8086_v5  ;;  %v6054_v46 = vmul.f32 -1.442695, %v8217_v21 }
 0x266   : > { %v8210_v47 = vpop.f32.mrb[32].mxu1  ;;  %6698 = vrcp.f32 %v2199_v14 }
 0x267   : > { %v6683_v8 = vpop.eup %6682  ;;  %v8213_v33 = vpop.f32.mrb[33].mxu1  ;;  %6700 = vpow2.f32 %v6052_v43  ;;  %11274 = vst [vmem:[#allocation76_spill] sm:$0xff] %v8226_v32  ;;  %v8234_v43 = vadd.f32 %v8086_v5, %v8181_v39  ;;  %v6057_v2 = vmul.f32 -1.442695, %v8226_v32 }
 0x268   : > { %2466 = vrot.lane.b32.xlu1 %v6683_v8, %s7281_s13  ;;  %v6685_v12 = vpop.eup %6684 }
 0x269   : > { %v6687_v37 = vpop.eup %6686  ;;  %v2198_v51 = vadd.f32 1.0, %v6685_v12  ;;  %v6056_v6 = vmul.f32 -1.442695, %v8234_v43 }
 0x26a   : > { %v8220_v31 = vpop.f32.mrb[34].mxu1  ;;  %2464 = vrot.lane.b32.xlu0 %v6687_v37, %s7281_s13  ;;  %v6689_v25 = vpop.eup %6688 }
 0x26b   : > { %v8223_v26 = vpop.f32.mrb[35].mxu1  ;;  %6702 = vrcp.f32 %v2198_v51  ;;  %v2201_v8 = vadd.f32 1.0, %v6689_v25 }
 0x26c   : > { %v6691_v14 = vpop.eup %6690  ;;  %6704 = vpow2.f32 %v6055_v36  ;;  %v8242_v36 = vadd.f32 %v8188_v56, %v8086_v5 }
 0x26d   : > { %2470 = vrot.lane.b32.xlu1 %v6691_v14, %s7281_s13  ;;  %v6693_v27 = vpop.eup %6692  ;;  %6706 = vrcp.f32 %v2201_v8 }
 0x26e   : > { %v8230_v12 = vpop.f32.mrb[36].mxu1  ;;  %v6695_v51 = vpop.eup %6694  ;;  %v2200_v23 = vadd.f32 1.0, %v6693_v27  ;;  %6708 = vpow2.f32 %v6054_v46  ;;  %11275 = vst [vmem:[#allocation77_spill] sm:$0xff] %v8242_v36  ;;  %v8252_v46 = vadd.f32 %v8086_v5, %v8190_v55 }
 0x26f   : > { %v8236_v37 = vpop.f32.mrb[37].mxu1  ;;  %2468 = vrot.lane.b32.xlu0 %v6695_v51, %s7281_s13  ;;  %v6697_v25 = vpop.eup %6696 }
 0x270   : > { %6710 = vrcp.f32 %v2200_v23  ;;  %v6699_v8 = vpop.eup %6698  ;;  %v2203_v39 = vadd.f32 1.0, %v6697_v25  ;;  %v6059_v23 = vmul.f32 -1.442695, %v8242_v36  ;;  %v6058_v48 = vmul.f32 -1.442695, %v8252_v46 }
 0x271   : > { %6712 = vpow2.f32 %v6057_v2  ;;  %2474 = vrot.lane.b32.xlu1 %v6699_v8, %s7281_s13  ;;  %v6701_v27 = vpop.eup %6700  ;;  %v8262_v8 = vadd.f32 %v8198_v35, %v8086_v5 }
 0x272   : > { %v8244_v14 = vpop.f32.mrb[38].mxu1  ;;  %6714 = vrcp.f32 %v2203_v39  ;;  %v2202_v56 = vadd.f32 1.0, %v6701_v27 }
 0x273   : > { %v8247_v58 = vpop.f32.mrb[39].mxu1  ;;  %6716 = vpow2.f32 %v6056_v6  ;;  %11276 = vst [vmem:[#allocation78_spill] sm:$0xff] %v8262_v8  ;;  %v6061_v40 = vmul.f32 -1.442695, %v8262_v8 }
 0x274   : > { %6718 = vrcp.f32 %v2202_v56 }
 0x275   : > { %v6703_v51 = vpop.eup %6702  ;;  %6720 = vpow2.f32 %v6059_v23 }
 0x276   : > { %v8255_v60 = vpop.f32.mrb[40].mxu1  ;;  %2472 = vrot.lane.b32.xlu0 %v6703_v51, %s7281_s13  ;;  %v6705_v2 = vpop.eup %6704  ;;  %v8270_v51 = vadd.f32 %v8086_v5, %v8203_v41 }
 0x277   : > { %v8258_v25 = vpop.f32.mrb[41].mxu1  ;;  %v6707_v39 = vpop.eup %6706  ;;  %v2205_v55 = vadd.f32 1.0, %v6705_v2  ;;  %v8278_v2 = vadd.f32 %v8210_v47, %v8086_v5 }
 0x278   : > { %2478 = vrot.lane.b32.xlu1 %v6707_v39, %s7281_s13  ;;  %v6709_v6 = vpop.eup %6708  ;;  %v6060_v42 = vmul.f32 -1.442695, %v8270_v51 }
 0x279   : > { %6722 = vrcp.f32 %v2205_v55  ;;  %v2204_v35 = vadd.f32 1.0, %v6709_v6  ;;  %11277 = vst [vmem:[#allocation79_spill] sm:$0xff] %v8278_v2 }
 0x27a   : > { %v8266_v27 = vpop.f32.mrb[42].mxu1  ;;  %v6711_v52 = vpop.eup %6710  ;;  %6724 = vpow2.f32 %v6058_v48 }
 0x27b   : > { %v8272_v56 = vpop.f32.mrb[43].mxu1  ;;  %2476 = vrot.lane.b32.xlu0 %v6711_v52, %s7281_s13  ;;  %v6713_v23 = vpop.eup %6712  ;;  %6726 = vrcp.f32 %v2204_v35  ;;  %v8288_v52 = vadd.f32 %v8086_v5, %v8213_v33  ;;  %v6063_v35 = vmul.f32 -1.442695, %v8278_v2 }
 0x27c   : > { %v6715_v55 = vpop.eup %6714  ;;  %v2207_v41 = vadd.f32 1.0, %v6713_v23  ;;  %6728 = vpow2.f32 %v6061_v40 }
 0x27d   : > { %2482 = vrot.lane.b32.xlu1 %v6715_v55, %s7281_s13  ;;  %v6717_v48 = vpop.eup %6716  ;;  %v8298_v55 = vadd.f32 %v8220_v31, %v8086_v5  ;;  %v6062_v30 = vmul.f32 -1.442695, %v8288_v52 }
 0x27e   : > { %v8280_v39 = vpop.f32.mrb[44].mxu1  ;;  %6730 = vrcp.f32 %v2207_v41  ;;  %v6719_v6 = vpop.eup %6718  ;;  %v2206_v47 = vadd.f32 1.0, %v6717_v48 }
 0x27f   : > { %v8283_v34 = vpop.f32.mrb[45].mxu1  ;;  %6732 = vpow2.f32 %v6060_v42  ;;  %2480 = vrot.lane.b32.xlu0 %v6719_v6, %s7281_s13  ;;  %v6721_v40 = vpop.eup %6720  ;;  %11278 = vst [vmem:[#allocation80_spill] sm:$0xff] %v8298_v55  ;;  %v8306_v6 = vadd.f32 %v8086_v5, %v8223_v26  ;;  %v6065_v22 = vmul.f32 -1.442695, %v8298_v55 }
 0x280   : > { %6734 = vrcp.f32 %v2206_v47  ;;  %v2209_v33 = vadd.f32 1.0, %v6721_v40  ;;  %v8314_v40 = vadd.f32 %v8230_v12, %v8086_v5 }
 0x281   : > { %6736 = vpow2.f32 %v6063_v35  ;;  %v6064_v11 = vmul.f32 -1.442695, %v8306_v6 }
 0x282   : > { %v8291_v24 = vpop.f32.mrb[46].mxu1  ;;  %6738 = vrcp.f32 %v2209_v33  ;;  %11279 = vst [vmem:[#allocation81_spill] sm:$0xff] %v8314_v40 }
 0x283   : > { %v8294_v23 = vpop.f32.mrb[47].mxu1  ;;  %v6723_v41 = vpop.eup %6722  ;;  %6740 = vpow2.f32 %v6062_v30 }
 0x284   : > { %2486 = vrot.lane.b32.xlu1 %v6723_v41, %s7281_s13  ;;  %v6725_v42 = vpop.eup %6724 }
 0x285   : > { %v6727_v17 = vpop.eup %6726  ;;  %v2208_v31 = vadd.f32 1.0, %v6725_v42 }
 0x286   : > { %v8302_v48 = vpop.f32.mrb[48].mxu1  ;;  %2484 = vrot.lane.b32.xlu0 %v6727_v17, %s7281_s13  ;;  %v6729_v35 = vpop.eup %6728  ;;  %v8324_v17 = vadd.f32 %v8086_v5, %v8236_v37 }
 0x287   : > { %v8308_v47 = vpop.f32.mrb[49].mxu1  ;;  %6742 = vrcp.f32 %v2208_v31  ;;  %v2211_v26 = vadd.f32 1.0, %v6729_v35  ;;  %v6067_v31 = vmul.f32 -1.442695, %v8314_v40 }
 0x288   : > { %v6731_v33 = vpop.eup %6730  ;;  %6744 = vpow2.f32 %v6065_v22  ;;  %v6066_v55 = vmul.f32 -1.442695, %v8324_v17 }
 0x289   : > { %2490 = vrot.lane.b32.xlu1 %v6731_v33, %s7281_s13  ;;  %v6733_v30 = vpop.eup %6732  ;;  %6746 = vrcp.f32 %v2211_v26  ;;  %v8334_v33 = vadd.f32 %v8244_v14, %v8086_v5 }
 0x28a   : > { %v8316_v41 = vpop.f32.mrb[50].mxu1  ;;  %v6735_v42 = vpop.eup %6734  ;;  %v2210_v12 = vadd.f32 1.0, %v6733_v30  ;;  %6748 = vpow2.f32 %v6064_v11 }
 0x28b   : > { %v8319_v15 = vpop.f32.mrb[51].mxu1  ;;  %2488 = vrot.lane.b32.xlu0 %v6735_v42, %s7281_s13  ;;  %v6737_v22 = vpop.eup %6736  ;;  %11280 = vst [vmem:[#allocation82_spill] sm:$0xff] %v8334_v33  ;;  %v8342_v42 = vadd.f32 %v8086_v5, %v8247_v58  ;;  %v6069_v2 = vmul.f32 -1.442695, %v8334_v33 }
 0x28c   : > { %6750 = vrcp.f32 %v2210_v12  ;;  %v6739_v26 = vpop.eup %6738  ;;  %v2213_v37 = vadd.f32 1.0, %v6737_v22  ;;  %v8350_v22 = vadd.f32 %v8255_v60, %v8086_v5 }
 0x28d   : > { %6752 = vpow2.f32 %v6067_v31  ;;  %2494 = vrot.lane.b32.xlu1 %v6739_v26, %s7281_s13  ;;  %v6741_v11 = vpop.eup %6740  ;;  %11281 = vst [vmem:[#allocation83_spill] sm:$0xff] %v8342_v42  ;;  %v6068_v8 = vmul.f32 -1.442695, %v8342_v42 }
 0x28e   : > { %v8327_v9 = vpop.f32.mrb[52].mxu1  ;;  %6754 = vrcp.f32 %v2213_v37  ;;  %v2212_v14 = vadd.f32 1.0, %v6741_v11  ;;  %11282 = vst [vmem:[#allocation84_spill] sm:$0xff] %v8350_v22 }
 0x28f   : > { %v8330_v35 = vpop.f32.mrb[53].mxu1  ;;  %6756 = vpow2.f32 %v6066_v55 }
 0x290   : > { %6758 = vrcp.f32 %v2212_v14  ;;  %v6071_v14 = vmul.f32 -1.442695, %v8350_v22 }
 0x291   : > { %v6743_v40 = vpop.eup %6742  ;;  %6760 = vpow2.f32 %v6069_v2 }
 0x292   : > { %v8338_v30 = vpop.f32.mrb[54].mxu1  ;;  %2492 = vrot.lane.b32.xlu0 %v6743_v40, %s7281_s13  ;;  %v6745_v31 = vpop.eup %6744  ;;  %v8360_v40 = vadd.f32 %v8086_v5, %v8258_v25 }
 0x293   : > { %v8344_v12 = vpop.f32.mrb[55].mxu1  ;;  %v6747_v37 = vpop.eup %6746  ;;  %v2215_v58 = vadd.f32 1.0, %v6745_v31 }
 0x294   : > { %2498 = vrot.lane.b32.xlu1 %v6747_v37, %s7281_s13  ;;  %v6749_v55 = vpop.eup %6748  ;;  %11283 = vst [vmem:[#allocation85_spill] sm:$0xff] %v8360_v40  ;;  %v8370_v37 = vadd.f32 %v8266_v27, %v8086_v5  ;;  %v6070_v32 = vmul.f32 -1.442695, %v8360_v40 }
 0x295   : > { %6762 = vrcp.f32 %v2215_v58  ;;  %v2214_v60 = vadd.f32 1.0, %v6749_v55 }
 0x296   : > { %v8352_v26 = vpop.f32.mrb[56].mxu1  ;;  %v6751_v11 = vpop.eup %6750  ;;  %6764 = vpow2.f32 %v6068_v8  ;;  %11284 = vst [vmem:[#allocation86_spill] sm:$0xff] %v8370_v37  ;;  %v6073_v42 = vmul.f32 -1.442695, %v8370_v37 }
 0x297   : > { %v8355_v36 = vpop.f32.mrb[57].mxu1  ;;  %2496 = vrot.lane.b32.xlu0 %v6751_v11, %s7281_s13  ;;  %v6753_v2 = vpop.eup %6752  ;;  %6766 = vrcp.f32 %v2214_v60  ;;  %v8378_v11 = vadd.f32 %v8086_v5, %v8272_v56 }
 0x298   : > { %v6755_v58 = vpop.eup %6754  ;;  %v2217_v25 = vadd.f32 1.0, %v6753_v2  ;;  %6768 = vpow2.f32 %v6071_v14  ;;  %v8386_v2 = vadd.f32 %v8280_v39, %v8086_v5 }
 0x299   : > { %2502 = vrot.lane.b32.xlu1 %v6755_v58, %s7281_s13  ;;  %v6757_v8 = vpop.eup %6756  ;;  %11285 = vst [vmem:[#allocation87_spill] sm:$0xff] %v8378_v11  ;;  %v6072_v40 = vmul.f32 -1.442695, %v8378_v11 }
 0x29a   : > { %v8363_v33 = vpop.f32.mrb[58].mxu1  ;;  %6770 = vrcp.f32 %v2217_v25  ;;  %v6759_v22 = vpop.eup %6758  ;;  %v2216_v27 = vadd.f32 1.0, %v6757_v8  ;;  %v6075_v39 = vmul.f32 -1.442695, %v8386_v2 }
 0x29b   : > { %v8366_v31 = vpop.f32.mrb[59].mxu1  ;;  %6772 = vpow2.f32 %v6070_v32  ;;  %2500 = vrot.lane.b32.xlu0 %v6759_v22, %s7281_s13  ;;  %v6761_v14 = vpop.eup %6760  ;;  %v8394_v32 = vadd.f32 %v8086_v5, %v8283_v34 }
 0x29c   : > { %6774 = vrcp.f32 %v2216_v27  ;;  %v2219_v56 = vadd.f32 1.0, %v6761_v14 }
 0x29d   : > { %6776 = vpow2.f32 %v6073_v42  ;;  %11286 = vst [vmem:[#allocation88_spill] sm:$0xff] %v8394_v32  ;;  %v8400_v42 = vadd.f32 %v8291_v24, %v8086_v5 }
 0x29e   : > { %v8374_v55 = vpop.f32.mrb[60].mxu1  ;;  %6778 = vrcp.f32 %v2219_v56  ;;  %v6074_v56 = vmul.f32 -1.442695, %v8394_v32 }
 0x29f   : > { %v8380_v60 = vpop.f32.mrb[61].mxu1  ;;  %v6763_v25 = vpop.eup %6762  ;;  %6780 = vpow2.f32 %v6072_v40  ;;  %11287 = vst [vmem:[#allocation89_spill] sm:$0xff] %v8400_v42  ;;  %v8406_v40 = vadd.f32 %v8086_v5, %v8294_v23 }
 0x2a0   : > { %2506 = vrot.lane.b32.xlu1 %v6763_v25, %s7281_s13  ;;  %v6765_v8 = vpop.eup %6764 }
 0x2a1   : > { %v6767_v22 = vpop.eup %6766  ;;  %v2218_v27 = vadd.f32 1.0, %v6765_v8  ;;  %11288 = vst [vmem:[#allocation90_spill] sm:$0xff] %v8406_v40  ;;  %v6076_v23 = vmul.f32 -1.442695, %v8406_v40 }
 0x2a2   : > { %v8388_v58 = vpop.f32.mrb[62].mxu1  ;;  %2504 = vrot.lane.b32.xlu0 %v6767_v22, %s7281_s13  ;;  %v6769_v37 = vpop.eup %6768 }
 0x2a3   : > { %6782 = vrcp.f32 %v2218_v27  ;;  %v2221_v25 = vadd.f32 1.0, %v6769_v37  ;;  %v6077_v27 = vmul.f32 -1.442695, %v8400_v42  ;;  %v8409_v11 = vpop.f32.mrb[63].mxu1  ;;  %v8414_v37 = vadd.f32 %v8302_v48, %v8086_v5 }
 0x2a4   : > { %v6771_v14 = vpop.eup %6770  ;;  %6784 = vpow2.f32 %v6075_v39 }
 0x2a5   : > { %2510 = vrot.lane.b32.xlu1 %v6771_v14, %s7281_s13  ;;  %v6773_v34 = vpop.eup %6772  ;;  %6786 = vrcp.f32 %v2221_v25  ;;  %11289 = vst [vmem:[#allocation91_spill] sm:$0xff] %v8414_v37 }
 0x2a6   : > { %v6775_v8 = vpop.eup %6774  ;;  %v2220_v22 = vadd.f32 1.0, %v6773_v34  ;;  %6788 = vpow2.f32 %v6074_v56  ;;  %v8420_v56 = vadd.f32 %v8086_v5, %v8308_v47 }
 0x2a7   : > { %2508 = vrot.lane.b32.xlu0 %v6775_v8, %s7281_s13  ;;  %v6777_v24 = vpop.eup %6776 }
 0x2a8   : > { %6790 = vrcp.f32 %v2220_v22  ;;  %v6779_v39 = vpop.eup %6778  ;;  %v2223_v14 = vadd.f32 1.0, %v6777_v24  ;;  %11290 = vst [vmem:[#allocation92_spill] sm:$0xff] %v8420_v56  ;;  %v6079_v22 = vmul.f32 -1.442695, %v8414_v37 }
 0x2a9   : > { %6792 = vpow2.f32 %v6077_v27  ;;  %2514 = vrot.lane.b32.xlu1 %v6779_v39, %s7281_s13  ;;  %v6781_v25 = vpop.eup %6780  ;;  %v8426_v27 = vadd.f32 %v8316_v41, %v8086_v5 }
 0x2aa   : > { %6794 = vrcp.f32 %v2223_v14  ;;  %v2222_v8 = vadd.f32 1.0, %v6781_v25  ;;  %v6078_v14 = vmul.f32 -1.442695, %v8420_v56 }
 0x2ab   : > { %6796 = vpow2.f32 %v6076_v23  ;;  %11291 = vst [vmem:[#allocation93_spill] sm:$0xff] %v8426_v27  ;;  %v8432_v23 = vadd.f32 %v8086_v5, %v8319_v15 }
 0x2ac   : > { %6798 = vrcp.f32 %v2222_v8  ;;  %v6081_v8 = vmul.f32 -1.442695, %v8426_v27 }
 0x2ad   : > { %v6783_v34 = vpop.eup %6782  ;;  %6800 = vpow2.f32 %v6079_v22  ;;  %11292 = vst [vmem:[#allocation94_spill] sm:$0xff] %v8432_v23  ;;  %v8440_v22 = vadd.f32 %v8327_v9, %v8086_v5  ;;  %v6080_v15 = vmul.f32 -1.442695, %v8432_v23 }
 0x2ae   : > { %2512 = vrot.lane.b32.xlu0 %v6783_v34, %s7281_s13  ;;  %v6785_v48 = vpop.eup %6784 }
 0x2af   : > { %v6787_v24 = vpop.eup %6786  ;;  %v2225_v39 = vadd.f32 1.0, %v6785_v48  ;;  %11293 = vst [vmem:[#allocation95_spill] sm:$0xff] %v8440_v22  ;;  %v6083_v9 = vmul.f32 -1.442695, %v8440_v22 }
 0x2b0   : > { %2518 = vrot.lane.b32.xlu1 %v6787_v24, %s7281_s13  ;;  %v6789_v47 = vpop.eup %6788 }
 0x2b1   : > { %6802 = vrcp.f32 %v2225_v39  ;;  %v2224_v34 = vadd.f32 1.0, %v6789_v47 }
 0x2b2   : > { %v6791_v25 = vpop.eup %6790  ;;  %6804 = vpow2.f32 %v6078_v14  ;;  %v8446_v14 = vadd.f32 %v8086_v5, %v8330_v35 }
 0x2b3   : > { %2516 = vrot.lane.b32.xlu0 %v6791_v25, %s7281_s13  ;;  %v6793_v48 = vpop.eup %6792  ;;  %6806 = vrcp.f32 %v2224_v34 }
 0x2b4   : > { %v6795_v24 = vpop.eup %6794  ;;  %v2227_v39 = vadd.f32 1.0, %v6793_v48  ;;  %6808 = vpow2.f32 %v6081_v8  ;;  %11294 = vst [vmem:[#allocation96_spill] sm:$0xff] %v8446_v14  ;;  %v8454_v8 = vadd.f32 %v8338_v30, %v8086_v5  ;;  %v6082_v35 = vmul.f32 -1.442695, %v8446_v14 }
 0x2b5   : > { %2522 = vrot.lane.b32.xlu1 %v6795_v24, %s7281_s13  ;;  %v6797_v47 = vpop.eup %6796 }
 0x2b6   : > { %6810 = vrcp.f32 %v2227_v39  ;;  %v6799_v34 = vpop.eup %6798  ;;  %v2226_v27 = vadd.f32 1.0, %v6797_v47  ;;  %11295 = vst [vmem:[#allocation97_spill] sm:$0xff] %v8454_v8  ;;  %v6085_v30 = vmul.f32 -1.442695, %v8454_v8 }
 0x2b7   : > { %6812 = vpow2.f32 %v6080_v15  ;;  %2520 = vrot.lane.b32.xlu0 %v6799_v34, %s7281_s13  ;;  %v6801_v48 = vpop.eup %6800  ;;  %v8462_v15 = vadd.f32 %v8086_v5, %v8344_v12 }
 0x2b8   : > { %6814 = vrcp.f32 %v2226_v27  ;;  %v2229_v39 = vadd.f32 1.0, %v6801_v48 }
 0x2b9   : > { %v8436_v41 = vpop.permute.xlu1 %2442  ;;  %6816 = vpow2.f32 %v6083_v9  ;;  %11296 = vst [vmem:[#allocation98_spill] sm:$0xff] %v8462_v15  ;;  %v8470_v9 = vadd.f32 %v8352_v26, %v8086_v5  ;;  %v6084_v12 = vmul.f32 -1.442695, %v8462_v15 }
 0x2ba   : > { %6818 = vrcp.f32 %v2229_v39 }
 0x2bb   : > { %v6803_v24 = vpop.eup %6802  ;;  %6820 = vpow2.f32 %v6082_v35  ;;  %11297 = vst [vmem:[#allocation99_spill] sm:$0xff] %v8470_v9  ;;  %v8476_v35 = vadd.f32 %v8086_v5, %v8355_v36  ;;  %v6087_v26 = vmul.f32 -1.442695, %v8470_v9 }
 0x2bc   : > { %2526 = vrot.lane.b32.xlu1 %v6803_v24, %s7281_s13  ;;  %v6805_v47 = vpop.eup %6804 }
 0x2bd   : > { %v8448_v25 = vpop.permute.xlu1 %2440  ;;  %v6807_v27 = vpop.eup %6806  ;;  %v2228_v34 = vadd.f32 1.0, %v6805_v47  ;;  %11298 = vst [vmem:[#allocation100_spill] sm:$0xff] %v8476_v35  ;;  %v6086_v36 = vmul.f32 -1.442695, %v8476_v35 }
 0x2be   : > { %2524 = vrot.lane.b32.xlu0 %v6807_v27, %s7281_s13  ;;  %v6809_v22 = vpop.eup %6808 }
 0x2bf   : > { %6822 = vrcp.f32 %v2228_v34  ;;  %v2231_v39 = vadd.f32 1.0, %v6809_v22 }
 0x2c0   : > { %v6811_v24 = vpop.eup %6810  ;;  %6824 = vpow2.f32 %v6085_v30  ;;  %v8484_v30 = vadd.f32 %v8363_v33, %v8086_v5 }
 0x2c1   : > { %v8457_v37 = vpop.permute.xlu1 %2446  ;;  %2530 = vrot.lane.b32.xlu1 %v6811_v24, %s7281_s13  ;;  %v6813_v47 = vpop.eup %6812  ;;  %6826 = vrcp.f32 %v2231_v39 }
 0x2c2   : > { %v6815_v34 = vpop.eup %6814  ;;  %v2230_v8 = vadd.f32 1.0, %v6813_v47  ;;  %6828 = vpow2.f32 %v6084_v12  ;;  %11299 = vst [vmem:[#allocation101_spill] sm:$0xff] %v8484_v30  ;;  %v8490_v12 = vadd.f32 %v8086_v5, %v8366_v31  ;;  %v6089_v33 = vmul.f32 -1.442695, %v8484_v30 }
 0x2c3   : > { %2528 = vrot.lane.b32.xlu0 %v6815_v34, %s7281_s13  ;;  %v6817_v22 = vpop.eup %6816 }
 0x2c4   : > { %6830 = vrcp.f32 %v2230_v8  ;;  %v6819_v24 = vpop.eup %6818  ;;  %v2233_v39 = vadd.f32 1.0, %v6817_v22  ;;  %11300 = vst [vmem:[#allocation102_spill] sm:$0xff] %v8490_v12 }
 0x2c5   : > { %v8466_v48 = vpop.permute.xlu1 %2450  ;;  %6832 = vpow2.f32 %v6087_v26  ;;  %2534 = vrot.lane.b32.xlu1 %v6819_v24, %s7281_s13  ;;  %v6821_v42 = vpop.eup %6820  ;;  %v8499_v26 = vld [vmem:[%s10983_s4] ss:$0 sm:$0xff] }
 0x2c6   : > { %6834 = vrcp.f32 %v2233_v39  ;;  %v2232_v34 = vadd.f32 1.0, %v6821_v42  ;;  %v8503_v5 = vadd.f32 %v8499_v26, %v8374_v55  ;;  %v6088_v42 = vmul.f32 -1.442695, %v8490_v12 }
 0x2c7   : > { %6836 = vpow2.f32 %v6086_v36 }
 0x2c8   : > { %6838 = vrcp.f32 %v2232_v34  ;;  %11301 = vst [vmem:[#allocation103_spill] sm:$0xff] %v8503_v5  ;;  %v6091_v30 = vmul.f32 -1.442695, %v8503_v5 }
 0x2c9   : > { %v8478_v27 = vpop.permute.xlu1 %2454  ;;  %v6823_v8 = vpop.eup %6822  ;;  %6840 = vpow2.f32 %v6089_v33 }
 0x2ca   : > { %2532 = vrot.lane.b32.xlu0 %v6823_v8, %s7281_s13  ;;  %v6825_v22 = vpop.eup %6824 }
 0x2cb   : > { %v6827_v31 = vpop.eup %6826  ;;  %v2235_v24 = vadd.f32 1.0, %v6825_v22 }
 0x2cc   : > { %2538 = vrot.lane.b32.xlu1 %v6827_v31, %s7281_s13  ;;  %v6829_v36 = vpop.eup %6828 }
 0x2cd   : > { %6842 = vrcp.f32 %v2235_v24  ;;  %v2234_v34 = vadd.f32 1.0, %v6829_v36 }
 0x2ce   : > { %v8492_v47 = vpop.permute.xlu1 %2458  ;;  %v6831_v8 = vpop.eup %6830  ;;  %6844 = vpow2.f32 %v6088_v42 }
 0x2cf   : > { %2536 = vrot.lane.b32.xlu0 %v6831_v8, %s7281_s13  ;;  %v6833_v55 = vpop.eup %6832  ;;  %6846 = vrcp.f32 %v2234_v34 }
 0x2d0   : > { %v6835_v9 = vpop.eup %6834  ;;  %v2237_v22 = vadd.f32 1.0, %v6833_v55  ;;  %6848 = vpow2.f32 %v6091_v30 }
 0x2d1   : > { %2542 = vrot.lane.b32.xlu1 %v6835_v9, %s7281_s13  ;;  %v6837_v31 = vpop.eup %6836 }
 0x2d2   : > { %6850 = vrcp.f32 %v2237_v22  ;;  %v6839_v12 = vpop.eup %6838  ;;  %v2236_v24 = vadd.f32 1.0, %v6837_v31 }
 0x2d3   : > { %v8507_v39 = vpop.permute.xlu1 %2462  ;;  %2540 = vrot.lane.b32.xlu0 %v6839_v12, %s7281_s13  ;;  %v6841_v36 = vpop.eup %6840 }
 0x2d4   : > { %6852 = vrcp.f32 %v2236_v24  ;;  %v2239_v5 = vadd.f32 1.0, %v6841_v36 }
 0x2d6   : > { %6854 = vrcp.f32 %v2239_v5 }
 0x2d7   : > { %v6843_v42 = vpop.eup %6842 }
 0x2d8   : > { %2546 = vrot.lane.b32.xlu1 %v6843_v42, %s7281_s13  ;;  %v6845_v34 = vpop.eup %6844 }
 0x2d9   : > { %v6847_v30 = vpop.eup %6846  ;;  %v2238_v9 = vadd.f32 1.0, %v6845_v34 }
 0x2da   : > { %v8512_v33 = vpop.permute.xlu1 %2466  ;;  %2544 = vrot.lane.b32.xlu0 %v6847_v30, %s7281_s13  ;;  %v6849_v55 = vpop.eup %6848 }
 0x2db   : > { %6856 = vrcp.f32 %v2238_v9  ;;  %v2241_v31 = vadd.f32 1.0, %v6849_v55 }
 0x2dc   : > { %v6851_v22 = vpop.eup %6850 }
 0x2dd   : > { %2550 = vrot.lane.b32.xlu1 %v6851_v22, %s7281_s13  ;;  %6858 = vrcp.f32 %v2241_v31  ;;  %v8537_v22 = vadd.f32 %v8499_v26, %v8380_v60  ;;  %v2439_v31 = vpop.permute.xlu0 %2438 }
 0x2de   : > { %v6853_v24 = vpop.eup %6852  ;;  %6860 = vtanh.f32 %v8089_v20  ;;  %v8550_v20 = vld [vmem:[%s10984_s5 + $0x1] ss:$0 sm:$0xff] }
 0x2df   : > { %v8516_v8 = vpop.permute.xlu1 %2470  ;;  %2548 = vrot.lane.b32.xlu0 %v6853_v24, %s7281_s13  ;;  %11302 = vst [vmem:[#allocation104_spill] sm:$0xff] %v8537_v22  ;;  %6862 = vtanh.f32 %v8092_v3  ;;  %v8560_v3 = vld [vmem:[%s10984_s5] ss:$0 sm:$0xff] }
 0x2e0   : > { %v6855_v36 = vpop.eup %6854 }
 0x2e1   : > { %2554 = vrot.lane.b32.xlu1 %v6855_v36, %s7281_s13  ;;  %v6090_v36 = vmul.f32 -1.442695, %v8537_v22 }
 0x2e3   : > { %v8520_v12 = vpop.permute.xlu1 %2474  ;;  %6864 = vpow2.f32 %v6090_v36 }
 0x2e5   : > { %v6857_v42 = vpop.eup %6856 }
 0x2e6   : > { %2552 = vrot.lane.b32.xlu0 %v6857_v42, %s7281_s13 }
 0x2e7   : > { %v6859_v34 = vpop.eup %6858 }
 0x2e8   : > { %2558 = vrot.lane.b32.xlu1 %v6859_v34, %s7281_s13  ;;  %v6861_v24 = vpop.eup %6860  ;;  %v8544_v34 = vadd.f32 %v8499_v26, %v8388_v58  ;;  %v2437_v58 = vpop.permute.xlu0 %2436 }
 0x2e9   : > { %v2629_v35 = vmul.f32 %v6861_v24, %v2439_v31  ;;  %v6863_v24 = vpop.eup %6862 }
 0x2ea   : > { %v8524_v5 = vpop.permute.xlu1 %2478  ;;  %11304 = vst [vmem:[#allocation106_spill] sm:$0xff] %v8544_v34  ;;  %v6093_v15 = vmul.f32 -1.442695, %v8544_v34  ;;  %v2628_v36 = vmul.f32 %v6863_v24, %v2437_v58 }
 0x2eb   : > { %v3031_v60 = vmul.f32 %v8550_v20, %v2629_v35  ;;  %v2699_v23 = vmul.f32 %v8560_v3, %v2629_v35 }
 0x2ec   : > { %6866 = vpow2.f32 %v6093_v15 }
 0x2ed   : > { %v3097_v31 = vsel %vm2762_vm4, %v3031_v60, 0.0  ;;  %v6865_v34 = vpop.eup %6864  ;;  %v2766_v40 = vsel %vm2762_vm4, %v2699_v23, 0.0  ;;  %v3030_v60 = vmul.f32 %v8550_v20, %v2628_v36 }
 0x2ee   : > { %v2240_v56 = vadd.f32 1.0, %v6865_v34 }
 0x2ef   : > { %v8528_v30 = vpop.permute.xlu1 %2482 }
 0x2f0   : > { %6868 = vrcp.f32 %v2240_v56 }
 0x2f6   : > { %v8530_v9 = vpop.permute.xlu1 %2486 }
 0x2fb   : > { %v8533_v55 = vpop.permute.xlu1 %2490 }
 0x2ff   : > { %v8540_v42 = vpop.permute.xlu1 %2494 }
 0x300   : > { %11303 = vst [vmem:[#allocation105_spill] sm:$0xff] %v8540_v42 }
 0x305   : > { %3098 = vadd.xlane.f32.xlu0 %v3097_v31  ;;  %v6867_v31 = vpop.eup %6866 }
 0x306   : > { %v8554_v22 = vpop.permute.xlu1 %2498  ;;  %v2243_v32 = vadd.f32 1.0, %v6867_v31  ;;  %v6869_v35 = vpop.eup %6868 }
 0x307   : > { %11305 = vst [vmem:[#allocation107_spill] sm:$0xff] %v8554_v22  ;;  %v3094_v22 = vsel %vm2762_vm4, %v3030_v60, 0.0  ;;  %v8587_v60 = vadd.f32 %v8499_v26, %v8409_v11  ;;  %v2445_v26 = vpop.permute.xlu0 %2444 }
 0x308   : > { %6870 = vrcp.f32 %v2243_v32 }
 0x309   : > { %6872 = vtanh.f32 %v8386_v2  ;;  %v2698_v2 = vmul.f32 %v8560_v3, %v2628_v36 }
 0x30a   : > { %6874 = vtanh.f32 %v8097_v50 }
 0x30b   : > { %v8562_v14 = vpop.permute.xlu1 %2502  ;;  %6876 = vtanh.f32 %v8100_v7  ;;  %v2763_v50 = vsel %vm2762_vm4, %v2698_v2, 0.0  ;;  %v2449_v2 = vpop.permute.xlu0 %2448 }
 0x30c   : > { %2767 = vadd.xlane.f32.xlu1 %v2766_v40  ;;  %6878 = vtanh.f32 %v8108_v18 }
 0x310   : > { %3095 = vadd.xlane.f32.xlu1 %v3094_v22 }
 0x312   : > { %v8567_v15 = vpop.permute.xlu1 %2506  ;;  %v6871_v23 = vpop.eup %6870 }
 0x313   : > { %v6873_v56 = vpop.eup %6872 }
 0x314   : > { %v6875_v32 = vpop.eup %6874 }
 0x315   : > { %v2631_v31 = vmul.f32 %v6875_v32, %v8436_v41 }
 0x317   : > { %v8570_v42 = vpop.permute.xlu1 %2510  ;;  %v3033_v41 = vmul.f32 %v8550_v20, %v2631_v31 }
 0x31b   : > { %v8572_v58 = vpop.permute.xlu1 %2514  ;;  %2556 = vrot.lane.b32.xlu0 %v6869_v35, %s7281_s13  ;;  %v6092_v35 = vmul.f32 -1.442695, %v8587_v60 }
 0x31d   : > { %6880 = vpow2.f32 %v6092_v35 }
 0x31e   : > { %6882 = vtanh.f32 %v8116_v13 }
 0x31f   : > { %6884 = vtanh.f32 %v8125_v4 }
 0x321   : > { %2562 = vrot.lane.b32.xlu1 %v6871_v23, %s7281_s13  ;;  %v2701_v23 = vmul.f32 %v8560_v3, %v2631_v31 }
 0x322   : > { %v8575_v34 = vpop.permute.xlu1 %2518 }
 0x323   : > { %v2772_v11 = vsel %vm2762_vm4, %v2701_v23, 0.0 }
 0x327   : > { %v8579_v40 = vpop.permute.xlu1 %2522 }
 0x32e   : > { %v2527_v22 = vpop.permute.xlu1 %2526 }
 0x32f   : > { %v8582_v24 = vmul.f32 %v6873_v56, %v2527_v22  ;;  %v6877_v56 = vpop.eup %6876  ;;  %v3103_v22 = vsel %vm2762_vm4, %v3033_v41, 0.0  ;;  %v2453_v41 = vpop.permute.xlu0 %2452 }
 0x330   : > { %v8596_v7 = vmul.f32 %v6877_v56, %v8448_v25  ;;  %v6879_v18 = vpop.eup %6878 }
 0x331   : > { %v2632_v36 = vmul.f32 %v6879_v18, %v2445_v26 }
 0x332   : > { %v3032_v32 = vmul.f32 %v8550_v20, %v8596_v7 }
 0x333   : > { %v2702_v35 = vmul.f32 %v8560_v3, %v2632_v36  ;;  %v2457_v4 = vpop.permute.xlu0 %2456 }
 0x334   : > { %v3100_v25 = vsel %vm2762_vm4, %v3032_v32, 0.0 }
 0x335   : > { %v2775_v56 = vsel %vm2762_vm4, %v2702_v35, 0.0 }
 0x33a   : > { %2764 = vadd.xlane.f32.xlu0 %v2763_v50  ;;  %v6881_v50 = vpop.eup %6880 }
 0x33b   : > { %v6883_v13 = vpop.eup %6882  ;;  %v2242_v23 = vadd.f32 1.0, %v6881_v50  ;;  %v2461_v50 = vpop.permute.xlu0 %2460 }
 0x33c   : > { %v2634_v31 = vmul.f32 %v6883_v13, %v2449_v2 }
 0x33d   : > { %6886 = vrcp.f32 %v2242_v23 }
 0x33e   : > { %2773 = vadd.xlane.f32.xlu0 %v2772_v11  ;;  %v3034_v11 = vmul.f32 %v8550_v20, %v2632_v36  ;;  %v2704_v18 = vmul.f32 %v8560_v3, %v2634_v31  ;;  %6888 = vtanh.f32 %v8132_v59 }
 0x33f   : > { %6890 = vtanh.f32 %v8141_v0 }
 0x340   : > { %v3106_v26 = vsel %vm2762_vm4, %v3034_v11, 0.0  ;;  %v2781_v2 = vsel %vm2762_vm4, %v2704_v18, 0.0  ;;  %6892 = vtanh.f32 %v8151_v1 }
 0x341   : > { %6894 = vtanh.f32 %v8162_v62 }
 0x342   : > { %3104 = vadd.xlane.f32.xlu0 %v3103_v22  ;;  %v6885_v22 = vpop.eup %6884  ;;  %6896 = vtanh.f32 %v8105_v57 }
 0x343   : > { %v2636_v32 = vmul.f32 %v6885_v22, %v2453_v41  ;;  %6898 = vtanh.f32 %v8172_v53 }
 0x344   : > { %6900 = vtanh.f32 %v8113_v44 }
 0x345   : > { %3101 = vadd.xlane.f32.xlu1 %v3100_v25  ;;  %v3036_v25 = vmul.f32 %v8550_v20, %v2634_v31  ;;  %v2706_v35 = vmul.f32 %v8560_v3, %v2636_v32  ;;  %v3038_v11 = vmul.f32 %v8550_v20, %v2636_v32  ;;  %v2465_v31 = vpop.permute.xlu0 %2464  ;;  %6902 = vtanh.f32 %v8184_v38 }
 0x346   : > { %6904 = vtanh.f32 %v8121_v29 }
 0x347   : > { %v3112_v36 = vsel %vm2762_vm4, %v3036_v25, 0.0  ;;  %v6887_v13 = vpop.eup %6886  ;;  %v3118_v41 = vsel %vm2762_vm4, %v3038_v11, 0.0  ;;  %6906 = vtanh.f32 %v8201_v10 }
 0x348   : > { %v6889_v23 = vpop.eup %6888  ;;  %6908 = vtanh.f32 %v8128_v49 }
 0x349   : > { %2776 = vadd.xlane.f32.xlu1 %v2775_v56  ;;  %v2638_v59 = vmul.f32 %v6889_v23, %v2457_v4  ;;  %v2787_v56 = vsel %vm2762_vm4, %v2706_v35, 0.0  ;;  %v6891_v0 = vpop.eup %6890  ;;  %v2469_v4 = vpop.permute.xlu0 %2468  ;;  %6910 = vtanh.f32 %v8217_v21 }
 0x34a   : > { %v2640_v18 = vmul.f32 %v6891_v0, %v2461_v50  ;;  %v2700_v0 = vmul.f32 %v8560_v3, %v8596_v7  ;;  %6912 = vtanh.f32 %v8136_v63 }
 0x34b   : > { %6914 = vtanh.f32 %v8234_v43 }
 0x34c   : > { %v2710_v32 = vmul.f32 %v8560_v3, %v2640_v18  ;;  %v2769_v44 = vsel %vm2762_vm4, %v2700_v0, 0.0  ;;  %6916 = vtanh.f32 %v8147_v16 }
 0x34d   : > { %3107 = vadd.xlane.f32.xlu1 %v3106_v26  ;;  %v2708_v26 = vmul.f32 %v8560_v3, %v2638_v59  ;;  %v2473_v1 = vpop.permute.xlu0 %2472  ;;  %6918 = vtanh.f32 %v8252_v46 }
 0x34e   : > { %v2799_v50 = vsel %vm2762_vm4, %v2710_v32, 0.0  ;;  %6920 = vtanh.f32 %v8157_v28 }
 0x34f   : > { %v2793_v22 = vsel %vm2762_vm4, %v2708_v26, 0.0  ;;  %6922 = vtanh.f32 %v8270_v51 }
 0x351   : > { %2782 = vadd.xlane.f32.xlu1 %v2781_v2  ;;  %v3040_v2 = vmul.f32 %v8550_v20, %v2638_v59 }
 0x353   : > { %v3124_v25 = vsel %vm2762_vm4, %v3040_v2, 0.0 }
 0x355   : > { %3113 = vadd.xlane.f32.xlu1 %v3112_v36  ;;  %v6893_v36 = vpop.eup %6892  ;;  %6924 = vtanh.f32 %v8168_v45 }
 0x356   : > { %v2642_v35 = vmul.f32 %v6893_v36, %v2465_v31  ;;  %v6895_v62 = vpop.eup %6894  ;;  %6926 = vtanh.f32 %v8288_v52 }
 0x357   : > { %v6897_v57 = vpop.eup %6896  ;;  %v2644_v11 = vmul.f32 %v6895_v62, %v2469_v4  ;;  %6928 = vtanh.f32 %v8177_v61 }
 0x358   : > { %2560 = vrot.lane.b32.xlu0 %v6887_v13, %s7281_s13  ;;  %v3042_v13 = vmul.f32 %v8550_v20, %v2640_v18  ;;  %v2712_v59 = vmul.f32 %v8560_v3, %v2642_v35  ;;  %v2633_v26 = vmul.f32 %v6897_v57, %v8457_v37  ;;  %v6899_v37 = vpop.eup %6898  ;;  %6930 = vtanh.f32 %v8306_v6 }
 0x359   : > { %2788 = vadd.xlane.f32.xlu1 %v2787_v56  ;;  %v2477_v56 = vpop.permute.xlu0 %2476  ;;  %v6901_v4 = vpop.eup %6900  ;;  %v3046_v32 = vmul.f32 %v8550_v20, %v2644_v11  ;;  %6932 = vtanh.f32 %v8193_v54 }
 0x35a   : > { %v3130_v23 = vsel %vm2762_vm4, %v3042_v13, 0.0  ;;  %v2805_v31 = vsel %vm2762_vm4, %v2712_v59, 0.0  ;;  %v2703_v2 = vmul.f32 %v8560_v3, %v2633_v26  ;;  %v2635_v36 = vmul.f32 %v6901_v4, %v8466_v48  ;;  %v6903_v48 = vpop.eup %6902 }
 0x35b   : > { %v3142_v13 = vsel %vm2762_vm4, %v3046_v32, 0.0  ;;  %v6905_v62 = vpop.eup %6904  ;;  %v2648_v57 = vmul.f32 %v6903_v48, %v2477_v56  ;;  %6934 = vtanh.f32 %v8324_v17 }
 0x35c   : > { %v2778_v38 = vsel %vm2762_vm4, %v2703_v2, 0.0  ;;  %6936 = vtanh.f32 %v8208_v19 }
 0x35d   : > { %3119 = vadd.xlane.f32.xlu1 %v3118_v41  ;;  %v3044_v41 = vmul.f32 %v8550_v20, %v2642_v35  ;;  %v2481_v18 = vpop.permute.xlu0 %2480  ;;  %v2718_v49 = vmul.f32 %v8560_v3, %v2648_v57  ;;  %v3050_v4 = vmul.f32 %v8550_v20, %v2648_v57  ;;  %v8690_v57 = vpop.permute.xlu1 %2530 }
 0x35f   : > { %v3136_v53 = vsel %vm2762_vm4, %v3044_v41, 0.0  ;;  %v2637_v41 = vmul.f32 %v6905_v62, %v8478_v27  ;;  %v6907_v27 = vpop.eup %6906  ;;  %v3154_v63 = vsel %vm2762_vm4, %v3050_v4, 0.0 }
 0x360   : > { %v2650_v2 = vmul.f32 %v6907_v27, %v2481_v18 }
 0x361   : > { %2794 = vadd.xlane.f32.xlu1 %v2793_v22  ;;  %v2714_v22 = vmul.f32 %v8560_v3, %v2644_v11  ;;  %v2485_v35 = vpop.permute.xlu0 %2484  ;;  %v8705_v27 = vpop.permute.xlu1 %2534 }
 0x363   : > { %v2811_v7 = vsel %vm2762_vm4, %v2714_v22, 0.0  ;;  %v2707_v22 = vmul.f32 %v8560_v3, %v2637_v41 }
 0x365   : > { %3125 = vadd.xlane.f32.xlu1 %v3124_v25  ;;  %v2646_v25 = vmul.f32 %v6899_v37, %v2473_v1  ;;  %v2489_v59 = vpop.permute.xlu0 %2488  ;;  %v2823_v37 = vsel %vm2762_vm4, %v2718_v49, 0.0  ;;  %v2790_v21 = vsel %vm2762_vm4, %v2707_v22, 0.0 }
 0x367   : > { %v2716_v29 = vmul.f32 %v8560_v3, %v2646_v25 }
 0x369   : > { %2800 = vadd.xlane.f32.xlu1 %v2799_v50  ;;  %v3035_v50 = vmul.f32 %v8550_v20, %v2633_v26  ;;  %v2817_v11 = vsel %vm2762_vm4, %v2716_v29, 0.0  ;;  %v3037_v26 = vmul.f32 %v8550_v20, %v2635_v36 }
 0x36b   : > { %v3109_v1 = vsel %vm2762_vm4, %v3035_v50, 0.0  ;;  %v3115_v56 = vsel %vm2762_vm4, %v3037_v26, 0.0 }
 0x36d   : > { %3131 = vadd.xlane.f32.xlu1 %v3130_v23  ;;  %v2705_v23 = vmul.f32 %v8560_v3, %v2635_v36  ;;  %v2720_v36 = vmul.f32 %v8560_v3, %v2650_v2 }
 0x36f   : > { %v2784_v10 = vsel %vm2762_vm4, %v2705_v23, 0.0  ;;  %v2829_v29 = vsel %vm2762_vm4, %v2720_v36, 0.0 }
 0x371   : > { %2806 = vadd.xlane.f32.xlu1 %v2805_v31  ;;  %v3048_v31 = vmul.f32 %v8550_v20, %v2646_v25 }
 0x373   : > { %v3148_v0 = vsel %vm2762_vm4, %v3048_v31, 0.0 }
 0x375   : > { %3137 = vadd.xlane.f32.xlu1 %v3136_v53  ;;  %v8665_v53 = vpop.permute.xlu0 %2492 }
 0x377   : > { %2770 = vadd.xlane.f32.xlu0 %v2769_v44  ;;  %v6909_v44 = vpop.eup %6908 }
 0x378   : > { %v2639_v25 = vmul.f32 %v6909_v44, %v8492_v47  ;;  %v6911_v47 = vpop.eup %6910 }
 0x379   : > { %2812 = vadd.xlane.f32.xlu1 %v2811_v7  ;;  %v3039_v7 = vmul.f32 %v8550_v20, %v2637_v41  ;;  %v8675_v32 = vpop.permute.xlu0 %2496  ;;  %v6913_v50 = vpop.eup %6912 }
 0x37a   : > { %v2641_v23 = vmul.f32 %v6913_v50, %v8507_v39  ;;  %v3041_v62 = vmul.f32 %v8550_v20, %v2639_v25  ;;  %v6915_v31 = vpop.eup %6914 }
 0x37b   : > { %2779 = vadd.xlane.f32.xlu0 %v2778_v38  ;;  %v3121_v18 = vsel %vm2762_vm4, %v3039_v7, 0.0  ;;  %v2709_v38 = vmul.f32 %v8560_v3, %v2639_v25  ;;  %v2654_v26 = vmul.f32 %v6915_v31, %v2489_v59 }
 0x37c   : > { %v2711_v39 = vmul.f32 %v8560_v3, %v2641_v23  ;;  %v3043_v22 = vmul.f32 %v8550_v20, %v2641_v23 }
 0x37d   : > { %3143 = vadd.xlane.f32.xlu1 %v3142_v13  ;;  %v2652_v13 = vmul.f32 %v6911_v47, %v2485_v35  ;;  %v8686_v48 = vpop.permute.xlu0 %2500  ;;  %v2796_v43 = vsel %vm2762_vm4, %v2709_v38, 0.0  ;;  %v2724_v44 = vmul.f32 %v8560_v3, %v2654_v26  ;;  %v3056_v51 = vmul.f32 %v8550_v20, %v2654_v26 }
 0x37e   : > { %v2802_v46 = vsel %vm2762_vm4, %v2711_v39, 0.0 }
 0x37f   : > { %3110 = vadd.xlane.f32.xlu0 %v3109_v1  ;;  %v3052_v1 = vmul.f32 %v8550_v20, %v2650_v2  ;;  %v2722_v35 = vmul.f32 %v8560_v3, %v2652_v13  ;;  %v3054_v49 = vmul.f32 %v8550_v20, %v2652_v13  ;;  %v3133_v2 = vsel %vm2762_vm4, %v3043_v22, 0.0 }
 0x380   : > { %v2841_v7 = vsel %vm2762_vm4, %v2724_v44, 0.0  ;;  %v3172_v38 = vsel %vm2762_vm4, %v3056_v51, 0.0 }
 0x381   : > { %2818 = vadd.xlane.f32.xlu1 %v2817_v11  ;;  %v3160_v16 = vsel %vm2762_vm4, %v3052_v1, 0.0  ;;  %v3127_v11 = vsel %vm2762_vm4, %v3041_v62, 0.0  ;;  %v8698_v41 = vpop.permute.xlu0 %2504  ;;  %v3166_v28 = vsel %vm2762_vm4, %v3054_v49, 0.0 }
 0x383   : > { %2785 = vadd.xlane.f32.xlu0 %v2784_v10  ;;  %v6917_v10 = vpop.eup %6916 }
 0x385   : > { %3149 = vadd.xlane.f32.xlu1 %v3148_v0  ;;  %v2835_v0 = vsel %vm2762_vm4, %v2722_v35, 0.0  ;;  %v8710_v59 = vpop.permute.xlu0 %2508 }
 0x387   : > { %3116 = vadd.xlane.f32.xlu0 %v3115_v56  ;;  %v2643_v56 = vmul.f32 %v6917_v10, %v8512_v33 }
 0x389   : > { %2824 = vadd.xlane.f32.xlu1 %v2823_v37  ;;  %v2713_v33 = vmul.f32 %v8560_v3, %v2643_v56  ;;  %v6919_v37 = vpop.eup %6918  ;;  %v8723_v45 = vpop.permute.xlu0 %2512 }
 0x38a   : > { %v6921_v4 = vpop.eup %6920  ;;  %v2656_v25 = vmul.f32 %v6919_v37, %v8665_v53 }
 0x38b   : > { %2791 = vadd.xlane.f32.xlu0 %v2790_v21  ;;  %v8716_v21 = vpop.permute.xlu1 %2538  ;;  %v2808_v36 = vsel %vm2762_vm4, %v2713_v33, 0.0  ;;  %v6923_v13 = vpop.eup %6922 }
 0x38c   : > { %v2726_v53 = vmul.f32 %v8560_v3, %v2656_v25  ;;  %v2658_v1 = vmul.f32 %v6923_v13, %v8675_v32 }
 0x38d   : > { %3155 = vadd.xlane.f32.xlu1 %v3154_v63  ;;  %v2645_v63 = vmul.f32 %v6921_v4, %v8516_v8  ;;  %v8737_v62 = vpop.permute.xlu0 %2516 }
 0x38e   : > { %v2847_v23 = vsel %vm2762_vm4, %v2726_v53, 0.0  ;;  %v2728_v32 = vmul.f32 %v8560_v3, %v2658_v1 }
 0x38f   : > { %3122 = vadd.xlane.f32.xlu0 %v3121_v18  ;;  %v3045_v18 = vmul.f32 %v8550_v20, %v2643_v56  ;;  %v2715_v50 = vmul.f32 %v8560_v3, %v2645_v63  ;;  %v8731_v8 = vpop.permute.xlu1 %2542  ;;  %v3047_v61 = vmul.f32 %v8550_v20, %v2645_v63  ;;  %v3060_v56 = vmul.f32 %v8550_v20, %v2658_v1 }
 0x390   : > { %v2853_v49 = vsel %vm2762_vm4, %v2728_v32, 0.0 }
 0x391   : > { %2830 = vadd.xlane.f32.xlu1 %v2829_v29  ;;  %v3139_v47 = vsel %vm2762_vm4, %v3045_v18, 0.0  ;;  %v6925_v29 = vpop.eup %6924  ;;  %v3145_v39 = vsel %vm2762_vm4, %v3047_v61, 0.0  ;;  %v8749_v10 = vpop.permute.xlu0 %2520  ;;  %v3184_v54 = vsel %vm2762_vm4, %v3060_v56, 0.0 }
 0x392   : > { %v2647_v52 = vmul.f32 %v6925_v29, %v8520_v12  ;;  %v6927_v31 = vpop.eup %6926 }
 0x393   : > { %2797 = vadd.xlane.f32.xlu0 %v2796_v43  ;;  %v3058_v43 = vmul.f32 %v8550_v20, %v2656_v25  ;;  %v8741_v35 = vpop.permute.xlu1 %2546  ;;  %v6929_v26 = vpop.eup %6928 }
 0x394   : > { %v2717_v12 = vmul.f32 %v8560_v3, %v2647_v52  ;;  %v2649_v6 = vmul.f32 %v6929_v26, %v8524_v5  ;;  %v3049_v22 = vmul.f32 %v8550_v20, %v2647_v52  ;;  %v6931_v33 = vpop.eup %6930  ;;  %v11309_v26 = vld [vmem:[#allocation77_spill] sm:$0xff] }
 0x395   : > { %3161 = vadd.xlane.f32.xlu1 %v3160_v16  ;;  %v2814_v16 = vsel %vm2762_vm4, %v2715_v50, 0.0  ;;  %v6933_v37 = vpop.eup %6932  ;;  %v2662_v4 = vmul.f32 %v6931_v33, %v8698_v41 }
 0x396   : > { %v2719_v5 = vmul.f32 %v8560_v3, %v2649_v6  ;;  %v2651_v51 = vmul.f32 %v6933_v37, %v8528_v30  ;;  %v11307_v30 = vld [vmem:[#allocation76_spill] sm:$0xff]  ;;  %v6935_v13 = vpop.eup %6934 }
 0x397   : > { %3128 = vadd.xlane.f32.xlu0 %v3127_v11  ;;  %v3178_v11 = vsel %vm2762_vm4, %v3058_v43, 0.0  ;;  %v2732_v41 = vmul.f32 %v8560_v3, %v2662_v4  ;;  %v6937_v29 = vpop.eup %6936  ;;  %v2664_v1 = vmul.f32 %v6935_v13, %v8710_v59  ;;  %v3064_v43 = vmul.f32 %v8550_v20, %v2662_v4  ;;  %v11310_v4 = vld [vmem:[#allocation87_spill] sm:$0xff] }
 0x398   : > { %v2826_v63 = vsel %vm2762_vm4, %v2719_v5, 0.0  ;;  %v2653_v52 = vmul.f32 %v6937_v29, %v8530_v9 }
 0x399   : > { %2836 = vadd.xlane.f32.xlu1 %v2835_v0  ;;  %v2660_v0 = vmul.f32 %v6927_v31, %v8686_v48  ;;  %v8762_v48 = vpop.permute.xlu0 %2524  ;;  %v2734_v59 = vmul.f32 %v8560_v3, %v2664_v1 }
 0x39a   : > { %v2723_v9 = vmul.f32 %v8560_v3, %v2653_v52  ;;  %v3055_v5 = vmul.f32 %v8550_v20, %v2653_v52 }
 0x39b   : > { %2803 = vadd.xlane.f32.xlu0 %v2802_v46  ;;  %v2820_v46 = vsel %vm2762_vm4, %v2717_v12, 0.0  ;;  %v2730_v44 = vmul.f32 %v8560_v3, %v2660_v0  ;;  %v3062_v17 = vmul.f32 %v8550_v20, %v2660_v0  ;;  %v11308_v12 = vld [vmem:[#allocation85_spill] sm:$0xff] }
 0x39d   : > { %3167 = vadd.xlane.f32.xlu1 %v3166_v28  ;;  %v8757_v28 = vpop.permute.xlu1 %2550  ;;  %v8775_v19 = vpop.permute.xlu0 %2528  ;;  %v3190_v18 = vsel %vm2762_vm4, %v3062_v17, 0.0 }
 0x39f   : > { %3134 = vadd.xlane.f32.xlu0 %v3133_v2  ;;  %v3151_v2 = vsel %vm2762_vm4, %v3049_v22, 0.0  ;;  %v2871_v22 = vsel %vm2762_vm4, %v2734_v59, 0.0 }
 0x3a1   : > { %2842 = vadd.xlane.f32.xlu1 %v2841_v7  ;;  %v8768_v25 = vpop.permute.xlu1 %2554  ;;  %v2859_v7 = vsel %vm2762_vm4, %v2730_v44, 0.0 }
 0x3a3   : > { %2809 = vadd.xlane.f32.xlu0 %v2808_v36  ;;  %v3051_v36 = vmul.f32 %v8550_v20, %v2649_v6 }
 0x3a5   : > { %3173 = vadd.xlane.f32.xlu1 %v3172_v38  ;;  %v11306_v38 = vld [vmem:[#allocation83_spill] sm:$0xff]  ;;  %v3157_v53 = vsel %vm2762_vm4, %v3051_v36, 0.0  ;;  %v8783_v50 = vpop.permute.xlu1 %2558 }
 0x3a6   : > { %6938 = vtanh.f32 %v11306_v38 }
 0x3a7   : > { %3140 = vadd.xlane.f32.xlu0 %v3139_v47  ;;  %v2721_v47 = vmul.f32 %v8560_v3, %v2651_v51  ;;  %6940 = vtanh.f32 %v11307_v30 }
 0x3a8   : > { %6942 = vtanh.f32 %v11308_v12 }
 0x3a9   : > { %2848 = vadd.xlane.f32.xlu1 %v2847_v23  ;;  %v2865_v23 = vsel %vm2762_vm4, %v2732_v41, 0.0  ;;  %v2832_v61 = vsel %vm2762_vm4, %v2721_v47, 0.0  ;;  %v8793_v32 = vpop.xlane.xlu1 %2767  ;;  %6944 = vtanh.f32 %v11309_v26 }
 0x3aa   : > { %6946 = vtanh.f32 %v11310_v4  ;;  %v11317_v4 = vld [vmem:[#allocation80_spill] sm:$0xff] }
 0x3ab   : > { %2815 = vadd.xlane.f32.xlu0 %v2814_v16  ;;  %v8789_v16 = vpop.permute.xlu0 %2532 }
 0x3ad   : > { %3179 = vadd.xlane.f32.xlu1 %v3178_v11  ;;  %v3053_v11 = vmul.f32 %v8550_v20, %v2651_v51 }
 0x3af   : > { %3146 = vadd.xlane.f32.xlu0 %v3145_v39  ;;  %v3196_v39 = vsel %vm2762_vm4, %v3064_v43, 0.0  ;;  %v3163_v31 = vsel %vm2762_vm4, %v3053_v11, 0.0  ;;  %v11313_v43 = vld [vmem:[#allocation88_spill] sm:$0xff]  ;;  %v11314_v11 = vld [vmem:[#allocation79_spill] sm:$0xff] }
 0x3b0   : > { %v6939_v0 = vpop.eup %6938 }
 0x3b1   : > { %2854 = vadd.xlane.f32.xlu1 %v2853_v49  ;;  %v8801_v49 = vpop.permute.xlu0 %2536  ;;  %v6941_v56 = vpop.eup %6940  ;;  %v2666_v6 = vmul.f32 %v6939_v0, %v8723_v45  ;;  %v11315_v0 = vld [vmem:[#allocation107_spill] sm:$0xff] }
 0x3b2   : > { %v2655_v44 = vmul.f32 %v6941_v56, %v8533_v55  ;;  %v11311_v55 = vld [vmem:[#allocation78_spill] sm:$0xff] }
 0x3b3   : > { %2821 = vadd.xlane.f32.xlu0 %v2820_v46  ;;  %v8804_v46 = vpop.xlane.xlu1 %3095  ;;  %v2736_v37 = vmul.f32 %v8560_v3, %v2666_v6  ;;  %6948 = vtanh.f32 %v11311_v55  ;;  %v3068_v38 = vmul.f32 %v8550_v20, %v2666_v6 }
 0x3b4   : > { %v2725_v17 = vmul.f32 %v8560_v3, %v2655_v44  ;;  %v3057_v13 = vmul.f32 %v8550_v20, %v2655_v44  ;;  %6950 = vtanh.f32 %v11313_v43 }
 0x3b5   : > { %3185 = vadd.xlane.f32.xlu1 %v3184_v54  ;;  %v3066_v54 = vmul.f32 %v8550_v20, %v2664_v1  ;;  %v8814_v45 = vpop.permute.xlu0 %2540  ;;  %v2877_v41 = vsel %vm2762_vm4, %v2736_v37, 0.0  ;;  %6952 = vtanh.f32 %v11314_v11 }
 0x3b6   : > { %v2844_v30 = vsel %vm2762_vm4, %v2725_v17, 0.0  ;;  %v3175_v52 = vsel %vm2762_vm4, %v3057_v13, 0.0 }
 0x3b7   : > { %3152 = vadd.xlane.f32.xlu0 %v3151_v2  ;;  %v2838_v2 = vsel %vm2762_vm4, %v2723_v9, 0.0  ;;  %v3202_v33 = vsel %vm2762_vm4, %v3066_v54, 0.0  ;;  %v8819_v51 = vpop.permute.xlu1 %2562 }
 0x3b9   : > { %2860 = vadd.xlane.f32.xlu1 %v2859_v7  ;;  %v3169_v7 = vsel %vm2762_vm4, %v3055_v5, 0.0  ;;  %v8829_v1 = vpop.permute.xlu0 %2544  ;;  %v11316_v5 = vld [vmem:[#allocation90_spill] sm:$0xff] }
 0x3ba   : > { %6954 = vtanh.f32 %v11316_v5 }
 0x3bb   : > { %2827 = vadd.xlane.f32.xlu0 %v2826_v63  ;;  %v6943_v63 = vpop.eup %6942  ;;  %6956 = vtanh.f32 %v11317_v4 }
 0x3bc   : > { %v6945_v36 = vpop.eup %6944 }
 0x3bd   : > { %3191 = vadd.xlane.f32.xlu1 %v3190_v18  ;;  %v2668_v18 = vmul.f32 %v6943_v63, %v8737_v62  ;;  %v6947_v59 = vpop.eup %6946  ;;  %v8843_v6 = vpop.permute.xlu0 %2548 }
 0x3be   : > { %v6949_v12 = vpop.eup %6948 }
 0x3bf   : > { %3158 = vadd.xlane.f32.xlu0 %v3157_v53  ;;  %v11312_v53 = vld [vmem:[#allocation105_spill] sm:$0xff]  ;;  %v2738_v62 = vmul.f32 %v8560_v3, %v2668_v18  ;;  %v3070_v26 = vmul.f32 %v8550_v20, %v2668_v18  ;;  %v2659_v56 = vmul.f32 %v6949_v12, %v11315_v0  ;;  %v6951_v17 = vpop.eup %6950 }
 0x3c0   : > { %v2657_v47 = vmul.f32 %v6945_v36, %v11312_v53  ;;  %v6953_v63 = vpop.eup %6952  ;;  %v2672_v36 = vmul.f32 %v6951_v17, %v8762_v48 }
 0x3c1   : > { %2866 = vadd.xlane.f32.xlu1 %v2865_v23  ;;  %v3208_v23 = vsel %vm2762_vm4, %v3068_v38, 0.0  ;;  %v2883_v9 = vsel %vm2762_vm4, %v2738_v62, 0.0  ;;  %v2729_v37 = vmul.f32 %v8560_v3, %v2659_v56  ;;  %v8857_v55 = vpop.permute.xlu0 %2552  ;;  %v2661_v38 = vmul.f32 %v6953_v63, %v8562_v14  ;;  %v11318_v62 = vld [vmem:[#allocation92_spill] sm:$0xff] }
 0x3c2   : > { %v3059_v54 = vmul.f32 %v8550_v20, %v2657_v47  ;;  %v2742_v48 = vmul.f32 %v8560_v3, %v2672_v36  ;;  %6958 = vtanh.f32 %v11318_v62 }
 0x3c3   : > { %2833 = vadd.xlane.f32.xlu0 %v2832_v61  ;;  %v2727_v61 = vmul.f32 %v8560_v3, %v2657_v47  ;;  %v2856_v53 = vsel %vm2762_vm4, %v2729_v37, 0.0  ;;  %v3061_v47 = vmul.f32 %v8550_v20, %v2659_v56  ;;  %v2731_v14 = vmul.f32 %v8560_v3, %v2661_v38  ;;  %v11321_v37 = vld [vmem:[#allocation82_spill] sm:$0xff] }
 0x3c4   : > { %v6955_v11 = vpop.eup %6954 }
 0x3c5   : > { %3197 = vadd.xlane.f32.xlu1 %v3196_v39  ;;  %v8867_v13 = vpop.xlane.xlu0 %3098  ;;  %v3187_v43 = vsel %vm2762_vm4, %v3061_v47, 0.0  ;;  %v2674_v12 = vmul.f32 %v6955_v11, %v8775_v19  ;;  %v2862_v56 = vsel %vm2762_vm4, %v2731_v14, 0.0 }
 0x3c7   : > { %3164 = vadd.xlane.f32.xlu0 %v3163_v31  ;;  %v2670_v31 = vmul.f32 %v6947_v59, %v8749_v10  ;;  %v6957_v59 = vpop.eup %6956  ;;  %v2744_v19 = vmul.f32 %v8560_v3, %v2674_v12 }
 0x3c9   : > { %2872 = vadd.xlane.f32.xlu1 %v2871_v22  ;;  %v2850_v22 = vsel %vm2762_vm4, %v2727_v61, 0.0  ;;  %v2740_v10 = vmul.f32 %v8560_v3, %v2670_v31  ;;  %v8881_v0 = vpop.permute.xlu0 %2556 }
 0x3cb   : > { %2839 = vadd.xlane.f32.xlu0 %v2838_v2  ;;  %v3214_v2 = vsel %vm2762_vm4, %v3070_v26, 0.0  ;;  %v2889_v18 = vsel %vm2762_vm4, %v2740_v10, 0.0  ;;  %v2663_v26 = vmul.f32 %v6957_v59, %v8567_v15  ;;  %v11320_v10 = vld [vmem:[#allocation94_spill] sm:$0xff] }
 0x3cc   : > { %v6959_v17 = vpop.eup %6958 }
 0x3cd   : > { %3203 = vadd.xlane.f32.xlu1 %v3202_v33  ;;  %v3181_v33 = vsel %vm2762_vm4, %v3059_v54, 0.0  ;;  %v2765_v5 = vpop.xlane.xlu0 %2764  ;;  %v2733_v15 = vmul.f32 %v8560_v3, %v2663_v26  ;;  %v3065_v47 = vmul.f32 %v8550_v20, %v2663_v26 }
 0x3cf   : > { %3170 = vadd.xlane.f32.xlu0 %v3169_v7  ;;  %v3199_v14 = vsel %vm2762_vm4, %v3065_v47, 0.0 }
 0x3d1   : > { %2878 = vadd.xlane.f32.xlu1 %v2877_v41  ;;  %v3072_v41 = vmul.f32 %v8550_v20, %v2670_v31  ;;  %v2895_v31 = vsel %vm2762_vm4, %v2742_v48, 0.0  ;;  %v8903_v48 = vpop.xlane.xlu0 %2773 }
 0x3d2   : > { %v8827_v29 = vpop.xlane.xlu1 %3101 }
 0x3d3   : > { %2845 = vadd.xlane.f32.xlu0 %v2844_v30 }
 0x3d5   : > { %3209 = vadd.xlane.f32.xlu1 %v3208_v23  ;;  %v3220_v23 = vsel %vm2762_vm4, %v3072_v41, 0.0  ;;  %v3076_v41 = vmul.f32 %v8550_v20, %v2674_v12 }
 0x3d6   : > { %v8837_v39 = vpop.xlane.xlu1 %2776 }
 0x3d7   : > { %3176 = vadd.xlane.f32.xlu0 %v3175_v52  ;;  %v11319_v52 = vld [vmem:[#allocation81_spill] sm:$0xff]  ;;  %v3232_v62 = vsel %vm2762_vm4, %v3076_v41, 0.0 }
 0x3d8   : > { %6960 = vtanh.f32 %v11319_v52  ;;  %v11323_v52 = vld [vmem:[#allocation84_spill] sm:$0xff] }
 0x3d9   : > { %2884 = vadd.xlane.f32.xlu1 %v2883_v9  ;;  %v3074_v9 = vmul.f32 %v8550_v20, %v2672_v36  ;;  %6962 = vtanh.f32 %v11320_v10  ;;  %v2676_v36 = vmul.f32 %v6959_v17, %v8789_v16 }
 0x3da   : > { %v8847_v44 = vpop.xlane.xlu1 %3107  ;;  %6964 = vtanh.f32 %v11321_v37 }
 0x3db   : > { %2851 = vadd.xlane.f32.xlu0 %v2850_v22  ;;  %v3063_v22 = vmul.f32 %v8550_v20, %v2661_v38  ;;  %v2746_v16 = vmul.f32 %v8560_v3, %v2676_v36  ;;  %v3078_v26 = vmul.f32 %v8550_v20, %v2676_v36  ;;  %v11325_v36 = vld [vmem:[#allocation86_spill] sm:$0xff] }
 0x3dd   : > { %3215 = vadd.xlane.f32.xlu1 %v3214_v2  ;;  %v3226_v2 = vsel %vm2762_vm4, %v3074_v9, 0.0  ;;  %v2907_v9 = vsel %vm2762_vm4, %v2746_v16, 0.0 }
 0x3de   : > { %v8855_v7 = vpop.xlane.xlu1 %2782 }
 0x3df   : > { %3182 = vadd.xlane.f32.xlu0 %v3181_v33  ;;  %v3193_v33 = vsel %vm2762_vm4, %v3063_v22, 0.0  ;;  %v3105_v22 = vpop.xlane.xlu0 %3104 }
 0x3e1   : > { %2890 = vadd.xlane.f32.xlu1 %v2889_v18  ;;  %v2901_v18 = vsel %vm2762_vm4, %v2744_v19, 0.0 }
 0x3e2   : > { %v8865_v30 = vpop.xlane.xlu1 %3113  ;;  %v6961_v63 = vpop.eup %6960 }
 0x3e3   : > { %2857 = vadd.xlane.f32.xlu0 %v2856_v53  ;;  %v2665_v38 = vmul.f32 %v6961_v63, %v8570_v42  ;;  %v2868_v53 = vsel %vm2762_vm4, %v2733_v15, 0.0  ;;  %v6963_v59 = vpop.eup %6962 }
 0x3e4   : > { %v6965_v12 = vpop.eup %6964 }
 0x3e5   : > { %3221 = vadd.xlane.f32.xlu1 %v3220_v23  ;;  %v2735_v42 = vmul.f32 %v8560_v3, %v2665_v38  ;;  %v3067_v19 = vmul.f32 %v8550_v20, %v2665_v38 }
 0x3e6   : > { %v8875_v61 = vpop.xlane.xlu1 %2788 }
 0x3e7   : > { %3188 = vadd.xlane.f32.xlu0 %v3187_v43  ;;  %v11322_v43 = vld [vmem:[#allocation96_spill] sm:$0xff]  ;;  %v3205_v17 = vsel %vm2762_vm4, %v3067_v19, 0.0 }
 0x3e8   : > { %6966 = vtanh.f32 %v11322_v43  ;;  %v11326_v19 = vld [vmem:[#allocation100_spill] sm:$0xff] }
 0x3e9   : > { %2896 = vadd.xlane.f32.xlu1 %v2895_v31  ;;  %6968 = vtanh.f32 %v11323_v52  ;;  %v2678_v31 = vmul.f32 %v6963_v59, %v8801_v49  ;;  %v11324_v49 = vld [vmem:[#allocation98_spill] sm:$0xff] }
 0x3ea   : > { %v8885_v54 = vpop.xlane.xlu1 %3119  ;;  %6970 = vtanh.f32 %v11324_v49 }
 0x3eb   : > { %2863 = vadd.xlane.f32.xlu0 %v2862_v56  ;;  %v2667_v56 = vmul.f32 %v6965_v12, %v8572_v58  ;;  %v3238_v58 = vsel %vm2762_vm4, %v3078_v26, 0.0  ;;  %v2748_v37 = vmul.f32 %v8560_v3, %v2678_v31  ;;  %6972 = vtanh.f32 %v11325_v36 }
 0x3ec   : > { %v3080_v47 = vmul.f32 %v8550_v20, %v2678_v31  ;;  %v8954_v20 = vld [vmem:[%s10984_s5 + $0x1] ss:$0 sm:$0xff]  ;;  %v11149_v12 = vmov 0   ;;  %6974 = vtanh.f32 %v11326_v19 }
 0x3ed   : > { %3227 = vadd.xlane.f32.xlu1 %v3226_v2  ;;  %v2874_v2 = vsel %vm2762_vm4, %v2735_v42, 0.0  ;;  %v2737_v63 = vmul.f32 %v8560_v3, %v2667_v56  ;;  %6583 = vset.pattern.permute.xlu0 %v11149_v12 }
 0x3ee   : > { %v8893_v4 = vpop.xlane.xlu1 %2794  ;;  %v3244_v59 = vsel %vm2762_vm4, %v3080_v47, 0.0 }
 0x3ef   : > { %3194 = vadd.xlane.f32.xlu0 %v3193_v33  ;;  %v8924_v33 = vld [vmem:[%s10985_s6] ss:$0 sm:$0xff] }
 0x3f0   : > { %v2961_v15 = vadd.f32 %v8924_v33, %v2765_v5  ;;  %v3286_v41 = vadd.f32 %v8924_v33, %v8804_v46  ;;  %v3287_v16 = vadd.f32 %v8924_v33, %v8867_v13  ;;  %v2913_v46 = vsel %vm2762_vm4, %v2748_v37, 0.0 }
 0x3f1   : > { %2902 = vadd.xlane.f32.xlu1 %v2901_v18  ;;  %v2962_v18 = vadd.f32 %v8924_v33, %v8793_v32  ;;  %v3289_v31 = vadd.f32 %v8924_v33, %v3105_v22  ;;  %v2964_v37 = vadd.f32 %v8924_v33, %v8903_v48  ;;  %v3290_v48 = vadd.f32 %v8924_v33, %v8847_v44 }
 0x3f2   : > { %v8901_v23 = vpop.xlane.xlu1 %3125  ;;  %v6967_v5 = vpop.eup %6966  ;;  %v8946_v32 = vsel %vm3350_vm5, %v2961_v15, %v3286_v41 }
 0x3f3   : > { %2869 = vadd.xlane.f32.xlu0 %v2868_v53  ;;  %v8939_v53 = vpop.permute.xlu0 %2560  ;;  %v2680_v3 = vmul.f32 %v6967_v5, %v8814_v45  ;;  %v3069_v45 = vmul.f32 %v8954_v20, %v2667_v56  ;;  %v8958_v13 = vsel %vm3350_vm5, %v2962_v18, %v3287_v16  ;;  %v8973_v56 = vld [vmem:[%s10984_s5] ss:$0 sm:$0xff] }
 0x3f4   : > { %v3425_v49 = vsel %vm3423_vm6, %v8958_v13, -inf }
 0x3f5   : > { %3233 = vadd.xlane.f32.xlu1 %v3232_v62  ;;  %v6969_v62 = vpop.eup %6968  ;;  %v3211_v15 = vsel %vm2762_vm4, %v3069_v45, 0.0  ;;  %v3082_v5 = vmul.f32 %v8954_v20, %v2680_v3 }
 0x3f6   : > { %v8911_v11 = vpop.xlane.xlu1 %2800  ;;  %v2669_v43 = vmul.f32 %v6969_v62, %v8575_v34  ;;  %v3424_v34 = vsel %vm3423_vm6, %v8946_v32, -inf  ;;  %v8993_v62 = vsel %vm3350_vm5, %v2964_v37, %v3289_v31 }
 0x3f7   : > { %3200 = vadd.xlane.f32.xlu0 %v3199_v14  ;;  %v2880_v14 = vsel %vm2762_vm4, %v2737_v63, 0.0  ;;  %v3429_v44 = vsel %vm3423_vm6, %v8993_v62, -inf  ;;  %v3250_v31 = vsel %vm2762_vm4, %v3082_v5, 0.0 }
 0x3f8   : > { %v2739_v22 = vmul.f32 %v8973_v56, %v2669_v43  ;;  %v3071_v45 = vmul.f32 %v8954_v20, %v2669_v43 }
 0x3f9   : > { %2908 = vadd.xlane.f32.xlu1 %v2907_v9  ;;  %v3288_v9 = vadd.f32 %v8924_v33, %v8827_v29  ;;  %v6971_v29 = vpop.eup %6970 }
 0x3fa   : > { %v8919_v10 = vpop.xlane.xlu1 %3131  ;;  %v2682_v36 = vmul.f32 %v6971_v29, %v8829_v1  ;;  %v6973_v47 = vpop.eup %6972  ;;  %v2886_v1 = vsel %vm2762_vm4, %v2739_v22, 0.0  ;;  %v3217_v19 = vsel %vm2762_vm4, %v3071_v45, 0.0 }
 0x3fb   : > { %2875 = vadd.xlane.f32.xlu0 %v2874_v2  ;;  %v2750_v2 = vmul.f32 %v8973_v56, %v2680_v3  ;;  %v2965_v3 = vadd.f32 %v8924_v33, %v8837_v39 }
 0x3fc   : > { %v3084_v5 = vmul.f32 %v8954_v20, %v2682_v36 }
 0x3fd   : > { %3239 = vadd.xlane.f32.xlu1 %v3238_v58  ;;  %v3426_v58 = vmax.f32 %v3424_v34, %v3425_v49 }
 0x3fe   : > { %v8937_v38 = vpop.xlane.xlu1 %2806 }
 0x3ff   : > { %3206 = vadd.xlane.f32.xlu0 %v3205_v17 }
 0x401   : > { %2914 = vadd.xlane.f32.xlu1 %v2913_v46  ;;  %v2919_v46 = vsel %vm2762_vm4, %v2750_v2, 0.0  ;;  %v11328_v2 = vld [vmem:[#allocation102_spill] sm:$0xff] }
 0x402   : > { %v8960_v42 = vpop.xlane.xlu1 %3137 }
 0x403   : > { %2881 = vadd.xlane.f32.xlu0 %v2880_v14  ;;  %v2671_v14 = vmul.f32 %v6973_v47, %v8579_v40  ;;  %v2752_v40 = vmul.f32 %v8973_v56, %v2682_v36 }
 0x404   : > { %v2771_v52 = vpop.xlane.xlu0 %2770 }
 0x405   : > { %v2963_v26 = vadd.f32 %v8924_v33, %v2771_v52  ;;  %3245 = vadd.xlane.f32.xlu1 %v3244_v59  ;;  %v11327_v52 = vld [vmem:[#allocation89_spill] sm:$0xff]  ;;  %v2741_v49 = vmul.f32 %v8973_v56, %v2671_v14  ;;  %v3073_v45 = vmul.f32 %v8954_v20, %v2671_v14 }
 0x406   : > { %v8986_v63 = vpop.xlane.xlu1 %2812  ;;  %6976 = vtanh.f32 %v11327_v52 }
 0x407   : > { %v8984_v17 = vsel %vm3350_vm5, %v2963_v26, %v3288_v9  ;;  %3212 = vadd.xlane.f32.xlu0 %v3211_v15  ;;  %v9011_v9 = vsel %vm3350_vm5, %v2965_v3, %v3290_v48  ;;  %6978 = vtanh.f32 %v11328_v2  ;;  %v3292_v15 = vadd.f32 %v8924_v33, %v8865_v30  ;;  %v11330_v3 = vld [vmem:[#allocation93_spill] sm:$0xff] }
 0x408   : > { %v3427_v18 = vsel %vm3423_vm6, %v8984_v17, -inf  ;;  %v2780_v41 = vpop.xlane.xlu0 %2779  ;;  %v3431_v37 = vsel %vm3423_vm6, %v9011_v9, -inf  ;;  %v2967_v30 = vadd.f32 %v8924_v33, %v8855_v7  ;;  %v11331_v7 = vld [vmem:[#allocation104_spill] sm:$0xff]  ;;  %v2743_v2 = vmul.f32 %v8973_v56, %v8582_v24 }
 0x409   : > { %v3428_v16 = vmax.f32 %v3426_v58, %v3427_v18  ;;  %2920 = vadd.xlane.f32.xlu1 %v2919_v46  ;;  %v2966_v26 = vadd.f32 %v8924_v33, %v2780_v41  ;;  %v6975_v58 = vpop.eup %6974  ;;  %v11329_v46 = vld [vmem:[#allocation91_spill] sm:$0xff] }
 0x40a   : > { %v9003_v34 = vpop.xlane.xlu1 %3143  ;;  %v2684_v47 = vmul.f32 %v6975_v58, %v8843_v6  ;;  %6980 = vtanh.f32 %v11329_v46  ;;  %v9039_v52 = vsel %vm3350_vm5, %v2967_v30, %v3292_v15  ;;  %v2898_v46 = vsel %vm2762_vm4, %v2743_v2, 0.0 }
 0x40b   : > { %2887 = vadd.xlane.f32.xlu0 %v2886_v1  ;;  %v3430_v43 = vmax.f32 %v3428_v16, %v3429_v44  ;;  %v2925_v16 = vsel %vm2762_vm4, %v2752_v40, 0.0  ;;  %v2892_v1 = vsel %vm2762_vm4, %v2741_v49, 0.0  ;;  %6982 = vtanh.f32 %v11330_v3 }
 0x40c   : > { %v3111_v59 = vpop.xlane.xlu0 %3110  ;;  %6984 = vtanh.f32 %v11331_v7  ;;  %v3256_v40 = vsel %vm2762_vm4, %v3084_v5, 0.0  ;;  %v2754_v14 = vmul.f32 %v8973_v56, %v2684_v47 }
 0x40d   : > { %v3291_v39 = vadd.f32 %v8924_v33, %v3111_v59  ;;  %3251 = vadd.xlane.f32.xlu1 %v3250_v31  ;;  %v3432_v48 = vmax.f32 %v3430_v43, %v3431_v37  ;;  %6986 = vtanh.f32 %v8587_v60 }
 0x40e   : > { %v9023_v29 = vpop.xlane.xlu1 %2818 }
 0x40f   : > { %v9021_v22 = vsel %vm3350_vm5, %v2966_v26, %v3291_v39  ;;  %3218 = vadd.xlane.f32.xlu0 %v3217_v19  ;;  %v3435_v26 = vsel %vm3423_vm6, %v9039_v52, -inf  ;;  %v3223_v39 = vsel %vm2762_vm4, %v3073_v45, 0.0 }
 0x410   : > { %v3433_v18 = vsel %vm3423_vm6, %v9021_v22, -inf  ;;  %v2786_v41 = vpop.xlane.xlu0 %2785  ;;  %v6977_v43 = vpop.eup %6976 }
 0x411   : > { %2926 = vadd.xlane.f32.xlu1 %v2925_v16  ;;  %v3434_v36 = vmax.f32 %v3432_v48, %v3433_v18  ;;  %v2968_v59 = vadd.f32 %v8924_v33, %v2786_v41  ;;  %v6979_v58 = vpop.eup %6978  ;;  %v2675_v37 = vmul.f32 %v6977_v43, %v8690_v57  ;;  %v2931_v48 = vsel %vm2762_vm4, %v2754_v14, 0.0 }
 0x412   : > { %v9041_v6 = vpop.xlane.xlu1 %3149  ;;  %v2686_v5 = vmul.f32 %v6979_v58, %v8857_v55  ;;  %v3086_v16 = vmul.f32 %v8954_v20, %v2684_v47  ;;  %v3632_v55 = vlaneseq }
 0x413   : > { %2893 = vadd.xlane.f32.xlu0 %v2892_v1  ;;  %v3436_v19 = vmax.f32 %v3434_v36, %v3435_v26  ;;  %v3075_v1 = vmul.f32 %v8954_v20, %v8582_v24  ;;  %v11332_v36 = vld [vmem:[#allocation95_spill] sm:$0xff]  ;;  %v3077_v26 = vmul.f32 %v8954_v20, %v2675_v37 }
 0x414   : > { %v3117_v44 = vpop.xlane.xlu0 %3116  ;;  %v6981_v3 = vpop.eup %6980  ;;  %6988 = vtanh.f32 %v11332_v36  ;;  %v3262_v47 = vsel %vm2762_vm4, %v3086_v16, 0.0 }
 0x415   : > { %v3293_v31 = vadd.f32 %v8924_v33, %v3117_v44  ;;  %3257 = vadd.xlane.f32.xlu1 %v3256_v40  ;;  %v6983_v44 = vpop.eup %6982  ;;  %v2756_v40 = vmul.f32 %v8973_v56, %v2686_v5  ;;  %v2677_v60 = vmul.f32 %v6981_v3, %v8705_v27  ;;  %v3229_v43 = vsel %vm2762_vm4, %v3075_v1, 0.0 }
 0x416   : > { %v9056_v15 = vpop.xlane.xlu1 %2824  ;;  %v6985_v24 = vpop.eup %6984  ;;  %v2679_v2 = vmul.f32 %v6983_v44, %v8716_v21  ;;  %v3294_v27 = vadd.f32 %v8924_v33, %v8885_v54  ;;  %v2969_v3 = vadd.f32 %v8924_v33, %v8875_v61 }
 0x417   : > { %v9054_v49 = vsel %vm3350_vm5, %v2968_v59, %v3293_v31  ;;  %3224 = vadd.xlane.f32.xlu0 %v3223_v39  ;;  %v2745_v31 = vmul.f32 %v8973_v56, %v2675_v37  ;;  %v11333_v39 = vld [vmem:[#allocation97_spill] sm:$0xff]  ;;  %v11334_v37 = vld [vmem:[#allocation99_spill] sm:$0xff]  ;;  %v2747_v54 = vmul.f32 %v8973_v56, %v2677_v60 }
 0x418   : > { %v3437_v18 = vsel %vm3423_vm6, %v9054_v49, -inf  ;;  %v2792_v41 = vpop.xlane.xlu0 %2791  ;;  %6990 = vtanh.f32 %v11333_v39  ;;  %v2749_v44 = vmul.f32 %v8973_v56, %v2679_v2  ;;  %v9104_v61 = vsel %vm3350_vm5, %v2969_v3, %v3294_v27 }
 0x419   : > { %v3438_v30 = vmax.f32 %v3436_v19, %v3437_v18  ;;  %2932 = vadd.xlane.f32.xlu1 %v2931_v48  ;;  %v3088_v18 = vmul.f32 %v8954_v20, %v2686_v5  ;;  %v3633_v48 = vshrl.u32 %v3632_v55, 7  ;;  %v2970_v16 = vadd.f32 %v8924_v33, %v2792_v41 }
 0x41a   : > { %v9068_v45 = vpop.xlane.xlu1 %3155  ;;  %6992 = vtanh.f32 %v11334_v37  ;;  %v2904_v21 = vsel %vm2762_vm4, %v2745_v31, 0.0  ;;  %v3296_v41 = vadd.f32 %v8924_v33, %v8901_v23  ;;  %v9136_v3 = vmul.f32 %v8954_v20, %v2679_v2 }
 0x41b   : > { %v3439_v57 = vrot.slane %v3438_v30, 4  ;;  %2899 = vadd.xlane.f32.xlu0 %v2898_v46 }
 0x41c   : > { %v3123_v7 = vpop.xlane.xlu0 %3122 }
 0x41d   : > { %v3440_v59 = vmax.f32 %v3438_v30, %v3439_v57  ;;  %v3295_v14 = vadd.f32 %v8924_v33, %v3123_v7  ;;  %3263 = vadd.xlane.f32.xlu1 %v3262_v47  ;;  %v2688_v30 = vmul.f32 %v6985_v24, %v8881_v0  ;;  %v2937_v57 = vsel %vm2762_vm4, %v2756_v40, 0.0  ;;  %v6987_v24 = vpop.eup %6986 }
 0x41e   : > { %v9080_v58 = vpop.xlane.xlu1 %2830  ;;  %v3235_v0 = vsel %vm2762_vm4, %v3077_v26, 0.0  ;;  %v3079_v7 = vmul.f32 %v8954_v20, %v2677_v60  ;;  %v9108_v47 = vsub.s32 0, %v3633_v48  ;;  %v3268_v40 = vsel %vm2762_vm4, %v3088_v18, 0.0  ;;  %v6989_v39 = vpop.eup %6988 }
 0x41f   : > { %v3441_v19 = vrot.slane %v3440_v59, 2  ;;  %3230 = vadd.xlane.f32.xlu0 %v3229_v43  ;;  %v9093_v5 = vsel %vm3350_vm5, %v2970_v16, %v3295_v14  ;;  %v2758_v23 = vmul.f32 %v8973_v56, %v2688_v30  ;;  %v2971_v14 = vadd.f32 %v8924_v33, %v8893_v4 }
 0x420   : > { %v2798_v46 = vpop.xlane.xlu0 %2797  ;;  %v3446_v60 = vsel %vm3423_vm6, %v9093_v5, -inf  ;;  %v2910_v18 = vsel %vm2762_vm4, %v2747_v54, 0.0  ;;  %v3445_v48 = vsel %vm3423_vm6, %v9104_v61, -inf }
 0x421   : > { %v3442_v1 = vmax.f32 %v3440_v59, %v3441_v19  ;;  %2938 = vadd.xlane.f32.xlu1 %v2937_v57  ;;  %v9106_v59 = vld [vmem:[#allocation2] sm:$0x1]  ;;  %v2690_v19 = vmul.f32 %v6987_v24, %v8939_v53  ;;  %v2972_v27 = vadd.f32 %v8924_v33, %v2798_v46  ;;  %v9123_v4 = vsel %vm3350_vm5, %v2971_v14, %v3296_v41 }
 0x422   : > { %v9099_v55 = vpop.xlane.xlu1 %3161  ;;  %v3241_v53 = vsel %vm2762_vm4, %v3079_v7, 0.0  ;;  %v3090_v57 = vmul.f32 %v8954_v20, %v2688_v30  ;;  %v9138_v54 = vpop.eup %6990  ;;  %v3298_v41 = vadd.f32 %v8924_v33, %v8919_v10  ;;  %v2916_v7 = vsel %vm2762_vm4, %v2749_v44, 0.0 }
 0x423   : > { %v3443_v36 = vrot.slane %v3442_v1, 1  ;;  %2905 = vadd.xlane.f32.xlu0 %v2904_v21  ;;  %v9151_v30 = vmul.f32 %v6989_v39, %v8731_v8  ;;  %v3448_v2 = vsel %vm3423_vm6, %v9123_v4, -inf  ;;  %v2973_v10 = vadd.f32 %v8924_v33, %v8911_v11 }
 0x424   : > { %v3129_v31 = vpop.xlane.xlu0 %3128 }
 0x425   : > { %v3444_v43 = vmax.f32 %v3442_v1, %v3443_v36  ;;  %v3297_v26 = vadd.f32 %v8924_v33, %v3129_v31  ;;  %3269 = vadd.xlane.f32.xlu1 %v3268_v40  ;;  %v3447_v1 = vmax.f32 %v3445_v48, %v3446_v60  ;;  %v2943_v36 = vsel %vm2762_vm4, %v2758_v23, 0.0  ;;  %v9158_v40 = vpop.eup %6992 }
 0x426   : > { %v9128_v37 = vpop.xlane.xlu1 %2836  ;;  %v2760_v31 = vmul.f32 %v8973_v56, %v2690_v19 }
 0x427   : > { %v9126_v16 = vmax.f32 %v9106_v59, %v3444_v43  ;;  %3236 = vadd.xlane.f32.xlu0 %v3235_v0  ;;  %v9132_v46 = vsel %vm3350_vm5, %v2972_v27, %v3297_v26  ;;  %v3449_v60 = vmax.f32 %v3447_v1, %v3448_v2  ;;  %v3274_v26 = vsel %vm2762_vm4, %v3090_v57, 0.0 }
 0x428   : > { %v2804_v21 = vpop.xlane.xlu0 %2803  ;;  %v3450_v23 = vsel %vm3423_vm6, %v9132_v46, -inf  ;;  %v3092_v27 = vmul.f32 %v8954_v20, %v2690_v19 }
 0x429   : > { %v9144_v0 = vrot.slane %v9126_v16, %v9108_v47  ;;  %4065 = vst.msk [vmem:[#allocation2] sm:$0x1] %vm4056_vm7, %v9126_v16  ;;  %2944 = vadd.xlane.f32.xlu1 %v2943_v36  ;;  %v2974_v1 = vadd.f32 %v8924_v33, %v2804_v21 }
 0x42a   : > { %v9168_v14 = vpop.xlane.xlu1 %3167 }
 0x42b   : > { %v3672_v24 = vsub.f32 %v8946_v32, %v9144_v0  ;;  %v3673_v44 = vsub.f32 %v8958_v13, %v9144_v0  ;;  %v3674_v8 = vsub.f32 %v8984_v17, %v9144_v0  ;;  %2911 = vadd.xlane.f32.xlu0 %v2910_v18  ;;  %v3675_v11 = vsub.f32 %v8993_v62, %v9144_v0 }
 0x42c   : > { %v3676_v43 = vsub.f32 %v9011_v9, %v9144_v0  ;;  %v3135_v32 = vpop.xlane.xlu0 %3134  ;;  %v9176_v13 = vsel %vm3350_vm5, %v2973_v10, %v3298_v41  ;;  %v3677_v18 = vsub.f32 %v9021_v22, %v9144_v0  ;;  %v3451_v62 = vmax.f32 %v3449_v60, %v3450_v23 }
 0x42d   : > { %v3736_v17 = vmul.f32 1.442695, %v3672_v24  ;;  %v3738_v39 = vmul.f32 1.442695, %v3673_v44  ;;  %v3740_v48 = vmul.f32 1.442695, %v3674_v8  ;;  %3275 = vadd.xlane.f32.xlu1 %v3274_v26  ;;  %v3300_v9 = vadd.f32 %v8924_v33, %v8960_v42 }
 0x42e   : > { %v3742_v36 = vmul.f32 1.442695, %v3675_v11  ;;  %v9184_v57 = vpop.xlane.xlu1 %2842  ;;  %v2949_v41 = vsel %vm2762_vm4, %v2760_v31, 0.0  ;;  %v3678_v19 = vsub.f32 %v9039_v52, %v9144_v0  ;;  %v3744_v22 = vmul.f32 1.442695, %v3676_v43  ;;  %v11335_v44 = vld [vmem:[#allocation101_spill] sm:$0xff] }
 0x42f   : > { %6994 = vpow2.f32 %v3736_v17  ;;  %3242 = vadd.xlane.f32.xlu0 %v3241_v53  ;;  %v3299_v2 = vadd.f32 %v8924_v33, %v3135_v32  ;;  %v3452_v24 = vsel %vm3423_vm6, %v9176_v13, -inf  ;;  %v2975_v42 = vadd.f32 %v8924_v33, %v8937_v38 }
 0x430   : > { %6996 = vpow2.f32 %v3738_v39  ;;  %v2810_v10 = vpop.xlane.xlu0 %2809  ;;  %v3679_v53 = vsub.f32 %v9054_v49, %v9144_v0  ;;  %v3746_v21 = vmul.f32 1.442695, %v3677_v18  ;;  %v3453_v31 = vmax.f32 %v3451_v62, %v3452_v24 }
 0x431   : > { %6998 = vpow2.f32 %v3740_v48  ;;  %v9197_v52 = vsel %vm3350_vm5, %v2974_v1, %v3299_v2  ;;  %2950 = vadd.xlane.f32.xlu1 %v2949_v41  ;;  %v9201_v8 = vsel %vm3350_vm5, %v2975_v42, %v3300_v9  ;;  %v3748_v49 = vmul.f32 1.442695, %v3678_v19 }
 0x432   : > { %7000 = vpow2.f32 %v3742_v36  ;;  %v3454_v23 = vsel %vm3423_vm6, %v9197_v52, -inf  ;;  %v9205_v38 = vpop.xlane.xlu1 %3173  ;;  %v2976_v43 = vadd.f32 %v8924_v33, %v2810_v10  ;;  %v3247_v32 = vsel %vm2762_vm4, %v9136_v3, 0.0 }
 0x433   : > { %7002 = vtanh.f32 %v11335_v44  ;;  %2917 = vadd.xlane.f32.xlu0 %v2916_v7  ;;  %v3455_v0 = vmax.f32 %v3453_v31, %v3454_v23  ;;  %v3280_v26 = vsel %vm2762_vm4, %v3092_v27, 0.0  ;;  %v3456_v17 = vsel %vm3423_vm6, %v9201_v8, -inf }
 0x434   : > { %7004 = vpow2.f32 %v3744_v22  ;;  %v3141_v11 = vpop.xlane.xlu0 %3140  ;;  %v3750_v7 = vmul.f32 1.442695, %v3679_v53  ;;  %v2751_v39 = vmul.f32 %v8973_v56, %v9151_v30  ;;  %v2683_v3 = vmul.f32 %v9138_v54, %v8741_v35 }
 0x435   : > { %v3301_v60 = vadd.f32 %v8924_v33, %v3141_v11  ;;  %7006 = vpow2.f32 %v3746_v21  ;;  %3281 = vadd.xlane.f32.xlu1 %v3280_v26  ;;  %v3457_v18 = vmax.f32 %v3455_v0, %v3456_v17  ;;  %v3083_v2 = vmul.f32 %v8954_v20, %v9151_v30 }
 0x436   : > { %v9219_v36 = vpop.xlane.xlu1 %2848  ;;  %7008 = vpow2.f32 %v3748_v49  ;;  %v2922_v22 = vsel %vm2762_vm4, %v2751_v39, 0.0  ;;  %v2753_v31 = vmul.f32 %v8973_v56, %v2683_v3  ;;  %v3085_v44 = vmul.f32 %v8954_v20, %v2683_v3  ;;  %v11336_v49 = vld [vmem:[#allocation103_spill] sm:$0xff] }
 0x437   : > { %v9217_v48 = vsel %vm3350_vm5, %v2976_v43, %v3301_v60  ;;  %3248 = vadd.xlane.f32.xlu0 %v3247_v32  ;;  %7010 = vpow2.f32 %v3750_v7  ;;  %v2685_v30 = vmul.f32 %v9158_v40, %v8757_v28  ;;  %v11337_v60 = vld [vmem:[#allocation106_spill] sm:$0xff]  ;;  %v3600_v32 = vsub.f32 %v9106_v59, %v9126_v16 }
 0x438   : > { %v3458_v27 = vsel %vm3423_vm6, %v9217_v48, -inf  ;;  %v2816_v62 = vpop.xlane.xlu0 %2815  ;;  %7012 = vtanh.f32 %v11336_v49  ;;  %v3253_v17 = vsel %vm2762_vm4, %v3083_v2, 0.0 }
 0x439   : > { %v9225_v9 = vpop.eup %6994  ;;  %v3459_v1 = vmax.f32 %v3457_v18, %v3458_v27  ;;  %7014 = vtanh.f32 %v11337_v60  ;;  %v3302_v27 = vadd.f32 %v8924_v33, %v9003_v34  ;;  %v2978_v2 = vadd.f32 %v8924_v33, %v2816_v62 }
 0x43a   : > { %v9227_v41 = vpop.eup %6996  ;;  %v3880_v19 = vsel %vm3423_vm6, %v9225_v9, 0.0  ;;  %v9238_v24 = vpop.xlane.xlu1 %3179  ;;  %v3608_v34 = vmul.f32 1.442695, %v3600_v32  ;;  %v9291_v32 = vld [vmem:[#allocation2 + $0x1] sm:$0x1] }
 0x43b   : > { %v9234_v35 = vpop.eup %6998  ;;  %v3881_v54 = vsel %vm3423_vm6, %v9227_v41, 0.0  ;;  %v3460_v10 = vrot.slane %v3459_v1, 4  ;;  %2923 = vadd.xlane.f32.xlu0 %v2922_v22 }
 0x43c   : > { %v9240_v42 = vpop.eup %7000  ;;  %v3882_v53 = vadd.f32 %v3881_v54, %v3880_v19  ;;  %v3147_v21 = vpop.xlane.xlu0 %3146  ;;  %v3883_v0 = vsel %vm3423_vm6, %v9234_v35, 0.0  ;;  %v2755_v54 = vmul.f32 %v8973_v56, %v2685_v30  ;;  %7016 = vpow2.f32 %v3608_v34 }
 0x43d   : > { %v7003_v23 = vpop.eup %7002  ;;  %v3461_v11 = vmax.f32 %v3459_v1, %v3460_v10  ;;  %v3885_v39 = vsel %vm3423_vm6, %v9240_v42, 0.0  ;;  %v3303_v40 = vadd.f32 %v8924_v33, %v3147_v21  ;;  %v2928_v1 = vsel %vm2762_vm4, %v2753_v31, 0.0 }
 0x43e   : > { %v9249_v43 = vpop.eup %7004  ;;  %v3884_v26 = vadd.f32 %v3883_v0, %v3882_v53  ;;  %v2687_v7 = vmul.f32 %v7003_v23, %v8768_v25  ;;  %v9259_v18 = vpop.xlane.xlu1 %2854  ;;  %v3259_v25 = vsel %vm2762_vm4, %v3085_v44, 0.0  ;;  %v2977_v53 = vadd.f32 %v8924_v33, %v8986_v63 }
 0x43f   : > { %v3462_v28 = vrot.slane %v3461_v11, 2  ;;  %3254 = vadd.xlane.f32.xlu0 %v3253_v17  ;;  %v9261_v3 = vpop.eup %7006  ;;  %v3887_v19 = vsel %vm3423_vm6, %v9249_v43, 0.0  ;;  %v3087_v23 = vmul.f32 %v8954_v20, %v2685_v30  ;;  %v9279_v49 = vsel %vm3350_vm5, %v2978_v2, %v3303_v40 }
 0x440   : > { %v3886_v59 = vadd.f32 %v3885_v39, %v3884_v26  ;;  %v2822_v16 = vpop.xlane.xlu0 %2821  ;;  %v9271_v10 = vpop.eup %7008  ;;  %v3889_v31 = vsel %vm3423_vm6, %v9261_v3, 0.0  ;;  %v2757_v0 = vmul.f32 %v8973_v56, %v2687_v7  ;;  %v9287_v63 = vsel %vm3350_vm5, %v2977_v53, %v3302_v27 }
 0x441   : > { %v3463_v22 = vmax.f32 %v3461_v11, %v3462_v28  ;;  %11338 = vst [vmem:[#allocation83_spill] sm:$0xff] %v9271_v10  ;;  %v9284_v11 = vpop.eup %7010  ;;  %v3304_v30 = vadd.f32 %v8924_v33, %v9041_v6  ;;  %v3089_v17 = vmul.f32 %v8954_v20, %v2687_v7  ;;  %v2979_v39 = vadd.f32 %v8924_v33, %v9023_v29 }
 0x442   : > { %v3888_v21 = vadd.f32 %v3887_v19, %v3886_v59  ;;  %v9281_v62 = vpop.xlane.xlu1 %3185  ;;  %v3891_v28 = vsel %vm3423_vm6, %v9271_v10, 0.0  ;;  %v3467_v6 = vsel %vm3423_vm6, %v9279_v49, -inf  ;;  %v7013_v19 = vpop.eup %7012  ;;  %v3893_v7 = vsel %vm3423_vm6, %v9284_v11, 0.0 }
 0x443   : > { %v3464_v44 = vrot.slane %v3463_v22, 1  ;;  %2929 = vadd.xlane.f32.xlu0 %v2928_v1  ;;  %v3306_v1 = vadd.f32 %v8924_v33, %v9068_v45  ;;  %v2980_v2 = vadd.f32 %v8924_v33, %v2822_v16  ;;  %v2934_v53 = vsel %vm2762_vm4, %v2755_v54, 0.0  ;;  %v9312_v34 = vpop.eup %7014 }
 0x444   : > { %v3890_v60 = vadd.f32 %v3889_v31, %v3888_v21  ;;  %v3153_v26 = vpop.xlane.xlu0 %3152  ;;  %v3466_v45 = vsel %vm3423_vm6, %v9287_v63, -inf  ;;  %v9317_v31 = vsel %vm3350_vm5, %v2979_v39, %v3304_v30  ;;  %v9336_v39 = vsel %vm2762_vm4, %v3089_v17, 0.0 }
 0x445   : > { %v3465_v40 = vmax.f32 %v3463_v22, %v3464_v44  ;;  %v3305_v59 = vadd.f32 %v8924_v33, %v3153_v26  ;;  %v2981_v44 = vadd.f32 %v8924_v33, %v9056_v15  ;;  %v3265_v26 = vsel %vm2762_vm4, %v3087_v23, 0.0 }
 0x446   : > { %v3892_v27 = vadd.f32 %v3891_v28, %v3890_v60  ;;  %v9309_v22 = vpop.xlane.xlu1 %2860  ;;  %v2940_v15 = vsel %vm2762_vm4, %v2757_v0, 0.0 }
 0x447   : > { %v9306_v29 = vmax.f32 %v9291_v32, %v3465_v40  ;;  %3260 = vadd.xlane.f32.xlu0 %v3259_v25  ;;  %v3468_v25 = vmax.f32 %v3466_v45, %v3467_v6  ;;  %v9328_v54 = vsel %vm3350_vm5, %v2980_v2, %v3305_v59  ;;  %v9332_v30 = vsel %vm3350_vm5, %v2981_v44, %v3306_v1 }
 0x448   : > { %v3894_v21 = vadd.f32 %v3893_v7, %v3892_v27  ;;  %v2828_v60 = vpop.xlane.xlu0 %2827  ;;  %v3469_v40 = vsel %vm3423_vm6, %v9317_v31, -inf  ;;  %v3471_v7 = vsel %vm3423_vm6, %v9328_v54, -inf  ;;  %v2689_v2 = vmul.f32 %v7013_v19, %v8783_v50  ;;  %v9363_v50 = vpop.eup %7016  ;;  %v3864_v19 = vld [vmem:[#allocation3] sm:$0x1] }
 0x449   : > { %v9323_v16 = vrot.slane %v9306_v29, %v9108_v47  ;;  %4066 = vst.msk [vmem:[#allocation2 + $0x1] sm:$0x1] %vm4056_vm7, %v9306_v29 }
 0x44a   : > { %v3895_v28 = vrot.slane %v3894_v21, 4  ;;  %v9346_v1 = vpop.xlane.xlu1 %3191 }
 0x44b   : > { %v3680_v27 = vsub.f32 %v9104_v61, %v9323_v16  ;;  %v3681_v59 = vsub.f32 %v9093_v5, %v9323_v16  ;;  %v3682_v23 = vsub.f32 %v9123_v4, %v9323_v16  ;;  %2935 = vadd.xlane.f32.xlu0 %v2934_v53  ;;  %v3683_v0 = vsub.f32 %v9132_v46, %v9323_v16 }
 0x44c   : > { %v3896_v6 = vadd.f32 %v3895_v28, %v3894_v21  ;;  %v3684_v17 = vsub.f32 %v9176_v13, %v9323_v16  ;;  %v3159_v61 = vpop.xlane.xlu0 %3158  ;;  %v3473_v5 = vsel %vm3423_vm6, %v9332_v30, -inf  ;;  %v3470_v53 = vmax.f32 %v3468_v25, %v3469_v40 }
 0x44d   : > { %v3752_v4 = vmul.f32 1.442695, %v3680_v27  ;;  %v3685_v21 = vsub.f32 %v9197_v52, %v9323_v16  ;;  %v3754_v44 = vmul.f32 1.442695, %v3681_v59  ;;  %v3756_v46 = vmul.f32 1.442695, %v3682_v23 }
 0x44e   : > { %v3897_v45 = vrot.slane %v3896_v6, 2  ;;  %v3308_v13 = vadd.f32 %v8924_v33, %v9099_v55  ;;  %v3758_v28 = vmul.f32 1.442695, %v3683_v0  ;;  %v3472_v12 = vmax.f32 %v3470_v53, %v3471_v7  ;;  %v9361_v10 = vpop.xlane.xlu1 %2866 }
 0x44f   : > { %7018 = vpow2.f32 %v3752_v4  ;;  %3266 = vadd.xlane.f32.xlu0 %v3265_v26  ;;  %v3686_v25 = vsub.f32 %v9201_v8, %v9323_v16  ;;  %v3760_v52 = vmul.f32 1.442695, %v3684_v17  ;;  %v2983_v59 = vadd.f32 %v8924_v33, %v9080_v58 }
 0x450   : > { %v3898_v27 = vadd.f32 %v3897_v45, %v3896_v6  ;;  %7020 = vpow2.f32 %v3754_v44  ;;  %v2834_v40 = vpop.xlane.xlu0 %2833  ;;  %v2982_v55 = vadd.f32 %v8924_v33, %v2828_v60  ;;  %v3307_v26 = vadd.f32 %v8924_v33, %v3159_v61 }
 0x451   : > { %7022 = vpow2.f32 %v3756_v46  ;;  %v3687_v0 = vsub.f32 %v9217_v48, %v9323_v16  ;;  %v3762_v6 = vmul.f32 1.442695, %v3685_v21  ;;  %v3872_v7 = vmul.f32 %v9363_v50, %v3864_v19 }
 0x452   : > { %v3899_v23 = vrot.slane %v3898_v27, 1  ;;  %7024 = vpow2.f32 %v3758_v28  ;;  %v9375_v8 = vsel %vm3350_vm5, %v2983_v59, %v3308_v13  ;;  %v3474_v17 = vmax.f32 %v3472_v12, %v3473_v5  ;;  %v9380_v58 = vpop.xlane.xlu1 %3197 }
 0x453   : > { %v9378_v4 = vsel %vm3350_vm5, %v2982_v55, %v3307_v26  ;;  %2941 = vadd.xlane.f32.xlu0 %v2940_v15  ;;  %7026 = vpow2.f32 %v3760_v52  ;;  %v3764_v61 = vmul.f32 1.442695, %v3686_v25  ;;  %v2984_v45 = vadd.f32 %v8924_v33, %v2834_v40 }
 0x454   : > { %v3900_v60 = vadd.f32 %v3899_v23, %v3898_v27  ;;  %v3475_v48 = vsel %vm3423_vm6, %v9378_v4, -inf  ;;  %v3165_v16 = vpop.xlane.xlu0 %3164  ;;  %v2759_v12 = vmul.f32 %v8973_v56, %v2689_v2  ;;  %v3477_v15 = vsel %vm3423_vm6, %v9375_v8, -inf }
 0x455   : > { %v3476_v53 = vmax.f32 %v3474_v17, %v3475_v48  ;;  %v3309_v21 = vadd.f32 %v8924_v33, %v3165_v16  ;;  %7028 = vpow2.f32 %v3762_v6  ;;  %v3766_v44 = vmul.f32 1.442695, %v3687_v0 }
 0x456   : > { %v4048_v5 = vadd.f32 %v3900_v60, %v3872_v7  ;;  %v9393_v28 = vpop.xlane.xlu1 %2872  ;;  %7030 = vpow2.f32 %v3764_v61  ;;  %v3091_v40 = vmul.f32 %v8954_v20, %v2689_v2  ;;  %v2691_v55 = vmul.f32 %v9312_v34, %v8819_v51 }
 0x457   : > { %v3478_v46 = vmax.f32 %v3476_v53, %v3477_v15  ;;  %v9390_v13 = vsel %vm3350_vm5, %v2984_v45, %v3309_v21  ;;  %3272 = vadd.xlane.f32.xlu0 %v9336_v39  ;;  %7032 = vpow2.f32 %v3766_v44  ;;  %v2946_v26 = vsel %vm2762_vm4, %v2759_v12, 0.0 }
 0x458   : > { %4057 = vst.msk [vmem:[#allocation3] sm:$0x1] %vm4056_vm7, %v4048_v5  ;;  %v3479_v19 = vsel %vm3423_vm6, %v9390_v13, -inf  ;;  %v2840_v27 = vpop.xlane.xlu0 %2839  ;;  %v3601_v48 = vsub.f32 %v9291_v32, %v9306_v29  ;;  %v3277_v53 = vsel %vm2762_vm4, %v3091_v40, 0.0  ;;  %v2761_v45 = vmul.f32 %v8973_v56, %v2691_v55 }
 0x459   : > { %v9398_v25 = vpop.eup %7018  ;;  %v3480_v52 = vmax.f32 %v3478_v46, %v3479_v19  ;;  %v3093_v32 = vmul.f32 %v8954_v20, %v2691_v55  ;;  %v3310_v29 = vadd.f32 %v8924_v33, %v9168_v14  ;;  %v2986_v40 = vadd.f32 %v8924_v33, %v2840_v27 }
 0x45a   : > { %v9401_v59 = vpop.eup %7020  ;;  %v3901_v39 = vsel %vm3423_vm6, %v9398_v25, 0.0  ;;  %v9412_v7 = vpop.xlane.xlu1 %3203 }
 0x45b   : > { %v9408_v23 = vpop.eup %7022  ;;  %v3902_v0 = vsel %vm3423_vm6, %v9401_v59, 0.0  ;;  %v3481_v6 = vrot.slane %v3480_v52, 4  ;;  %2947 = vadd.xlane.f32.xlu0 %v2946_v26  ;;  %v3610_v26 = vmul.f32 1.442695, %v3601_v48  ;;  %v3312_v48 = vadd.f32 %v8924_v33, %v9205_v38 }
 0x45c   : > { %v9414_v2 = vpop.eup %7024  ;;  %v3903_v17 = vadd.f32 %v3902_v0, %v3901_v39  ;;  %v3171_v60 = vpop.xlane.xlu0 %3170  ;;  %v3904_v51 = vsel %vm3423_vm6, %v9408_v23, 0.0 }
 0x45d   : > { %v3482_v34 = vmax.f32 %v3480_v52, %v3481_v6  ;;  %v9418_v61 = vpop.eup %7026  ;;  %v3906_v21 = vsel %vm3423_vm6, %v9414_v2, 0.0  ;;  %v3311_v5 = vadd.f32 %v8924_v33, %v3171_v60  ;;  %v2952_v6 = vsel %vm2762_vm4, %v2761_v45, 0.0 }
 0x45e   : > { %v3905_v16 = vadd.f32 %v3904_v51, %v3903_v17  ;;  %v9427_v15 = vpop.xlane.xlu1 %2878  ;;  %v3908_v56 = vsel %vm3423_vm6, %v9418_v61, 0.0  ;;  %v2985_v17 = vadd.f32 %v8924_v33, %v9128_v37  ;;  %v2987_v51 = vadd.f32 %v8924_v33, %v9184_v57  ;;  %v9455_v37 = vld [vmem:[#allocation2 + $0x2] sm:$0x1] }
 0x45f   : > { %v3483_v12 = vrot.slane %v3482_v34, 2  ;;  %3278 = vadd.xlane.f32.xlu0 %v3277_v53  ;;  %v9429_v44 = vpop.eup %7028  ;;  %v9445_v14 = vsel %vm3350_vm5, %v2986_v40, %v3311_v5  ;;  %v3283_v53 = vsel %vm2762_vm4, %v3093_v32, 0.0  ;;  %7034 = vpow2.f32 %v3610_v26 }
 0x460   : > { %v3907_v46 = vadd.f32 %v3906_v21, %v3905_v16  ;;  %v2846_v19 = vpop.xlane.xlu0 %2845  ;;  %v9437_v39 = vpop.eup %7030  ;;  %v3910_v20 = vsel %vm3423_vm6, %v9429_v44, 0.0  ;;  %v9459_v45 = vsel %vm3350_vm5, %v2985_v17, %v3310_v29  ;;  %v3488_v38 = vsel %vm3423_vm6, %v9445_v14, -inf }
 0x461   : > { %v3484_v52 = vmax.f32 %v3482_v34, %v3483_v12  ;;  %v9449_v27 = vpop.eup %7032  ;;  %v3912_v21 = vsel %vm3423_vm6, %v9437_v39, 0.0  ;;  %v3487_v40 = vsel %vm3423_vm6, %v9459_v45, -inf }
 0x462   : > { %v3909_v0 = vadd.f32 %v3908_v56, %v3907_v46  ;;  %v9447_v60 = vpop.xlane.xlu1 %3209  ;;  %v3314_v46 = vadd.f32 %v8924_v33, %v9238_v24  ;;  %v3914_v32 = vsel %vm3423_vm6, %v9449_v27, 0.0  ;;  %v2988_v56 = vadd.f32 %v8924_v33, %v2846_v19 }
 0x463   : > { %v3485_v55 = vrot.slane %v3484_v52, 1  ;;  %2953 = vadd.xlane.f32.xlu0 %v2952_v6  ;;  %v9479_v24 = vsel %vm3350_vm5, %v2987_v51, %v3312_v48  ;;  %v3489_v19 = vmax.f32 %v3487_v40, %v3488_v38 }
 0x464   : > { %v3911_v34 = vadd.f32 %v3910_v20, %v3909_v0  ;;  %v3177_v16 = vpop.xlane.xlu0 %3176  ;;  %v2989_v0 = vadd.f32 %v8924_v33, %v9219_v36 }
 0x465   : > { %v3486_v12 = vmax.f32 %v3484_v52, %v3485_v55  ;;  %v3313_v5 = vadd.f32 %v8924_v33, %v3177_v16  ;;  %v3490_v33 = vsel %vm3423_vm6, %v9479_v24, -inf }
 0x466   : > { %v3913_v57 = vadd.f32 %v3912_v21, %v3911_v34  ;;  %v9474_v52 = vpop.xlane.xlu1 %2884  ;;  %v9492_v51 = vsel %vm3350_vm5, %v2989_v0, %v3314_v46 }
 0x467   : > { %v9471_v29 = vmax.f32 %v9455_v37, %v3486_v12  ;;  %3284 = vadd.xlane.f32.xlu0 %v3283_v53  ;;  %v9488_v20 = vsel %vm3350_vm5, %v2988_v56, %v3313_v5 }
 0x468   : > { %v3915_v26 = vadd.f32 %v3914_v32, %v3913_v57  ;;  %v2852_v6 = vpop.xlane.xlu0 %2851  ;;  %5122 = vxpose.xlu1.b32.start.end [1/1] (short) (narrow) %v9363_v50, 8  ;;  %v3492_v12 = vsel %vm3423_vm6, %v9488_v20, -inf  ;;  %v3494_v57 = vsel %vm3423_vm6, %v9492_v51, -inf }
 0x469   : > { %v3643_v17 = vrot.slane %v9471_v29, %v9108_v47  ;;  %4067 = vst.msk [vmem:[#allocation2 + $0x2] sm:$0x1] %vm4056_vm7, %v9471_v29  ;;  %v9517_v0 = vpop.eup %7034 }
 0x46a   : > { %v3916_v55 = vrot.slane %v3915_v26, 4  ;;  %v9499_v16 = vpop.xlane.xlu1 %3215 }
 0x46b   : > { %v3688_v36 = vsub.f32 %v9287_v63, %v3643_v17  ;;  %v3689_v34 = vsub.f32 %v9279_v49, %v3643_v17  ;;  %v3690_v48 = vsub.f32 %v9317_v31, %v3643_v17  ;;  %v3691_v21 = vsub.f32 %v9328_v54, %v3643_v17  ;;  %v9511_v54 = vld [vmem:[%s10985_s6] ss:$0 sm:$0xff] }
 0x46c   : > { %v3917_v53 = vadd.f32 %v3916_v55, %v3915_v26  ;;  %v3692_v50 = vsub.f32 %v9332_v30, %v3643_v17  ;;  %v3183_v5 = vpop.xlane.xlu0 %3182  ;;  %v3491_v63 = vmax.f32 %v3489_v19, %v3490_v33  ;;  %v3693_v49 = vsub.f32 %v9378_v4, %v3643_v17  ;;  %v3865_v19 = vld [vmem:[#allocation3 + $0x1] sm:$0x1] }
 0x46d   : > { %v3768_v46 = vmul.f32 1.442695, %v3688_v36  ;;  %v3770_v31 = vmul.f32 1.442695, %v3689_v34  ;;  %v3772_v32 = vmul.f32 1.442695, %v3690_v48  ;;  %v3316_v30 = vadd.f32 %v9511_v54, %v9281_v62 }
 0x46e   : > { %v3918_v38 = vrot.slane %v3917_v53, 2  ;;  %v3774_v56 = vmul.f32 1.442695, %v3691_v21  ;;  %v3493_v40 = vmax.f32 %v3491_v63, %v3492_v12  ;;  %v9515_v26 = vpop.xlane.xlu1 %2890  ;;  %v3694_v4 = vsub.f32 %v9375_v8, %v3643_v17 }
 0x46f   : > { %7036 = vpow2.f32 %v3768_v46  ;;  %v3776_v33 = vmul.f32 1.442695, %v3692_v50  ;;  %v2991_v34 = vadd.f32 %v9511_v54, %v9259_v18  ;;  %v2990_v62 = vadd.f32 %v9511_v54, %v2852_v6 }
 0x470   : > { %v3919_v55 = vadd.f32 %v3918_v38, %v3917_v53  ;;  %7038 = vpow2.f32 %v3770_v31  ;;  %v2858_v36 = vpop.xlane.xlu0 %2857  ;;  %v3315_v48 = vadd.f32 %v9511_v54, %v3183_v5  ;;  %v3695_v12 = vsub.f32 %v9390_v13, %v3643_v17 }
 0x471   : > { %7040 = vpow2.f32 %v3772_v32  ;;  %v3778_v46 = vmul.f32 1.442695, %v3693_v49  ;;  %v3873_v53 = vmul.f32 %v9517_v0, %v3865_v19  ;;  %v9527_v8 = vsel %vm3350_vm5, %v2991_v34, %v3316_v30 }
 0x472   : > { %v3920_v21 = vrot.slane %v3919_v55, 1  ;;  %7042 = vpow2.f32 %v3774_v56  ;;  %v3495_v50 = vmax.f32 %v3493_v40, %v3494_v57  ;;  %v9530_v63 = vsel %vm3350_vm5, %v2990_v62, %v3315_v48  ;;  %v9534_v31 = vpop.xlane.xlu1 %3221 }
 0x473   : > { %7044 = vpow2.f32 %v3776_v33  ;;  %v3780_v38 = vmul.f32 1.442695, %v3694_v4  ;;  %v3496_v6 = vsel %vm3423_vm6, %v9530_v63, -inf  ;;  %v2992_v17 = vadd.f32 %v9511_v54, %v2858_v36 }
 0x474   : > { %v3921_v18 = vadd.f32 %v3920_v21, %v3919_v55  ;;  %v3189_v5 = vpop.xlane.xlu0 %3188  ;;  %v3497_v13 = vmax.f32 %v3495_v50, %v3496_v6  ;;  %v3498_v57 = vsel %vm3423_vm6, %v9527_v8, -inf  ;;  %7046 = vpow2.f32 %v3778_v46 }
 0x475   : > { %v3317_v49 = vadd.f32 %v9511_v54, %v3189_v5  ;;  %v3782_v30 = vmul.f32 1.442695, %v3695_v12  ;;  %7048 = vpow2.f32 %v3780_v38  ;;  %v3602_v5 = vsub.f32 %v9455_v37, %v9471_v29 }
 0x476   : > { %v4049_v32 = vadd.f32 %v3921_v18, %v3873_v53  ;;  %v3499_v56 = vmax.f32 %v3497_v13, %v3498_v57  ;;  %v9552_v62 = vpop.xlane.xlu1 %2896 }
 0x477   : > { %v9541_v40 = vsel %vm3350_vm5, %v2992_v17, %v3317_v49  ;;  %7050 = vpow2.f32 %v3782_v30 }
 0x478   : > { %4058 = vst.msk [vmem:[#allocation3 + $0x1] sm:$0x1] %vm4056_vm7, %v4049_v32  ;;  %v3500_v19 = vsel %vm3423_vm6, %v9541_v40, -inf  ;;  %v2864_v55 = vpop.xlane.xlu0 %2863 }
 0x479   : > { %v9546_v4 = vpop.eup %7036  ;;  %v3501_v33 = vmax.f32 %v3499_v56, %v3500_v19  ;;  %v2994_v29 = vadd.f32 %v9511_v54, %v2864_v55 }
 0x47a   : > { %11339 = vst [vmem:[#allocation76_spill] sm:$0xff] %v9546_v4  ;;  %v9548_v36 = vpop.eup %7038  ;;  %v3922_v34 = vsel %vm3423_vm6, %v9546_v4, 0.0  ;;  %v9572_v56 = vpop.xlane.xlu1 %3227 }
 0x47b   : > { %v9554_v48 = vpop.eup %7040  ;;  %v3923_v21 = vsel %vm3423_vm6, %v9548_v36, 0.0  ;;  %v3502_v12 = vrot.slane %v3501_v33, 4 }
 0x47c   : > { %11340 = vst [vmem:[#allocation85_spill] sm:$0xff] %v9554_v48  ;;  %v9558_v46 = vpop.eup %7042  ;;  %v3924_v53 = vadd.f32 %v3923_v21, %v3922_v34  ;;  %v3195_v50 = vpop.xlane.xlu0 %3194  ;;  %v3925_v18 = vsel %vm3423_vm6, %v9554_v48, 0.0  ;;  %v11153_v21 = vmov 1  }
 0x47d   : > { %11341 = vst [vmem:[#allocation77_spill] sm:$0xff] %v9558_v46  ;;  %v3503_v38 = vmax.f32 %v3501_v33, %v3502_v12  ;;  %4080 = vperm.xlu0 %6583, %v9227_v41   ;;  %v9563_v6 = vpop.eup %7044  ;;  %v3927_v17 = vsel %vm3423_vm6, %v9558_v46, 0.0  ;;  %v3319_v32 = vadd.f32 %v9511_v54, %v3195_v50  ;;  %v3318_v33 = vadd.f32 %v9511_v54, %v9346_v1 }
 0x47e   : > { %11342 = vst [vmem:[#allocation87_spill] sm:$0xff] %v9563_v6  ;;  %v3926_v13 = vadd.f32 %v3925_v18, %v3924_v53  ;;  %v9570_v57 = vpop.eup %7046  ;;  %v3929_v34 = vsel %vm3423_vm6, %v9563_v6, 0.0  ;;  %v3612_v53 = vmul.f32 1.442695, %v3602_v5  ;;  %v2993_v18 = vadd.f32 %v9511_v54, %v9309_v22 }
 0x47f   : > { %v3504_v49 = vrot.slane %v3503_v38, 2  ;;  %11343 = vst [vmem:[#allocation78_spill] sm:$0xff] %v9570_v57  ;;  %v9580_v12 = vpop.eup %7048  ;;  %v3931_v1 = vsel %vm3423_vm6, %v9570_v57, 0.0  ;;  %v3320_v5 = vadd.f32 %v9511_v54, %v9380_v58  ;;  %v3866_v57 = vld [vmem:[#allocation3 + $0x2] sm:$0x1] }
 0x480   : > { %v3928_v30 = vadd.f32 %v3927_v17, %v3926_v13  ;;  %v2870_v19 = vpop.xlane.xlu0 %2869  ;;  %11344 = vst [vmem:[#allocation105_spill] sm:$0xff] %v9580_v12  ;;  %v2995_v17 = vadd.f32 %v9511_v54, %v9361_v10  ;;  %v9599_v22 = vsel %vm3350_vm5, %v2993_v18, %v3318_v33  ;;  %7052 = vpow2.f32 %v3612_v53 }
 0x481   : > { %v3505_v37 = vmax.f32 %v3503_v38, %v3504_v49  ;;  %6584 = vset.pattern.permute.xlu0 %v11153_v21  ;;  %v9588_v38 = vsel %vm3350_vm5, %v2994_v29, %v3319_v32  ;;  %v9590_v55 = vpop.eup %7050  ;;  %v3933_v21 = vsel %vm3423_vm6, %v9580_v12, 0.0  ;;  %v3322_v10 = vadd.f32 %v9511_v54, %v9412_v7 }
 0x482   : > { %v3930_v50 = vadd.f32 %v3929_v34, %v3928_v30  ;;  %4626 = vperm.xlu0 %6584, %v9225_v9   ;;  %11345 = vst [vmem:[#allocation88_spill] sm:$0xff] %v9590_v55  ;;  %v9596_v30 = vld [vmem:[#allocation2 + $0x3] sm:$0x1]  ;;  %v3509_v58 = vsel %vm3423_vm6, %v9588_v38, -inf  ;;  %v3935_v33 = vsel %vm3423_vm6, %v9590_v55, 0.0  ;;  %v11346_v53 = vmov 0  }
 0x483   : > { %v3506_v13 = vrot.slane %v3505_v37, 1  ;;  %v3508_v7 = vsel %vm3423_vm6, %v9599_v22, -inf }
 0x484   : > { %v3932_v49 = vadd.f32 %v3931_v1, %v3930_v50  ;;  %v3201_v34 = vpop.xlane.xlu0 %3200  ;;  %v9608_v50 = vpop.xlane.xlu1 %2902  ;;  %v9621_v1 = vsel %vm3350_vm5, %v2995_v17, %v3320_v5 }
 0x485   : > { %v3507_v32 = vmax.f32 %v3505_v37, %v3506_v13  ;;  %v3321_v29 = vadd.f32 %v9511_v54, %v3201_v34  ;;  %v2996_v37 = vadd.f32 %v9511_v54, %v2870_v19  ;;  %v2997_v13 = vadd.f32 %v9511_v54, %v9393_v28 }
 0x486   : > { %v3934_v6 = vadd.f32 %v3933_v21, %v3932_v49  ;;  %4638 = vperm.xlu0 %6584, %v9240_v42   ;;  %6582 = vset.pattern.permute.xlu1 %v11346_v53  ;;  %v3510_v19 = vmax.f32 %v3508_v7, %v3509_v58 }
 0x487   : > { %v9614_v18 = vmax.f32 %v9596_v30, %v3507_v32  ;;  %4075 = vperm.xlu1 %6582, %v9225_v9   ;;  %v9633_v32 = vsel %vm3350_vm5, %v2996_v37, %v3321_v29  ;;  %v9636_v17 = vsel %vm3350_vm5, %v2997_v13, %v3322_v10  ;;  %v3511_v9 = vsel %vm3423_vm6, %v9621_v1, -inf }
 0x488   : > { %v3936_v21 = vadd.f32 %v3935_v33, %v3934_v6  ;;  %v2876_v49 = vpop.xlane.xlu0 %2875  ;;  %v3513_v37 = vsel %vm3423_vm6, %v9633_v32, -inf  ;;  %v9653_v7 = vpop.xlane.xlu1 %3233 }
 0x489   : > { %v9628_v34 = vrot.slane %v9614_v18, %v9108_v47  ;;  %4068 = vst.msk [vmem:[#allocation2 + $0x3] sm:$0x1] %vm4056_vm7, %v9614_v18 }
 0x48a   : > { %v3937_v6 = vrot.slane %v3936_v21, 4  ;;  %4646 = vperm.xlu0 %6584, %v9261_v3   ;;  %v9663_v55 = vpop.eup %7052 }
 0x48b   : > { %v3696_v28 = vsub.f32 %v9459_v45, %v9628_v34  ;;  %v3697_v5 = vsub.f32 %v9445_v14, %v9628_v34  ;;  %v3698_v58 = vsub.f32 %v9479_v24, %v9628_v34  ;;  %v3699_v33 = vsub.f32 %v9488_v20, %v9628_v34  ;;  %4085 = vperm.xlu1 %6582, %v9234_v35  }
 0x48c   : > { %v3938_v29 = vadd.f32 %v3937_v6, %v3936_v21  ;;  %v3700_v10 = vsub.f32 %v9492_v51, %v9628_v34  ;;  %v3207_v13 = vpop.xlane.xlu0 %3206  ;;  %v3515_v14 = vsel %vm3423_vm6, %v9636_v17, -inf  ;;  %v3512_v24 = vmax.f32 %v3510_v19, %v3511_v9 }
 0x48d   : > { %v3784_v45 = vmul.f32 1.442695, %v3696_v28  ;;  %v3701_v20 = vsub.f32 %v9530_v63, %v9628_v34  ;;  %v3786_v6 = vmul.f32 1.442695, %v3697_v5  ;;  %v3788_v12 = vmul.f32 1.442695, %v3698_v58 }
 0x48e   : > { %v3939_v21 = vrot.slane %v3938_v29, 2  ;;  %4654 = vperm.xlu0 %6584, %v9284_v11   ;;  %v3324_v51 = vadd.f32 %v9511_v54, %v9447_v60  ;;  %v3790_v48 = vmul.f32 1.442695, %v3699_v33  ;;  %v3514_v4 = vmax.f32 %v3512_v24, %v3513_v37 }
 0x48f   : > { %7054 = vpow2.f32 %v3784_v45  ;;  %v3702_v19 = vsub.f32 %v9527_v8, %v9628_v34  ;;  %v3792_v9 = vmul.f32 1.442695, %v3700_v10  ;;  %4090 = vperm.xlu1 %6582, %v9240_v42   ;;  %v2999_v28 = vadd.f32 %v9511_v54, %v9427_v15  ;;  %v9674_v8 = vpop.xlane.xlu1 %2908 }
 0x490   : > { %v3940_v46 = vadd.f32 %v3939_v21, %v3938_v29  ;;  %7056 = vpow2.f32 %v3786_v6  ;;  %v2882_v63 = vpop.xlane.xlu0 %2881  ;;  %v2998_v60 = vadd.f32 %v9511_v54, %v2876_v49  ;;  %v3323_v5 = vadd.f32 %v9511_v54, %v3207_v13 }
 0x491   : > { %7058 = vpow2.f32 %v3788_v12  ;;  %v3703_v29 = vsub.f32 %v9541_v40, %v9628_v34  ;;  %v3794_v33 = vmul.f32 1.442695, %v3701_v20  ;;  %v3874_v10 = vmul.f32 %v9663_v55, %v3866_v57 }
 0x492   : > { %v3941_v58 = vrot.slane %v3940_v46, 1  ;;  %7060 = vpow2.f32 %v3790_v48  ;;  %v9678_v42 = vsel %vm3350_vm5, %v2999_v28, %v3324_v51  ;;  %v3516_v37 = vmax.f32 %v3514_v4, %v3515_v14 }
 0x493   : > { %v9681_v15 = vsel %vm3350_vm5, %v2998_v60, %v3323_v5  ;;  %7062 = vpow2.f32 %v3792_v9  ;;  %v3796_v49 = vmul.f32 1.442695, %v3702_v19  ;;  %4095 = vperm.xlu1 %6582, %v9249_v43   ;;  %v3000_v34 = vadd.f32 %v9511_v54, %v2882_v63  ;;  %v9694_v21 = vpop.xlane.xlu1 %3239 }
 0x494   : > { %v3942_v12 = vadd.f32 %v3941_v58, %v3940_v46  ;;  %v3517_v13 = vsel %vm3423_vm6, %v9681_v15, -inf  ;;  %v3213_v40 = vpop.xlane.xlu0 %3212  ;;  %v3519_v4 = vsel %vm3423_vm6, %v9678_v42, -inf  ;;  %7064 = vpow2.f32 %v3794_v33 }
 0x495   : > { %v3518_v48 = vmax.f32 %v3516_v37, %v3517_v13  ;;  %v3325_v57 = vadd.f32 %v9511_v54, %v3213_v40  ;;  %v3798_v14 = vmul.f32 1.442695, %v3703_v29  ;;  %7066 = vpow2.f32 %v3796_v49 }
 0x496   : > { %v4050_v45 = vadd.f32 %v3942_v12, %v3874_v10  ;;  %v3603_v49 = vsub.f32 %v9596_v30, %v9614_v18 }
 0x497   : > { %v3520_v46 = vmax.f32 %v3518_v48, %v3519_v4  ;;  %v9691_v24 = vsel %vm3350_vm5, %v3000_v34, %v3325_v57  ;;  %4100 = vperm.xlu1 %6582, %v9261_v3   ;;  %7068 = vpow2.f32 %v3798_v14  ;;  %v11347_v3 = vld [vmem:[#allocation83_spill] sm:$0xff]  ;;  %v9718_v40 = vpop.xlane.xlu1 %2914 }
 0x498   : > { %4059 = vst.msk [vmem:[#allocation3 + $0x2] sm:$0x1] %vm4056_vm7, %v4050_v45  ;;  %v3521_v20 = vsel %vm3423_vm6, %v9691_v24, -inf  ;;  %v2888_v6 = vpop.xlane.xlu0 %2887 }
 0x499   : > { %v9699_v51 = vpop.eup %7054  ;;  %v3522_v19 = vmax.f32 %v3520_v46, %v3521_v20  ;;  %v3326_v46 = vadd.f32 %v9511_v54, %v9499_v16  ;;  %v3002_v20 = vadd.f32 %v9511_v54, %v2888_v6 }
 0x49a   : > { %v9701_v9 = vpop.eup %7056  ;;  %v3943_v63 = vsel %vm3423_vm6, %v9699_v51, 0.0 }
 0x49b   : > { %v9705_v28 = vpop.eup %7058  ;;  %v3944_v60 = vsel %vm3423_vm6, %v9701_v9, 0.0  ;;  %v3523_v5 = vrot.slane %v3522_v19, 4  ;;  %4105 = vperm.xlu1 %6582, %v11347_v3  }
 0x49c   : > { %v9709_v58 = vpop.eup %7060  ;;  %v3945_v29 = vadd.f32 %v3944_v60, %v3943_v63  ;;  %v3219_v33 = vpop.xlane.xlu0 %3218  ;;  %v3946_v10 = vsel %vm3423_vm6, %v9705_v28, 0.0  ;;  %v3614_v63 = vmul.f32 1.442695, %v3603_v49  ;;  %v9746_v49 = vld [vmem:[#allocation2 + $0x4] sm:$0x1] }
 0x49d   : > { %v3524_v37 = vmax.f32 %v3522_v19, %v3523_v5  ;;  %v9714_v12 = vpop.eup %7062  ;;  %v3948_v48 = vsel %vm3423_vm6, %v9709_v58, 0.0  ;;  %v3327_v57 = vadd.f32 %v9511_v54, %v3219_v33  ;;  %v3001_v5 = vadd.f32 %v9511_v54, %v9474_v52 }
 0x49e   : > { %11348 = vst [vmem:[#allocation79_spill] sm:$0xff] %v9714_v12  ;;  %v3947_v13 = vadd.f32 %v3946_v10, %v3945_v29  ;;  %v9723_v45 = vpop.eup %7064  ;;  %v3950_v30 = vsel %vm3423_vm6, %v9714_v12, 0.0  ;;  %v3003_v10 = vadd.f32 %v9511_v54, %v9515_v26  ;;  %7070 = vpow2.f32 %v3614_v63 }
 0x49f   : > { %v3525_v34 = vrot.slane %v3524_v37, 2  ;;  %4110 = vperm.xlu1 %6582, %v9284_v11   ;;  %v9731_v19 = vpop.eup %7066  ;;  %v3952_v29 = vsel %vm3423_vm6, %v9723_v45, 0.0  ;;  %v9738_v33 = vsel %vm3350_vm5, %v3002_v20, %v3327_v57 }
 0x4a0   : > { %v3949_v4 = vadd.f32 %v3948_v48, %v3947_v13  ;;  %v2894_v14 = vpop.xlane.xlu0 %2893  ;;  %11349 = vst [vmem:[#allocation107_spill] sm:$0xff] %v9731_v19  ;;  %v9748_v13 = vpop.xlane.xlu1 %3245  ;;  %v11350_v48 = vmov 1   ;;  %v3954_v57 = vsel %vm3423_vm6, %v9731_v19, 0.0  ;;  %v3530_v20 = vsel %vm3423_vm6, %v9738_v33, -inf  ;;  %v3867_v19 = vld [vmem:[#allocation3 + $0x3] sm:$0x1] }
 0x4a1   : > { %v3526_v18 = vmax.f32 %v3524_v37, %v3525_v34  ;;  %v9740_v16 = vpop.eup %7068  ;;  %v3328_v37 = vadd.f32 %v9511_v54, %v9534_v31  ;;  %v9752_v34 = vsel %vm3350_vm5, %v3001_v5, %v3326_v46 }
 0x4a2   : > { %v3951_v60 = vadd.f32 %v3950_v30, %v3949_v4  ;;  %v3330_v30 = vadd.f32 %v9511_v54, %v9572_v56  ;;  %v3956_v46 = vsel %vm3423_vm6, %v9740_v16, 0.0  ;;  %v3529_v5 = vsel %vm3423_vm6, %v9752_v34, -inf }
 0x4a3   : > { %v3527_v11 = vrot.slane %v3526_v18, 1  ;;  %6585 = vset.pattern.permute.xlu1 %v11350_v48  ;;  %v9771_v63 = vsel %vm3350_vm5, %v3003_v10, %v3328_v37  ;;  %v3005_v56 = vadd.f32 %v9511_v54, %v9552_v62 }
 0x4a4   : > { %v3953_v6 = vadd.f32 %v3952_v29, %v3951_v60  ;;  %v3225_v52 = vpop.xlane.xlu0 %3224  ;;  %4630 = vperm.xlu1 %6585, %v9227_v41   ;;  %v9788_v37 = vpop.xlane.xlu1 %2920  ;;  %v3532_v62 = vsel %vm3423_vm6, %v9771_v63, -inf }
 0x4a5   : > { %v3528_v4 = vmax.f32 %v3526_v18, %v3527_v11  ;;  %v3329_v26 = vadd.f32 %v9511_v54, %v3225_v52  ;;  %v3004_v18 = vadd.f32 %v9511_v54, %v2894_v14  ;;  %v9786_v10 = vsel %vm3350_vm5, %v3005_v56, %v3330_v30 }
 0x4a6   : > { %v3955_v31 = vadd.f32 %v3954_v57, %v3953_v6  ;;  %v3531_v6 = vmax.f32 %v3529_v5, %v3530_v20 }
 0x4a7   : > { %v9765_v60 = vmax.f32 %v9746_v49, %v3528_v4  ;;  %v9782_v14 = vsel %vm3350_vm5, %v3004_v18, %v3329_v26 }
 0x4a8   : > { %v3957_v41 = vadd.f32 %v3956_v46, %v3955_v31  ;;  %v2900_v29 = vpop.xlane.xlu0 %2899  ;;  %4634 = vperm.xlu1 %6585, %v9234_v35   ;;  %v3534_v20 = vsel %vm3423_vm6, %v9782_v14, -inf  ;;  %v3533_v18 = vmax.f32 %v3531_v6, %v3532_v62  ;;  %v9816_v62 = vpop.xlane.xlu1 %3251 }
 0x4a9   : > { %v9777_v11 = vrot.slane %v9765_v60, %v9108_v47  ;;  %4069 = vst.msk [vmem:[#allocation2 + $0x4] sm:$0x1] %vm4056_vm7, %v9765_v60 }
 0x4aa   : > { %v3958_v52 = vrot.slane %v3957_v41, 4 }
 0x4ab   : > { %v3704_v57 = vsub.f32 %v9599_v22, %v9777_v11  ;;  %v3705_v4 = vsub.f32 %v9588_v38, %v9777_v11  ;;  %v3706_v26 = vsub.f32 %v9621_v1, %v9777_v11  ;;  %v3707_v35 = vsub.f32 %v9633_v32, %v9777_v11 }
 0x4ac   : > { %v3959_v31 = vadd.f32 %v3958_v52, %v3957_v41  ;;  %v3708_v30 = vsub.f32 %v9636_v17, %v9777_v11  ;;  %5154 = vxpose.xlu0.b32.start.end [1/1] (short) (narrow) %v9517_v0, 8  ;;  %v3231_v46 = vpop.xlane.xlu0 %3230  ;;  %v3536_v22 = vsel %vm3423_vm6, %v9786_v10, -inf  ;;  %4642 = vperm.xlu1 %6585, %v9249_v43   ;;  %v3709_v32 = vsub.f32 %v9681_v15, %v9777_v11  ;;  %v9812_v52 = vpop.eup %7070 }
 0x4ad   : > { %v3800_v38 = vmul.f32 1.442695, %v3704_v57  ;;  %v3802_v5 = vmul.f32 1.442695, %v3705_v4  ;;  %v3804_v41 = vmul.f32 1.442695, %v3706_v26  ;;  %v3332_v17 = vadd.f32 %v9511_v54, %v9653_v7 }
 0x4ae   : > { %v3960_v1 = vrot.slane %v3959_v31, 2  ;;  %v3806_v56 = vmul.f32 1.442695, %v3707_v35  ;;  %v3535_v0 = vmax.f32 %v3533_v18, %v3534_v20  ;;  %11351 = vst [vmem:[#allocation90_spill] sm:$0xff] %v9812_v52  ;;  %v3710_v6 = vsub.f32 %v9678_v42, %v9777_v11 }
 0x4af   : > { %7072 = vpow2.f32 %v3800_v38  ;;  %v3808_v43 = vmul.f32 1.442695, %v3708_v30  ;;  %v3007_v57 = vadd.f32 %v9511_v54, %v9608_v50  ;;  %v3006_v7 = vadd.f32 %v9511_v54, %v2900_v29 }
 0x4b0   : > { %v3961_v12 = vadd.f32 %v3960_v1, %v3959_v31  ;;  %7074 = vpow2.f32 %v3802_v5  ;;  %v2906_v15 = vpop.xlane.xlu0 %2905  ;;  %v3331_v4 = vadd.f32 %v9511_v54, %v3231_v46  ;;  %4650 = vperm.xlu1 %6585, %v11347_v3   ;;  %v3711_v31 = vsub.f32 %v9691_v24, %v9777_v11 }
 0x4b1   : > { %7076 = vpow2.f32 %v3804_v41  ;;  %v3810_v42 = vmul.f32 1.442695, %v3709_v32  ;;  %v3875_v35 = vmul.f32 %v9812_v52, %v3867_v19  ;;  %v9827_v30 = vsel %vm3350_vm5, %v3007_v57, %v3332_v17 }
 0x4b2   : > { %v3962_v26 = vrot.slane %v3961_v12, 1  ;;  %7078 = vpow2.f32 %v3806_v56  ;;  %v3537_v20 = vmax.f32 %v3535_v0, %v3536_v22  ;;  %v9830_v50 = vsel %vm3350_vm5, %v3006_v7, %v3331_v4 }
 0x4b3   : > { %7080 = vpow2.f32 %v3808_v43  ;;  %v3812_v46 = vmul.f32 1.442695, %v3710_v6  ;;  %v3538_v3 = vsel %vm3423_vm6, %v9830_v50, -inf  ;;  %v3008_v24 = vadd.f32 %v9511_v54, %v2906_v15 }
 0x4b4   : > { %v3963_v29 = vadd.f32 %v3962_v26, %v3961_v12  ;;  %v3237_v38 = vpop.xlane.xlu0 %3236  ;;  %v3539_v18 = vmax.f32 %v3537_v20, %v3538_v3  ;;  %6586 = vset.pattern.permute.xlu1 %v11346_v53  ;;  %v3540_v22 = vsel %vm3423_vm6, %v9827_v30, -inf  ;;  %7082 = vpow2.f32 %v3810_v42  ;;  %v9839_v12 = vpop.xlane.xlu1 %2926 }
 0x4b5   : > { %v3333_v11 = vadd.f32 %v9511_v54, %v3237_v38  ;;  %v3814_v1 = vmul.f32 1.442695, %v3711_v31  ;;  %4115 = vperm.xlu1 %6586, %v9398_v25   ;;  %7084 = vpow2.f32 %v3812_v46  ;;  %v3604_v46 = vsub.f32 %v9746_v49, %v9765_v60 }
 0x4b6   : > { %v4051_v19 = vadd.f32 %v3963_v29, %v3875_v35  ;;  %v3541_v32 = vmax.f32 %v3539_v18, %v3540_v22 }
 0x4b7   : > { %v9843_v5 = vsel %vm3350_vm5, %v3008_v24, %v3333_v11  ;;  %7086 = vpow2.f32 %v3814_v1  ;;  %v3334_v1 = vadd.f32 %v9511_v54, %v9694_v21 }
 0x4b8   : > { %4060 = vst.msk [vmem:[#allocation3 + $0x3] sm:$0x1] %vm4056_vm7, %v4051_v19  ;;  %v3542_v41 = vsel %vm3423_vm6, %v9843_v5, -inf  ;;  %v2912_v17 = vpop.xlane.xlu0 %2911  ;;  %v9861_v31 = vpop.xlane.xlu1 %3257 }
 0x4b9   : > { %v9848_v56 = vpop.eup %7072  ;;  %v3543_v0 = vmax.f32 %v3541_v32, %v3542_v41  ;;  %4120 = vperm.xlu1 %6586, %v9401_v59   ;;  %v3010_v60 = vadd.f32 %v9511_v54, %v2912_v17  ;;  %v3011_v17 = vadd.f32 %v9511_v54, %v9718_v40  ;;  %v3338_v40 = vadd.f32 %v9511_v54, %v9816_v62 }
 0x4ba   : > { %v9850_v6 = vpop.eup %7074  ;;  %v3964_v43 = vsel %vm3423_vm6, %v9848_v56, 0.0  ;;  %v3013_v62 = vadd.f32 %v9511_v54, %v9788_v37 }
 0x4bb   : > { %v9855_v15 = vpop.eup %7076  ;;  %v3965_v57 = vsel %vm3423_vm6, %v9850_v6, 0.0  ;;  %v3544_v7 = vrot.slane %v3543_v0, 4 }
 0x4bc   : > { %v9859_v4 = vpop.eup %7078  ;;  %v3966_v26 = vadd.f32 %v3965_v57, %v3964_v43  ;;  %v3243_v42 = vpop.xlane.xlu0 %3242  ;;  %v3967_v35 = vsel %vm3423_vm6, %v9855_v15, 0.0 }
 0x4bd   : > { %v3545_v20 = vmax.f32 %v3543_v0, %v3544_v7  ;;  %v9865_v29 = vpop.eup %7080  ;;  %4130 = vperm.xlu1 %6586, %v9414_v2   ;;  %v3969_v38 = vsel %vm3423_vm6, %v9859_v4, 0.0  ;;  %v3335_v24 = vadd.f32 %v9511_v54, %v3243_v42  ;;  %v3616_v0 = vmul.f32 1.442695, %v3604_v46  ;;  %v9882_v57 = vpop.xlane.xlu1 %2932 }
 0x4be   : > { %11352 = vst [vmem:[#allocation80_spill] sm:$0xff] %v9865_v29  ;;  %v3968_v3 = vadd.f32 %v3967_v35, %v3966_v26  ;;  %v9873_v11 = vpop.eup %7082  ;;  %v3971_v32 = vsel %vm3423_vm6, %v9865_v29, 0.0  ;;  %v3009_v7 = vadd.f32 %v9511_v54, %v9674_v8  ;;  %v3336_v46 = vadd.f32 %v9511_v54, %v9748_v13 }
 0x4bf   : > { %v3546_v18 = vrot.slane %v3545_v20, 2  ;;  %v9880_v41 = vpop.eup %7084  ;;  %v3973_v21 = vsel %vm3423_vm6, %v9873_v11, 0.0  ;;  %v9890_v42 = vsel %vm3350_vm5, %v3010_v60, %v3335_v24  ;;  %7088 = vpow2.f32 %v3616_v0 }
 0x4c0   : > { %v3970_v19 = vadd.f32 %v3969_v38, %v3968_v3  ;;  %v2918_v22 = vpop.xlane.xlu0 %2917  ;;  %11353 = vst [vmem:[#allocation92_spill] sm:$0xff] %v9880_v41  ;;  %v9898_v3 = vld [vmem:[#allocation2 + $0x5] sm:$0x1]  ;;  %v9901_v8 = vsel %vm3350_vm5, %v3009_v7, %v3334_v1  ;;  %v3551_v13 = vsel %vm3423_vm6, %v9890_v42, -inf  ;;  %v9920_v7 = vsel %vm3350_vm5, %v3011_v17, %v3336_v46 }
 0x4c1   : > { %v3547_v49 = vmax.f32 %v3545_v20, %v3546_v18  ;;  %4140 = vperm.xlu1 %6586, %v9429_v44   ;;  %v9892_v35 = vpop.eup %7086  ;;  %v3975_v18 = vsel %vm3423_vm6, %v9880_v41, 0.0  ;;  %v3550_v0 = vsel %vm3423_vm6, %v9901_v8, -inf  ;;  %v9936_v17 = vsel %vm3350_vm5, %v3013_v62, %v3338_v40 }
 0x4c2   : > { %v3972_v43 = vadd.f32 %v3971_v32, %v3970_v19  ;;  %v3977_v1 = vsel %vm3423_vm6, %v9892_v35, 0.0  ;;  %v3553_v37 = vsel %vm3423_vm6, %v9920_v7, -inf }
 0x4c3   : > { %v3548_v26 = vrot.slane %v3547_v49, 1 }
 0x4c4   : > { %v3974_v20 = vadd.f32 %v3973_v21, %v3972_v43  ;;  %v3249_v38 = vpop.xlane.xlu0 %3248  ;;  %v9924_v21 = vpop.xlane.xlu1 %3263 }
 0x4c5   : > { %v3549_v24 = vmax.f32 %v3547_v49, %v3548_v26  ;;  %v3337_v19 = vadd.f32 %v9511_v54, %v3249_v38  ;;  %4150 = vperm.xlu1 %6586, %v9449_v27   ;;  %v3012_v49 = vadd.f32 %v9511_v54, %v2918_v22  ;;  %v3552_v22 = vmax.f32 %v3550_v0, %v3551_v13 }
 0x4c6   : > { %v3976_v32 = vadd.f32 %v3975_v18, %v3974_v20 }
 0x4c7   : > { %v9914_v60 = vmax.f32 %v9898_v3, %v3549_v24  ;;  %v9933_v38 = vsel %vm3350_vm5, %v3012_v49, %v3337_v19  ;;  %v3554_v0 = vmax.f32 %v3552_v22, %v3553_v37 }
 0x4c8   : > { %v3978_v43 = vadd.f32 %v3977_v1, %v3976_v32  ;;  %v2924_v26 = vpop.xlane.xlu0 %2923  ;;  %v3555_v1 = vsel %vm3423_vm6, %v9933_v38, -inf }
 0x4c9   : > { %v9928_v20 = vrot.slane %v9914_v60, %v9108_v47  ;;  %4070 = vst.msk [vmem:[#allocation2 + $0x5] sm:$0x1] %vm4056_vm7, %v9914_v60  ;;  %6588 = vset.pattern.permute.xlu1 %v11350_v48  ;;  %v3556_v52 = vmax.f32 %v3554_v0, %v3555_v1  ;;  %v9963_v41 = vpop.eup %7088 }
 0x4ca   : > { %v3979_v18 = vrot.slane %v3978_v43, 4  ;;  %4658 = vperm.xlu1 %6588, %v9398_v25   ;;  %11354 = vst [vmem:[#allocation81_spill] sm:$0xff] %v9963_v41 }
 0x4cb   : > { %v3712_v46 = vsub.f32 %v9752_v34, %v9928_v20  ;;  %v3713_v24 = vsub.f32 %v9738_v33, %v9928_v20  ;;  %v3714_v32 = vsub.f32 %v9771_v63, %v9928_v20  ;;  %v3715_v40 = vsub.f32 %v9782_v14, %v9928_v20  ;;  %v9956_v63 = vpop.xlane.xlu1 %2938 }
 0x4cc   : > { %v3980_v19 = vadd.f32 %v3979_v18, %v3978_v43  ;;  %v3716_v13 = vsub.f32 %v9786_v10, %v9928_v20  ;;  %v3255_v49 = vpop.xlane.xlu0 %3254  ;;  %v3557_v34 = vsel %vm3423_vm6, %v9936_v17, -inf  ;;  %v3717_v25 = vsub.f32 %v9830_v50, %v9928_v20 }
 0x4cd   : > { %v3816_v33 = vmul.f32 1.442695, %v3712_v46  ;;  %v3818_v43 = vmul.f32 1.442695, %v3713_v24  ;;  %v3820_v14 = vmul.f32 1.442695, %v3714_v32  ;;  %v3340_v10 = vadd.f32 %v9511_v54, %v9861_v31 }
 0x4ce   : > { %v3981_v62 = vrot.slane %v3980_v19, 2  ;;  %v3822_v18 = vmul.f32 1.442695, %v3715_v40  ;;  %4666 = vperm.xlu1 %6588, %v9408_v23   ;;  %v3868_v46 = vld [vmem:[#allocation3 + $0x4] sm:$0x1]  ;;  %v3718_v37 = vsub.f32 %v9827_v30, %v9928_v20  ;;  %v3015_v24 = vadd.f32 %v9511_v54, %v9839_v12 }
 0x4cf   : > { %7090 = vpow2.f32 %v3816_v33  ;;  %v3824_v29 = vmul.f32 1.442695, %v3716_v13  ;;  %v3014_v31 = vadd.f32 %v9511_v54, %v2924_v26  ;;  %v3339_v32 = vadd.f32 %v9511_v54, %v3255_v49  ;;  %v9981_v49 = vpop.xlane.xlu1 %3269 }
 0x4d0   : > { %v3982_v22 = vadd.f32 %v3981_v62, %v3980_v19  ;;  %7092 = vpow2.f32 %v3818_v43  ;;  %v2930_v50 = vpop.xlane.xlu0 %2929  ;;  %v3719_v1 = vsub.f32 %v9843_v5, %v9928_v20  ;;  %v3826_v19 = vmul.f32 1.442695, %v3717_v25 }
 0x4d1   : > { %7094 = vpow2.f32 %v3820_v14  ;;  %v3876_v33 = vmul.f32 %v9963_v41, %v3868_v46  ;;  %v9975_v30 = vsel %vm3350_vm5, %v3015_v24, %v3340_v10  ;;  %v3558_v13 = vmax.f32 %v3556_v52, %v3557_v34 }
 0x4d2   : > { %v3983_v40 = vrot.slane %v3982_v22, 1  ;;  %7096 = vpow2.f32 %v3822_v18  ;;  %v9978_v0 = vsel %vm3350_vm5, %v3014_v31, %v3339_v32  ;;  %4674 = vperm.xlu1 %6588, %v9418_v61   ;;  %v3828_v26 = vmul.f32 1.442695, %v3718_v37 }
 0x4d3   : > { %7098 = vpow2.f32 %v3824_v29  ;;  %v3559_v5 = vsel %vm3423_vm6, %v9978_v0, -inf  ;;  %v3016_v25 = vadd.f32 %v9511_v54, %v2930_v50  ;;  %v3561_v34 = vsel %vm3423_vm6, %v9975_v30, -inf  ;;  %v2945_v24 = vpop.xlane.xlu1 %2944 }
 0x4d4   : > { %v3984_v12 = vadd.f32 %v3983_v40, %v3982_v22  ;;  %v3261_v20 = vpop.xlane.xlu0 %3260  ;;  %v3560_v62 = vmax.f32 %v3558_v13, %v3559_v5  ;;  %7100 = vpow2.f32 %v3826_v19  ;;  %v3830_v29 = vmul.f32 1.442695, %v3719_v1 }
 0x4d5   : > { %v3341_v43 = vadd.f32 %v9511_v54, %v3261_v20  ;;  %6587 = vset.pattern.permute.xlu0 %v11346_v53  ;;  %7102 = vpow2.f32 %v3828_v26 }
 0x4d6   : > { %v4052_v52 = vadd.f32 %v3984_v12, %v3876_v33  ;;  %4125 = vperm.xlu0 %6587, %v9408_v23   ;;  %v3562_v14 = vmax.f32 %v3560_v62, %v3561_v34  ;;  %4682 = vperm.xlu1 %6588, %v9437_v39   ;;  %7104 = vpow2.f32 %v3830_v29 }
 0x4d7   : > { %v9992_v10 = vsel %vm3350_vm5, %v3016_v25, %v3341_v43  ;;  %v3276_v34 = vpop.xlane.xlu1 %3275 }
 0x4d8   : > { %4061 = vst.msk [vmem:[#allocation3 + $0x4] sm:$0x1] %vm4056_vm7, %v4052_v52  ;;  %v3563_v18 = vsel %vm3423_vm6, %v9992_v10, -inf  ;;  %v2936_v46 = vpop.xlane.xlu0 %2935 }
 0x4d9   : > { %v9998_v22 = vpop.eup %7090  ;;  %v3564_v37 = vmax.f32 %v3562_v14, %v3563_v18  ;;  %v11358_v14 = vld [vmem:[#allocation77_spill] sm:$0xff]  ;;  %v3342_v18 = vadd.f32 %v9511_v54, %v9924_v21 }
 0x4da   : > { %11355 = vst [vmem:[#allocation94_spill] sm:$0xff] %v9998_v22  ;;  %v10000_v50 = vpop.eup %7092  ;;  %v3985_v23 = vsel %vm3423_vm6, %v9998_v22, 0.0  ;;  %4135 = vperm.xlu0 %6587, %v9418_v61   ;;  %6591 = vset.pattern.permute.xlu1 %v11346_v53  ;;  %v3605_v61 = vsub.f32 %v9898_v3, %v9914_v60  ;;  %v3018_v60 = vadd.f32 %v9511_v54, %v2936_v46 }
 0x4db   : > { %v10005_v31 = vpop.eup %7094  ;;  %v3986_v32 = vsel %vm3423_vm6, %v10000_v50, 0.0  ;;  %v3565_v40 = vrot.slane %v3564_v37, 4  ;;  %4160 = vperm.xlu1 %6591, %v9548_v36   ;;  %v3019_v46 = vadd.f32 %v9511_v54, %v9956_v63 }
 0x4dc   : > { %11356 = vst [vmem:[#allocation82_spill] sm:$0xff] %v10005_v31  ;;  %v10010_v1 = vpop.eup %7096  ;;  %v3987_v19 = vadd.f32 %v3986_v32, %v3985_v23  ;;  %v3267_v33 = vpop.xlane.xlu0 %3266  ;;  %v3988_v13 = vsel %vm3423_vm6, %v10005_v31, 0.0  ;;  %v3618_v23 = vmul.f32 1.442695, %v3605_v61  ;;  %v3344_v61 = vadd.f32 %v9511_v54, %v9981_v49  ;;  %v3869_v31 = vld [vmem:[#allocation3 + $0x5] sm:$0x1] }
 0x4dd   : > { %v3566_v12 = vmax.f32 %v3564_v37, %v3565_v40  ;;  %v10015_v26 = vpop.eup %7098  ;;  %v3990_v20 = vsel %vm3423_vm6, %v10010_v1, 0.0  ;;  %v3343_v25 = vadd.f32 %v9511_v54, %v3267_v33  ;;  %v3017_v40 = vadd.f32 %v9511_v54, %v9882_v57 }
 0x4de   : > { %11357 = vst [vmem:[#allocation96_spill] sm:$0xff] %v10015_v26  ;;  %v3989_v5 = vadd.f32 %v3988_v13, %v3987_v19  ;;  %4145 = vperm.xlu0 %6587, %v9437_v39   ;;  %v10023_v43 = vpop.eup %7100  ;;  %v3992_v3 = vsel %vm3423_vm6, %v10015_v26, 0.0  ;;  %7106 = vpow2.f32 %v3618_v23 }
 0x4df   : > { %v3567_v62 = vrot.slane %v3566_v12, 2  ;;  %4170 = vperm.xlu1 %6591, %v11358_v14   ;;  %v10031_v37 = vpop.eup %7102  ;;  %v3994_v19 = vsel %vm3423_vm6, %v10023_v43, 0.0  ;;  %v10039_v21 = vsel %vm3350_vm5, %v3018_v60, %v3343_v25  ;;  %v2951_v60 = vpop.xlane.xlu1 %2950 }
 0x4e0   : > { %v3991_v52 = vadd.f32 %v3990_v20, %v3989_v5  ;;  %v2942_v29 = vpop.xlane.xlu0 %2941  ;;  %11359 = vst [vmem:[#allocation84_spill] sm:$0xff] %v10031_v37  ;;  %v10042_v13 = vpop.eup %7104  ;;  %v10048_v5 = vld [vmem:[#allocation2 + $0x6] sm:$0x1]  ;;  %v11361_v20 = vld [vmem:[#allocation78_spill] sm:$0xff]  ;;  %v3572_v49 = vsel %vm3423_vm6, %v10039_v21, -inf }
 0x4e1   : > { %v3568_v39 = vmax.f32 %v3566_v12, %v3567_v62  ;;  %11360 = vst [vmem:[#allocation98_spill] sm:$0xff] %v10042_v13  ;;  %v10052_v62 = vsel %vm3350_vm5, %v3017_v40, %v3342_v18  ;;  %v3020_v40 = vadd.f32 %v9511_v54, %v2942_v29 }
 0x4e2   : > { %v3993_v32 = vadd.f32 %v3992_v3, %v3991_v52  ;;  %6589 = vset.pattern.permute.xlu0 %v11350_v48  ;;  %v3346_v3 = vadd.f32 %v9511_v54, %v3276_v34  ;;  %v10070_v34 = vsel %vm3350_vm5, %v3019_v46, %v3344_v61 }
 0x4e3   : > { %v3569_v33 = vrot.slane %v3568_v39, 1  ;;  %4662 = vperm.xlu0 %6589, %v9401_v59   ;;  %4180 = vperm.xlu1 %6591, %v11361_v20   ;;  %v3996_v59 = vsel %vm3423_vm6, %v10031_v37, 0.0 }
 0x4e4   : > { %v3995_v12 = vadd.f32 %v3994_v19, %v3993_v32  ;;  %v3273_v57 = vpop.xlane.xlu0 %3272  ;;  %v3998_v32 = vsel %vm3423_vm6, %v10042_v13, 0.0  ;;  %v7148_v19 = vld [vmem:[%s10985_s6] ss:$0 sm:$0xff] }
 0x4e5   : > { %v3570_v25 = vmax.f32 %v3568_v39, %v3569_v33  ;;  %v3345_v52 = vadd.f32 %v9511_v54, %v3273_v57  ;;  %v3571_v39 = vsel %vm3423_vm6, %v10052_v62, -inf  ;;  %v3021_v33 = vadd.f32 %v7148_v19, %v2945_v24  ;;  %v11362_v57 = vld [vmem:[#allocation88_spill] sm:$0xff] }
 0x4e6   : > { %v3997_v63 = vadd.f32 %v3996_v59, %v3995_v12  ;;  %v3574_v24 = vsel %vm3423_vm6, %v10070_v34, -inf  ;;  %v3023_v13 = vadd.f32 %v7148_v19, %v2951_v60 }
 0x4e7   : > { %v10063_v18 = vmax.f32 %v10048_v5, %v3570_v25  ;;  %4670 = vperm.xlu0 %6589, %v9414_v2   ;;  %4190 = vperm.xlu1 %6591, %v11362_v57   ;;  %v3573_v2 = vmax.f32 %v3571_v39, %v3572_v49  ;;  %v10083_v29 = vsel %vm3350_vm5, %v3020_v40, %v3345_v52  ;;  %v3282_v49 = vpop.xlane.xlu1 %3281 }
 0x4e8   : > { %v3999_v23 = vadd.f32 %v3998_v32, %v3997_v63  ;;  %v2948_v12 = vpop.xlane.xlu0 %2947  ;;  %v10086_v61 = vsel %vm3350_vm5, %v3021_v33, %v3346_v3  ;;  %v3576_v40 = vsel %vm3423_vm6, %v10083_v29, -inf  ;;  %v10110_v26 = vpop.eup %7106 }
 0x4e9   : > { %v10078_v54 = vrot.slane %v10063_v18, %v9108_v47  ;;  %4071 = vst.msk [vmem:[#allocation2 + $0x6] sm:$0x1] %vm4056_vm7, %v10063_v18  ;;  %v3575_v39 = vmax.f32 %v3573_v2, %v3574_v24 }
 0x4ea   : > { %v4000_v46 = vrot.slane %v3999_v23, 4 }
 0x4eb   : > { %v3720_v59 = vsub.f32 %v9901_v8, %v10078_v54  ;;  %v3721_v25 = vsub.f32 %v9890_v42, %v10078_v54  ;;  %v3722_v63 = vsub.f32 %v9920_v7, %v10078_v54  ;;  %4678 = vperm.xlu0 %6589, %v9429_v44   ;;  %v3723_v3 = vsub.f32 %v9933_v38, %v10078_v54  ;;  %v11363_v44 = vld [vmem:[#allocation76_spill] sm:$0xff] }
 0x4ec   : > { %v4001_v52 = vadd.f32 %v4000_v46, %v3999_v23  ;;  %v3724_v32 = vsub.f32 %v9936_v17, %v10078_v54  ;;  %v3279_v8 = vpop.xlane.xlu0 %3278  ;;  %6592 = vset.pattern.permute.xlu1 %v11350_v48  ;;  %v3578_v42 = vsel %vm3423_vm6, %v10086_v61, -inf  ;;  %v3725_v38 = vsub.f32 %v9978_v0, %v10078_v54 }
 0x4ed   : > { %v3832_v7 = vmul.f32 1.442695, %v3720_v59  ;;  %4690 = vperm.xlu1 %6592, %v11363_v44   ;;  %v3834_v33 = vmul.f32 1.442695, %v3721_v25  ;;  %v3836_v46 = vmul.f32 1.442695, %v3722_v63  ;;  %v3348_v17 = vadd.f32 %v7148_v19, %v3282_v49 }
 0x4ee   : > { %v4002_v23 = vrot.slane %v4001_v52, 2  ;;  %v3838_v41 = vmul.f32 1.442695, %v3723_v3  ;;  %v3577_v37 = vmax.f32 %v3575_v39, %v3576_v40  ;;  %v3726_v2 = vsub.f32 %v9975_v30, %v10078_v54  ;;  %v11364_v63 = vld [vmem:[#allocation85_spill] sm:$0xff] }
 0x4ef   : > { %7108 = vpow2.f32 %v3832_v7  ;;  %4686 = vperm.xlu0 %6589, %v9449_v27   ;;  %v3840_v24 = vmul.f32 1.442695, %v3724_v32  ;;  %v3022_v0 = vadd.f32 %v7148_v19, %v2948_v12  ;;  %v3347_v25 = vadd.f32 %v7148_v19, %v3279_v8 }
 0x4f0   : > { %v4003_v22 = vadd.f32 %v4002_v23, %v4001_v52  ;;  %7110 = vpow2.f32 %v3834_v33  ;;  %v2954_v59 = vpop.xlane.xlu0 %2953  ;;  %v3727_v27 = vsub.f32 %v9992_v10, %v10078_v54  ;;  %v3842_v3 = vmul.f32 1.442695, %v3725_v38  ;;  %v11365_v54 = vld [vmem:[#allocation87_spill] sm:$0xff]  ;;  %v11367_v33 = vld [vmem:[#allocation105_spill] sm:$0xff] }
 0x4f1   : > { %7112 = vpow2.f32 %v3836_v46  ;;  %4698 = vperm.xlu1 %6592, %v11364_v63   ;;  %v3877_v52 = vmul.f32 %v10110_v26, %v3869_v31  ;;  %v10119_v40 = vsel %vm3350_vm5, %v3023_v13, %v3348_v17  ;;  %v3579_v30 = vmax.f32 %v3577_v37, %v3578_v42 }
 0x4f2   : > { %v4004_v49 = vrot.slane %v4003_v22, 1  ;;  %7114 = vpow2.f32 %v3838_v41  ;;  %v10122_v32 = vsel %vm3350_vm5, %v3022_v0, %v3347_v25  ;;  %v3844_v12 = vmul.f32 1.442695, %v3726_v2 }
 0x4f3   : > { %7116 = vpow2.f32 %v3840_v24  ;;  %v3580_v8 = vsel %vm3423_vm6, %v10122_v32, -inf  ;;  %v3024_v10 = vadd.f32 %v7148_v19, %v2954_v59  ;;  %v3582_v13 = vsel %vm3423_vm6, %v10119_v40, -inf }
 0x4f4   : > { %v4005_v60 = vadd.f32 %v4004_v49, %v4003_v22  ;;  %v3285_v7 = vpop.xlane.xlu0 %3284  ;;  %v3581_v39 = vmax.f32 %v3579_v30, %v3580_v8  ;;  %7118 = vpow2.f32 %v3842_v3  ;;  %v3846_v37 = vmul.f32 1.442695, %v3727_v27 }
 0x4f5   : > { %v3349_v41 = vadd.f32 %v7148_v19, %v3285_v7  ;;  %4706 = vperm.xlu1 %6592, %v11365_v54   ;;  %7120 = vpow2.f32 %v3844_v12  ;;  %v3606_v30 = vsub.f32 %v10048_v5, %v10063_v18 }
 0x4f6   : > { %v4053_v31 = vadd.f32 %v4005_v60, %v3877_v52  ;;  %v3583_v42 = vmax.f32 %v3581_v39, %v3582_v13  ;;  %7122 = vpow2.f32 %v3846_v37 }
 0x4f7   : > { %v10130_v22 = vsel %vm3350_vm5, %v3024_v10, %v3349_v41  ;;  %v10162_v41 = vpop.trf.xlu1  ;;  %v3620_v37 = vmul.f32 1.442695, %v3606_v30 }
 0x4f8   : > { %4062 = vst.msk [vmem:[#allocation3 + $0x5] sm:$0x1] %vm4056_vm7, %v4053_v31  ;;  %v3584_v23 = vsel %vm3423_vm6, %v10130_v22, -inf }
 0x4f9   : > { %v10135_v38 = vpop.eup %7108  ;;  %v3585_v19 = vmax.f32 %v3583_v42, %v3584_v23  ;;  %4714 = vperm.xlu1 %6592, %v11367_v33   ;;  %7124 = vpow2.f32 %v3620_v37 }
 0x4fa   : > { %11366 = vst [vmem:[#allocation86_spill] sm:$0xff] %v10135_v38  ;;  %v10138_v46 = vpop.eup %7110  ;;  %v4006_v17 = vsel %vm3423_vm6, %v10135_v38, 0.0 }
 0x4fb   : > { %11368 = vst [vmem:[#allocation100_spill] sm:$0xff] %v10138_v46  ;;  %v10142_v2 = vpop.eup %7112  ;;  %v4007_v24 = vsel %vm3423_vm6, %v10138_v46, 0.0  ;;  %v3586_v59 = vrot.slane %v3585_v19, 4 }
 0x4fc   : > { %11369 = vst [vmem:[#allocation89_spill] sm:$0xff] %v10142_v2  ;;  %v10146_v0 = vpop.eup %7114  ;;  %v4008_v25 = vadd.f32 %v4007_v24, %v4006_v17  ;;  %v4009_v49 = vsel %vm3423_vm6, %v10142_v2, 0.0 }
 0x4fd   : > { %11370 = vst [vmem:[#allocation102_spill] sm:$0xff] %v10146_v0  ;;  %v3587_v27 = vmax.f32 %v3585_v19, %v3586_v59  ;;  %6595 = vset.pattern.permute.xlu1 %v11346_v53  ;;  %v10151_v3 = vpop.eup %7116  ;;  %v4011_v60 = vsel %vm3423_vm6, %v10146_v0, 0.0  ;;  %v10171_v19 = vld [vmem:[#allocation2 + $0x7] sm:$0x1] }
 0x4fe   : > { %11371 = vst [vmem:[#allocation91_spill] sm:$0xff] %v10151_v3  ;;  %v4010_v52 = vadd.f32 %v4009_v49, %v4008_v25  ;;  %4200 = vperm.xlu1 %6595, %v9701_v9   ;;  %v10158_v8 = vpop.eup %7118  ;;  %v4013_v39 = vsel %vm3423_vm6, %v10151_v3, 0.0 }
 0x4ff   : > { %v3588_v12 = vrot.slane %v3587_v27, 2  ;;  %11372 = vst [vmem:[#allocation93_spill] sm:$0xff] %v10158_v8  ;;  %v10164_v31 = vpop.eup %7120  ;;  %v4015_v5 = vsel %vm3423_vm6, %v10158_v8, 0.0 }
 0x500   : > { %v4012_v7 = vadd.f32 %v4011_v60, %v4010_v52  ;;  %11373 = vst [vmem:[#allocation104_spill] sm:$0xff] %v10164_v31  ;;  %v10169_v42 = vpop.eup %7122  ;;  %v4017_v17 = vsel %vm3423_vm6, %v10164_v31, 0.0 }
 0x501   : > { %v3589_v10 = vmax.f32 %v3587_v27, %v3588_v12  ;;  %11374 = vst [vmem:[#allocation95_spill] sm:$0xff] %v10169_v42  ;;  %v4019_v25 = vsel %vm3423_vm6, %v10169_v42, 0.0 }
 0x502   : > { %v4014_v13 = vadd.f32 %v4013_v39, %v4012_v7  ;;  %4210 = vperm.xlu1 %6595, %v9709_v58  }
 0x503   : > { %v3590_v18 = vrot.slane %v3589_v10, 1 }
 0x504   : > { %v4016_v23 = vadd.f32 %v4015_v5, %v4014_v13 }
 0x505   : > { %v3591_v24 = vmax.f32 %v3589_v10, %v3590_v18 }
 0x506   : > { %v4018_v59 = vadd.f32 %v4017_v17, %v4016_v23  ;;  %4220 = vperm.xlu1 %6595, %v9723_v45   ;;  %v10181_v27 = vpop.permute.xlu1 %4075 }
 0x507   : > { %v10179_v49 = vmax.f32 %v10171_v19, %v3591_v24 }
 0x508   : > { %v4020_v52 = vadd.f32 %v4019_v25, %v4018_v59  ;;  %v10202_v59 = vpop.eup %7124 }
 0x509   : > { %v3663_v30 = vrot.slane %v10179_v49, %v9108_v47  ;;  %4072 = vst.msk [vmem:[#allocation2 + $0x7] sm:$0x1] %vm4056_vm7, %v10179_v49 }
 0x50a   : > { %v4021_v60 = vrot.slane %v4020_v52, 4  ;;  %4230 = vperm.xlu1 %6595, %v9740_v16   ;;  %v10191_v10 = vpop.permute.xlu1 %4085 }
 0x50b   : > { %v3728_v12 = vsub.f32 %v10052_v62, %v3663_v30  ;;  %v3729_v7 = vsub.f32 %v10039_v21, %v3663_v30  ;;  %v3730_v39 = vsub.f32 %v10070_v34, %v3663_v30  ;;  %v3731_v37 = vsub.f32 %v10083_v29, %v3663_v30 }
 0x50c   : > { %v4022_v13 = vadd.f32 %v4021_v60, %v4020_v52  ;;  %v3732_v5 = vsub.f32 %v10086_v61, %v3663_v30  ;;  %v3733_v23 = vsub.f32 %v10122_v32, %v3663_v30  ;;  %v3734_v29 = vsub.f32 %v10119_v40, %v3663_v30 }
 0x50d   : > { %v3848_v47 = vmul.f32 1.442695, %v3728_v12  ;;  %5186 = vxpose.xlu0.b32.start.end [1/1] (short) (narrow) %v9663_v55, 8  ;;  %v3850_v17 = vmul.f32 1.442695, %v3729_v7  ;;  %v3735_v25 = vsub.f32 %v10130_v22, %v3663_v30 }
 0x50e   : > { %v4023_v18 = vrot.slane %v4022_v13, 2  ;;  %v3852_v24 = vmul.f32 1.442695, %v3730_v39  ;;  %6596 = vset.pattern.permute.xlu1 %v11350_v48  ;;  %v3854_v21 = vmul.f32 1.442695, %v3731_v37  ;;  %v10198_v62 = vpop.permute.xlu1 %4090  ;;  %v11377_v37 = vld [vmem:[#allocation79_spill] sm:$0xff] }
 0x50f   : > { %7126 = vpow2.f32 %v3848_v47  ;;  %11375 = vst [vmem:[#allocation97_spill] sm:$0xff] %v10198_v62  ;;  %4722 = vperm.xlu1 %6596, %v9699_v51   ;;  %v3856_v61 = vmul.f32 1.442695, %v3732_v5  ;;  %v3870_v55 = vld [vmem:[#allocation3 + $0x6] sm:$0x1] }
 0x510   : > { %v4024_v34 = vadd.f32 %v4023_v18, %v4022_v13  ;;  %7128 = vpow2.f32 %v3850_v17  ;;  %v3858_v52 = vmul.f32 1.442695, %v3733_v23  ;;  %v3878_v60 = vmul.f32 %v10202_v59, %v3870_v55  ;;  %v11382_v17 = vld [vmem:[#allocation107_spill] sm:$0xff] }
 0x511   : > { %7130 = vpow2.f32 %v3852_v24  ;;  %v3860_v7 = vmul.f32 1.442695, %v3734_v29  ;;  %v3862_v13 = vmul.f32 1.442695, %v3735_v25  ;;  %v3607_v55 = vsub.f32 %v10171_v19, %v10179_v49 }
 0x512   : > { %v4025_v32 = vrot.slane %v4024_v34, 1  ;;  %7132 = vpow2.f32 %v3854_v21  ;;  %v10207_v39 = vpop.permute.xlu1 %4095 }
 0x513   : > { %4730 = vperm.xlu1 %6596, %v9705_v28   ;;  %7134 = vpow2.f32 %v3856_v61  ;;  %11376 = vst [vmem:[#allocation99_spill] sm:$0xff] %v10207_v39 }
 0x514   : > { %v4026_v12 = vadd.f32 %v4025_v32, %v4024_v34  ;;  %7136 = vpow2.f32 %v3858_v52 }
 0x515   : > { %7138 = vpow2.f32 %v3860_v7 }
 0x516   : > { %v4054_v40 = vadd.f32 %v4026_v12, %v3878_v60  ;;  %7140 = vpow2.f32 %v3862_v13  ;;  %v10221_v23 = vpop.permute.xlu1 %4100  ;;  %v3622_v13 = vmul.f32 1.442695, %v3607_v55 }
 0x517   : > { %4738 = vperm.xlu1 %6596, %v11377_v37   ;;  %11381 = vst [vmem:[#allocation83_spill] sm:$0xff] %v10221_v23 }
 0x518   : > { %4063 = vst.msk [vmem:[#allocation3 + $0x6] sm:$0x1] %vm4056_vm7, %v4054_v40  ;;  %7142 = vpow2.f32 %v3622_v13  ;;  %v3871_v13 = vld [vmem:[#allocation3 + $0x7] sm:$0x1] }
 0x519   : > { %v10211_v22 = vpop.eup %7126 }
 0x51a   : > { %11378 = vst [vmem:[#allocation101_spill] sm:$0xff] %v10211_v22  ;;  %v10213_v30 = vpop.eup %7128  ;;  %v4027_v5 = vsel %vm3423_vm6, %v10211_v22, 0.0  ;;  %v10240_v12 = vpop.permute.xlu1 %4105 }
 0x51b   : > { %11379 = vst [vmem:[#allocation103_spill] sm:$0xff] %v10213_v30  ;;  %v10217_v47 = vpop.eup %7130  ;;  %v4028_v18 = vsel %vm3423_vm6, %v10213_v30, 0.0  ;;  %4746 = vperm.xlu1 %6596, %v11382_v17   ;;  %11383 = vst [vmem:[#allocation77_spill] sm:$0xff] %v10240_v12 }
 0x51c   : > { %11380 = vst [vmem:[#allocation106_spill] sm:$0xff] %v10217_v47  ;;  %v10224_v24 = vpop.eup %7132  ;;  %v4029_v21 = vadd.f32 %v4028_v18, %v4027_v5  ;;  %v4030_v34 = vsel %vm3423_vm6, %v10217_v47, 0.0 }
 0x51d   : > { %v10228_v29 = vpop.eup %7134  ;;  %v4032_v32 = vsel %vm3423_vm6, %v10224_v24, 0.0 }
 0x51e   : > { %v4031_v61 = vadd.f32 %v4030_v34, %v4029_v21  ;;  %v10235_v25 = vpop.eup %7136  ;;  %v4034_v60 = vsel %vm3423_vm6, %v10228_v29, 0.0 }
 0x51f   : > { %6599 = vset.pattern.permute.xlu1 %v11346_v53  ;;  %v10242_v7 = vpop.eup %7138  ;;  %v4036_v19 = vsel %vm3423_vm6, %v10235_v25, 0.0 }
 0x520   : > { %v4033_v52 = vadd.f32 %v4032_v32, %v4031_v61  ;;  %4240 = vperm.xlu1 %6599, %v9850_v6   ;;  %v10246_v49 = vpop.eup %7140  ;;  %v4038_v18 = vsel %vm3423_vm6, %v10242_v7, 0.0  ;;  %v10253_v61 = vpop.permute.xlu1 %4110 }
 0x521   : > { %11384 = vst [vmem:[#allocation78_spill] sm:$0xff] %v10246_v49  ;;  %v4040_v34 = vsel %vm3423_vm6, %v10246_v49, 0.0  ;;  %11385 = vst [vmem:[#allocation88_spill] sm:$0xff] %v10253_v61 }
 0x522   : > { %v4035_v40 = vadd.f32 %v4034_v60, %v4033_v52 }
 0x524   : > { %v4037_v5 = vadd.f32 %v4036_v19, %v4035_v40  ;;  %4250 = vperm.xlu1 %6599, %v9859_v4   ;;  %v10257_v60 = vpop.permute.xlu1 %4630 }
 0x526   : > { %v4039_v21 = vadd.f32 %v4038_v18, %v4037_v5  ;;  %v10260_v5 = vpop.eup %7142 }
 0x528   : > { %v4041_v32 = vadd.f32 %v4040_v34, %v4039_v21  ;;  %4260 = vperm.xlu1 %6599, %v9873_v11   ;;  %v10263_v47 = vpop.permute.xlu1 %4634  ;;  %v3879_v21 = vmul.f32 %v10260_v5, %v3871_v13 }
 0x52a   : > { %v4042_v55 = vrot.slane %v4041_v32, 4 }
 0x52c   : > { %v4043_v52 = vadd.f32 %v4042_v55, %v4041_v32  ;;  %4270 = vperm.xlu1 %6599, %v9892_v35   ;;  %v10270_v55 = vpop.permute.xlu1 %4642 }
 0x52d   : > { %11386 = vst [vmem:[#allocation76_spill] sm:$0xff] %v10270_v55 }
 0x52e   : > { %v4044_v40 = vrot.slane %v4043_v52, 2 }
 0x530   : > { %v4045_v19 = vadd.f32 %v4044_v40, %v4043_v52  ;;  %6600 = vset.pattern.permute.xlu1 %v11350_v48  ;;  %v11387_v52 = vld [vmem:[#allocation80_spill] sm:$0xff]  ;;  %v10275_v61 = vpop.permute.xlu1 %4650 }
 0x531   : > { %4754 = vperm.xlu1 %6600, %v9848_v56   ;;  %v11388_v40 = vld [vmem:[#allocation92_spill] sm:$0xff]  ;;  %11389 = vst [vmem:[#allocation85_spill] sm:$0xff] %v10275_v61 }
 0x532   : > { %v4046_v18 = vrot.slane %v4045_v19, 1 }
 0x534   : > { %v4047_v34 = vadd.f32 %v4046_v18, %v4045_v19  ;;  %v10279_v19 = vpop.permute.xlu1 %4115  ;;  %v10296_v18 = vpop.permute.xlu0 %4080 }
 0x535   : > { %4762 = vperm.xlu1 %6600, %v9855_v15   ;;  %11390 = vst [vmem:[#allocation87_spill] sm:$0xff] %v10279_v19  ;;  %v11409_v19 = vld [vmem:[#allocation98_spill] sm:$0xff] }
 0x536   : > { %v4055_v32 = vadd.f32 %v4047_v34, %v3879_v21  ;;  %6590 = vset.pattern.permute.xlu0 %v11346_v53  ;;  %v11398_v34 = vld [vmem:[#allocation90_spill] sm:$0xff] }
 0x537   : > { %4155 = vperm.xlu0 %6590, %v11363_v44  }
 0x538   : > { %4064 = vst.msk [vmem:[#allocation3 + $0x7] sm:$0x1] %vm4056_vm7, %v4055_v32  ;;  %v10283_v44 = vpop.permute.xlu1 %4120  ;;  %v10301_v21 = vpop.permute.xlu0 %4626 }
 0x539   : > { %4770 = vperm.xlu1 %6600, %v11387_v52   ;;  %11391 = vst [vmem:[#allocation105_spill] sm:$0xff] %v10283_v44 }
 0x53b   : > { %4165 = vperm.xlu0 %6590, %v11364_v63  }
 0x53c   : > { %v10287_v63 = vpop.permute.xlu1 %4130 }
 0x53d   : > { %4778 = vperm.xlu1 %6600, %v11388_v40   ;;  %11392 = vst [vmem:[#allocation79_spill] sm:$0xff] %v10287_v63 }
 0x53f   : > { %4175 = vperm.xlu0 %6590, %v11365_v54  }
 0x540   : > { %v10290_v13 = vpop.permute.xlu1 %4140 }
 0x541   : > { %11393 = vst [vmem:[#allocation107_spill] sm:$0xff] %v10290_v13 }
 0x543   : > { %4185 = vperm.xlu0 %6590, %v11367_v33  }
 0x544   : > { %v10292_v54 = vpop.permute.xlu1 %4150 }
 0x545   : > { %11394 = vst [vmem:[#allocation80_spill] sm:$0xff] %v10292_v54 }
 0x547   : > { %6593 = vset.pattern.permute.xlu0 %v11350_v48 }
 0x548   : > { %4694 = vperm.xlu0 %6593, %v9548_v36  }
 0x549   : > { %v10294_v33 = vpop.permute.xlu1 %4658 }
 0x54a   : > { %11395 = vst [vmem:[#allocation92_spill] sm:$0xff] %v10294_v33 }
 0x54c   : > { %4702 = vperm.xlu0 %6593, %v11358_v14  }
 0x54d   : > { %v10299_v36 = vpop.permute.xlu1 %4666 }
 0x54e   : > { %11396 = vst [vmem:[#allocation108_spill] sm:$0xff] %v10299_v36 }
 0x550   : > { %4710 = vperm.xlu0 %6593, %v11361_v20   ;;  %v10305_v20 = vpop.permute.xlu0 %4638 }
 0x551   : > { %v10303_v14 = vpop.permute.xlu1 %4674 }
 0x552   : > { %11397 = vst [vmem:[#allocation109_spill] sm:$0xff] %v10303_v14 }
 0x554   : > { %4718 = vperm.xlu0 %6593, %v11362_v57   ;;  %v10310_v32 = vpop.permute.xlu0 %4646 }
 0x555   : > { %v10308_v57 = vpop.permute.xlu1 %4682  ;;  %11400 = vst [vmem:[#allocation110_spill] sm:$0xff] %v10310_v32 }
 0x556   : > { %11399 = vst [vmem:[#allocation90_spill] sm:$0xff] %v10308_v57 }
 0x558   : > { %v10314_v13 = vpop.permute.xlu0 %4654 }
 0x559   : > { %11402 = vst [vmem:[#allocation112_spill] sm:$0xff] %v10314_v13 }
 0x55a   : > { %v10312_v54 = vpop.permute.xlu1 %4160 }
 0x55b   : > { %11401 = vst [vmem:[#allocation111_spill] sm:$0xff] %v10312_v54 }
 0x55e   : > { %v10316_v63 = vpop.permute.xlu1 %4170 }
 0x55f   : > { %11403 = vst [vmem:[#allocation113_spill] sm:$0xff] %v10316_v63 }
 0x562   : > { %v10322_v14 = vpop.permute.xlu1 %4180 }
 0x563   : > { %11405 = vst [vmem:[#allocation115_spill] sm:$0xff] %v10322_v14 }
 0x566   : > { %5282 = vxpose.xlu1.b32.start.end [1/1] (short) (narrow) %v10110_v26, 8  ;;  %v10318_v26 = vpop.trf.xlu0 }
 0x567   : > { %11404 = vst [vmem:[#allocation114_spill] sm:$0xff] %v10318_v26  ;;  %v11411_v26 = vld [vmem:[#allocation94_spill] sm:$0xff] }
 0x56a   : > { %v10324_v36 = vpop.permute.xlu0 %4125 }
 0x56b   : > { %11406 = vst [vmem:[#allocation116_spill] sm:$0xff] %v10324_v36  ;;  %v11413_v36 = vld [vmem:[#allocation82_spill] sm:$0xff] }
 0x56e   : > { %v10330_v57 = vpop.permute.xlu0 %4135 }
 0x56f   : > { %11408 = vst [vmem:[#allocation118_spill] sm:$0xff] %v10330_v57 }
 0x572   : > { %5218 = vxpose.xlu0.b32.start.end [1/1] (short) (narrow) %v11398_v34, 8  ;;  %v10327_v34 = vpop.permute.xlu1 %4190  ;;  %v10333_v33 = vpop.permute.xlu0 %4145 }
 0x573   : > { %11407 = vst [vmem:[#allocation117_spill] sm:$0xff] %v10327_v34  ;;  %11410 = vst [vmem:[#allocation98_spill] sm:$0xff] %v10333_v33  ;;  %v11414_v34 = vld [vmem:[#allocation96_spill] sm:$0xff] }
 0x574   : > { %v11416_v33 = vld [vmem:[#allocation84_spill] sm:$0xff] }
 0x576   : > { %v4691_v44 = vpop.permute.xlu1 %4690  ;;  %v10337_v13 = vpop.permute.xlu0 %4662 }
 0x577   : > { %11412 = vst [vmem:[#allocation94_spill] sm:$0xff] %v10337_v13 }
 0x57a   : > { %v4699_v14 = vpop.permute.xlu1 %4698  ;;  %v10343_v12 = vpop.permute.xlu0 %4670 }
 0x57b   : > { %11415 = vst [vmem:[#allocation82_spill] sm:$0xff] %v10343_v12 }
 0x57e   : > { %v4707_v57 = vpop.permute.xlu1 %4706  ;;  %v10348_v63 = vpop.permute.xlu0 %4678 }
 0x57f   : > { %11417 = vst [vmem:[#allocation96_spill] sm:$0xff] %v10348_v63 }
 0x582   : > { %v4715_v61 = vpop.permute.xlu1 %4714  ;;  %v10356_v12 = vpop.permute.xlu0 %4686 }
 0x583   : > { %11418 = vst [vmem:[#allocation84_spill] sm:$0xff] %v10356_v12 }
 0x584   : > { %6603 = vset.pattern.permute.xlu1 %v11346_v53 }
 0x585   : > { %4280 = vperm.xlu1 %6603, %v10000_v50  }
 0x589   : > { %4290 = vperm.xlu1 %6603, %v10010_v1  }
 0x58d   : > { %4300 = vperm.xlu1 %6603, %v10023_v43  }
 0x591   : > { %4310 = vperm.xlu1 %6603, %v11409_v19  }
 0x595   : > { %6604 = vset.pattern.permute.xlu1 %v11350_v48 }
 0x596   : > { %4786 = vperm.xlu1 %6604, %v11411_v26  }
 0x59a   : > { %4794 = vperm.xlu1 %6604, %v11413_v36  }
 0x59b   : > { %6594 = vset.pattern.permute.xlu0 %v11346_v53 }
 0x59c   : > { %4195 = vperm.xlu0 %6594, %v9699_v51   ;;  %v10353_v51 = vpop.permute.xlu1 %4200 }
 0x59e   : > { %4802 = vperm.xlu1 %6604, %v11414_v34  }
 0x5a0   : > { %4205 = vperm.xlu0 %6594, %v9705_v28   ;;  %v10361_v28 = vpop.trf.xlu0 }
 0x5a2   : > { %4810 = vperm.xlu1 %6604, %v11416_v33  }
 0x5a4   : > { %4215 = vperm.xlu0 %6594, %v11377_v37   ;;  %v10363_v37 = vpop.permute.xlu1 %4210 }
 0x5a6   : > { %6607 = vset.pattern.permute.xlu1 %v11346_v53 }
 0x5a7   : > { %4320 = vperm.xlu1 %6607, %v10138_v46  }
 0x5a8   : > { %4225 = vperm.xlu0 %6594, %v11382_v17   ;;  %v10370_v63 = vpop.permute.xlu1 %4220 }
 0x5ab   : > { %4330 = vperm.xlu1 %6607, %v10146_v0  }
 0x5ac   : > { %6597 = vset.pattern.permute.xlu0 %v11350_v48  ;;  %v10378_v12 = vpop.permute.xlu1 %4230 }
 0x5ad   : > { %4726 = vperm.xlu0 %6597, %v9701_v9  }
 0x5af   : > { %4340 = vperm.xlu1 %6607, %v10158_v8  }
 0x5b0   : > { %v10385_v13 = vpop.permute.xlu1 %4722 }
 0x5b1   : > { %4734 = vperm.xlu0 %6597, %v9709_v58  }
 0x5b3   : > { %4350 = vperm.xlu1 %6607, %v10169_v42   ;;  %v11423_v42 = vld [vmem:[#allocation28_spill] sm:$0xff] }
 0x5b4   : > { %v4897_v8 = vmul.f32 %v4691_v44, %v11423_v42 }
 0x5b5   : > { %4742 = vperm.xlu0 %6597, %v9723_v45  }
 0x5b6   : > { %v10368_v17 = vpop.permute.xlu0 %4155  ;;  %v4987_v32 = vsel %vm1346_vm3, %v4897_v8, 0.0  ;;  %v11428_v8 = vld [vmem:[#allocation34_spill] sm:$0xff] }
 0x5b7   : > { %11419 = vst [vmem:[#allocation119_spill] sm:$0xff] %v10368_v17  ;;  %6608 = vset.pattern.permute.xlu1 %v11350_v48  ;;  %v4903_v42 = vmul.f32 %v4715_v61, %v11428_v8 }
 0x5b8   : > { %4818 = vperm.xlu1 %6608, %v10135_v38   ;;  %v11425_v38 = vld [vmem:[#allocation29_spill] sm:$0xff] }
 0x5b9   : > { %4750 = vperm.xlu0 %6597, %v9740_v16   ;;  %v11424_v16 = vld [vmem:[#allocation30_spill] sm:$0xff] }
 0x5ba   : > { %v10375_v9 = vpop.permute.xlu0 %4165  ;;  %v4899_v46 = vmul.f32 %v4699_v14, %v11424_v16 }
 0x5bb   : > { %11420 = vst [vmem:[#allocation120_spill] sm:$0xff] %v10375_v9  ;;  %v11426_v9 = vld [vmem:[#allocation32_spill] sm:$0xff] }
 0x5bc   : > { %4826 = vperm.xlu1 %6608, %v10142_v2   ;;  %v10391_v2 = vpop.permute.xlu1 %4730  ;;  %v4901_v54 = vmul.f32 %v4707_v57, %v11426_v9 }
 0x5be   : > { %v10380_v58 = vpop.permute.xlu0 %4175 }
 0x5bf   : > { %11421 = vst [vmem:[#allocation121_spill] sm:$0xff] %v10380_v58 }
 0x5c0   : > { %4834 = vperm.xlu1 %6608, %v10151_v3   ;;  %v10399_v14 = vpop.permute.xlu1 %4738 }
 0x5c2   : > { %v10383_v45 = vpop.permute.xlu0 %4185 }
 0x5c3   : > { %11422 = vst [vmem:[#allocation122_spill] sm:$0xff] %v10383_v45  ;;  %v4990_v45 = vsel %vm1346_vm3, %v4899_v46, 0.0 }
 0x5c4   : > { %4842 = vperm.xlu1 %6608, %v10164_v31   ;;  %v11427_v31 = vld [vmem:[#allocation31_spill] sm:$0xff] }
 0x5c7   : > { %v4695_v0 = vpop.permute.xlu0 %4694 }
 0x5c8   : > { %v4898_v23 = vmul.f32 %v4695_v0, %v11425_v38  ;;  %v4994_v38 = vsel %vm1346_vm3, %v4901_v54, 0.0  ;;  %v11431_v54 = vld [vmem:[#allocation81_spill] sm:$0xff] }
 0x5ca   : > { %v4988_v58 = vsel %vm1346_vm3, %v4898_v23, 0.0  ;;  %v11429_v23 = vld [vmem:[#allocation33_spill] sm:$0xff] }
 0x5cb   : > { %v4989_v3 = vadd.f32 %v4988_v58, %v4987_v32  ;;  %v4703_v39 = vpop.permute.xlu0 %4702 }
 0x5cc   : > { %v4900_v55 = vmul.f32 %v4703_v39, %v11427_v31  ;;  %v4998_v39 = vsel %vm1346_vm3, %v4903_v42, 0.0 }
 0x5cd   : > { %v4991_v44 = vadd.f32 %v4990_v45, %v4989_v3  ;;  %v11430_v3 = vld [vmem:[#allocation35_spill] sm:$0xff] }
 0x5ce   : > { %v4992_v17 = vsel %vm1346_vm3, %v4900_v55, 0.0  ;;  %v10407_v55 = vpop.permute.xlu1 %4746 }
 0x5cf   : > { %v4993_v0 = vadd.f32 %v4992_v17, %v4991_v44  ;;  %v4711_v16 = vpop.permute.xlu0 %4710 }
 0x5d0   : > { %v4902_v32 = vmul.f32 %v4711_v16, %v11429_v23 }
 0x5d1   : > { %v4995_v58 = vadd.f32 %v4994_v38, %v4993_v0 }
 0x5d2   : > { %v4996_v46 = vsel %vm1346_vm3, %v4902_v32, 0.0  ;;  %v10413_v61 = vpop.permute.xlu1 %4240 }
 0x5d3   : > { %v4997_v62 = vadd.f32 %v4996_v46, %v4995_v58  ;;  %v4719_v57 = vpop.permute.xlu0 %4718  ;;  %v11435_v46 = vld [vmem:[#allocation37_spill] sm:$0xff] }
 0x5d4   : > { %v4904_v45 = vmul.f32 %v4719_v57, %v11430_v3  ;;  %v4418_v57 = vmul.f32 %v10353_v51, %v11435_v46 }
 0x5d5   : > { %v4999_v9 = vadd.f32 %v4998_v39, %v4997_v62  ;;  %v11436_v39 = vld [vmem:[#allocation36_spill] sm:$0xff] }
 0x5d6   : > { %v5000_v17 = vsel %vm1346_vm3, %v4904_v45, 0.0  ;;  %v10415_v38 = vpop.permute.xlu1 %4250 }
 0x5d7   : > { %v10410_v44 = vadd.f32 %v5000_v17, %v4999_v9  ;;  %5250 = vxpose.xlu0.b32.start.end [1/1] (short) (narrow) %v11431_v54, 8  ;;  %v4521_v17 = vsel %vm1346_vm3, %v4418_v57, 0.0 }
 0x5da   : > { %v10417_v16 = vpop.permute.xlu1 %4260 }
 0x5de   : > { %v10419_v0 = vpop.permute.xlu1 %4270 }
 0x5e2   : > { %v10422_v42 = vpop.permute.xlu1 %4754 }
 0x5e6   : > { %v10424_v32 = vpop.permute.xlu1 %4762 }
 0x5ea   : > { %v10426_v62 = vpop.permute.xlu1 %4770 }
 0x5ed   : > { %5346 = vxpose.xlu1.b32.start.end [1/1] (short) (narrow) %v10260_v5, 8 }
 0x5ee   : > { %v10430_v9 = vpop.permute.xlu1 %4778 }
 0x5f2   : > { %v10433_v58 = vpop.trf.xlu1 }
 0x600   : > { %6598 = vset.pattern.permute.xlu0 %v11346_v53 }
 0x601   : > { %4235 = vperm.xlu0 %6598, %v9848_v56  }
 0x604   : > { %v10439_v5 = vpop.permute.xlu1 %4280 }
 0x605   : > { %4245 = vperm.xlu0 %6598, %v9855_v15   ;;  %11432 = vst [vmem:[#allocation31_spill] sm:$0xff] %v10439_v5  ;;  %v10447_v15 = vpop.trf.xlu0 }
 0x608   : > { %v10445_v56 = vpop.permute.xlu1 %4290 }
 0x609   : > { %4255 = vperm.xlu0 %6598, %v11387_v52   ;;  %11433 = vst [vmem:[#allocation34_spill] sm:$0xff] %v10445_v56  ;;  %v11441_v56 = vld [vmem:[#allocation40_spill] sm:$0xff] }
 0x60b   : > { %6611 = vset.pattern.permute.xlu1 %v11346_v53 }
 0x60c   : > { %4360 = vperm.xlu1 %6611, %v10213_v30   ;;  %v10452_v52 = vpop.permute.xlu1 %4300 }
 0x60d   : > { %4265 = vperm.xlu0 %6598, %v11388_v40   ;;  %11434 = vst [vmem:[#allocation33_spill] sm:$0xff] %v10452_v52 }
 0x610   : > { %4370 = vperm.xlu1 %6611, %v10224_v24   ;;  %v10465_v52 = vpop.permute.xlu1 %4310 }
 0x611   : > { %6601 = vset.pattern.permute.xlu0 %v11350_v48  ;;  %11439 = vst [vmem:[#allocation35_spill] sm:$0xff] %v10465_v52 }
 0x612   : > { %4758 = vperm.xlu0 %6601, %v9850_v6  }
 0x614   : > { %4380 = vperm.xlu1 %6611, %v10235_v25  }
 0x616   : > { %4766 = vperm.xlu0 %6601, %v9859_v4  }
 0x618   : > { %4390 = vperm.xlu1 %6611, %v10246_v49   ;;  %v11438_v49 = vld [vmem:[#allocation38_spill] sm:$0xff] }
 0x61a   : > { %4774 = vperm.xlu0 %6601, %v9873_v11   ;;  %v11437_v11 = vld [vmem:[#allocation39_spill] sm:$0xff] }
 0x61b   : > { %v4196_v40 = vpop.permute.xlu0 %4195  ;;  %v4420_v54 = vmul.f32 %v10363_v37, %v11437_v11 }
 0x61c   : > { %v4417_v6 = vmul.f32 %v4196_v40, %v11436_v39  ;;  %6612 = vset.pattern.permute.xlu1 %v11350_v48 }
 0x61d   : > { %4850 = vperm.xlu1 %6612, %v10211_v22   ;;  %v4525_v57 = vsel %vm1346_vm3, %v4420_v54, 0.0  ;;  %v11440_v22 = vld [vmem:[#allocation41_spill] sm:$0xff] }
 0x61e   : > { %v4520_v45 = vsel %vm1346_vm3, %v4417_v6, 0.0  ;;  %4782 = vperm.xlu0 %6601, %v9892_v35   ;;  %v4422_v37 = vmul.f32 %v10370_v63, %v11440_v22 }
 0x61f   : > { %v4206_v4 = vpop.permute.xlu0 %4205  ;;  %v4522_v51 = vadd.f32 %v4521_v17, %v4520_v45  ;;  %v10477_v45 = vpop.permute.xlu1 %4786 }
 0x620   : > { %v4419_v30 = vmul.f32 %v4206_v4, %v11438_v49 }
 0x621   : > { %4862 = vperm.xlu1 %6612, %v10224_v24  }
 0x622   : > { %v4523_v40 = vsel %vm1346_vm3, %v4419_v30, 0.0  ;;  %6602 = vset.pattern.permute.xlu0 %v11346_v53 }
 0x623   : > { %v4524_v6 = vadd.f32 %v4523_v40, %v4522_v51  ;;  %4275 = vperm.xlu0 %6602, %v11411_v26   ;;  %v4216_v35 = vpop.permute.xlu0 %4215  ;;  %v4529_v26 = vsel %vm1346_vm3, %v4422_v37, 0.0  ;;  %v11442_v51 = vld [vmem:[#allocation43_spill] sm:$0xff]  ;;  %v11443_v40 = vld [vmem:[#allocation42_spill] sm:$0xff]  ;;  %v4907_v37 = vmul.f32 %v10391_v2, %v11438_v49  ;;  %v4909_v2 = vmul.f32 %v10399_v14, %v11441_v56 }
 0x624   : > { %v4421_v4 = vmul.f32 %v4216_v35, %v11441_v56  ;;  %v4424_v54 = vmul.f32 %v10378_v12, %v11442_v51  ;;  %v4905_v35 = vmul.f32 %v10385_v13, %v11436_v39  ;;  %v10492_v12 = vpop.permute.xlu1 %4794  ;;  %v4911_v56 = vmul.f32 %v10407_v55, %v11443_v40 }
 0x625   : > { %v4526_v5 = vadd.f32 %v4525_v57, %v4524_v6  ;;  %4866 = vperm.xlu1 %6612, %v10228_v29   ;;  %v5011_v39 = vsel %vm1346_vm3, %v4907_v37, 0.0  ;;  %v5015_v14 = vsel %vm1346_vm3, %v4909_v2, 0.0 }
 0x626   : > { %v4527_v24 = vsel %vm1346_vm3, %v4421_v4, 0.0 }
 0x627   : > { %v4528_v30 = vadd.f32 %v4527_v24, %v4526_v5  ;;  %4285 = vperm.xlu0 %6602, %v11413_v36   ;;  %v4226_v17 = vpop.permute.xlu0 %4225  ;;  %v4533_v36 = vsel %vm1346_vm3, %v4424_v54, 0.0 }
 0x628   : > { %v4423_v63 = vmul.f32 %v4226_v17, %v11443_v40 }
 0x629   : > { %v4530_v52 = vadd.f32 %v4529_v26, %v4528_v30  ;;  %4870 = vperm.xlu1 %6612, %v10235_v25   ;;  %v5008_v25 = vsel %vm1346_vm3, %v4905_v35, 0.0  ;;  %v10505_v30 = vpop.permute.xlu1 %4802 }
 0x62a   : > { %v4531_v6 = vsel %vm1346_vm3, %v4423_v63, 0.0 }
 0x62b   : > { %v4532_v57 = vadd.f32 %v4531_v6, %v4530_v52  ;;  %4295 = vperm.xlu0 %6602, %v11414_v34  }
 0x62c   : > { %v4727_v5 = vpop.permute.xlu0 %4726 }
 0x62d   : > { %v4534_v4 = vadd.f32 %v4533_v36, %v4532_v57  ;;  %v4906_v24 = vmul.f32 %v4727_v5, %v11435_v46  ;;  %4874 = vperm.xlu1 %6612, %v10242_v7   ;;  %v10518_v36 = vpop.permute.xlu1 %4810 }
 0x62f   : > { %v5009_v13 = vsel %vm1346_vm3, %v4906_v24, 0.0  ;;  %4305 = vperm.xlu0 %6602, %v11416_v33   ;;  %v4535_v33 = vrot.slane %v4534_v4, 4 }
 0x630   : > { %v5010_v34 = vadd.f32 %v5009_v13, %v5008_v25  ;;  %v4735_v52 = vpop.permute.xlu0 %4734 }
 0x631   : > { %v4908_v49 = vmul.f32 %v4735_v52, %v11437_v11  ;;  %6614 = vset.pattern.permute.xlu1 %v11346_v53  ;;  %v4536_v6 = vadd.f32 %v4535_v33, %v4534_v4 }
 0x632   : > { %v5012_v46 = vadd.f32 %v5011_v39, %v5010_v34  ;;  %5388 = vperm.xlu1 %6614, %v10162_v41  }
 0x633   : > { %v5013_v17 = vsel %vm1346_vm3, %v4908_v49, 0.0  ;;  %6605 = vset.pattern.permute.xlu0 %v11350_v48  ;;  %v4537_v55 = vrot.slane %v4536_v6, 2 }
 0x634   : > { %v5014_v26 = vadd.f32 %v5013_v17, %v5012_v46  ;;  %4790 = vperm.xlu0 %6605, %v10000_v50   ;;  %v4743_v54 = vpop.permute.xlu0 %4742  ;;  %v5019_v50 = vsel %vm1346_vm3, %v4911_v56, 0.0 }
 0x635   : > { %v4910_v11 = vmul.f32 %v4743_v54, %v11440_v22  ;;  %v4538_v4 = vadd.f32 %v4537_v55, %v4536_v6  ;;  %v11449_v55 = vld [vmem:[#allocation45_spill] sm:$0xff] }
 0x636   : > { %v5016_v63 = vadd.f32 %v5015_v14, %v5014_v26  ;;  %5398 = vperm.xlu1 %6614, %v10361_v28   ;;  %v11444_v26 = vld [vmem:[#allocation13_spill] sm:$0xff]  ;;  %v11445_v14 = vld [vmem:[#allocation12_spill] sm:$0xff] }
 0x637   : > { %v5017_v41 = vsel %vm1346_vm3, %v4910_v11, 0.0  ;;  %v4539_v13 = vrot.slane %v4538_v4, 1  ;;  %v4882_v54 = vmul.f32 %v10257_v60, %v11444_v26  ;;  %v4881_v56 = vmul.f32 %v10301_v21, %v11445_v14  ;;  %v11446_v11 = vld [vmem:[#allocation14_spill] sm:$0xff] }
 0x638   : > { %v5018_v35 = vadd.f32 %v5017_v41, %v5016_v63  ;;  %4798 = vperm.xlu0 %6605, %v10010_v1   ;;  %v4751_v57 = vpop.permute.xlu0 %4750  ;;  %v10525_v1 = vpop.permute.xlu1 %4320  ;;  %v4883_v63 = vmul.f32 %v10263_v47, %v11446_v11  ;;  %v4395_v47 = vmul.f32 %v10191_v10, %v11446_v11  ;;  %v11454_v10 = vld [vmem:[#allocation44_spill] sm:$0xff] }
 0x639   : > { %v4912_v5 = vmul.f32 %v4751_v57, %v11442_v51  ;;  %v4540_v52 = vadd.f32 %v4539_v13, %v4538_v4  ;;  %v4946_v6 = vsel %vm1346_vm3, %v4882_v54, 0.0  ;;  %v4945_v57 = vsel %vm1346_vm3, %v4881_v56, 0.0  ;;  %v11451_v4 = vld [vmem:[#allocation119_spill] sm:$0xff]  ;;  %v11453_v13 = vld [vmem:[#allocation76_spill] sm:$0xff] }
 0x63a   : > { %v5020_v37 = vadd.f32 %v5019_v50, %v5018_v35  ;;  %5403 = vperm.xlu1 %6614, %v10447_v15   ;;  %v4394_v35 = vmul.f32 %v10296_v18, %v11444_v26  ;;  %v4948_v60 = vsel %vm1346_vm3, %v4883_v63, 0.0  ;;  %v11447_v50 = vld [vmem:[#allocation15_spill] sm:$0xff]  ;;  %v11455_v26 = vld [vmem:[#allocation29_spill] sm:$0xff]  ;;  %v11458_v56 = vld [vmem:[#allocation120_spill] sm:$0xff] }
 0x63b   : > { %v5021_v22 = vsel %vm1346_vm3, %v4912_v5, 0.0  ;;  %v4884_v21 = vmul.f32 %v10305_v20, %v11447_v50  ;;  %v4947_v5 = vadd.f32 %v4946_v6, %v4945_v57  ;;  %v11452_v20 = vld [vmem:[#allocation16_spill] sm:$0xff]  ;;  %v11459_v57 = vld [vmem:[#allocation99_spill] sm:$0xff] }
 0x63c   : > { %v5022_v28 = vadd.f32 %v5021_v22, %v5020_v37  ;;  %4806 = vperm.xlu0 %6605, %v10023_v43   ;;  %v10528_v34 = vpop.permute.xlu1 %4330  ;;  %v11448_v37 = vld [vmem:[#allocation97_spill] sm:$0xff] }
 0x63d   : > { %v4396_v22 = vmul.f32 %v11448_v37, %v11447_v50  ;;  %v4949_v18 = vadd.f32 %v4948_v60, %v4947_v5  ;;  %v4397_v60 = vmul.f32 %v11459_v57, %v11452_v20  ;;  %v11468_v57 = vld [vmem:[#allocation48_spill] sm:$0xff] }
 0x63e   : > { %v5023_v40 = vrot.slane %v5022_v28, 4  ;;  %5413 = vperm.xlu1 %6614, %v10433_v58  }
 0x63f   : > { %v4462_v6 = vsel %vm1346_vm3, %v4396_v22, 0.0 }
 0x640   : > { %v5024_v24 = vadd.f32 %v5023_v40, %v5022_v28  ;;  %4814 = vperm.xlu0 %6605, %v11409_v19   ;;  %v10533_v2 = vpop.permute.xlu1 %4340  ;;  %v11450_v40 = vld [vmem:[#allocation28_spill] sm:$0xff] }
 0x642   : > { %v5025_v25 = vrot.slane %v5024_v24, 2 }
 0x644   : > { %v5026_v51 = vadd.f32 %v5025_v25, %v5024_v24  ;;  %v10535_v58 = vpop.permute.xlu1 %4350  ;;  %v4409_v24 = vmul.f32 %v11451_v4, %v11450_v40  ;;  %v11460_v4 = vld [vmem:[#allocation47_spill] sm:$0xff] }
 0x646   : > { %v5027_v15 = vrot.slane %v5026_v51, 1 }
 0x648   : > { %v5028_v39 = vadd.f32 %v5027_v15, %v5026_v51  ;;  %v10537_v49 = vpop.permute.xlu1 %4818  ;;  %v4458_v51 = vsel %vm1346_vm3, %v4394_v35, 0.0  ;;  %v4885_v15 = vmul.f32 %v11453_v13, %v11452_v20 }
 0x64a   : > { %v10531_v43 = vsel %vm5113_vm8, %v4540_v52, %v5028_v39  ;;  %v4950_v39 = vsel %vm1346_vm3, %v4884_v21, 0.0  ;;  %v4499_v21 = vsel %vm1346_vm3, %v4409_v24, 0.0  ;;  %v4952_v40 = vsel %vm1346_vm3, %v4885_v15, 0.0  ;;  %v11464_v24 = vld [vmem:[#allocation83_spill] sm:$0xff] }
 0x64b   : > { %v4951_v50 = vadd.f32 %v4950_v39, %v4949_v18 }
 0x64c   : > { %v10539_v46 = vpop.permute.xlu1 %4826 }
 0x64d   : > { %v4953_v15 = vadd.f32 %v4952_v40, %v4951_v50  ;;  %v11472_v50 = vld [vmem:[#allocation121_spill] sm:$0xff] }
 0x650   : > { %v10542_v19 = vpop.permute.xlu1 %4834 }
 0x654   : > { %v10544_v17 = vpop.permute.xlu1 %4842 }
 0x657   : > { %v10552_v41 = vpop.trf.xlu0 }
 0x65e   : > { %5314 = vxpose.xlu0.b32.start.end [1/1] (short) (narrow) %v10202_v59, 8  ;;  %v4393_v59 = vmul.f32 %v10181_v27, %v11445_v14  ;;  %v4426_v27 = vmul.f32 %v10413_v61, %v11449_v55  ;;  %v11456_v61 = vld [vmem:[#allocation111_spill] sm:$0xff]  ;;  %v11457_v14 = vld [vmem:[#allocation30_spill] sm:$0xff] }
 0x65f   : > { %v4410_v54 = vmul.f32 %v11456_v61, %v11455_v26  ;;  %v4411_v11 = vmul.f32 %v11458_v56, %v11457_v14  ;;  %v11465_v61 = vld [vmem:[#allocation113_spill] sm:$0xff] }
 0x660   : > { %v4457_v28 = vsel %vm1346_vm3, %v4393_v59, 0.0  ;;  %v4542_v59 = vsel %vm1346_vm3, %v4426_v27, 0.0  ;;  %v11463_v27 = vld [vmem:[#allocation110_spill] sm:$0xff]  ;;  %v4412_v14 = vmul.f32 %v11465_v61, %v11427_v31  ;;  %v11474_v61 = vld [vmem:[#allocation89_spill] sm:$0xff] }
 0x661   : > { %v4459_v63 = vadd.f32 %v4458_v51, %v4457_v28  ;;  %v4428_v28 = vmul.f32 %v10415_v38, %v11460_v4  ;;  %v11462_v51 = vld [vmem:[#allocation17_spill] sm:$0xff]  ;;  %v4502_v20 = vsel %vm1346_vm3, %v4411_v11, 0.0  ;;  %v4464_v38 = vsel %vm1346_vm3, %v4397_v60, 0.0  ;;  %v11471_v60 = vld [vmem:[#allocation32_spill] sm:$0xff] }
 0x662   : > { %v4886_v13 = vmul.f32 %v11463_v27, %v11462_v51  ;;  %v4398_v39 = vmul.f32 %v11464_v24, %v11462_v51  ;;  %v4413_v40 = vmul.f32 %v11472_v50, %v11471_v60 }
 0x663   : > { %v4546_v11 = vsel %vm1346_vm3, %v4428_v28, 0.0 }
 0x664   : > { %v4954_v31 = vsel %vm1346_vm3, %v4886_v13, 0.0  ;;  %v4466_v27 = vsel %vm1346_vm3, %v4398_v39, 0.0  ;;  %v11475_v13 = vld [vmem:[#allocation51_spill] sm:$0xff] }
 0x665   : > { %v4955_v24 = vadd.f32 %v4954_v31, %v4953_v15  ;;  %v11477_v15 = vld [vmem:[#allocation19_spill] sm:$0xff]  ;;  %v4913_v31 = vmul.f32 %v10422_v42, %v11454_v10 }
 0x66d   : > { %v5362_v33 = vpop.trf.xlu1 }
 0x66e   : > { %5423 = vperm.xlu1 %6614, %v5362_v33   ;;  %v4460_v33 = vsel %vm1346_vm3, %v4395_v47, 0.0 }
 0x66f   : > { %v4461_v37 = vadd.f32 %v4460_v33, %v4459_v63  ;;  %v11466_v63 = vld [vmem:[#allocation86_spill] sm:$0xff] }
 0x671   : > { %v4463_v18 = vadd.f32 %v4462_v6, %v4461_v37  ;;  %v11467_v6 = vld [vmem:[#allocation49_spill] sm:$0xff] }
 0x672   : > { %v11470_v37 = vld [vmem:[#allocation85_spill] sm:$0xff] }
 0x680   : > { %v4236_v25 = vpop.permute.xlu0 %4235 }
 0x681   : > { %v4425_v52 = vmul.f32 %v4236_v25, %v11454_v10  ;;  %v11461_v25 = vld [vmem:[#allocation46_spill] sm:$0xff] }
 0x683   : > { %v4541_v35 = vsel %vm1346_vm3, %v4425_v52, 0.0  ;;  %v4500_v52 = vsel %vm1346_vm3, %v4410_v54, 0.0 }
 0x684   : > { %v4543_v47 = vadd.f32 %v4542_v59, %v4541_v35  ;;  %v4246_v5 = vpop.permute.xlu0 %4245  ;;  %v4501_v26 = vadd.f32 %v4500_v52, %v4499_v21  ;;  %v4430_v59 = vmul.f32 %v10417_v16, %v11467_v6  ;;  %v11473_v16 = vld [vmem:[#allocation77_spill] sm:$0xff] }
 0x685   : > { %v4427_v22 = vmul.f32 %v4246_v5, %v11461_v25  ;;  %v11469_v5 = vld [vmem:[#allocation18_spill] sm:$0xff] }
 0x686   : > { %v4503_v35 = vadd.f32 %v4502_v20, %v4501_v26  ;;  %v4399_v20 = vmul.f32 %v11473_v16, %v11469_v5  ;;  %v4504_v26 = vsel %vm1346_vm3, %v4412_v14, 0.0 }
 0x687   : > { %v4544_v33 = vsel %vm1346_vm3, %v4427_v22, 0.0  ;;  %6606 = vset.pattern.permute.xlu0 %v11346_v53  ;;  %v4887_v22 = vmul.f32 %v11470_v37, %v11469_v5  ;;  %v11478_v37 = vld [vmem:[#allocation112_spill] sm:$0xff] }
 0x688   : > { %v4545_v56 = vadd.f32 %v4544_v33, %v4543_v47  ;;  %4315 = vperm.xlu0 %6606, %v11466_v63   ;;  %v4256_v54 = vpop.permute.xlu0 %4255  ;;  %v4465_v47 = vadd.f32 %v4464_v38, %v4463_v18  ;;  %v4432_v18 = vmul.f32 %v10419_v0, %v11475_v13  ;;  %v4505_v39 = vadd.f32 %v4504_v26, %v4503_v35  ;;  %v11476_v38 = vld [vmem:[#allocation50_spill] sm:$0xff]  ;;  %v11479_v0 = vld [vmem:[#allocation115_spill] sm:$0xff] }
 0x689   : > { %v4429_v21 = vmul.f32 %v4256_v54, %v11468_v57  ;;  %v4888_v14 = vmul.f32 %v11478_v37, %v11477_v15  ;;  %v4414_v35 = vmul.f32 %v11479_v0, %v11429_v23  ;;  %v11484_v0 = vld [vmem:[#allocation117_spill] sm:$0xff] }
 0x68a   : > { %v4547_v51 = vadd.f32 %v4546_v11, %v4545_v56  ;;  %v4550_v56 = vsel %vm1346_vm3, %v4430_v59, 0.0  ;;  %v4956_v11 = vsel %vm1346_vm3, %v4887_v22, 0.0  ;;  %v4467_v60 = vadd.f32 %v4466_v27, %v4465_v47 }
 0x68b   : > { %v4548_v28 = vsel %vm1346_vm3, %v4429_v21, 0.0  ;;  %v10615_v52 = vpop.permute.xlu1 %4360  ;;  %v4506_v21 = vsel %vm1346_vm3, %v4413_v40, 0.0  ;;  %v4468_v59 = vsel %vm1346_vm3, %v4399_v20, 0.0  ;;  %v11481_v40 = vld [vmem:[#allocation88_spill] sm:$0xff]  ;;  %v4957_v26 = vadd.f32 %v4956_v11, %v4955_v24 }
 0x68c   : > { %v4549_v33 = vadd.f32 %v4548_v28, %v4547_v51  ;;  %4325 = vperm.xlu0 %6606, %v11474_v61   ;;  %v4266_v63 = vpop.permute.xlu0 %4265  ;;  %v11480_v28 = vld [vmem:[#allocation91_spill] sm:$0xff]  ;;  %v4400_v16 = vmul.f32 %v11481_v40, %v11477_v15  ;;  %v4554_v47 = vsel %vm1346_vm3, %v4432_v18, 0.0  ;;  %v4507_v27 = vadd.f32 %v4506_v21, %v4505_v39  ;;  %v11482_v61 = vld [vmem:[#allocation122_spill] sm:$0xff]  ;;  %v11483_v11 = vld [vmem:[#allocation104_spill] sm:$0xff] }
 0x68d   : > { %v4431_v54 = vmul.f32 %v4266_v63, %v11476_v38  ;;  %v4915_v20 = vmul.f32 %v10424_v32, %v11461_v25  ;;  %v4415_v23 = vmul.f32 %v11482_v61, %v11428_v8  ;;  %v4958_v10 = vsel %vm1346_vm3, %v4888_v14, 0.0 }
 0x68e   : > { %v4551_v5 = vadd.f32 %v4550_v56, %v4549_v33  ;;  %v4508_v24 = vsel %vm1346_vm3, %v4414_v35, 0.0  ;;  %v5029_v18 = vsel %vm1346_vm3, %v4913_v31, 0.0  ;;  %v4470_v32 = vsel %vm1346_vm3, %v4400_v16, 0.0  ;;  %v11485_v16 = vld [vmem:[#allocation100_spill] sm:$0xff] }
 0x68f   : > { %v4552_v50 = vsel %vm1346_vm3, %v4431_v54, 0.0  ;;  %v10630_v51 = vpop.permute.xlu1 %4370  ;;  %v4469_v54 = vadd.f32 %v4468_v59, %v4467_v60  ;;  %v4959_v25 = vadd.f32 %v4958_v10, %v4957_v26  ;;  %v4509_v8 = vadd.f32 %v4508_v24, %v4507_v27 }
 0x690   : > { %v4553_v22 = vadd.f32 %v4552_v50, %v4551_v5  ;;  %4335 = vperm.xlu0 %6606, %v11480_v28   ;;  %v4917_v15 = vmul.f32 %v10426_v62, %v11468_v57  ;;  %v4510_v37 = vsel %vm1346_vm3, %v4415_v23, 0.0  ;;  %v4416_v35 = vmul.f32 %v11484_v0, %v11430_v3 }
 0x691   : > { %v4759_v33 = vpop.permute.xlu0 %4758  ;;  %v4471_v59 = vadd.f32 %v4470_v32, %v4469_v54  ;;  %v4960_v57 = vrot.slane %v4959_v25, 4  ;;  %v4919_v26 = vmul.f32 %v10430_v9, %v11476_v38  ;;  %v11486_v54 = vld [vmem:[#allocation102_spill] sm:$0xff]  ;;  %v5002_v9 = vrot.slane %v10410_v44, 4 }
 0x692   : > { %v4555_v63 = vadd.f32 %v4554_v47, %v4553_v22  ;;  %v4914_v42 = vmul.f32 %v4759_v33, %v11449_v55  ;;  %v5032_v55 = vsel %vm1346_vm3, %v4915_v20, 0.0  ;;  %v4511_v22 = vadd.f32 %v4510_v37, %v4509_v8 }
 0x693   : > { %v10647_v56 = vpop.permute.xlu1 %4380  ;;  %v4472_v3 = vrot.slane %v4471_v59, 4  ;;  %v4512_v33 = vsel %vm1346_vm3, %v4416_v35, 0.0 }
 0x694   : > { %v5030_v39 = vsel %vm1346_vm3, %v4914_v42, 0.0  ;;  %4345 = vperm.xlu0 %6606, %v11483_v11   ;;  %v4556_v28 = vrot.slane %v4555_v63, 4  ;;  %v4513_v23 = vadd.f32 %v4512_v33, %v4511_v22 }
 0x695   : > { %v5031_v21 = vadd.f32 %v5030_v39, %v5029_v18  ;;  %v4767_v5 = vpop.permute.xlu0 %4766  ;;  %v4961_v18 = vadd.f32 %v4960_v57, %v4959_v25  ;;  %v5040_v39 = vsel %vm1346_vm3, %v4919_v26, 0.0  ;;  %v4473_v11 = vadd.f32 %v4472_v3, %v4471_v59  ;;  %v11491_v57 = vld [vmem:[#allocation95_spill] sm:$0xff]  ;;  %v11493_v3 = vld [vmem:[#allocation34_spill] sm:$0xff] }
 0x696   : > { %v4916_v14 = vmul.f32 %v4767_v5, %v11460_v4  ;;  %v5036_v4 = vsel %vm1346_vm3, %v4917_v15, 0.0  ;;  %v4557_v42 = vadd.f32 %v4556_v28, %v4555_v63  ;;  %v5003_v25 = vadd.f32 %v5002_v9, %v10410_v44 }
 0x697   : > { %v5033_v60 = vadd.f32 %v5032_v55, %v5031_v21  ;;  %v10659_v50 = vpop.permute.xlu1 %4390  ;;  %v4514_v21 = vrot.slane %v4513_v23, 4  ;;  %v11487_v55 = vld [vmem:[#allocation93_spill] sm:$0xff]  ;;  %v4962_v15 = vrot.slane %v4961_v18, 2  ;;  %v4474_v59 = vrot.slane %v4473_v11, 2 }
 0x698   : > { %v5034_v31 = vsel %vm1346_vm3, %v4916_v14, 0.0  ;;  %6609 = vset.pattern.permute.xlu0 %v11350_v48  ;;  %v4558_v5 = vrot.slane %v4557_v42, 2  ;;  %v11488_v14 = vld [vmem:[#allocation53_spill] sm:$0xff] }
 0x699   : > { %v5035_v40 = vadd.f32 %v5034_v31, %v5033_v60  ;;  %4822 = vperm.xlu0 %6609, %v11485_v16   ;;  %v4775_v62 = vpop.permute.xlu0 %4774  ;;  %v11489_v60 = vld [vmem:[#allocation31_spill] sm:$0xff]  ;;  %v4515_v28 = vadd.f32 %v4514_v21, %v4513_v23  ;;  %v4963_v44 = vadd.f32 %v4962_v15, %v4961_v18  ;;  %v11495_v21 = vld [vmem:[#allocation101_spill] sm:$0xff] }
 0x69a   : > { %v4918_v47 = vmul.f32 %v4775_v62, %v11467_v6  ;;  %v4434_v0 = vmul.f32 %v11489_v60, %v11488_v14  ;;  %v11496_v15 = vld [vmem:[#allocation57_spill] sm:$0xff] }
 0x69b   : > { %v5037_v27 = vadd.f32 %v5036_v4, %v5035_v40  ;;  %v4559_v40 = vadd.f32 %v4558_v5, %v4557_v42  ;;  %v5004_v4 = vrot.slane %v5003_v25, 2  ;;  %v4516_v42 = vrot.slane %v4515_v28, 2 }
 0x69c   : > { %v5038_v20 = vsel %vm1346_vm3, %v4918_v47, 0.0  ;;  %v10672_v61 = vpop.permute.xlu1 %4850  ;;  %v4563_v47 = vsel %vm1346_vm3, %v4434_v0, 0.0  ;;  %v11498_v0 = vld [vmem:[#allocation56_spill] sm:$0xff] }
 0x69d   : > { %v5039_v10 = vadd.f32 %v5038_v20, %v5037_v27  ;;  %4830 = vperm.xlu0 %6609, %v11486_v54   ;;  %v4783_v24 = vpop.permute.xlu0 %4782  ;;  %v11492_v27 = vld [vmem:[#allocation55_spill] sm:$0xff]  ;;  %v5005_v18 = vadd.f32 %v5004_v4, %v5003_v25  ;;  %v4517_v25 = vadd.f32 %v4516_v42, %v4515_v28 }
 0x69e   : > { %v4920_v6 = vmul.f32 %v4783_v24, %v11475_v13  ;;  %v11490_v13 = vld [vmem:[#allocation52_spill] sm:$0xff]  ;;  %v4436_v33 = vmul.f32 %v11493_v3, %v11492_v27  ;;  %v4475_v24 = vadd.f32 %v4474_v59, %v4473_v11  ;;  %v11497_v11 = vld [vmem:[#allocation33_spill] sm:$0xff]  ;;  %v11499_v3 = vld [vmem:[#allocation106_spill] sm:$0xff] }
 0x69f   : > { %v5041_v38 = vadd.f32 %v5040_v39, %v5039_v10  ;;  %v11494_v10 = vld [vmem:[#allocation54_spill] sm:$0xff] }
 0x6a0   : > { %v5042_v32 = vsel %vm1346_vm3, %v4920_v6, 0.0  ;;  %v10679_v8 = vpop.permute.xlu1 %4862 }
 0x6a1   : > { %v5043_v63 = vadd.f32 %v5042_v32, %v5041_v38  ;;  %4838 = vperm.xlu0 %6609, %v11487_v55   ;;  %v4560_v38 = vrot.slane %v4559_v40, 1  ;;  %v4567_v55 = vsel %vm1346_vm3, %v4436_v33, 0.0 }
 0x6a2   : > { %v4276_v37 = vpop.permute.xlu0 %4275 }
 0x6a3   : > { %v5044_v35 = vrot.slane %v5043_v63, 4  ;;  %v4433_v31 = vmul.f32 %v4276_v37, %v11490_v13  ;;  %v4438_v37 = vmul.f32 %v11497_v11, %v11496_v15 }
 0x6a4   : > { %v10686_v22 = vpop.permute.xlu1 %4866 }
 0x6a5   : > { %v5045_v16 = vadd.f32 %v5044_v35, %v5043_v63  ;;  %v4562_v62 = vsel %vm1346_vm3, %v4433_v31, 0.0  ;;  %4846 = vperm.xlu0 %6609, %v11491_v57   ;;  %v4964_v63 = vrot.slane %v4963_v44, 1  ;;  %v4561_v57 = vadd.f32 %v4560_v38, %v4559_v40 }
 0x6a6   : > { %v4286_v26 = vpop.permute.xlu0 %4285  ;;  %v4564_v39 = vadd.f32 %v4563_v47, %v4562_v62  ;;  %v4518_v38 = vrot.slane %v4517_v25, 1 }
 0x6a7   : > { %v5046_v20 = vrot.slane %v5045_v16, 2  ;;  %v4435_v54 = vmul.f32 %v4286_v26, %v11494_v10  ;;  %v5006_v26 = vrot.slane %v5005_v18, 1 }
 0x6a8   : > { %v10694_v23 = vpop.permute.xlu1 %4870 }
 0x6a9   : > { %v5047_v9 = vadd.f32 %v5046_v20, %v5045_v16  ;;  %v4565_v6 = vsel %vm1346_vm3, %v4435_v54, 0.0  ;;  %6610 = vset.pattern.permute.xlu0 %v11346_v53  ;;  %v4476_v16 = vrot.slane %v4475_v24, 1  ;;  %v4965_v20 = vadd.f32 %v4964_v63, %v4963_v44 }
 0x6aa   : > { %v4566_v32 = vadd.f32 %v4565_v6, %v4564_v39  ;;  %4355 = vperm.xlu0 %6610, %v11495_v21   ;;  %v4296_v5 = vpop.permute.xlu0 %4295  ;;  %v4571_v54 = vsel %vm1346_vm3, %v4438_v37, 0.0  ;;  %v11500_v39 = vld [vmem:[#allocation59_spill] sm:$0xff]  ;;  %v4921_v44 = vmul.f32 %v10477_v45, %v11490_v13  ;;  %v4519_v13 = vadd.f32 %v4518_v38, %v4517_v25 }
 0x6ab   : > { %v5048_v60 = vrot.slane %v5047_v9, 1  ;;  %v4437_v35 = vmul.f32 %v4296_v5, %v11498_v0  ;;  %v11501_v6 = vld [vmem:[#allocation35_spill] sm:$0xff] }
 0x6ac   : > { %v4568_v31 = vadd.f32 %v4567_v55, %v4566_v32  ;;  %v10703_v59 = vpop.permute.xlu1 %4874  ;;  %v4440_v21 = vmul.f32 %v11501_v6, %v11500_v39  ;;  %v11502_v32 = vld [vmem:[#allocation58_spill] sm:$0xff] }
 0x6ad   : > { %v4569_v62 = vsel %vm1346_vm3, %v4437_v35, 0.0  ;;  %v5049_v4 = vadd.f32 %v5048_v60, %v5047_v9  ;;  %v5378_v55 = vld [vmem:[#allocation4] sm:$0x3]  ;;  %v4477_v9 = vadd.f32 %v4476_v16, %v4475_v24 }
 0x6ae   : > { %v4570_v47 = vadd.f32 %v4569_v62, %v4568_v31  ;;  %4365 = vperm.xlu0 %6610, %v11499_v3   ;;  %v4306_v33 = vpop.permute.xlu0 %4305  ;;  %v4575_v60 = vsel %vm1346_vm3, %v4440_v21, 0.0  ;;  %v5380_v62 = vld [vmem:[#allocation4 + $0x4] sm:$0x3] }
 0x6af   : > { %v4439_v5 = vmul.f32 %v4306_v33, %v11502_v32  ;;  %v10712_v11 = vsel %vm5113_vm8, %v4561_v57, %v5049_v4  ;;  %v5114_v31 = vsel %vm5113_vm8, %v4477_v9, %v4965_v20  ;;  %v5007_v57 = vadd.f32 %v5006_v26, %v5005_v18 }
 0x6b0   : > { %v4572_v28 = vadd.f32 %v4571_v54, %v4570_v47  ;;  %v4923_v4 = vmul.f32 %v10492_v12, %v11494_v10  ;;  %v5381_v12 = vld [vmem:[#allocation4 + $0x6] sm:$0x3] }
 0x6b1   : > { %v4573_v40 = vsel %vm1346_vm3, %v4439_v5, 0.0  ;;  %v5389_v42 = vpop.permute.xlu1 %5388  ;;  %v5116_v26 = vsel %vm5113_vm8, %v4519_v13, %v5007_v57 }
 0x6b2   : > { %v4574_v63 = vadd.f32 %v4573_v40, %v4572_v28  ;;  %4375 = vperm.xlu0 %6610, %v10228_v29   ;;  %v5426_v37 = vmul.f32 %v5389_v42, %v5378_v55  ;;  %v5050_v29 = vsel %vm1346_vm3, %v4921_v44, 0.0  ;;  %v5053_v10 = vsel %vm1346_vm3, %v4923_v4, 0.0  ;;  %v11503_v42 = vld [vmem:[#allocation103_spill] sm:$0xff] }
 0x6b3   : > { %v4791_v35 = vpop.permute.xlu0 %4790 }
 0x6b4   : > { %v4576_v24 = vadd.f32 %v4575_v60, %v4574_v63  ;;  %v4922_v16 = vmul.f32 %v4791_v35, %v11488_v14  ;;  %v5434_v47 = vadd.f32 %v5426_v37, %v5114_v31  ;;  %v4925_v14 = vmul.f32 %v10505_v30, %v11498_v0 }
 0x6b5   : > { %v5399_v45 = vpop.permute.xlu1 %5398  ;;  %v4927_v30 = vmul.f32 %v10518_v36, %v11502_v32 }
 0x6b6   : > { %v5051_v33 = vsel %vm1346_vm3, %v4922_v16, 0.0  ;;  %5443 = vst.msk [vmem:[#allocation4] sm:$0x3] %vm5442_vm9, %v5434_v47  ;;  %4385 = vperm.xlu0 %6610, %v10242_v7   ;;  %v5428_v20 = vmul.f32 %v5399_v45, %v5380_v62  ;;  %v4577_v28 = vrot.slane %v4576_v24, 4  ;;  %v5057_v38 = vsel %vm1346_vm3, %v4925_v14, 0.0 }
 0x6b7   : > { %v5052_v54 = vadd.f32 %v5051_v33, %v5050_v29  ;;  %v4799_v18 = vpop.permute.xlu0 %4798  ;;  %v5061_v35 = vsel %vm1346_vm3, %v4927_v30, 0.0  ;;  %v5383_v45 = vld [vmem:[#allocation4 + $0xa] sm:$0x3] }
 0x6b8   : > { %v4924_v25 = vmul.f32 %v4799_v18, %v11492_v27  ;;  %v5436_v6 = vadd.f32 %v5428_v20, %v5116_v26 }
 0x6b9   : > { %v5054_v21 = vadd.f32 %v5053_v10, %v5052_v54  ;;  %v5404_v5 = vpop.permute.xlu1 %5403  ;;  %v11506_v10 = vld [vmem:[#allocation61_spill] sm:$0xff] }
 0x6ba   : > { %v5055_v55 = vsel %vm1346_vm3, %v4924_v25, 0.0  ;;  %5445 = vst.msk [vmem:[#allocation4 + $0x4] sm:$0x3] %vm5442_vm9, %v5436_v6  ;;  %6613 = vset.pattern.permute.xlu0 %v11350_v48  ;;  %v5429_v7 = vmul.f32 %v5404_v5, %v5381_v12  ;;  %v4578_v48 = vadd.f32 %v4577_v28, %v4576_v24  ;;  %v11505_v24 = vld [vmem:[#allocation114_spill] sm:$0xff]  ;;  %v4442_v14 = vmul.f32 %v10525_v1, %v11506_v10  ;;  %v11507_v25 = vld [vmem:[#allocation60_spill] sm:$0xff] }
 0x6bb   : > { %v5056_v40 = vadd.f32 %v5055_v55, %v5054_v21  ;;  %4854 = vperm.xlu0 %6613, %v11503_v42   ;;  %v4807_v9 = vpop.permute.xlu0 %4806  ;;  %v11508_v55 = vld [vmem:[#allocation63_spill] sm:$0xff]  ;;  %v11509_v28 = vld [vmem:[#allocation62_spill] sm:$0xff]  ;;  %v11513_v1 = vld [vmem:[#allocation92_spill] sm:$0xff] }
 0x6bc   : > { %v4926_v27 = vmul.f32 %v4807_v9, %v11496_v15  ;;  %v5437_v0 = vadd.f32 %v5429_v7, %v10531_v43  ;;  %v4579_v15 = vrot.slane %v4578_v48, 2  ;;  %v11504_v43 = vld [vmem:[#allocation78_spill] sm:$0xff]  ;;  %v4584_v5 = vsel %vm1346_vm3, %v4442_v14, 0.0  ;;  %v11510_v9 = vld [vmem:[#allocation21_spill] sm:$0xff]  ;;  %v11523_v14 = vld [vmem:[#allocation23_spill] sm:$0xff] }
 0x6bd   : > { %v5058_v44 = vadd.f32 %v5057_v38, %v5056_v40  ;;  %v5414_v13 = vpop.permute.xlu1 %5413  ;;  %v4444_v7 = vmul.f32 %v10528_v34, %v11508_v55  ;;  %v11511_v38 = vld [vmem:[#allocation94_spill] sm:$0xff] }
 0x6be   : > { %v5059_v63 = vsel %vm1346_vm3, %v4926_v27, 0.0  ;;  %5446 = vst.msk [vmem:[#allocation4 + $0x6] sm:$0x3] %vm5442_vm9, %v5437_v0  ;;  %v4580_v4 = vadd.f32 %v4579_v15, %v4578_v48  ;;  %v5431_v33 = vmul.f32 %v5414_v13, %v5383_v45  ;;  %v4890_v30 = vmul.f32 %v11511_v38, %v11510_v9  ;;  %v11512_v0 = vld [vmem:[#allocation20_spill] sm:$0xff] }
 0x6bf   : > { %v5060_v37 = vadd.f32 %v5059_v63, %v5058_v44  ;;  %4858 = vperm.xlu0 %6613, %v11499_v3   ;;  %v4815_v60 = vpop.permute.xlu0 %4814  ;;  %v4889_v44 = vmul.f32 %v11513_v1, %v11512_v0  ;;  %v11520_v13 = vld [vmem:[#allocation116_spill] sm:$0xff] }
 0x6c0   : > { %v4928_v31 = vmul.f32 %v4815_v60, %v11500_v39  ;;  %v4581_v29 = vrot.slane %v4580_v4, 1  ;;  %v11514_v60 = vld [vmem:[#allocation65_spill] sm:$0xff] }
 0x6c1   : > { %v5062_v62 = vadd.f32 %v5061_v35, %v5060_v37  ;;  %v4588_v37 = vsel %vm1346_vm3, %v4444_v7, 0.0  ;;  %v4446_v35 = vmul.f32 %v10533_v2, %v11514_v60  ;;  %v4929_v7 = vmul.f32 %v10537_v49, %v11507_v25 }
 0x6c2   : > { %v5063_v36 = vsel %vm1346_vm3, %v4928_v31, 0.0  ;;  %v4582_v20 = vadd.f32 %v4581_v29, %v4580_v4  ;;  %v11515_v31 = vld [vmem:[#allocation64_spill] sm:$0xff] }
 0x6c3   : > { %v5064_v32 = vadd.f32 %v5063_v36, %v5062_v62  ;;  %4878 = vperm.xlu0 %6613, %v11504_v43   ;;  %v11516_v62 = vld [vmem:[#allocation105_spill] sm:$0xff] }
 0x6c4   : > { %v4402_v36 = vmul.f32 %v11516_v62, %v11510_v9  ;;  %v11527_v62 = vld [vmem:[#allocation109_spill] sm:$0xff] }
 0x6c5   : > { %v5065_v57 = vrot.slane %v5064_v32, 4 }
 0x6c7   : > { %v5066_v16 = vadd.f32 %v5065_v57, %v5064_v32  ;;  %6615 = vset.pattern.permute.xlu0 %v11346_v53  ;;  %v4967_v32 = vsel %vm1346_vm3, %v4890_v30, 0.0  ;;  %v11517_v57 = vld [vmem:[#allocation87_spill] sm:$0xff] }
 0x6c8   : > { %5393 = vperm.xlu0 %6615, %v11505_v24   ;;  %v4401_v4 = vmul.f32 %v11517_v57, %v11512_v0  ;;  %v11518_v24 = vld [vmem:[#allocation22_spill] sm:$0xff]  ;;  %v4931_v0 = vmul.f32 %v10539_v46, %v11509_v28  ;;  %v4933_v57 = vmul.f32 %v10542_v19, %v11515_v31 }
 0x6c9   : > { %v5067_v3 = vrot.slane %v5066_v16, 2  ;;  %v4403_v29 = vmul.f32 %v11520_v13, %v11518_v24 }
 0x6ca   : > { %v5078_v19 = vsel %vm1346_vm3, %v4933_v57, 0.0  ;;  %v11539_v57 = vld [vmem:[#allocation68_spill] sm:$0xff] }
 0x6cb   : > { %v5068_v47 = vadd.f32 %v5067_v3, %v5066_v16  ;;  %v4966_v16 = vsel %vm1346_vm3, %v4889_v44, 0.0  ;;  %v11519_v3 = vld [vmem:[#allocation108_spill] sm:$0xff]  ;;  %v4481_v9 = vsel %vm1346_vm3, %v4403_v29, 0.0 }
 0x6cc   : > { %5408 = vperm.xlu0 %6615, %v10552_v41  }
 0x6cd   : > { %v5069_v39 = vrot.slane %v5068_v47, 1 }
 0x6cf   : > { %v5070_v54 = vadd.f32 %v5069_v39, %v5068_v47  ;;  %v4891_v47 = vmul.f32 %v11519_v3, %v11518_v24  ;;  %v4592_v39 = vsel %vm1346_vm3, %v4446_v35, 0.0  ;;  %v11529_v24 = vld [vmem:[#allocation25_spill] sm:$0xff]  ;;  %v11530_v3 = vld [vmem:[#allocation96_spill] sm:$0xff] }
 0x6d1   : > { %v5119_v18 = vsel %vm5113_vm8, %v4582_v20, %v5070_v54  ;;  %v11522_v54 = vld [vmem:[#allocation66_spill] sm:$0xff] }
 0x6d2   : > { %v5439_v26 = vadd.f32 %v5431_v33, %v5119_v18  ;;  %v11521_v33 = vld [vmem:[#allocation67_spill] sm:$0xff] }
 0x6d3   : > { %v4448_v20 = vmul.f32 %v10535_v58, %v11521_v33  ;;  %v4969_v58 = vsel %vm1346_vm3, %v4891_v47, 0.0  ;;  %v4894_v47 = vmul.f32 %v11530_v3, %v11529_v24 }
 0x6d4   : > { %5448 = vst.msk [vmem:[#allocation4 + $0xa] sm:$0x3] %vm5442_vm9, %v5439_v26  ;;  %v4479_v26 = vsel %vm1346_vm3, %v4402_v36, 0.0 }
 0x6d5   : > { %v4596_v38 = vsel %vm1346_vm3, %v4448_v20, 0.0 }
 0x6de   : > { %v5330_v12 = vpop.trf.xlu0 }
 0x6df   : > { %5418 = vperm.xlu0 %6615, %v5330_v12   ;;  %v4968_v12 = vadd.f32 %v4967_v32, %v4966_v16 }
 0x707   : > { %v4316_v53 = vpop.permute.xlu0 %4315 }
 0x708   : > { %v4441_v6 = vmul.f32 %v4316_v53, %v11507_v25 }
 0x70a   : > { %v4583_v21 = vsel %vm1346_vm3, %v4441_v6, 0.0  ;;  %v11524_v6 = vld [vmem:[#allocation82_spill] sm:$0xff] }
 0x70b   : > { %v4326_v41 = vpop.permute.xlu0 %4325  ;;  %v4585_v42 = vadd.f32 %v4584_v5, %v4583_v21  ;;  %v4892_v21 = vmul.f32 %v11524_v6, %v11523_v14  ;;  %v4478_v5 = vsel %vm1346_vm3, %v4401_v4, 0.0  ;;  %v4975_v6 = vsel %vm1346_vm3, %v4894_v47, 0.0 }
 0x70c   : > { %v4443_v40 = vmul.f32 %v4326_v41, %v11509_v28 }
 0x70d   : > { %v4971_v49 = vsel %vm1346_vm3, %v4892_v21, 0.0 }
 0x70e   : > { %v4586_v27 = vsel %vm1346_vm3, %v4443_v40, 0.0 }
 0x70f   : > { %v4587_v63 = vadd.f32 %v4586_v27, %v4585_v42  ;;  %v4336_v48 = vpop.permute.xlu0 %4335  ;;  %v4480_v42 = vadd.f32 %v4479_v26, %v4478_v5  ;;  %v4970_v27 = vadd.f32 %v4969_v58, %v4968_v12  ;;  %v11534_v58 = vld [vmem:[#allocation98_spill] sm:$0xff] }
 0x710   : > { %v4445_v34 = vmul.f32 %v4336_v48, %v11515_v31 }
 0x711   : > { %v4589_v15 = vadd.f32 %v4588_v37, %v4587_v63  ;;  %v11525_v63 = vld [vmem:[#allocation79_spill] sm:$0xff]  ;;  %v4482_v25 = vadd.f32 %v4481_v9, %v4480_v42  ;;  %v5071_v37 = vsel %vm1346_vm3, %v4929_v7, 0.0  ;;  %v11532_v7 = vld [vmem:[#allocation26_spill] sm:$0xff] }
 0x712   : > { %v4590_v43 = vsel %vm1346_vm3, %v4445_v34, 0.0  ;;  %v4404_v48 = vmul.f32 %v11525_v63, %v11523_v14  ;;  %v11526_v34 = vld [vmem:[#allocation24_spill] sm:$0xff]  ;;  %v4407_v9 = vmul.f32 %v11534_v58, %v11532_v7 }
 0x713   : > { %v4591_v45 = vadd.f32 %v4590_v43, %v4589_v15  ;;  %v4346_v2 = vpop.permute.xlu0 %4345  ;;  %v4893_v36 = vmul.f32 %v11527_v62, %v11526_v34  ;;  %v11528_v15 = vld [vmem:[#allocation118_spill] sm:$0xff]  ;;  %v4972_v43 = vadd.f32 %v4971_v49, %v4970_v27  ;;  %v11536_v63 = vld [vmem:[#allocation84_spill] sm:$0xff] }
 0x714   : > { %v4447_v18 = vmul.f32 %v4346_v2, %v11522_v54  ;;  %v4405_v32 = vmul.f32 %v11528_v15, %v11526_v34  ;;  %v4483_v16 = vsel %vm1346_vm3, %v4404_v48, 0.0 }
 0x715   : > { %v4593_v53 = vadd.f32 %v4592_v39, %v4591_v45  ;;  %v4484_v2 = vadd.f32 %v4483_v16, %v4482_v25  ;;  %v4973_v29 = vsel %vm1346_vm3, %v4893_v36, 0.0  ;;  %v11537_v36 = vld [vmem:[#allocation80_spill] sm:$0xff] }
 0x716   : > { %v4594_v41 = vsel %vm1346_vm3, %v4447_v18, 0.0  ;;  %v4485_v39 = vsel %vm1346_vm3, %v4405_v32, 0.0  ;;  %v4974_v12 = vadd.f32 %v4973_v29, %v4972_v43 }
 0x717   : > { %v4595_v40 = vadd.f32 %v4594_v41, %v4593_v53  ;;  %v11531_v53 = vld [vmem:[#allocation107_spill] sm:$0xff]  ;;  %v4486_v41 = vadd.f32 %v4485_v39, %v4484_v2 }
 0x718   : > { %v4823_v30 = vpop.permute.xlu0 %4822  ;;  %v4406_v14 = vmul.f32 %v11531_v53, %v11529_v24  ;;  %v11540_v39 = vld [vmem:[#allocation71_spill] sm:$0xff] }
 0x719   : > { %v4597_v1 = vadd.f32 %v4596_v38, %v4595_v40  ;;  %v4930_v44 = vmul.f32 %v4823_v30, %v11506_v10  ;;  %v5074_v10 = vsel %vm1346_vm3, %v4931_v0, 0.0  ;;  %v11533_v40 = vld [vmem:[#allocation90_spill] sm:$0xff] }
 0x71a   : > { %v4895_v42 = vmul.f32 %v11533_v40, %v11532_v7  ;;  %v4487_v0 = vsel %vm1346_vm3, %v4406_v14, 0.0 }
 0x71b   : > { %v5072_v35 = vsel %vm1346_vm3, %v4930_v44, 0.0  ;;  %v4598_v20 = vrot.slane %v4597_v1, 4  ;;  %v11535_v44 = vld [vmem:[#allocation27_spill] sm:$0xff]  ;;  %v4488_v25 = vadd.f32 %v4487_v0, %v4486_v41 }
 0x71c   : > { %v5073_v46 = vadd.f32 %v5072_v35, %v5071_v37  ;;  %v4831_v28 = vpop.permute.xlu0 %4830  ;;  %v4896_v48 = vmul.f32 %v11536_v63, %v11535_v44  ;;  %v4977_v35 = vsel %vm1346_vm3, %v4895_v42, 0.0  ;;  %v4408_v15 = vmul.f32 %v11537_v36, %v11535_v44  ;;  %v11543_v42 = vld [vmem:[#allocation73_spill] sm:$0xff]  ;;  %v11544_v44 = vld [vmem:[#allocation74_spill] sm:$0xff] }
 0x71d   : > { %v4932_v4 = vmul.f32 %v4831_v28, %v11508_v55  ;;  %v4935_v55 = vmul.f32 %v10544_v17, %v11522_v54  ;;  %v4599_v38 = vadd.f32 %v4598_v20, %v4597_v1  ;;  %v4976_v54 = vadd.f32 %v4975_v6, %v4974_v12  ;;  %v11538_v28 = vld [vmem:[#allocation69_spill] sm:$0xff] }
 0x71e   : > { %v5075_v45 = vadd.f32 %v5074_v10, %v5073_v46  ;;  %v4489_v1 = vsel %vm1346_vm3, %v4407_v9, 0.0  ;;  %v4979_v46 = vsel %vm1346_vm3, %v4896_v48, 0.0  ;;  %v4450_v43 = vmul.f32 %v10615_v52, %v11538_v28  ;;  %v11545_v48 = vld [vmem:[#allocation75_spill] sm:$0xff] }
 0x71f   : > { %v5076_v13 = vsel %vm1346_vm3, %v4932_v4, 0.0  ;;  %v4600_v34 = vrot.slane %v4599_v38, 2  ;;  %v4978_v32 = vadd.f32 %v4977_v35, %v4976_v54  ;;  %v4490_v16 = vadd.f32 %v4489_v1, %v4488_v25 }
 0x720   : > { %v5077_v18 = vadd.f32 %v5076_v13, %v5075_v45  ;;  %v4839_v26 = vpop.permute.xlu0 %4838  ;;  %v4491_v45 = vsel %vm1346_vm3, %v4408_v15, 0.0  ;;  %v4605_v29 = vsel %vm1346_vm3, %v4450_v43, 0.0  ;;  %v4452_v20 = vmul.f32 %v10630_v51, %v11540_v39 }
 0x721   : > { %v4934_v31 = vmul.f32 %v4839_v26, %v11514_v60  ;;  %v5082_v60 = vsel %vm1346_vm3, %v4935_v55, 0.0  ;;  %v4601_v24 = vadd.f32 %v4600_v34, %v4599_v38  ;;  %v4980_v2 = vadd.f32 %v4979_v46, %v4978_v32  ;;  %v11541_v26 = vld [vmem:[#allocation70_spill] sm:$0xff] }
 0x722   : > { %v5079_v21 = vadd.f32 %v5078_v19, %v5077_v18  ;;  %v4492_v12 = vadd.f32 %v4491_v45, %v4490_v16  ;;  %v4609_v41 = vsel %vm1346_vm3, %v4452_v20, 0.0  ;;  %v4456_v63 = vmul.f32 %v10659_v50, %v11544_v44 }
 0x723   : > { %v5080_v5 = vsel %vm1346_vm3, %v4934_v31, 0.0  ;;  %v4602_v53 = vrot.slane %v4601_v24, 1  ;;  %v4981_v14 = vrot.slane %v4980_v2, 4  ;;  %v4937_v32 = vmul.f32 %v10672_v61, %v11539_v57 }
 0x724   : > { %v5081_v30 = vadd.f32 %v5080_v5, %v5079_v21  ;;  %v4847_v17 = vpop.permute.xlu0 %4846  ;;  %v11542_v5 = vld [vmem:[#allocation72_spill] sm:$0xff]  ;;  %v4493_v58 = vrot.slane %v4492_v12, 4  ;;  %v4940_v16 = vmul.f32 %v10679_v8, %v11540_v39  ;;  %v4941_v45 = vmul.f32 %v10686_v22, %v11543_v42  ;;  %v5379_v22 = vld [vmem:[#allocation4 + $0x2] sm:$0x3] }
 0x725   : > { %v4936_v27 = vmul.f32 %v4847_v17, %v11521_v33  ;;  %v4454_v7 = vmul.f32 %v10647_v56, %v11542_v5  ;;  %v4982_v54 = vadd.f32 %v4981_v14, %v4980_v2 }
 0x726   : > { %v5083_v49 = vadd.f32 %v5082_v60, %v5081_v30  ;;  %v4603_v30 = vadd.f32 %v4602_v53, %v4601_v24  ;;  %v4494_v25 = vadd.f32 %v4493_v58, %v4492_v12  ;;  %v5099_v39 = vsel %vm1346_vm3, %v4941_v45, 0.0 }
 0x727   : > { %v5084_v37 = vsel %vm1346_vm3, %v4936_v27, 0.0  ;;  %v4613_v0 = vsel %vm1346_vm3, %v4454_v7, 0.0  ;;  %v4983_v1 = vrot.slane %v4982_v54, 2 }
 0x728   : > { %v5085_v62 = vadd.f32 %v5084_v37, %v5083_v49  ;;  %v4495_v15 = vrot.slane %v4494_v25, 2 }
 0x729   : > { %v4356_v33 = vpop.permute.xlu0 %4355  ;;  %v4984_v46 = vadd.f32 %v4983_v1, %v4982_v54 }
 0x72a   : > { %v5086_v10 = vrot.slane %v5085_v62, 4  ;;  %v4449_v4 = vmul.f32 %v4356_v33, %v11539_v57 }
 0x72b   : > { %v4985_v57 = vrot.slane %v4984_v46, 1 }
 0x72c   : > { %v5087_v3 = vadd.f32 %v5086_v10, %v5085_v62  ;;  %v4604_v47 = vsel %vm1346_vm3, %v4449_v4, 0.0  ;;  %v4617_v62 = vsel %vm1346_vm3, %v4456_v63, 0.0  ;;  %v5092_v4 = vsel %vm1346_vm3, %v4937_v32, 0.0  ;;  %v5385_v63 = vld [vmem:[#allocation4 + $0xe] sm:$0x3] }
 0x72d   : > { %v4366_v13 = vpop.permute.xlu0 %4365  ;;  %v4606_v19 = vadd.f32 %v4605_v29, %v4604_v47  ;;  %v4942_v29 = vmul.f32 %v10694_v23, %v11542_v5  ;;  %v5382_v5 = vld [vmem:[#allocation4 + $0x8] sm:$0x3]  ;;  %v5455_v32 = vld [vmem:[#allocation3] sm:$0x1] (!%p6097_p4) }
 0x72e   : > { %v5088_v18 = vrot.slane %v5087_v3, 2  ;;  %v4451_v52 = vmul.f32 %v4366_v13, %v11541_v26  ;;  %v5097_v13 = vsel %vm1346_vm3, %v4940_v16, 0.0 }
 0x730   : > { %v5089_v55 = vadd.f32 %v5088_v18, %v5087_v3  ;;  %v4607_v31 = vsel %vm1346_vm3, %v4451_v52, 0.0  ;;  %v4496_v3 = vadd.f32 %v4495_v15, %v4494_v25  ;;  %v4986_v52 = vadd.f32 %v4985_v57, %v4984_v46  ;;  %v5457_v15 = vld [vmem:[#allocation3 + $0x2] sm:$0x1] (!%p6097_p4)  ;;  %v5460_v46 = vld [vmem:[#allocation3 + $0x5] sm:$0x1] (!%p6097_p4) }
 0x731   : > { %v4608_v6 = vadd.f32 %v4607_v31, %v4606_v19  ;;  %v4376_v21 = vpop.permute.xlu0 %4375  ;;  %v5101_v19 = vsel %vm1346_vm3, %v4942_v29, 0.0  ;;  %7151 = vrcp.f32 (!%p6097_p4), %v5457_v15 }
 0x732   : > { %v5090_v40 = vrot.slane %v5089_v55, 1  ;;  %v4453_v51 = vmul.f32 %v4376_v21, %v11543_v42  ;;  %v4497_v20 = vrot.slane %v4496_v3, 1  ;;  %7153 = vrcp.f32 (!%p6097_p4), %v5455_v32 }
 0x733   : > { %v4610_v9 = vadd.f32 %v4609_v41, %v4608_v6 }
 0x734   : > { %v4611_v38 = vsel %vm1346_vm3, %v4453_v51, 0.0  ;;  %v5091_v17 = vadd.f32 %v5090_v40, %v5089_v55  ;;  %v4498_v31 = vadd.f32 %v4497_v20, %v4496_v3 }
 0x735   : > { %v4612_v60 = vadd.f32 %v4611_v38, %v4610_v9  ;;  %v4386_v27 = vpop.permute.xlu0 %4385 }
 0x736   : > { %v4455_v49 = vmul.f32 %v4386_v27, %v11545_v48  ;;  %v10860_v56 = vsel %vm5113_vm8, %v4603_v30, %v5091_v17  ;;  %v5115_v41 = vsel %vm5113_vm8, %v4498_v31, %v4986_v52  ;;  %v5471_v52 = vld [vmem:[#allocation4] sm:$0x3] (!%p6097_p4) }
 0x737   : > { %v4614_v37 = vadd.f32 %v4613_v0, %v4612_v60 }
 0x738   : > { %v4615_v35 = vsel %vm1346_vm3, %v4455_v49, 0.0 }
 0x739   : > { %v4616_v34 = vadd.f32 %v4615_v35, %v4614_v37 }
 0x73a   : > { %v4855_v36 = vpop.permute.xlu0 %4854 }
 0x73b   : > { %v4618_v33 = vadd.f32 %v4617_v62, %v4616_v34  ;;  %v4938_v50 = vmul.f32 %v4855_v36, %v11538_v28  ;;  %v5384_v34 = vld [vmem:[#allocation4 + $0xc] sm:$0x3] }
 0x73d   : > { %v5093_v43 = vsel %vm1346_vm3, %v4938_v50, 0.0  ;;  %v4619_v18 = vrot.slane %v4618_v33, 4  ;;  %v5456_v50 = vld [vmem:[#allocation3 + $0x1] sm:$0x1] (!%p6097_p4) }
 0x73e   : > { %v4859_v10 = vpop.permute.xlu0 %4858  ;;  %v5094_v47 = vadd.f32 %v5093_v43, %v5092_v4  ;;  %v5459_v43 = vld [vmem:[#allocation3 + $0x4] sm:$0x1] (!%p6097_p4)  ;;  %v5461_v4 = vld [vmem:[#allocation3 + $0x6] sm:$0x1] (!%p6097_p4) }
 0x73f   : > { %v4939_v24 = vmul.f32 %v4859_v10, %v11541_v26  ;;  %v4943_v26 = vmul.f32 %v10703_v59, %v11545_v48  ;;  %v4620_v14 = vadd.f32 %v4619_v18, %v4618_v33  ;;  %v5424_v48 = vpop.permute.xlu1 %5423  ;;  %v5458_v33 = vld [vmem:[#allocation3 + $0x3] sm:$0x1] (!%p6097_p4)  ;;  %v5462_v10 = vld [vmem:[#allocation3 + $0x7] sm:$0x1] (!%p6097_p4) }
 0x740   : > { %v5433_v37 = vmul.f32 %v5424_v48, %v5385_v63  ;;  %7155 = vrcp.f32 (!%p6097_p4), %v5458_v33 }
 0x741   : > { %v5095_v61 = vsel %vm1346_vm3, %v4939_v24, 0.0  ;;  %v5103_v21 = vsel %vm1346_vm3, %v4943_v26, 0.0  ;;  %v4621_v51 = vrot.slane %v4620_v14, 2  ;;  %7157 = vrcp.f32 (!%p6097_p4), %v5456_v50 }
 0x742   : > { %v5096_v28 = vadd.f32 %v5095_v61, %v5094_v47  ;;  %v4879_v2 = vpop.permute.xlu0 %4878  ;;  %7159 = vrcp.f32 (!%p6097_p4), %v5460_v46 }
 0x743   : > { %v4944_v55 = vmul.f32 %v4879_v2, %v11544_v44  ;;  %v4622_v17 = vadd.f32 %v4621_v51, %v4620_v14  ;;  %7161 = vrcp.f32 (!%p6097_p4), %v5459_v43  ;;  %v5473_v14 = vld [vmem:[#allocation4 + $0x4] sm:$0x3] (!%p6097_p4) }
 0x744   : > { %v5098_v8 = vadd.f32 %v5097_v13, %v5096_v28  ;;  %7163 = vrcp.f32 (!%p6097_p4), %v5462_v10  ;;  %v7284_v28 = vmov (!%p6097_p4), 0  }
 0x745   : > { %v5105_v59 = vsel %vm1346_vm3, %v4944_v55, 0.0  ;;  %v4623_v0 = vrot.slane %v4622_v17, 1  ;;  %7165 = vrcp.f32 (!%p6097_p4), %v5461_v4 }
 0x746   : > { %v5100_v12 = vadd.f32 %v5099_v39, %v5098_v8 }
 0x747   : > { %v5394_v53 = vpop.permute.xlu0 %5393  ;;  %v4624_v49 = vadd.f32 %v4623_v0, %v4622_v17 }
 0x748   : > { %v5102_v6 = vadd.f32 %v5101_v19, %v5100_v12  ;;  %v5427_v23 = vmul.f32 %v5394_v53, %v5379_v22  ;;  %v5476_v53 = vld [vmem:[#allocation4 + $0xa] sm:$0x3] (!%p6097_p4) }
 0x74a   : > { %v5104_v7 = vadd.f32 %v5103_v21, %v5102_v6  ;;  %v5435_v40 = vadd.f32 %v5427_v23, %v5115_v41 }
 0x74b   : > { %v5409_v42 = vpop.permute.xlu0 %5408 }
 0x74c   : > { %v5106_v58 = vadd.f32 %v5105_v59, %v5104_v7  ;;  %5444 = vst.msk [vmem:[#allocation4 + $0x2] sm:$0x3] %vm5442_vm9, %v5435_v40  ;;  %v5430_v9 = vmul.f32 %v5409_v42, %v5382_v5  ;;  %v5474_v7 = vld [vmem:[#allocation4 + $0x6] sm:$0x3] (!%p6097_p4) }
 0x74e   : > { %v5107_v38 = vrot.slane %v5106_v58, 4  ;;  %v5438_v30 = vadd.f32 %v5430_v9, %v10712_v11 }
 0x750   : > { %v5108_v54 = vadd.f32 %v5107_v38, %v5106_v58  ;;  %5447 = vst.msk [vmem:[#allocation4 + $0x8] sm:$0x3] %vm5442_vm9, %v5438_v30 }
 0x752   : > { %v5109_v60 = vrot.slane %v5108_v54, 2 }
 0x753   : > { %v5472_v19 = vld [vmem:[#allocation4 + $0x2] sm:$0x3] (!%p6097_p4) }
 0x754   : > { %v5110_v27 = vadd.f32 %v5109_v60, %v5108_v54 }
 0x756   : > { %v5111_v44 = vrot.slane %v5110_v27, 1 }
 0x757   : > { %v5475_v58 = vld [vmem:[#allocation4 + $0x8] sm:$0x3] (!%p6097_p4) }
 0x758   : > { %v5112_v25 = vadd.f32 %v5111_v44, %v5110_v27 }
 0x75a   : > { %v5121_v35 = vsel %vm5113_vm8, %v4624_v49, %v5112_v25 }
 0x75b   : > { %v5441_v1 = vadd.f32 %v5433_v37, %v5121_v35 }
 0x75d   : > { %5450 = vst.msk [vmem:[#allocation4 + $0xe] sm:$0x3] %vm5442_vm9, %v5441_v1  ;;  %5454 = sbr.rel (%p6097_p4) target bundleno = 2171 (0x87b), region = 94 }
 0x75e   : > { %v5419_v11 = vpop.permute.xlu0 %5418 }
 0x75f   : > { %v5432_v62 = vmul.f32 %v5419_v11, %v5384_v34 }
 0x761   : > { %v5440_v36 = vadd.f32 %v5432_v62, %v10860_v56  ;;  %v7152_v56 = vpop.eup (!%p6097_p4), %7151 }
 0x762   : > { %v7154_v16 = vpop.eup (!%p6097_p4), %7153  ;;  %5543 = vxpose.xlu1.b32.start.end [1/1] (short) (narrow) (!%p6097_p4), %v7152_v56, 8 }
 0x763   : > { %5449 = vst.msk [vmem:[#allocation4 + $0xc] sm:$0x3] %vm5442_vm9, %v5440_v36  ;;  %v7156_v24 = vpop.eup (!%p6097_p4), %7155  ;;  %5479 = vxpose.xlu0.b32.start.end [1/1] (short) (narrow) (!%p6097_p4), %v7154_v16, 8 }
 0x764   : > { %v7158_v3 = vpop.eup %7157  ;;  %v5478_v5 = vld [vmem:[#allocation4 + $0xe] sm:$0x3] }
 0x765   : > { %v7160_v47 = vpop.eup %7159 }
 0x766   : > { %5575 = vxpose.xlu1.b32.start.end [1/1] (short) (narrow) %v7156_v24, 8  ;;  %v7162_v45 = vpop.eup %7161 }
 0x767   : > { %5511 = vxpose.xlu0.b32.start.end [1/1] (short) (narrow) %v7158_v3, 8  ;;  %v7164_v61 = vpop.eup %7163 }
 0x768   : > { %v7166_v57 = vpop.eup %7165 }
 0x76a   : > { %5639 = vxpose.xlu1.b32.start.end [1/1] (short) (narrow) %v7160_v47, 8  ;;  %v5477_v30 = vld [vmem:[#allocation4 + $0xc] sm:$0x3] }
 0x76b   : > { %5607 = vxpose.xlu0.b32.start.end [1/1] (short) (narrow) %v7162_v45, 8 }
 0x76e   : > { %5703 = vxpose.xlu1.b32.start.end [1/1] (short) (narrow) %v7164_v61, 8 }
 0x76f   : > { %5671 = vxpose.xlu0.b32.start.end [1/1] (short) (narrow) %v7166_v57, 8 }
 0x78c   : > { %7150 = vset.pattern.permute.xlu1 %v7284_v28 }
 0x798   : > { %7149 = vset.pattern.permute.xlu0 %v7284_v28 }
 0x7e2   : > { %v5559_v2 = vpop.trf.xlu1 }
 0x7e3   : > { %v5495_v13 = vpop.trf.xlu0 }
 0x7e4   : > { %5737 = vperm.xlu0 %7149, %v5495_v13  }
 0x7e6   : > { %v5591_v29 = vpop.trf.xlu1 }
 0x7e7   : > { %v5527_v20 = vpop.trf.xlu0 }
 0x7e8   : > { %5742 = vperm.xlu1 %7150, %v5527_v20  }
 0x7ea   : > { %v5655_v18 = vpop.trf.xlu1 }
 0x7eb   : > { %5762 = vperm.xlu0 %7149, %v5655_v18   ;;  %v5623_v39 = vpop.trf.xlu0 }
 0x7ec   : > { %5747 = vperm.xlu1 %7150, %v5559_v2  }
 0x7ee   : > { %v5719_v8 = vpop.trf.xlu1 }
 0x7ef   : > { %5772 = vperm.xlu0 %7149, %v5719_v8   ;;  %v5687_v26 = vpop.trf.xlu0 }
 0x7f0   : > { %5752 = vperm.xlu1 %7150, %v5591_v29  }
 0x7f4   : > { %5757 = vperm.xlu1 %7150, %v5623_v39  }
 0x7f8   : > { %5767 = vperm.xlu1 %7150, %v5687_v26  }
 0x863   : > { %v5738_v22 = vpop.permute.xlu0 %5737 }
 0x864   : > { %v5775_v12 = vmul.f32 %v5738_v22, %v5471_v52 }
 0x866   : > { %5783 = vst.msk [vmem:[%s7567_s20] sm:$0x3] %vm5442_vm9, %v5775_v12 }
 0x867   : > { %v5743_v55 = vpop.permute.xlu1 %5742 }
 0x868   : > { %v5776_v31 = vmul.f32 %v5743_v55, %v5472_v19 }
 0x86a   : > { %5784 = vst.msk [vmem:[%s7567_s20 + $0x2] sm:$0x3] %vm5442_vm9, %v5776_v31  ;;  %v5763_v6 = vpop.permute.xlu0 %5762 }
 0x86b   : > { %v5748_v23 = vpop.permute.xlu1 %5747  ;;  %v5780_v21 = vmul.f32 %v5763_v6, %v5476_v53 }
 0x86c   : > { %v5777_v41 = vmul.f32 %v5748_v23, %v5473_v14 }
 0x86d   : > { %5788 = vst.msk [vmem:[%s7567_s20 + $0xa] sm:$0x3] %vm5442_vm9, %v5780_v21 }
 0x86e   : > { %5785 = vst.msk [vmem:[%s7567_s20 + $0x4] sm:$0x3] %vm5442_vm9, %v5777_v41  ;;  %v5773_v40 = vpop.permute.xlu0 %5772 }
 0x86f   : > { %v5753_v59 = vpop.permute.xlu1 %5752  ;;  %v5782_v42 = vmul.f32 %v5773_v40, %v5478_v5 }
 0x870   : > { %v5778_v51 = vmul.f32 %v5753_v59, %v5474_v7 }
 0x871   : > { %5790 = vst.msk [vmem:[%s7567_s20 + $0xe] sm:$0x3] %vm5442_vm9, %v5782_v42 }
 0x872   : > { %5786 = vst.msk [vmem:[%s7567_s20 + $0x6] sm:$0x3] %vm5442_vm9, %v5778_v51 }
 0x873   : > { %v5758_v9 = vpop.permute.xlu1 %5757 }
 0x874   : > { %v5779_v38 = vmul.f32 %v5758_v9, %v5475_v58 }
 0x876   : > { %5787 = vst.msk [vmem:[%s7567_s20 + $0x8] sm:$0x3] %vm5442_vm9, %v5779_v38 }
 0x877   : > { %v5768_v17 = vpop.permute.xlu1 %5767 }
 0x878   : > { %v5781_v54 = vmul.f32 %v5768_v17, %v5477_v30 }
 0x87a   : > { %5789 = vst.msk [vmem:[%s7567_s20 + $0xc] sm:$0x3] %vm5442_vm9, %v5781_v54 }
 0x87b PF: > { %s6104_s29 = sshll.u32 %s7265_s30, 8  ;;  %s5805_s16 = sshll.u32 %s7567_s20, 4  ;;  %s10917_s16 = int_to_ptr.vmem [resolvable:$true] %s5805_s16 }
 0x87c   : > { %s10914_s14 = scalar_lea.hbm %s10986_s7, %s6104_s29  ;;  %s11546_s17 = sand.u32 1, %s7245_s25  }
 0x87d   : > { %s10921_s13 = scalar_lea.sflag [#allocation7], %s11546_s17  ;;  %s7167_s22 = scalar_lea.vmem %s10917_s16, 256 }
 0x87e   : > { %p7168_p5 = scmp.ne.s32.totalorder %s10917_s16, %s7167_s22  ;;  %s7285_s30 = smov [#allocation6]  }
 0x87f   : > { %s7171_s12 = sshll.u32 %s7285_s30, 4  ;;  %s7172_s12 = int_to_ptr.vmem [resolvable:$false] %s7171_s12 }
 0x880   : > { %p7169_p6 = pnand %p7168_p5, %p7400_p7  ;;  %s7173_s27 = scalar_lea.vmem %s7172_s12, 512 }
 0x881   : > { %p7174_p9 = scmp.lt.s32.totalorder %s10917_s16, %s7172_s12  ;;  %p7175_p10 = scmp.lt.s32.totalorder %s7173_s27, %s7167_s22 }
 0x882   : > { %p7170_p8 = pneg %p7169_p6 }
 0x883   : > { %p7176_p11 = por %p7175_p10, %p7174_p9 }
 0x885   : > { %p7177_p13 = pnand %p7176_p11, %p7170_p8 }
 0x887   : > { %7180 = shalt.err (!%p7177_p13)
}
 0x888   : > { %s7181_s20 = scalar_lea.hbm %s10914_s14, 256  ;;  %s7185_s29 = scalar_lea.hbm %s10986_s7, 512 }
 0x889   : > { %p7182_p0 = scmp.ne.s32.totalorder %s10914_s14, %s7181_s20  ;;  %p7186_p3 = scmp.lt.u32.totalorder %s10914_s14, %s10986_s7 }
 0x88a   : > { %p7187_p4 = scmp.lt.u32.totalorder %s7185_s29, %s7181_s20  ;;  %p7189_p6 = scmp.lt.u32.totalorder %s7181_s20, %s10914_s14 }
 0x88b   : > { %p7183_p1 = pnand %p7182_p0, %p7400_p7 }
 0x88c   : > { %p7188_p5 = por %p7187_p4, %p7186_p3 }
 0x88d   : > { %p7184_p2 = pneg %p7183_p1 }
 0x88e   : > { %p7190_p8 = por %p7189_p6, %p7188_p5 }
 0x890   : > { %p7191_p9 = pnand %p7190_p8, %p7184_p2 }
 0x892   : > { %7194 = shalt.err (!%p7191_p9)
}
 0x893   : > { %s7286_s17 = smov 32   ;;  %s7287_s22 = smov 2  }
 0x894   : > { %6485 = dma.vmem_to_hbm [thread:$0]  (%p7400_p7), %s10917_s16, 256, %s10914_s14, %s10921_s13, %s7286_s17, %s7286_s17, %s7287_s22  }
 0x895 PF: > { %p6491_p10 = scmp.ge.s32.totalorder %s7277_s10, 2  ;;  %s5820_s12 = sand.u32 1, %s7241_s24  }
 0x896   : > { %s5821_s27 = scalar_lea.sflag [#allocation7], %s5820_s12 }
 0x897   : > { %p6488_p11 = pnand %p6491_p10, %p7408_p12 }
 0x899   : > { %7236 = dma.done.wait (!%p6488_p11), %s5821_s27, 256  }
 0x89a   : > { %7238 = vsyncadd (!%p6488_p11), %s5821_s27, 4294967040  ;;  %s20_s10 = sadd.s32 1, %s7277_s10   ;;  %s11548_s19 = sld [smem:[#allocation9_spill]] }
 0x89b   : > { %p17_p13 = scmp.ge.s32.totalorder %s20_s10, 6   ;;  %s11549_s14 = sld [smem:[#allocation10_spill]] }
 0x89c   : > { %s11550_s24 = smov %s7245_s25  ;;  %s11551_s25 = smov %s7249_s26 }
 0x89d   : > { %s11552_s26 = smov %s7413_s23  ;;  %s11553_s27 = smov %s7257_s28 }
 0x89e   : > { %s11554_s28 = smov %s7416_s11  ;;  %s11555_s29 = smov %s7269_s8 }
 0x89f   : > { %s11556_s30 = smov %s7273_s9  ;;  %19 = sbr.rel (!%p17_p13) target bundleno = 8 (0x8), region = 134 }
 0x8a0   : > { %s11557_s8 = smov %s11548_s19 }
 0x8a1   : > { %s11558_s9 = smov %s11549_s14 }
 0x8a6   :  { %5826 = vsyncpa [#allocation7], 1 }
 0x8a7   :  { %5828 = vsyncpa [#allocation7 + $0x1], 1 }

</bundles_post_ra>
